<compile_context>
chip_gen: v6e
topology: v6e:2x2x1
jax: 0.10.0
libtpu: 0.0.40
codegen_flags: <defaults>
</compile_context>

<pallas_src>
import functools
import math

import jax
import jax.numpy as jnp
from jax.experimental import pallas as pl
from jax.experimental.pallas import tpu as pltpu


# ----------------------------------------------------------------------------
# Helpers
# ----------------------------------------------------------------------------
def _round_up(n, m):
    return (n + m - 1) // m * m


def _pad2d(a, rows, cols):
    return jnp.pad(a, ((0, rows - a.shape[0]), (0, cols - a.shape[1])))


# ----------------------------------------------------------------------------
# Fused Pallas kernel: full AE forward (encoder + decoder) on one batch tile.
#   x_ref : (BM, D_pad)                  flattened, padded input tile (mxu dtype)
#   w0/b0 : (D_pad, P), (1, P)           first encoder layer (ReLU); w bf16/f32, b f32
#   wm/bm : (n_mid, P, P), (n_mid, 1, P) all middle layers (all ReLU)
#   wl/bl : (P, D_pad), (1, D_pad)       last decoder layer (NO activation)
#   o_ref : (BM, D_pad)
# All weights are zero-padded, so padded lanes stay exactly zero through the
# network (zero weight cols + zero bias + ReLU) and the math matches the
# unpadded model.
# ----------------------------------------------------------------------------
def _ae_fused_kernel(x_ref, w0_ref, b0_ref, wm_ref, bm_ref, wl_ref, bl_ref,
                     o_ref, *, n_mid, mxu_dtype):
    f32 = mxu_dtype == jnp.float32
    prec = jax.lax.Precision.HIGHEST if f32 else None

    # First layer: (BM, D_pad) @ (D_pad, P) + b, ReLU.  Operands arrive already
    # in mxu_dtype (pre-cast in the wrapper) -> no per-step casts here.
    h = jnp.dot(x_ref[...], w0_ref[...],
                preferred_element_type=jnp.float32, precision=prec)
    h = jnp.maximum(h + b0_ref[...], 0.0)

    # Middle layers (rest of encoder + all-but-last decoder): all ReLU.
    # n_mid is small and static -> unrolled for LLO scheduler visibility.
    for i in range(n_mid):
        h = jnp.dot(h.astype(mxu_dtype), wm_ref[i],
                    preferred_element_type=jnp.float32, precision=prec)
        h = jnp.maximum(h + bm_ref[i], 0.0)

    # Last decoder layer: no activation; single lane-dense store to HBM.
    y = jnp.dot(h.astype(mxu_dtype), wl_ref[...],
                preferred_element_type=jnp.float32, precision=prec)
    o_ref[...] = (y + bl_ref[...]).astype(o_ref.dtype)


# ----------------------------------------------------------------------------
# Wrapper: pad/pack/pre-cast parameters, launch one fused pallas_call, unpad.
# ----------------------------------------------------------------------------
def ae_forward(x, enc_params, dec_params, *, use_bf16_mxu=True,
               out_dtype=jnp.float32, max_block_b=512):
    B = x.shape[0]
    xf = x.reshape(B, -1).astype(jnp.float32)   # view(x.size(0), -1)
    D = xf.shape[1]

    hidden = enc_params[0][0].shape[1]
    latent = enc_params[-1][0].shape[1]

    # Lane-axis padding to 128, batch padding to a sublane-friendly tile.
    D_pad = _round_up(D, 128)
    P = _round_up(max(hidden, latent), 128)

    BM = min(_round_up(B, 8), max_block_b)
    if B > 8:
        # Guarantee >= 2 grid steps so the "parallel" batch axis can shard
        # across both TensorCores on v7x.
        BM = min(BM, _round_up(pl.cdiv(B, 2), 8))
    B_pad = _round_up(B, BM)

    mxu_dtype = jnp.bfloat16 if use_bf16_mxu else jnp.float32
    act_item = 2 if use_bf16_mxu else 4
    out_item = jnp.dtype(out_dtype).itemsize

    # Input: pad then cast once in the wrapper (halves the x HBM stream on
    # the bf16 path).
    x_pad = jnp.pad(xf, ((0, B_pad - B), (0, D_pad - D))).astype(mxu_dtype)

    # Layer order: encoder (ReLU on all) then decoder (ReLU on all but last).
    layers = list(enc_params) + list(dec_params)
    w0, b0 = layers[0]
    wl, bl = layers[-1]
    mids = layers[1:-1]
    n_mid = len(mids)                            # = 2 * no_layers + 2

    f32 = jnp.float32
    # Weights: pad in f32, pre-cast ONCE to the MXU operand dtype.
    w0_p = _pad2d(w0.astype(f32), D_pad, P).astype(mxu_dtype)
    wl_p = _pad2d(wl.astype(f32), P, D_pad).astype(mxu_dtype)
    wm_p = jnp.stack([_pad2d(w.astype(f32), P, P) for w, _ in mids]
                     ).astype(mxu_dtype)
    # Biases stay f32 (added to the f32 accumulator; negligible bytes).
    b0_p = _pad2d(b0.astype(f32).reshape(1, -1), 1, P)
    bl_p = _pad2d(bl.astype(f32).reshape(1, -1), 1, D_pad)
    bm_p = jnp.stack([_pad2d(b.astype(f32).reshape(1, -1), 1, P)
                      for _, b in mids])

    # VMEM budget estimate (double-buffered tiles + weights + headroom) so a
    # large batch tile never trips the default scoped-VMEM limit.  Capped at
    # 64 MiB to stay safe on v7x.
    est = (
        BM * D_pad * act_item * 2                      # x tile (double buf)
        + BM * D_pad * out_item * 2                    # out tile (double buf)
        + (D_pad * P + n_mid * P * P + P * D_pad) * act_item * 2   # weights
        + (P + n_mid * P + D_pad) * 4 * 2              # biases
        + BM * max(P, D_pad) * 4 * 4                   # live activations
    )
    vmem_limit = int(min(64 * 2**20, max(32 * 2**20, 2 * est)))

    grid = (B_pad // BM,)
    out_pad = pl.pallas_call(
        functools.partial(_ae_fused_kernel, n_mid=n_mid, mxu_dtype=mxu_dtype),
        out_shape=jax.ShapeDtypeStruct((B_pad, D_pad), out_dtype),
        grid_spec=pltpu.PrefetchScalarGridSpec(
            num_scalar_prefetch=0,
            grid=grid,
            in_specs=[
                pl.BlockSpec((BM, D_pad), lambda i: (i, 0)),          # x tile
                pl.BlockSpec((D_pad, P), lambda i: (0, 0)),           # w_first
                pl.BlockSpec((1, P), lambda i: (0, 0)),               # b_first
                pl.BlockSpec((n_mid, P, P), lambda i: (0, 0, 0)),     # w_mid
                pl.BlockSpec((n_mid, 1, P), lambda i: (0, 0, 0)),     # b_mid
                pl.BlockSpec((P, D_pad), lambda i: (0, 0)),           # w_last
                pl.BlockSpec((1, D_pad), lambda i: (0, 0)),           # b_last
            ],
            out_specs=pl.BlockSpec((BM, D_pad), lambda i: (i, 0)),
        ),
        compiler_params=pltpu.CompilerParams(
            dimension_semantics=("parallel",),   # batch tiles -> 2 TCs on v7x
            vmem_limit_bytes=vmem_limit,
        ),
    )(x_pad, w0_p, b0_p, wm_p, bm_p, wl_p, bl_p)

    return out_pad[:B, :D]


# ----------------------------------------------------------------------------
# Parameter construction (deterministic, mirrors the PyTorch __init__).
#   nn.init.xavier_normal_(weight): std = sqrt(2 / (fan_in + fan_out))
#   nn.init.constant_(bias, 0)
# Weights stored as (in_features, out_features) so each layer is x @ W + b.
# ----------------------------------------------------------------------------
def _init_linear(key, fan_in, fan_out):
    std = (2.0 / (fan_in + fan_out)) ** 0.5
    w = jax.random.normal(key, (fan_in, fan_out), dtype=jnp.float32) * std
    b = jnp.zeros((fan_out,), dtype=jnp.float32)
    return w, b


def make_ae_params(key, inp_prod, hidden_size, latent_dim, no_layers):
    enc_dims = [(inp_prod, hidden_size)]
    enc_dims += [(hidden_size, hidden_size)] * no_layers
    enc_dims += [(hidden_size, latent_dim)]
    dec_dims = [(latent_dim, hidden_size)]
    dec_dims += [(hidden_size, hidden_size)] * no_layers
    dec_dims += [(hidden_size, inp_prod)]

    keys = jax.random.split(key, len(enc_dims) + len(dec_dims))
    enc_params = [_init_linear(keys[i], fi, fo)
                  for i, (fi, fo) in enumerate(enc_dims)]
    dec_params = [_init_linear(keys[len(enc_dims) + i], fi, fo)
                  for i, (fi, fo) in enumerate(dec_dims)]
    return enc_params, dec_params


# ----------------------------------------------------------------------------
# Pure-JAX reference (same semantics, f32 precision) for a correctness check.
# ----------------------------------------------------------------------------
def ae_forward_ref(x, enc_params, dec_params):
    B = x.shape[0]
    h = x.reshape(B, -1)
    hi = jax.lax.Precision.HIGHEST
    for w, b in enc_params:
        h = jnp.maximum(jnp.dot(h, w, precision=hi) + b, 0.0)
    n_dec = len(dec_params)
    for i, (w, b) in enumerate(dec_params):
        h = jnp.dot(h, w, precision=hi) + b
        if i < n_dec - 1:
            h = jnp.maximum(h, 0.0)
    return h


if __name__ == "__main__":
    # Small, module-consistent shapes.
    batch = 2
    inp_dim = (4, 16, 16)          # flattened D = 1024
    hidden_size = 32
    latent_dim = 8
    no_layers = 3

    key = jax.random.PRNGKey(0)
    key_x, key_p = jax.random.split(key)

    x = jax.random.normal(key_x, (batch, *inp_dim), dtype=jnp.float32)
    enc_params, dec_params = make_ae_params(
        key_p, math.prod(inp_dim), hidden_size, latent_dim, no_layers
    )

    ref = ae_forward_ref(x, enc_params, dec_params)

    # f32-operand path (Precision.HIGHEST in-kernel): tight check.
    fwd_f32 = jax.jit(functools.partial(ae_forward, use_bf16_mxu=False))
    out_f32 = jax.block_until_ready(fwd_f32(x, enc_params, dec_params))
    assert out_f32.shape == (batch, math.prod(inp_dim)), out_f32.shape
    assert out_f32.dtype == jnp.float32
    assert jnp.allclose(out_f32, ref, atol=1e-3, rtol=1e-3), float(
        jnp.max(jnp.abs(out_f32 - ref))
    )

    # bf16-operand path (default; halves HBM traffic, f32 accumulate/epilogue):
    # looser tolerance vs. the f32 reference.
    fwd_bf16 = jax.jit(ae_forward)
    out_bf16 = jax.block_until_ready(fwd_bf16(x, enc_params, dec_params))
    assert out_bf16.shape == (batch, math.prod(inp_dim)), out_bf16.shape
    assert bool(jnp.all(jnp.isfinite(out_bf16)))
    assert jnp.allclose(out_bf16, ref, atol=3e-2, rtol=3e-2), float(
        jnp.max(jnp.abs(out_bf16 - ref))
    )

    print("KERNEL_OK")
</pallas_src>

<mosaic_0001>
module attributes {stable_mosaic.version = 11 : i64} {
  func.func @_ae_fused_kernel(%arg0: i32, %arg1: memref<8x1024xf32, #tpu.memory_space<vmem>>, %arg2: memref<1024x128xf32, #tpu.memory_space<vmem>>, %arg3: memref<1x128xf32, #tpu.memory_space<vmem>>, %arg4: memref<8x128x128xf32, #tpu.memory_space<vmem>>, %arg5: memref<8x1x128xf32, #tpu.memory_space<vmem>>, %arg6: memref<128x1024xf32, #tpu.memory_space<vmem>>, %arg7: memref<1x1024xf32, #tpu.memory_space<vmem>>, %arg8: memref<8x1024xf32, #tpu.memory_space<vmem>>) attributes {dimension_semantics = [#tpu.dimension_semantics<parallel>], iteration_bounds = array<i64: 1>, scalar_prefetch = 0 : i64, scratch_operands = 0 : i64, tpu.core_type = #tpu.core_type<tc>, window_params = [{transform_indices = @transform_0, window_bounds = array<i64: 8, 1024>}, {pipeline_mode = #tpu.pipeline_mode<synchronous>, transform_indices = @transform_1, window_bounds = array<i64: 1024, 128>}, {pipeline_mode = #tpu.pipeline_mode<synchronous>, transform_indices = @transform_2, window_bounds = array<i64: 1, 128>}, {pipeline_mode = #tpu.pipeline_mode<synchronous>, transform_indices = @transform_3, window_bounds = array<i64: 8, 128, 128>}, {pipeline_mode = #tpu.pipeline_mode<synchronous>, transform_indices = @transform_4, window_bounds = array<i64: 8, 1, 128>}, {pipeline_mode = #tpu.pipeline_mode<synchronous>, transform_indices = @transform_5, window_bounds = array<i64: 128, 1024>}, {pipeline_mode = #tpu.pipeline_mode<synchronous>, transform_indices = @transform_6, window_bounds = array<i64: 1, 1024>}, {transform_indices = @transform_7, window_bounds = array<i64: 8, 1024>}]} {
    %c0 = arith.constant 0 : index
    %c0_0 = arith.constant 0 : index
    %0 = vector.load %arg1[%c0, %c0_0] : memref<8x1024xf32, #tpu.memory_space<vmem>>, vector<8x1024xf32>
    %c0_1 = arith.constant 0 : index
    %c0_2 = arith.constant 0 : index
    %1 = vector.load %arg2[%c0_1, %c0_2] : memref<1024x128xf32, #tpu.memory_space<vmem>>, vector<1024x128xf32>
    %cst = arith.constant dense<0.000000e+00> : vector<8x128xf32>
    %2 = tpu.matmul %0, %1, %cst {dimension_numbers = #tpu.dot_dimension_numbers<[1], [0], [0], [1], [0, 0, 1, 1], [], []>, precision = #tpu.contract_precision<fp32>} : vector<8x1024xf32>, vector<1024x128xf32>, vector<8x128xf32> -> vector<8x128xf32>
    %c0_3 = arith.constant 0 : index
    %c0_4 = arith.constant 0 : index
    %3 = vector.load %arg3[%c0_3, %c0_4] : memref<1x128xf32, #tpu.memory_space<vmem>>, vector<1x128xf32>
    %4 = vector.broadcast %3 : vector<1x128xf32> to vector<8x128xf32>
    %5 = arith.addf %2, %4 : vector<8x128xf32>
    %cst_5 = arith.constant 0.000000e+00 : f32
    %6 = vector.broadcast %cst_5 : f32 to vector<8x128xf32>
    %7 = arith.maximumf %5, %6 : vector<8x128xf32>
    %c0_6 = arith.constant 0 : index
    %c0_7 = arith.constant 0 : index
    %c0_8 = arith.constant 0 : index
    %8 = vector.load %arg4[%c0_6, %c0_7, %c0_8] : memref<8x128x128xf32, #tpu.memory_space<vmem>>, vector<1x128x128xf32>
    %9 = vector.shape_cast %8 : vector<1x128x128xf32> to vector<128x128xf32>
    %cst_9 = arith.constant dense<0.000000e+00> : vector<8x128xf32>
    %10 = tpu.matmul %7, %9, %cst_9 {dimension_numbers = #tpu.dot_dimension_numbers<[1], [0], [0], [1], [0, 0, 1, 1], [], []>, precision = #tpu.contract_precision<fp32>} : vector<8x128xf32>, vector<128x128xf32>, vector<8x128xf32> -> vector<8x128xf32>
    %c0_10 = arith.constant 0 : index
    %c0_11 = arith.constant 0 : index
    %c0_12 = arith.constant 0 : index
    %11 = vector.load %arg5[%c0_10, %c0_11, %c0_12] : memref<8x1x128xf32, #tpu.memory_space<vmem>>, vector<1x1x128xf32>
    %12 = vector.shape_cast %11 : vector<1x1x128xf32> to vector<1x128xf32>
    %13 = vector.broadcast %12 : vector<1x128xf32> to vector<8x128xf32>
    %14 = arith.addf %10, %13 : vector<8x128xf32>
    %cst_13 = arith.constant 0.000000e+00 : f32
    %15 = vector.broadcast %cst_13 : f32 to vector<8x128xf32>
    %16 = arith.maximumf %14, %15 : vector<8x128xf32>
    %c1 = arith.constant 1 : index
    %c0_14 = arith.constant 0 : index
    %c0_15 = arith.constant 0 : index
    %17 = vector.load %arg4[%c1, %c0_14, %c0_15] : memref<8x128x128xf32, #tpu.memory_space<vmem>>, vector<1x128x128xf32>
    %18 = vector.shape_cast %17 : vector<1x128x128xf32> to vector<128x128xf32>
    %cst_16 = arith.constant dense<0.000000e+00> : vector<8x128xf32>
    %19 = tpu.matmul %16, %18, %cst_16 {dimension_numbers = #tpu.dot_dimension_numbers<[1], [0], [0], [1], [0, 0, 1, 1], [], []>, precision = #tpu.contract_precision<fp32>} : vector<8x128xf32>, vector<128x128xf32>, vector<8x128xf32> -> vector<8x128xf32>
    %c1_17 = arith.constant 1 : index
    %c0_18 = arith.constant 0 : index
    %c0_19 = arith.constant 0 : index
    %20 = vector.load %arg5[%c1_17, %c0_18, %c0_19] : memref<8x1x128xf32, #tpu.memory_space<vmem>>, vector<1x1x128xf32>
    %21 = vector.shape_cast %20 : vector<1x1x128xf32> to vector<1x128xf32>
    %22 = vector.broadcast %21 : vector<1x128xf32> to vector<8x128xf32>
    %23 = arith.addf %19, %22 : vector<8x128xf32>
    %cst_20 = arith.constant 0.000000e+00 : f32
    %24 = vector.broadcast %cst_20 : f32 to vector<8x128xf32>
    %25 = arith.maximumf %23, %24 : vector<8x128xf32>
    %c2 = arith.constant 2 : index
    %c0_21 = arith.constant 0 : index
    %c0_22 = arith.constant 0 : index
    %26 = vector.load %arg4[%c2, %c0_21, %c0_22] : memref<8x128x128xf32, #tpu.memory_space<vmem>>, vector<1x128x128xf32>
    %27 = vector.shape_cast %26 : vector<1x128x128xf32> to vector<128x128xf32>
    %cst_23 = arith.constant dense<0.000000e+00> : vector<8x128xf32>
    %28 = tpu.matmul %25, %27, %cst_23 {dimension_numbers = #tpu.dot_dimension_numbers<[1], [0], [0], [1], [0, 0, 1, 1], [], []>, precision = #tpu.contract_precision<fp32>} : vector<8x128xf32>, vector<128x128xf32>, vector<8x128xf32> -> vector<8x128xf32>
    %c2_24 = arith.constant 2 : index
    %c0_25 = arith.constant 0 : index
    %c0_26 = arith.constant 0 : index
    %29 = vector.load %arg5[%c2_24, %c0_25, %c0_26] : memref<8x1x128xf32, #tpu.memory_space<vmem>>, vector<1x1x128xf32>
    %30 = vector.shape_cast %29 : vector<1x1x128xf32> to vector<1x128xf32>
    %31 = vector.broadcast %30 : vector<1x128xf32> to vector<8x128xf32>
    %32 = arith.addf %28, %31 : vector<8x128xf32>
    %cst_27 = arith.constant 0.000000e+00 : f32
    %33 = vector.broadcast %cst_27 : f32 to vector<8x128xf32>
    %34 = arith.maximumf %32, %33 : vector<8x128xf32>
    %c3 = arith.constant 3 : index
    %c0_28 = arith.constant 0 : index
    %c0_29 = arith.constant 0 : index
    %35 = vector.load %arg4[%c3, %c0_28, %c0_29] : memref<8x128x128xf32, #tpu.memory_space<vmem>>, vector<1x128x128xf32>
    %36 = vector.shape_cast %35 : vector<1x128x128xf32> to vector<128x128xf32>
    %cst_30 = arith.constant dense<0.000000e+00> : vector<8x128xf32>
    %37 = tpu.matmul %34, %36, %cst_30 {dimension_numbers = #tpu.dot_dimension_numbers<[1], [0], [0], [1], [0, 0, 1, 1], [], []>, precision = #tpu.contract_precision<fp32>} : vector<8x128xf32>, vector<128x128xf32>, vector<8x128xf32> -> vector<8x128xf32>
    %c3_31 = arith.constant 3 : index
    %c0_32 = arith.constant 0 : index
    %c0_33 = arith.constant 0 : index
    %38 = vector.load %arg5[%c3_31, %c0_32, %c0_33] : memref<8x1x128xf32, #tpu.memory_space<vmem>>, vector<1x1x128xf32>
    %39 = vector.shape_cast %38 : vector<1x1x128xf32> to vector<1x128xf32>
    %40 = vector.broadcast %39 : vector<1x128xf32> to vector<8x128xf32>
    %41 = arith.addf %37, %40 : vector<8x128xf32>
    %cst_34 = arith.constant 0.000000e+00 : f32
    %42 = vector.broadcast %cst_34 : f32 to vector<8x128xf32>
    %43 = arith.maximumf %41, %42 : vector<8x128xf32>
    %c4 = arith.constant 4 : index
    %c0_35 = arith.constant 0 : index
    %c0_36 = arith.constant 0 : index
    %44 = vector.load %arg4[%c4, %c0_35, %c0_36] : memref<8x128x128xf32, #tpu.memory_space<vmem>>, vector<1x128x128xf32>
    %45 = vector.shape_cast %44 : vector<1x128x128xf32> to vector<128x128xf32>
    %cst_37 = arith.constant dense<0.000000e+00> : vector<8x128xf32>
    %46 = tpu.matmul %43, %45, %cst_37 {dimension_numbers = #tpu.dot_dimension_numbers<[1], [0], [0], [1], [0, 0, 1, 1], [], []>, precision = #tpu.contract_precision<fp32>} : vector<8x128xf32>, vector<128x128xf32>, vector<8x128xf32> -> vector<8x128xf32>
    %c4_38 = arith.constant 4 : index
    %c0_39 = arith.constant 0 : index
    %c0_40 = arith.constant 0 : index
    %47 = vector.load %arg5[%c4_38, %c0_39, %c0_40] : memref<8x1x128xf32, #tpu.memory_space<vmem>>, vector<1x1x128xf32>
    %48 = vector.shape_cast %47 : vector<1x1x128xf32> to vector<1x128xf32>
    %49 = vector.broadcast %48 : vector<1x128xf32> to vector<8x128xf32>
    %50 = arith.addf %46, %49 : vector<8x128xf32>
    %cst_41 = arith.constant 0.000000e+00 : f32
    %51 = vector.broadcast %cst_41 : f32 to vector<8x128xf32>
    %52 = arith.maximumf %50, %51 : vector<8x128xf32>
    %c5 = arith.constant 5 : index
    %c0_42 = arith.constant 0 : index
    %c0_43 = arith.constant 0 : index
    %53 = vector.load %arg4[%c5, %c0_42, %c0_43] : memref<8x128x128xf32, #tpu.memory_space<vmem>>, vector<1x128x128xf32>
    %54 = vector.shape_cast %53 : vector<1x128x128xf32> to vector<128x128xf32>
    %cst_44 = arith.constant dense<0.000000e+00> : vector<8x128xf32>
    %55 = tpu.matmul %52, %54, %cst_44 {dimension_numbers = #tpu.dot_dimension_numbers<[1], [0], [0], [1], [0, 0, 1, 1], [], []>, precision = #tpu.contract_precision<fp32>} : vector<8x128xf32>, vector<128x128xf32>, vector<8x128xf32> -> vector<8x128xf32>
    %c5_45 = arith.constant 5 : index
    %c0_46 = arith.constant 0 : index
    %c0_47 = arith.constant 0 : index
    %56 = vector.load %arg5[%c5_45, %c0_46, %c0_47] : memref<8x1x128xf32, #tpu.memory_space<vmem>>, vector<1x1x128xf32>
    %57 = vector.shape_cast %56 : vector<1x1x128xf32> to vector<1x128xf32>
    %58 = vector.broadcast %57 : vector<1x128xf32> to vector<8x128xf32>
    %59 = arith.addf %55, %58 : vector<8x128xf32>
    %cst_48 = arith.constant 0.000000e+00 : f32
    %60 = vector.broadcast %cst_48 : f32 to vector<8x128xf32>
    %61 = arith.maximumf %59, %60 : vector<8x128xf32>
    %c6 = arith.constant 6 : index
    %c0_49 = arith.constant 0 : index
    %c0_50 = arith.constant 0 : index
    %62 = vector.load %arg4[%c6, %c0_49, %c0_50] : memref<8x128x128xf32, #tpu.memory_space<vmem>>, vector<1x128x128xf32>
    %63 = vector.shape_cast %62 : vector<1x128x128xf32> to vector<128x128xf32>
    %cst_51 = arith.constant dense<0.000000e+00> : vector<8x128xf32>
    %64 = tpu.matmul %61, %63, %cst_51 {dimension_numbers = #tpu.dot_dimension_numbers<[1], [0], [0], [1], [0, 0, 1, 1], [], []>, precision = #tpu.contract_precision<fp32>} : vector<8x128xf32>, vector<128x128xf32>, vector<8x128xf32> -> vector<8x128xf32>
    %c6_52 = arith.constant 6 : index
    %c0_53 = arith.constant 0 : index
    %c0_54 = arith.constant 0 : index
    %65 = vector.load %arg5[%c6_52, %c0_53, %c0_54] : memref<8x1x128xf32, #tpu.memory_space<vmem>>, vector<1x1x128xf32>
    %66 = vector.shape_cast %65 : vector<1x1x128xf32> to vector<1x128xf32>
    %67 = vector.broadcast %66 : vector<1x128xf32> to vector<8x128xf32>
    %68 = arith.addf %64, %67 : vector<8x128xf32>
    %cst_55 = arith.constant 0.000000e+00 : f32
    %69 = vector.broadcast %cst_55 : f32 to vector<8x128xf32>
    %70 = arith.maximumf %68, %69 : vector<8x128xf32>
    %c7 = arith.constant 7 : index
    %c0_56 = arith.constant 0 : index
    %c0_57 = arith.constant 0 : index
    %71 = vector.load %arg4[%c7, %c0_56, %c0_57] : memref<8x128x128xf32, #tpu.memory_space<vmem>>, vector<1x128x128xf32>
    %72 = vector.shape_cast %71 : vector<1x128x128xf32> to vector<128x128xf32>
    %cst_58 = arith.constant dense<0.000000e+00> : vector<8x128xf32>
    %73 = tpu.matmul %70, %72, %cst_58 {dimension_numbers = #tpu.dot_dimension_numbers<[1], [0], [0], [1], [0, 0, 1, 1], [], []>, precision = #tpu.contract_precision<fp32>} : vector<8x128xf32>, vector<128x128xf32>, vector<8x128xf32> -> vector<8x128xf32>
    %c7_59 = arith.constant 7 : index
    %c0_60 = arith.constant 0 : index
    %c0_61 = arith.constant 0 : index
    %74 = vector.load %arg5[%c7_59, %c0_60, %c0_61] : memref<8x1x128xf32, #tpu.memory_space<vmem>>, vector<1x1x128xf32>
    %75 = vector.shape_cast %74 : vector<1x1x128xf32> to vector<1x128xf32>
    %76 = vector.broadcast %75 : vector<1x128xf32> to vector<8x128xf32>
    %77 = arith.addf %73, %76 : vector<8x128xf32>
    %cst_62 = arith.constant 0.000000e+00 : f32
    %78 = vector.broadcast %cst_62 : f32 to vector<8x128xf32>
    %79 = arith.maximumf %77, %78 : vector<8x128xf32>
    %c0_63 = arith.constant 0 : index
    %c0_64 = arith.constant 0 : index
    %80 = vector.load %arg6[%c0_63, %c0_64] : memref<128x1024xf32, #tpu.memory_space<vmem>>, vector<128x1024xf32>
    %cst_65 = arith.constant dense<0.000000e+00> : vector<8x1024xf32>
    %81 = tpu.matmul %79, %80, %cst_65 {dimension_numbers = #tpu.dot_dimension_numbers<[1], [0], [0], [1], [0, 0, 1, 1], [], []>, precision = #tpu.contract_precision<fp32>} : vector<8x128xf32>, vector<128x1024xf32>, vector<8x1024xf32> -> vector<8x1024xf32>
    %c0_66 = arith.constant 0 : index
    %c0_67 = arith.constant 0 : index
    %82 = vector.load %arg7[%c0_66, %c0_67] : memref<1x1024xf32, #tpu.memory_space<vmem>>, vector<1x1024xf32>
    %83 = vector.broadcast %82 : vector<1x1024xf32> to vector<8x1024xf32>
    %84 = arith.addf %81, %83 : vector<8x1024xf32>
    %c0_68 = arith.constant 0 : index
    %c0_69 = arith.constant 0 : index
    %85 = vector.load %arg8[%c0_68, %c0_69] : memref<8x1024xf32, #tpu.memory_space<vmem>>, vector<8x1024xf32>
    tpu.vector_store %arg8[%c0_68, %c0_69], %84 {strides = array<i32>} : memref<8x1024xf32, #tpu.memory_space<vmem>>, vector<8x1024xf32>,
    return
  }
  func.func @transform_0(%arg0: i32) -> (i32, i32) {
    %c0_i32 = arith.constant 0 : i32
    %c0_i32_0 = arith.constant 0 : i32
    return %arg0, %c0_i32 : i32, i32
  }
  func.func @transform_1(%arg0: i32) -> (i32, i32) {
    %c0_i32 = arith.constant 0 : i32
    %c0_i32_0 = arith.constant 0 : i32
    %c0_i32_1 = arith.constant 0 : i32
    return %c0_i32, %c0_i32_0 : i32, i32
  }
  func.func @transform_2(%arg0: i32) -> (i32, i32) {
    %c0_i32 = arith.constant 0 : i32
    %c0_i32_0 = arith.constant 0 : i32
    %c0_i32_1 = arith.constant 0 : i32
    return %c0_i32, %c0_i32_0 : i32, i32
  }
  func.func @transform_3(%arg0: i32) -> (i32, i32, i32) {
    %c0_i32 = arith.constant 0 : i32
    %c0_i32_0 = arith.constant 0 : i32
    %c0_i32_1 = arith.constant 0 : i32
    %c0_i32_2 = arith.constant 0 : i32
    return %c0_i32, %c0_i32_0, %c0_i32_1 : i32, i32, i32
  }
  func.func @transform_4(%arg0: i32) -> (i32, i32, i32) {
    %c0_i32 = arith.constant 0 : i32
    %c0_i32_0 = arith.constant 0 : i32
    %c0_i32_1 = arith.constant 0 : i32
    %c0_i32_2 = arith.constant 0 : i32
    return %c0_i32, %c0_i32_0, %c0_i32_1 : i32, i32, i32
  }
  func.func @transform_5(%arg0: i32) -> (i32, i32) {
    %c0_i32 = arith.constant 0 : i32
    %c0_i32_0 = arith.constant 0 : i32
    %c0_i32_1 = arith.constant 0 : i32
    return %c0_i32, %c0_i32_0 : i32, i32
  }
  func.func @transform_6(%arg0: i32) -> (i32, i32) {
    %c0_i32 = arith.constant 0 : i32
    %c0_i32_0 = arith.constant 0 : i32
    %c0_i32_1 = arith.constant 0 : i32
    return %c0_i32, %c0_i32_0 : i32, i32
  }
  func.func @transform_7(%arg0: i32) -> (i32, i32) {
    %c0_i32 = arith.constant 0 : i32
    %c0_i32_0 = arith.constant 0 : i32
    return %arg0, %c0_i32 : i32, i32
  }
}

</mosaic_0001>

<bundles_post_ra>
// kernel: ae_forward.1
= control target key start
LH: loop header
LB: loop body
LE: loop exit
PB: predicated region body
PF: predicated region fallthrough
CT: control target
= control target key end

     0   :  { %vm16022_vm0 = vmmov 0   ;;  %s24655_s1 = inlined_call_operand.vmem [shape: f32[1024,128], index: 1, kind: input, shape index: {}]   ;;  %s24656_s0 = inlined_call_operand.vmem [shape: f32[8,1024], index: 0, kind: input, shape index: {}]   ;;  %s24657_s3 = inlined_call_operand.vmem [shape: f32[8,128,128], index: 3, kind: input, shape index: {}]   ;;  %s24658_s2 = inlined_call_operand.vmem [shape: f32[1,128], index: 2, kind: input, shape index: {}]   ;;  %s24659_s4 = inlined_call_operand.vmem [shape: f32[8,1,128], index: 4, kind: input, shape index: {}]   ;;  %s24660_s5 = inlined_call_operand.vmem [shape: f32[128,1024], index: 5, kind: input, shape index: {}]   ;;  %s24661_s6 = inlined_call_operand.vmem [shape: f32[1,1024], index: 6, kind: input, shape index: {}]   ;;  %s24662_s7 = inlined_call_operand.vmem [shape: f32[8,1024], index: 7, kind: output, shape index: {}]  }
   0x1   :  { %v65_v0 = vld [vmem:[%s24655_s1 + $0xf8] sm:$0xff]  ;;  %v64_v2 = vld [vmem:[%s24655_s1 + $0xf0] sm:$0xff]  ;;  %v63_v7 = vld [vmem:[%s24655_s1 + $0xe8] sm:$0xff] }
   0x2   :  { %v49_v1 = vld [vmem:[%s24655_s1 + $0x78] sm:$0xff]  ;;  %v16072_v3 = vand.u32 4294901760, %v65_v0  ;;  %v16076_v5 = vand.u32 4294901760, %v64_v2  ;;  %v48_v6 = vld [vmem:[%s24655_s1 + $0x70] sm:$0xff]  ;;  %v47_v8 = vld [vmem:[%s24655_s1 + $0x68] sm:$0xff]  ;;  %v16089_v10 = vand.u32 4294901760, %v63_v7 }
   0x3   :  { %v16074_v4 = vand.u32 4294901760, %v49_v1  ;;  %v16087_v9 = vand.u32 4294901760, %v48_v6  ;;  %v16091_v11 = vand.u32 4294901760, %v47_v8  ;;  %v62_v12 = vld [vmem:[%s24655_s1 + $0xe0] sm:$0xff]  ;;  %v61_v14 = vld [vmem:[%s24655_s1 + $0xd8] sm:$0xff]  ;;  %v16120_v20 = vld [vmem:[%s24655_s1 + $0xd0] sm:$0xff] }
   0x4   :  { %v46_v13 = vld [vmem:[%s24655_s1 + $0x60] sm:$0xff]  ;;  %12682 = vmatprep.subr.mxu0 %v16072_v3  ;;  %v16103_v15 = vand.u32 4294901760, %v62_v12  ;;  %v16107_v17 = vand.u32 4294901760, %v61_v14  ;;  %v16110_v18 = vsub.f32 %v65_v0, %v16072_v3  ;;  %v16115_v19 = vld [vmem:[%s24655_s1 + $0x58] sm:$0xff]  ;;  %v16125_v21 = vld [vmem:[%s24655_s1 + $0x50] sm:$0xff]  ;;  %v16135_v24 = vand.u32 4294901760, %v16120_v20 }
   0x5   :  { %v16105_v16 = vand.u32 4294901760, %v46_v13  ;;  %12683 = vmatpush3.msra.mxu0 %v16074_v4  ;;  %v16129_v22 = vand.u32 4294901760, %v16115_v19  ;;  %v16132_v23 = vsub.f32 %v49_v1, %v16074_v4  ;;  %v16138_v25 = vsub.f32 %v64_v2, %v16076_v5  ;;  %v16143_v26 = vld [vmem:[%s24655_s1 + $0xc8] sm:$0xff]  ;;  %v16153_v28 = vld [vmem:[%s24655_s1 + $0xc0] sm:$0xff]  ;;  %v16205_v46 = vld [vmem:[%s24655_s1 + $0xb8] sm:$0xff] }
   0x6   :  { %v16148_v27 = vld [vmem:[%s24655_s1 + $0x48] sm:$0xff]  ;;  %12684 = vmatprep.subr.mxu0 %v16076_v5  ;;  %v24676_v29 = vand.u32 4294901760, %v16110_v18  ;;  %v16158_v30 = vand.u32 4294901760, %v16125_v21  ;;  %v16161_v31 = vsub.f32 %v48_v6, %v16087_v9  ;;  %v16164_v32 = vand.u32 4294901760, %v16143_v26  ;;  %v16178_v37 = vld [vmem:[%s24655_s1 + $0x40] sm:$0xff]  ;;  %v16218_v51 = vld [vmem:[%s24655_s1 + $0x38] sm:$0xff] }
   0x7   :  { %12685 = vmatpush3.msra.mxu0 %v16087_v9  ;;  %v24675_v33 = vand.u32 4294901760, %v16132_v23  ;;  %v24673_v34 = vand.u32 4294901760, %v16138_v25  ;;  %v16170_v35 = vsub.f32 %v63_v7, %v16089_v10  ;;  %v16173_v36 = vand.u32 4294901760, %v16148_v27  ;;  %v16228_v56 = vld [vmem:[%s24655_s1 + $0xb0] sm:$0xff]  ;;  %v16258_v2 = vld [vmem:[%s24655_s1 + $0xa8] sm:$0xff] }
   0x8   :  { %25215 = vst [vmem:[#allocation2_spill] sm:$0xff] %v16158_v30  ;;  %25216 = vst [vmem:[#allocation3_spill] sm:$0xff] %v16164_v32  ;;  %12686 = vmatprep.subr.mxu0 %v16089_v10  ;;  %v397_v38 = vsub.f32 %v16110_v18, %v24676_v29  ;;  %v24672_v39 = vand.u32 4294901760, %v16161_v31  ;;  %v16186_v40 = vsub.f32 %v47_v8, %v16091_v11  ;;  %v16189_v41 = vand.u32 4294901760, %v16153_v28  ;;  %v16243_v61 = vld [vmem:[%s24655_s1 + $0x30] sm:$0xff] }
   0x9   :  { %25217 = vst [vmem:[#allocation4_spill] sm:$0xff] %v16173_v36  ;;  %12687 = vmatpush3.msra.mxu0 %v16091_v11  ;;  %v285_v42 = vsub.f32 %v16132_v23, %v24675_v33  ;;  %v404_v43 = vsub.f32 %v16138_v25, %v24673_v34  ;;  %v24670_v44 = vand.u32 4294901760, %v16170_v35  ;;  %v16200_v45 = vsub.f32 %v62_v12, %v16103_v15  ;;  %v16394_v33 = vld [vmem:[%s24655_s1 + $0x88] sm:$0xff] }
   0xa   :  { %25218 = vst [vmem:[#allocation5_spill] sm:$0xff] %v16189_v41  ;;  %12688 = vmatprep.subr.mxu0 %v16103_v15  ;;  %v398_v47 = vand.u32 4294901760, %v397_v38  ;;  %v292_v48 = vsub.f32 %v16161_v31, %v24672_v39  ;;  %v24668_v49 = vand.u32 4294901760, %v16186_v40  ;;  %v16213_v50 = vand.u32 4294901760, %v16178_v37 }
   0xb   :  { %12689 = vmatpush3.msra.mxu0 %v16105_v16  ;;  %v286_v52 = vand.u32 4294901760, %v285_v42  ;;  %v405_v53 = vand.u32 4294901760, %v404_v43  ;;  %v411_v54 = vsub.f32 %v16170_v35, %v24670_v44  ;;  %v24667_v55 = vand.u32 4294901760, %v16200_v45  ;;  %v16367_v44 = vld [vmem:[%s24655_s1 + $0x90] sm:$0xff] }
   0xc   :  { %25219 = vst [vmem:[#allocation6_spill] sm:$0xff] %v16213_v50  ;;  %12690 = vmatprep.subr.mxu0 %v16107_v17  ;;  %12717 = vmatprep.subr.mxu1 %v398_v47  ;;  %v293_v57 = vand.u32 4294901760, %v292_v48  ;;  %v299_v58 = vsub.f32 %v16186_v40, %v24668_v49  ;;  %v16235_v59 = vsub.f32 %v46_v13, %v16105_v16  ;;  %v16238_v60 = vand.u32 4294901760, %v16205_v46  ;;  %v16272_v13 = vld [vmem:[%s24655_s1 + $0x28] sm:$0xff]  ;;  %v16351_v49 = vld [vmem:[%s24655_s1 + $0x18] sm:$0xff] }
   0xd   :  { %12691 = vmatpush3.msra.mxu0 %v16129_v22  ;;  %12718 = vmatpush3.msra.mxu1 %v286_v52  ;;  %v412_v62 = vand.u32 4294901760, %v411_v54  ;;  %v418_v63 = vsub.f32 %v16200_v45, %v24667_v55  ;;  %v16250_v0 = vsub.f32 %v61_v14, %v16107_v17  ;;  %v16253_v1 = vand.u32 4294901760, %v16218_v51 }
   0xe   :  { %25220 = vst [vmem:[#allocation7_spill] sm:$0xff] %v16238_v60  ;;  %12692 = vmatprep.subr.mxu0 %v16135_v24  ;;  %12719 = vmatprep.subr.mxu1 %v405_v53  ;;  %v300_v6 = vand.u32 4294901760, %v299_v58  ;;  %v24665_v7 = vand.u32 4294901760, %v16235_v59  ;;  %v16264_v8 = vsub.f32 %v16115_v19, %v16129_v22  ;;  %v16267_v12 = vand.u32 4294901760, %v16228_v56 }
   0xf   :  { %25221 = vst [vmem:[#allocation8_spill] sm:$0xff] %v16253_v1  ;;  %12693 = vmatpush3.msra.mxu0 %v16158_v30  ;;  %12720 = vmatpush3.msra.mxu1 %v293_v57  ;;  %v419_v14 = vand.u32 4294901760, %v418_v63  ;;  %v24663_v38 = vand.u32 4294901760, %v16250_v0  ;;  %v16278_v42 = vsub.f32 %v16120_v20, %v16135_v24  ;;  %v16281_v19 = vand.u32 4294901760, %v16243_v61  ;;  %v16298_v20 = vld [vmem:[%s24655_s1 + $0xa0] sm:$0xff] }
  0x10   :  { %25222 = vst [vmem:[#allocation9_spill] sm:$0xff] %v16267_v12  ;;  %12694 = vmatprep.subr.mxu0 %v16164_v32  ;;  %12721 = vmatprep.subr.mxu1 %v412_v62  ;;  %v306_v43 = vsub.f32 %v16235_v59, %v24665_v7  ;;  %v24664_v47 = vand.u32 4294901760, %v16264_v8  ;;  %v16290_v48 = vsub.f32 %v16125_v21, %v16158_v30  ;;  %v16293_v52 = vand.u32 4294901760, %v16258_v2 }
  0x11   :  { %25223 = vst [vmem:[#allocation10_spill] sm:$0xff] %v16281_v19  ;;  %12695 = vmatpush3.msra.mxu0 %v16173_v36  ;;  %12722 = vmatpush3.msra.mxu1 %v300_v6  ;;  %v425_v53 = vsub.f32 %v16250_v0, %v24663_v38  ;;  %v24666_v54 = vand.u32 4294901760, %v16278_v42  ;;  %v16307_v21 = vsub.f32 %v16143_v26, %v16164_v32  ;;  %v16310_v57 = vand.u32 4294901760, %v16272_v13  ;;  %v16324_v26 = vld [vmem:[%s24655_s1 + $0x20] sm:$0xff] }
  0x12   :  { %25224 = vst [vmem:[#allocation11_spill] sm:$0xff] %v16293_v52  ;;  %12696 = vmatprep.subr.mxu0 %v16189_v41  ;;  %12723 = vmatprep.subr.mxu1 %v419_v14  ;;  %v307_v58 = vand.u32 4294901760, %v306_v43  ;;  %v313_v62 = vsub.f32 %v16264_v8, %v24664_v47  ;;  %v24669_v63 = vand.u32 4294901760, %v16290_v48  ;;  %v16319_v6 = vsub.f32 %v16148_v27, %v16173_v36  ;;  %v16337_v27 = vld [vmem:[%s24655_s1 + $0x98] sm:$0xff] }
  0x13   :  { %25225 = vst [vmem:[#allocation12_spill] sm:$0xff] %v16310_v57  ;;  %12697 = vmatpush3.msra.mxu0 %v16213_v50  ;;  %v426_v38 = vand.u32 4294901760, %v425_v53  ;;  %v432_v14 = vsub.f32 %v16278_v42, %v24666_v54  ;;  %v24671_v43 = vand.u32 4294901760, %v16307_v21  ;;  %v16332_v47 = vand.u32 4294901760, %v16298_v20 }
  0x14   :  { %12724 = vmatpush3.msra.mxu1 %v307_v58  ;;  %12698 = vmatprep.subr.mxu0 %v16238_v60  ;;  %v314_v7 = vand.u32 4294901760, %v313_v62  ;;  %v320_v53 = vsub.f32 %v16290_v48, %v24669_v63  ;;  %v24674_v54 = vand.u32 4294901760, %v16319_v6  ;;  %v16346_v55 = vsub.f32 %v16153_v28, %v16189_v41  ;;  %v26_v41 = vld [vmem:[%s24656_s0] sm:$0xff] }
  0x15   :  { %25226 = vst [vmem:[#allocation13_spill] sm:$0xff] %v16332_v47  ;;  %12725 = vmatprep.subr.mxu1 %v426_v38  ;;  %12699 = vmatpush3.msra.mxu0 %v16253_v1  ;;  %v433_v58 = vand.u32 4294901760, %v432_v14  ;;  %v439_v62 = vsub.f32 %v16307_v21, %v24671_v43  ;;  %v16358_v63 = vand.u32 4294901760, %v16324_v26  ;;  %v16362_v28 = vsub.f32 %v16178_v37, %v16213_v50  ;;  %v16380_v37 = vld [vmem:[%s24655_s1 + $0x10] sm:$0xff] }
  0x16   :  { %12726 = vmatpush3.msra.mxu1 %v314_v7  ;;  %12700 = vmatprep.subr.mxu0 %v16267_v12  ;;  %v321_v38 = vand.u32 4294901760, %v320_v53  ;;  %v327_v14 = vsub.f32 %v16319_v6, %v24674_v54  ;;  %v24679_v43 = vand.u32 4294901760, %v16346_v55  ;;  %v16375_v39 = vand.u32 4294901760, %v16337_v27 }
  0x17   :  { %25227 = vst [vmem:[#allocation14_spill] sm:$0xff] %v16358_v63  ;;  %12727 = vmatprep.subr.mxu1 %v433_v58  ;;  %12701 = vmatpush3.msra.mxu0 %v16281_v19  ;;  %v440_v7 = vand.u32 4294901760, %v439_v62  ;;  %v24680_v53 = vand.u32 4294901760, %v16362_v28  ;;  %v16386_v34 = vsub.f32 %v16205_v46, %v16238_v60  ;;  %v16389_v54 = vand.u32 4294901760, %v16351_v49 }
  0x18   :  { %12728 = vmatpush3.msra.mxu1 %v321_v38  ;;  %12702 = vmatprep.subr.mxu0 %v16293_v52  ;;  %v328_v58 = vand.u32 4294901760, %v327_v14  ;;  %v446_v62 = vsub.f32 %v16346_v55, %v24679_v43  ;;  %v16402_v46 = vsub.f32 %v16218_v51, %v16253_v1  ;;  %v16405_v29 = vand.u32 4294901760, %v16367_v44  ;;  %v16422_v51 = vld [vmem:[%s24655_s1 + $0x8] sm:$0xff] }
  0x19   :  { %25228 = vst [vmem:[#allocation15_spill] sm:$0xff] %v16389_v54  ;;  %12729 = vmatprep.subr.mxu1 %v440_v7  ;;  %12703 = vmatpush3.msra.mxu0 %v16310_v57  ;;  %v334_v38 = vsub.f32 %v16362_v28, %v24680_v53  ;;  %v16414_v60 = vsub.f32 %v16228_v56, %v16267_v12  ;;  %v16417_v43 = vand.u32 4294901760, %v16380_v37  ;;  %v16431_v56 = vand.u32 4294901760, %v16394_v33  ;;  %v16436_v12 = vld [vmem:[%s24655_s1 + $0x80] sm:$0xff] }
  0x1a   :  { %25229 = vst [vmem:[#allocation16_spill] sm:$0xff] %v16405_v29  ;;  %12730 = vmatpush3.msra.mxu1 %v328_v58  ;;  %12704 = vmatprep.subr.mxu0 %v16332_v47  ;;  %v447_v7 = vand.u32 4294901760, %v446_v62  ;;  %v16428_v14 = vsub.f32 %v16243_v61, %v16281_v19  ;;  %v25233_v1 = vand.u32 4294901760, %v16386_v34  ;;  %v16445_v61 = vsub.f32 %v16258_v2, %v16293_v52  ;;  %v16462_v2 = vld [vmem:[%s24655_s1] sm:$0xff] }
  0x1b   :  { %25230 = vst [vmem:[#allocation17_spill] sm:$0xff] %v16417_v43  ;;  %25232 = vst [vmem:[#allocation19_spill] sm:$0xff] %v16431_v56  ;;  %12705 = vmatpush3.msra.mxu0 %v16358_v63  ;;  %v335_v58 = vand.u32 4294901760, %v334_v38  ;;  %v24697_v53 = vand.u32 4294901760, %v16414_v60  ;;  %v25235_v19 = vand.u32 4294901760, %v16402_v46  ;;  %v16453_v38 = vand.u32 4294901760, %v16422_v51 }
  0x1c   :  { %25231 = vst [vmem:[#allocation18_spill] sm:$0xff] %v16428_v14  ;;  %v453_v62 = vsub.f32 %v16386_v34, %v25233_v1  ;;  %25234 = vst [vmem:[#allocation20_spill] sm:$0xff] %v16445_v61  ;;  %12731 = vmatprep.subr.mxu1 %v447_v7  ;;  %12706 = vmatprep.subr.mxu0 %v16375_v39  ;;  %v16457_v1 = vsub.f32 %v16272_v13, %v16310_v57  ;;  %v16470_v52 = vand.u32 4294901760, %v16436_v12  ;;  %v27_v13 = vld [vmem:[%s24656_s0 + $0x8] sm:$0xff] }
  0x1d   :  { %v341_v50 = vsub.f32 %v16402_v46, %v25235_v19  ;;  %12732 = vmatpush3.msra.mxu1 %v335_v58  ;;  %12707 = vmatpush3.msra.mxu0 %v16389_v54  ;;  %v460_v19 = vsub.f32 %v16414_v60, %v24697_v53  ;;  %v25236_v58 = vand.u32 4294901760, %v16428_v14  ;;  %v16482_v53 = vsub.f32 %v16298_v20, %v16332_v47 }
  0x1e   :  { %v454_v7 = vand.u32 4294901760, %v453_v62  ;;  %12708 = vmatprep.subr.mxu0 %v16405_v29  ;;  %v16496_v36 = vsub.f32 %v16324_v26, %v16358_v63  ;;  %v16511_v26 = vand.u32 4294901760, %v26_v41 }
  0x1f   :  { %v342_v57 = vand.u32 4294901760, %v341_v50  ;;  %v348_v62 = vsub.f32 %v16428_v14, %v25236_v58  ;;  %v461_v32 = vand.u32 4294901760, %v460_v19  ;;  %12709 = vmatpush3.msra.mxu0 %v16417_v43  ;;  %v25237_v50 = vand.u32 4294901760, %v16445_v61 }
  0x20   :  { %12733 = vmatprep.subr.mxu1 %v454_v7  ;;  %v16492_v58 = vand.u32 4294901760, %v16462_v2  ;;  %12710 = vmatprep.subr.mxu0 %v16431_v56  ;;  %v25238_v7 = vand.u32 4294901760, %v16457_v1  ;;  %v24708_v47 = vand.u32 4294901760, %v16482_v53  ;;  %v16503_v14 = vand.u32 4294901760, %v27_v13  ;;  %25240 = vst [vmem:[#allocation22_spill] sm:$0xff] %v16511_v26 }
  0x21   :  { %v467_v30 = vsub.f32 %v16445_v61, %v25237_v50  ;;  %12734 = vmatpush3.msra.mxu1 %v342_v57  ;;  %v349_v20 = vand.u32 4294901760, %v348_v62  ;;  %12711 = vmatpush3.msra.mxu0 %v16453_v38  ;;  %v24709_v61 = vand.u32 4294901760, %v16496_v36  ;;  %v16509_v57 = vsub.f32 %v16337_v27, %v16375_v39 }
  0x22   :  { %v355_v19 = vsub.f32 %v16457_v1, %v25238_v7  ;;  %25239 = vst [vmem:[#allocation21_spill] sm:$0xff] %v16503_v14  ;;  %12735 = vmatprep.subr.mxu1 %v461_v32  ;;  %12712 = vmatprep.subr.mxu0 %v16470_v52  ;;  %v474_v7 = vsub.f32 %v16482_v53, %v24708_v47 }
  0x23   :  { %v468_v50 = vand.u32 4294901760, %v467_v30  ;;  %12736 = vmatpush3.msra.mxu1 %v349_v20  ;;  %v16518_v30 = vsub.f32 %v27_v13, %v16503_v14  ;;  %v16522_v32 = vsub.f32 %v16351_v49, %v16389_v54  ;;  %12713 = vmatpush3.msra.mxu0 %v16492_v58  ;;  %v362_v27 = vsub.f32 %v16496_v36, %v24709_v61 }
  0x24   :  { %v356_v62 = vand.u32 4294901760, %v355_v19  ;;  %v16530_v19 = vsub.f32 %v26_v41, %v16511_v26  ;;  %v16534_v13 = vsub.f32 %v16367_v44, %v16405_v29  ;;  %v475_v47 = vand.u32 4294901760, %v474_v7  ;;  %12752 = vmatprep.subr.mxu0 %v16110_v18  ;;  %506 = vmatprep.mubr.f32.mxu1 %v16503_v14 }
  0x25   :  { %12737 = vmatprep.subr.mxu1 %v468_v50  ;;  %v24714_v49 = vand.u32 4294901760, %v16518_v30  ;;  %v24717_v50 = vand.u32 4294901760, %v16522_v32  ;;  %v16541_v61 = vsub.f32 %v16380_v37, %v16417_v43  ;;  %v363_v20 = vand.u32 4294901760, %v362_v27 }
  0x26   :  { %12738 = vmatpush3.msra.mxu1 %v356_v62  ;;  %v25241_v41 = vand.u32 4294901760, %v16509_v57  ;;  %v25242_v62 = vand.u32 4294901760, %v16530_v19  ;;  %v25243_v14 = vand.u32 4294901760, %v16534_v13  ;;  %v16568_v43 = vsub.f32 %v16422_v51, %v16453_v38 }
  0x27   :  { %12739 = vmatprep.subr.mxu1 %v475_v47  ;;  %v268_v7 = vsub.f32 %v16518_v30, %v24714_v49  ;;  %v369_v37 = vsub.f32 %v16522_v32, %v24717_v50  ;;  %v25245_v29 = vand.u32 4294901760, %v16541_v61 }
  0x28   :  { %v481_v54 = vsub.f32 %v16509_v57, %v25241_v41  ;;  %v16558_v41 = vsub.f32 %v16394_v33, %v16431_v56  ;;  %12740 = vmatpush3.msra.mxu1 %v363_v20  ;;  %v274_v47 = vsub.f32 %v16530_v19, %v25242_v62  ;;  %v488_v49 = vsub.f32 %v16534_v13, %v25243_v14 }
  0x29   :  { %25244 = vst [vmem:[#allocation23_spill] sm:$0xff] %v16568_v43  ;;  %v269_v50 = vand.u32 4294901760, %v268_v7  ;;  %v370_v27 = vand.u32 4294901760, %v369_v37  ;;  %v376_v33 = vsub.f32 %v16541_v61, %v25245_v29  ;;  %v24724_v62 = vand.u32 4294901760, %v16568_v43 }
  0x2a   :  { %v482_v44 = vand.u32 4294901760, %v481_v54  ;;  %v24725_v54 = vand.u32 4294901760, %v16558_v41  ;;  %v275_v20 = vand.u32 4294901760, %v274_v47  ;;  %v489_v56 = vand.u32 4294901760, %v488_v49 }
  0x2b   :  { %v16577_v14 = vsub.f32 %v16436_v12, %v16470_v52  ;;  %270 = vmatprep.mubr.f32.mxu0 %v269_v50  ;;  %v377_v51 = vand.u32 4294901760, %v376_v33  ;;  %v16584_v29 = vsub.f32 %v16462_v2, %v16492_v58  ;;  %v383_v49 = vsub.f32 %v16568_v43, %v24724_v62  ;;  %v25248_v33 = vld [vmem:[#allocation18_spill] sm:$0xff]  ;;  %v25261_v62 = vld [vmem:[#allocation13_spill] sm:$0xff] }
  0x2c   :  { %12741 = vmatprep.subr.mxu1 %v482_v44  ;;  %v495_v7 = vsub.f32 %v16558_v41, %v24725_v54  ;;  %276 = vmatmul.mubr.f32.vlgmr.msra.gmra.mxu0 %v275_v20  ;;  %v25249_v20 = vld [vmem:[#allocation2_spill] sm:$0xff]  ;;  %v25262_v54 = vand.u32 4294901760, %v16110_v18  ;;  %v25270_v18 = vand.u32 4294901760, %v16170_v35 }
  0x2d   :  { %25246 = vst [vmem:[#allocation24_spill] sm:$0xff] %v16577_v14  ;;  %12742 = vmatpush3.msra.mxu1 %v370_v27  ;;  %25247 = vst [vmem:[#allocation25_spill] sm:$0xff] %v16584_v29  ;;  %v24723_v12 = vand.u32 4294901760, %v16577_v14  ;;  %12753 = vmatpush3.msra.mxu0 %v16132_v23  ;;  %v24722_v44 = vand.u32 4294901760, %v16584_v29  ;;  %v384_v37 = vand.u32 4294901760, %v383_v49  ;;  %v25252_v49 = vld [vmem:[#allocation4_spill] sm:$0xff] }
  0x2e   :  { %12743 = vmatprep.subr.mxu1 %v489_v56  ;;  %v496_v50 = vand.u32 4294901760, %v495_v7  ;;  %12754 = vmatprep.subr.mxu0 %v16138_v25  ;;  %v25251_v7 = vld [vmem:[#allocation3_spill] sm:$0xff] }
  0x2f   :  { %12744 = vmatpush3.msra.mxu1 %v377_v51  ;;  %v502_v2 = vsub.f32 %v16577_v14, %v24723_v12  ;;  %643 = vmatprep.mubr.f32.mxu0 %v16518_v30  ;;  %v390_v56 = vsub.f32 %v16584_v29, %v24722_v44  ;;  %v25250_v51 = vld [vmem:[#allocation20_spill] sm:$0xff]  ;;  %v25259_v44 = vld [vmem:[#allocation11_spill] sm:$0xff] }
  0x30   :  { %12755 = vmatpush3.msra.mxu0 %v16161_v31  ;;  %12745 = vmatprep.subr.mxu1 %v496_v50  ;;  %v25253_v50 = vld [vmem:[#allocation5_spill] sm:$0xff]  ;;  %v25260_v12 = vld [vmem:[#allocation12_spill] sm:$0xff] }
  0x31   :  { %12756 = vmatprep.subr.mxu0 %v16170_v35  ;;  %12746 = vmatpush3.msra.mxu1 %v384_v37  ;;  %v503_v27 = vand.u32 4294901760, %v502_v2  ;;  %v391_v47 = vand.u32 4294901760, %v390_v56  ;;  %v25254_v37 = vld [vmem:[#allocation6_spill] sm:$0xff]  ;;  %v25255_v2 = vld [vmem:[#allocation7_spill] sm:$0xff]  ;;  %v25256_v56 = vld [vmem:[#allocation8_spill] sm:$0xff]  ;;  %v25275_v35 = vand.u32 4294901760, %v16530_v19 }
  0x32   :  { %12757 = vmatpush3.msra.mxu0 %v16186_v40 }
  0x33   :  { %12747 = vmatprep.subr.mxu1 %v503_v27  ;;  %12758 = vmatprep.subr.mxu0 %v16200_v45  ;;  %v25257_v27 = vld [vmem:[#allocation9_spill] sm:$0xff] }
  0x34   :  { %12748 = vmatpush3.msra.mxu1 %v391_v47  ;;  %12759 = vmatpush3.msra.mxu0 %v16235_v59  ;;  %v25258_v47 = vld [vmem:[#allocation10_spill] sm:$0xff] }
  0x35   :  { %508 = vmatmul.mubr.f32.vlgmr.msra.gmra.mxu1 %v16511_v26  ;;  %12760 = vmatprep.subr.mxu0 %v16250_v0  ;;  %v25263_v26 = vld [vmem:[#allocation15_spill] sm:$0xff] }
  0x36   :  { %12787 = vmatprep.subr.mxu1 %v16072_v3  ;;  %12761 = vmatpush3.msra.mxu0 %v16264_v8 }
  0x37   :  { %12788 = vmatpush3.msra.mxu1 %v16074_v4  ;;  %12762 = vmatprep.subr.mxu0 %v16278_v42 }
  0x38   :  { %12789 = vmatprep.subr.mxu1 %v16076_v5  ;;  %12763 = vmatpush3.msra.mxu0 %v16290_v48 }
  0x39   :  { %12790 = vmatpush3.msra.mxu1 %v16087_v9  ;;  %12764 = vmatprep.subr.mxu0 %v16307_v21 }
  0x3a   :  { %12791 = vmatprep.subr.mxu1 %v16089_v10  ;;  %12765 = vmatpush3.msra.mxu0 %v16319_v6 }
  0x3b   :  { %12792 = vmatpush3.msra.mxu1 %v16091_v11  ;;  %12766 = vmatprep.subr.mxu0 %v16346_v55 }
  0x3c   :  { %12793 = vmatprep.subr.mxu1 %v16103_v15  ;;  %12767 = vmatpush3.msra.mxu0 %v16362_v28 }
  0x3d   :  { %12794 = vmatpush3.msra.mxu1 %v16105_v16  ;;  %12768 = vmatprep.subr.mxu0 %v16386_v34 }
  0x3e   :  { %12795 = vmatprep.subr.mxu1 %v16107_v17  ;;  %12769 = vmatpush3.msra.mxu0 %v16402_v46 }
  0x3f   :  { %12796 = vmatpush3.msra.mxu1 %v16129_v22  ;;  %12770 = vmatprep.subr.mxu0 %v16414_v60 }
  0x40   :  { %12797 = vmatprep.subr.mxu1 %v16135_v24  ;;  %12771 = vmatpush3.msra.mxu0 %v25248_v33 }
  0x41   :  { %12798 = vmatpush3.msra.mxu1 %v25249_v20  ;;  %12772 = vmatprep.subr.mxu0 %v25250_v51 }
  0x42   :  { %12799 = vmatprep.subr.mxu1 %v25251_v7  ;;  %12773 = vmatpush3.msra.mxu0 %v16457_v1 }
  0x43   :  { %12800 = vmatpush3.msra.mxu1 %v25252_v49  ;;  %12774 = vmatprep.subr.mxu0 %v16482_v53 }
  0x44   :  { %12801 = vmatprep.subr.mxu1 %v25253_v50  ;;  %12775 = vmatpush3.msra.mxu0 %v16496_v36 }
  0x45   :  { %12802 = vmatpush3.msra.mxu1 %v25254_v37  ;;  %12776 = vmatprep.subr.mxu0 %v16509_v57 }
  0x46   :  { %12803 = vmatprep.subr.mxu1 %v25255_v2  ;;  %12777 = vmatpush3.msra.mxu0 %v16522_v32 }
  0x47   :  { %12804 = vmatpush3.msra.mxu1 %v25256_v56  ;;  %12778 = vmatprep.subr.mxu0 %v16534_v13 }
  0x48   :  { %12805 = vmatprep.subr.mxu1 %v25257_v27  ;;  %12779 = vmatpush3.msra.mxu0 %v16541_v61 }
  0x49   :  { %12806 = vmatpush3.msra.mxu1 %v25258_v47  ;;  %12780 = vmatprep.subr.mxu0 %v16558_v41 }
  0x4a   :  { %12807 = vmatprep.subr.mxu1 %v25259_v44  ;;  %12781 = vmatpush3.msra.mxu0 %v16568_v43  ;;  %v25264_v43 = vand.u32 4294901760, %v16132_v23  ;;  %v25271_v23 = vand.u32 4294901760, %v16186_v40  ;;  %v25277_v40 = vand.u32 4294901760, %v16264_v8  ;;  %v25283_v8 = vand.u32 4294901760, %v16362_v28 }
  0x4b   :  { %12808 = vmatpush3.msra.mxu1 %v25260_v12  ;;  %12782 = vmatprep.subr.mxu0 %v16577_v14  ;;  %v25265_v12 = vld [vmem:[#allocation16_spill] sm:$0xff]  ;;  %v25269_v14 = vld [vmem:[#allocation19_spill] sm:$0xff] }
  0x4c   :  { %12809 = vmatprep.subr.mxu1 %v25261_v62  ;;  %12783 = vmatpush3.msra.mxu0 %v16584_v29  ;;  %v25266_v62 = vand.u32 4294901760, %v16138_v25  ;;  %v25267_v29 = vld [vmem:[#allocation17_spill] sm:$0xff]  ;;  %v25272_v25 = vand.u32 4294901760, %v16200_v45  ;;  %v25278_v45 = vand.u32 4294901760, %v16278_v42 }
  0x4d   :  { %12810 = vmatpush3.msra.mxu1 %v16358_v63  ;;  %646 = vmatmul.mubr.f32.vlgmr.msra.gmra.mxu0 %v16530_v19  ;;  %v25268_v63 = vand.u32 4294901760, %v16161_v31  ;;  %v25273_v31 = vand.u32 4294901760, %v16518_v30  ;;  %v25289_v30 = vand.u32 4294901760, %v25250_v51 }
  0x4e   :  { %12811 = vmatprep.subr.mxu1 %v16375_v39  ;;  %12822 = vmatprep.subr.mxu0 %v25262_v54  ;;  %v25291_v54 = vand.u32 4294901760, %v16457_v1 }
  0x4f   :  { %12812 = vmatpush3.msra.mxu1 %v25263_v26  ;;  %12823 = vmatpush3.msra.mxu0 %v25264_v43  ;;  %v25276_v43 = vand.u32 4294901760, %v16250_v0  ;;  %v25280_v0 = vand.u32 4294901760, %v16307_v21  ;;  %v25285_v21 = vand.u32 4294901760, %v16402_v46 }
  0x50   :  { %12813 = vmatprep.subr.mxu1 %v25265_v12  ;;  %12824 = vmatprep.subr.mxu0 %v25266_v62 }
  0x51   :  { %12814 = vmatpush3.msra.mxu1 %v25267_v29  ;;  %12825 = vmatpush3.msra.mxu0 %v25268_v63  ;;  %v25274_v63 = vand.u32 4294901760, %v16235_v59  ;;  %v25279_v59 = vand.u32 4294901760, %v16290_v48  ;;  %v79_v48 = vld [vmem:[%s24655_s1 + $0x168] sm:$0xff] }
  0x52   :  { %12815 = vmatprep.subr.mxu1 %v25269_v14  ;;  %12826 = vmatprep.subr.mxu0 %v25270_v18  ;;  %v16745_v46 = vand.u32 4294901760, %v79_v48  ;;  %v25295_v18 = vand.u32 4294901760, %v16509_v57 }
  0x53   :  { %12816 = vmatpush3.msra.mxu1 %v16453_v38  ;;  %12827 = vmatpush3.msra.mxu0 %v25271_v23  ;;  %v76_v23 = vld [vmem:[%s24655_s1 + $0x150] sm:$0xff] }
  0x54   :  { %12817 = vmatprep.subr.mxu1 %v16470_v52  ;;  %12828 = vmatprep.subr.mxu0 %v25272_v25  ;;  %25288 = vst [vmem:[#allocation18_spill] sm:$0xff] %v16745_v46  ;;  %v16779_v1 = vsub.f32 %v79_v48, %v16745_v46  ;;  %v25310_v48 = vld [vmem:[#allocation13_spill] sm:$0xff] }
  0x55   :  { %12818 = vmatpush3.msra.mxu1 %v16492_v58  ;;  %750 = vmatprep.mubr.f32.mxu1 %v25273_v31  ;;  %v25296_v31 = vand.u32 4294901760, %v16522_v32 }
  0x56   :  { %12829 = vmatpush3.msra.mxu0 %v25274_v63  ;;  %754 = vmatmul.mubr.f32.vlgmr.msra.gmra.mxu1 %v25275_v35  ;;  %v25298_v35 = vand.u32 4294901760, %v16534_v13  ;;  %v75_v13 = vld [vmem:[%s24655_s1 + $0x148] sm:$0xff] }
  0x57   :  { %12830 = vmatprep.subr.mxu0 %v25276_v43  ;;  %12857 = vmatprep.subr.mxu1 %v16072_v3  ;;  %v25281_v3 = vand.u32 4294901760, %v16319_v6  ;;  %v25287_v6 = vand.u32 4294901760, %v25248_v33  ;;  %v25292_v33 = vand.u32 4294901760, %v16482_v53  ;;  %v93_v53 = vld [vmem:[%s24655_s1 + $0x1d8] sm:$0xff] }
  0x58   :  { %12831 = vmatpush3.msra.mxu0 %v25277_v40  ;;  %12858 = vmatpush3.msra.mxu1 %v16074_v4  ;;  %v97_v4 = vld [vmem:[%s24655_s1 + $0x1f8] sm:$0xff]  ;;  %v16816_v32 = vand.u32 4294901760, %v93_v53 }
  0x59   :  { %12832 = vmatprep.subr.mxu0 %v25278_v45  ;;  %12859 = vmatprep.subr.mxu1 %v16076_v5  ;;  %v81_v5 = vld [vmem:[%s24655_s1 + $0x178] sm:$0xff]  ;;  %v16719_v42 = vand.u32 4294901760, %v97_v4 }
  0x5a   :  { %12833 = vmatpush3.msra.mxu0 %v25279_v59  ;;  %12860 = vmatpush3.msra.mxu1 %v16087_v9  ;;  %v25282_v9 = vand.u32 4294901760, %v16346_v55  ;;  %v16721_v55 = vand.u32 4294901760, %v81_v5  ;;  %25299 = vst [vmem:[#allocation4_spill] sm:$0xff] %v16816_v32  ;;  %v16824_v59 = vand.u32 4294901760, %v76_v23 }
  0x5b   :  { %12834 = vmatprep.subr.mxu0 %v25280_v0  ;;  %12861 = vmatprep.subr.mxu1 %v16089_v10  ;;  %v80_v10 = vld [vmem:[%s24655_s1 + $0x170] sm:$0xff]  ;;  %v16759_v19 = vsub.f32 %v97_v4, %v16719_v42  ;;  %v25303_v0 = vand.u32 4294901760, %v16558_v41  ;;  %v91_v4 = vld [vmem:[%s24655_s1 + $0x1c8] sm:$0xff] }
  0x5c   :  { %12835 = vmatpush3.msra.mxu0 %v25281_v3  ;;  %12862 = vmatpush3.msra.mxu1 %v16091_v11  ;;  %v25284_v11 = vand.u32 4294901760, %v16386_v34  ;;  %v25286_v34 = vand.u32 4294901760, %v16414_v60  ;;  %25302 = vst [vmem:[#allocation6_spill] sm:$0xff] %v16824_v59 }
  0x5d   :  { %12836 = vmatprep.subr.mxu0 %v25282_v9  ;;  %12863 = vmatprep.subr.mxu1 %v16103_v15  ;;  %v96_v15 = vld [vmem:[%s24655_s1 + $0x1f0] sm:$0xff] }
  0x5e   :  { %12837 = vmatpush3.msra.mxu0 %v25283_v8  ;;  %12864 = vmatpush3.msra.mxu1 %v16105_v16  ;;  %v16732_v16 = vand.u32 4294901760, %v80_v10  ;;  %v16743_v28 = vand.u32 4294901760, %v96_v15  ;;  %v25307_v9 = vld [vmem:[#allocation12_spill] sm:$0xff] }
  0x5f   :  { %12838 = vmatprep.subr.mxu0 %v25284_v11  ;;  %12865 = vmatprep.subr.mxu1 %v16107_v17  ;;  %v95_v17 = vld [vmem:[%s24655_s1 + $0x1e8] sm:$0xff]  ;;  %v25308_v11 = vld [vmem:[#allocation24_spill] sm:$0xff] }
  0x60   :  { %12839 = vmatpush3.msra.mxu0 %v25285_v21  ;;  %12866 = vmatpush3.msra.mxu1 %v16129_v22  ;;  %v78_v22 = vld [vmem:[%s24655_s1 + $0x160] sm:$0xff]  ;;  %v16756_v60 = vand.u32 4294901760, %v95_v17  ;;  %v16765_v62 = vsub.f32 %v80_v10, %v16732_v16 }
  0x61   :  { %12840 = vmatprep.subr.mxu0 %v25286_v34  ;;  %12867 = vmatprep.subr.mxu1 %v16135_v24  ;;  %v16754_v24 = vsub.f32 %v81_v5, %v16721_v55  ;;  %v16773_v51 = vand.u32 4294901760, %v78_v22  ;;  %v25305_v5 = vld [vmem:[#allocation23_spill] sm:$0xff]  ;;  %v90_v34 = vld [vmem:[%s24655_s1 + $0x1c0] sm:$0xff] }
  0x62   :  { %12841 = vmatpush3.msra.mxu0 %v25287_v6  ;;  %12868 = vmatpush3.msra.mxu1 %v25249_v20  ;;  %25290 = vst [vmem:[#allocation2_spill] sm:$0xff] %v16756_v60  ;;  %v94_v20 = vld [vmem:[%s24655_s1 + $0x1e0] sm:$0xff]  ;;  %v16799_v25 = vsub.f32 %v95_v17, %v16756_v60  ;;  %v24735_v63 = vand.u32 4294901760, %v16765_v62  ;;  %v16866_v17 = vand.u32 4294901760, %v75_v13 }
  0x63   :  { %12842 = vmatprep.subr.mxu0 %v25289_v30  ;;  %12869 = vmatprep.subr.mxu1 %v25251_v7  ;;  %25293 = vst [vmem:[#allocation20_spill] sm:$0xff] %v16773_v51  ;;  %v25294_v7 = vand.u32 4294901760, %v16496_v36  ;;  %v24738_v36 = vand.u32 4294901760, %v16759_v19  ;;  %v16804_v57 = vand.u32 4294901760, %v94_v20  ;;  %v16814_v43 = vsub.f32 %v78_v22, %v16773_v51  ;;  %v74_v6 = vld [vmem:[%s24655_s1 + $0x140] sm:$0xff] }
  0x64   :  { %12843 = vmatpush3.msra.mxu0 %v25291_v54  ;;  %12870 = vmatpush3.msra.mxu1 %v25252_v49  ;;  %v77_v49 = vld [vmem:[%s24655_s1 + $0x158] sm:$0xff]  ;;  %v24734_v41 = vand.u32 4294901760, %v16799_v25  ;;  %v16855_v10 = vsub.f32 %v16765_v62, %v24735_v63  ;;  %25311 = vst [vmem:[#allocation8_spill] sm:$0xff] %v16866_v17  ;;  %v16876_v30 = vsub.f32 %v93_v53, %v16816_v32 }
  0x65   :  { %12844 = vmatprep.subr.mxu0 %v25292_v33  ;;  %12871 = vmatprep.subr.mxu1 %v25253_v50  ;;  %v16788_v50 = vsub.f32 %v96_v15, %v16743_v28  ;;  %25297 = vst [vmem:[#allocation3_spill] sm:$0xff] %v16804_v57  ;;  %v16818_v40 = vand.u32 4294901760, %v77_v49  ;;  %v16858_v8 = vsub.f32 %v94_v20, %v16804_v57  ;;  %v25309_v15 = vand.u32 4294901760, %v25308_v11  ;;  %v25312_v54 = vld [vmem:[#allocation25_spill] sm:$0xff] }
  0x66   :  { %12845 = vmatpush3.msra.mxu0 %v25294_v7  ;;  %12872 = vmatpush3.msra.mxu1 %v25254_v37  ;;  %v24737_v37 = vand.u32 4294901760, %v16754_v24  ;;  %v24733_v22 = vand.u32 4294901760, %v16814_v43  ;;  %v25313_v33 = vand.u32 4294901760, %v25312_v54  ;;  %v25314_v20 = vld [vmem:[#allocation21_spill] sm:$0xff] }
  0x67   :  { %12846 = vmatprep.subr.mxu0 %v25295_v18  ;;  %12873 = vmatprep.subr.mxu1 %v25255_v2  ;;  %v92_v2 = vld [vmem:[%s24655_s1 + $0x1d0] sm:$0xff]  ;;  %25300 = vst [vmem:[#allocation5_spill] sm:$0xff] %v16818_v40  ;;  %v24736_v45 = vand.u32 4294901760, %v16788_v50  ;;  %v16864_v21 = vsub.f32 %v77_v49, %v16818_v40  ;;  %v16887_v49 = vsub.f32 %v76_v23, %v16824_v59  ;;  %v16889_v18 = vand.u32 4294901760, %v91_v4 }
  0x68   :  { %12847 = vmatpush3.msra.mxu0 %v25296_v31  ;;  %12874 = vmatpush3.msra.mxu1 %v25256_v56  ;;  %v25301_v56 = vand.u32 4294901760, %v16541_v61  ;;  %v16836_v61 = vsub.f32 %v16759_v19, %v24738_v36  ;;  %v16843_v3 = vand.u32 4294901760, %v92_v2  ;;  %v25316_v31 = vld [vmem:[#allocation14_spill] sm:$0xff]  ;;  %v16903_v23 = vsub.f32 %v16799_v25, %v24734_v41  ;;  %v71_v36 = vld [vmem:[%s24655_s1 + $0x128] sm:$0xff] }
  0x69   :  { %12848 = vmatprep.subr.mxu0 %v25298_v35  ;;  %12875 = vmatprep.subr.mxu1 %v25257_v27  ;;  %v24732_v27 = vand.u32 4294901760, %v16779_v1  ;;  %v16884_v7 = vsub.f32 %v16788_v50, %v24736_v45  ;;  %25315 = vst [vmem:[#allocation9_spill] sm:$0xff] %v16889_v18  ;;  %v25317_v35 = vld [vmem:[#allocation22_spill] sm:$0xff]  ;;  %v24739_v11 = vand.u32 4294901760, %v16858_v8  ;;  %v16930_v54 = vsub.f32 %v16814_v43, %v24733_v22  ;;  %v16944_v22 = vld [vmem:[%s24655_s1 + $0x1b0] sm:$0xff] }
  0x6a   :  { %12849 = vmatpush3.msra.mxu0 %v25301_v56  ;;  %12876 = vmatpush3.msra.mxu1 %v25258_v47  ;;  %v16841_v47 = vsub.f32 %v16754_v24, %v24737_v37  ;;  %25304 = vst [vmem:[#allocation7_spill] sm:$0xff] %v16843_v3  ;;  %v24742_v41 = vand.u32 4294901760, %v16887_v49  ;;  %v16948_v63 = vsub.f32 %v91_v4, %v16889_v18 }
  0x6b   :  { %12850 = vmatprep.subr.mxu0 %v25303_v0  ;;  %12877 = vmatprep.subr.mxu1 %v25259_v44  ;;  %v25306_v44 = vand.u32 4294901760, %v25305_v5  ;;  %v16894_v53 = vsub.f32 %v16779_v1, %v24732_v27  ;;  %v16906_v5 = vsub.f32 %v92_v2, %v16843_v3  ;;  %v73_v2 = vld [vmem:[%s24655_s1 + $0x138] sm:$0xff]  ;;  %v72_v27 = vld [vmem:[%s24655_s1 + $0x130] sm:$0xff] }
  0x6c   :  { %12878 = vmatpush3.msra.mxu1 %v25307_v9  ;;  %920 = vmatprep.mubr.f32.mxu0 %v25314_v20  ;;  %v16911_v9 = vand.u32 4294901760, %v90_v34 }
  0x6d   :  { %12851 = vmatpush3.msra.mxu0 %v25306_v44  ;;  %12879 = vmatprep.subr.mxu1 %v25310_v48  ;;  %v89_v48 = vld [vmem:[%s24655_s1 + $0x1b8] sm:$0xff]  ;;  %v24745_v37 = vand.u32 4294901760, %v16906_v5  ;;  %v70_v44 = vld [vmem:[%s24655_s1 + $0x120] sm:$0xff] }
  0x6e   :  { %12852 = vmatprep.subr.mxu0 %v25309_v15  ;;  %12880 = vmatpush3.msra.mxu1 %v25316_v31  ;;  %25318 = vst [vmem:[#allocation10_spill] sm:$0xff] %v16911_v9  ;;  %v16914_v15 = vand.u32 4294901760, %v74_v6  ;;  %v24741_v31 = vand.u32 4294901760, %v16864_v21  ;;  %v16953_v45 = vand.u32 4294901760, %v89_v48 }
  0x6f   :  { %12853 = vmatpush3.msra.mxu0 %v25313_v33  ;;  %12881 = vmatprep.subr.mxu1 %v16375_v39  ;;  %v16925_v39 = vsub.f32 %v75_v13, %v16866_v17  ;;  %v24740_v33 = vand.u32 4294901760, %v16876_v30  ;;  %v16971_v13 = vand.u32 4294901760, %v72_v27  ;;  %v17020_v56 = vsub.f32 %v16906_v5, %v24745_v37 }
  0x70   :  { %922 = vmatmul.mubr.f32.vlgmr.msra.gmra.mxu0 %v25317_v35  ;;  %12892 = vmatprep.subr.mxu0 %v16719_v42  ;;  %25319 = vst [vmem:[#allocation11_spill] sm:$0xff] %v16914_v15  ;;  %25321 = vst [vmem:[#allocation16_spill] sm:$0xff] %v16953_v45  ;;  %v16969_v4 = vsub.f32 %v74_v6, %v16914_v15  ;;  %v17025_v0 = vsub.f32 %v89_v48, %v16953_v45  ;;  %v25330_v37 = vand.u32 4294901760, %v16836_v61 }
  0x71   :  { %12882 = vmatpush3.msra.mxu1 %v25263_v26  ;;  %12893 = vmatpush3.msra.mxu0 %v16721_v55  ;;  %25320 = vst [vmem:[#allocation15_spill] sm:$0xff] %v16925_v39  ;;  %v1267_v26 = vand.u32 4294901760, %v16884_v7  ;;  %v16955_v7 = vand.u32 4294901760, %v73_v2  ;;  %25324 = vst [vmem:[#allocation23_spill] sm:$0xff] %v16971_v13  ;;  %v16985_v6 = vsub.f32 %v16876_v30, %v24740_v33  ;;  %v87_v33 = vld [vmem:[%s24655_s1 + $0x1a8] sm:$0xff] }
  0x72   :  { %12883 = vmatprep.subr.mxu1 %v25265_v12  ;;  %12894 = vmatprep.subr.mxu0 %v16743_v28  ;;  %25323 = vst [vmem:[#allocation19_spill] sm:$0xff] %v16969_v4  ;;  %v16974_v12 = vsub.f32 %v90_v34, %v16911_v9  ;;  %v16990_v34 = vsub.f32 %v16864_v21, %v24741_v31  ;;  %v17006_v31 = vand.u32 4294901760, %v71_v36 }
  0x73   :  { %12884 = vmatpush3.msra.mxu1 %v25267_v29  ;;  %12895 = vmatpush3.msra.mxu0 %v16732_v16  ;;  %25322 = vst [vmem:[#allocation17_spill] sm:$0xff] %v16955_v7  ;;  %v16966_v29 = vsub.f32 %v16858_v8, %v24739_v11  ;;  %v16993_v11 = vand.u32 4294901760, %v16944_v22  ;;  %v1288_v48 = vand.u32 4294901760, %v16985_v6  ;;  %v25333_v6 = vand.u32 4294901760, %v16948_v63 }
  0x74   :  { %12885 = vmatprep.subr.mxu1 %v25269_v14  ;;  %12896 = vmatprep.subr.mxu0 %v16756_v60  ;;  %25325 = vst [vmem:[#allocation12_spill] sm:$0xff] %v16974_v12  ;;  %25327 = vst [vmem:[#allocation13_spill] sm:$0xff] %v17006_v31  ;;  %v17022_v14 = vand.u32 4294901760, %v70_v44 }
  0x75   :  { %12886 = vmatpush3.msra.mxu1 %v16453_v38  ;;  %12897 = vmatpush3.msra.mxu0 %v16745_v46  ;;  %25326 = vst [vmem:[#allocation24_spill] sm:$0xff] %v16993_v11  ;;  %v17000_v38 = vsub.f32 %v16887_v49, %v24742_v41  ;;  %v17015_v41 = vsub.f32 %v73_v2, %v16955_v7  ;;  %v17040_v46 = vand.u32 4294901760, %v87_v33  ;;  %v25334_v2 = vand.u32 4294901760, %v16925_v39 }
  0x76   :  { %12887 = vmatprep.subr.mxu1 %v16470_v52  ;;  %12898 = vmatprep.subr.mxu0 %v16804_v57  ;;  %v86_v52 = vld [vmem:[%s24655_s1 + $0x1a0] sm:$0xff]  ;;  %25328 = vst [vmem:[#allocation25_spill] sm:$0xff] %v17022_v14  ;;  %v17060_v57 = vsub.f32 %v71_v36, %v17006_v31  ;;  %v17076_v36 = vsub.f32 %v70_v44, %v17022_v14 }
  0x77   :  { %12888 = vmatpush3.msra.mxu1 %v16492_v58  ;;  %1024 = vmatprep.mubr.f32.mxu1 %v25314_v20  ;;  %v1281_v58 = vand.u32 4294901760, %v16966_v29  ;;  %v17031_v20 = vsub.f32 %v72_v27, %v16971_v13  ;;  %25331 = vst [vmem:[#allocation14_spill] sm:$0xff] %v17040_v46  ;;  %v69_v27 = vld [vmem:[%s24655_s1 + $0x118] sm:$0xff] }
  0x78   :  { %12899 = vmatpush3.msra.mxu0 %v16773_v51  ;;  %1026 = vmatmul.mubr.f32.vlgmr.msra.gmra.mxu1 %v25317_v35  ;;  %v1176_v51 = vand.u32 4294901760, %v16990_v34  ;;  %v17042_v35 = vand.u32 4294901760, %v86_v52  ;;  %v29_v29 = vld [vmem:[%s24656_s0 + $0x18] sm:$0xff]  ;;  %v17057_v34 = vsub.f32 %v16948_v63, %v25333_v6  ;;  %v1295_v6 = vand.u32 4294901760, %v17020_v56  ;;  %25335 = vst [vmem:[#allocation22_spill] sm:$0xff] %v17076_v36 }
  0x79   :  { %25329 = vst [vmem:[#allocation21_spill] sm:$0xff] %v17031_v20  ;;  %12900 = vmatprep.subr.mxu0 %v16816_v32  ;;  %12927 = vmatprep.subr.mxu1 %v25330_v37  ;;  %v25332_v37 = vand.u32 4294901760, %v16841_v47  ;;  %v17065_v32 = vsub.f32 %v16925_v39, %v25334_v2  ;;  %v68_v47 = vld [vmem:[%s24655_s1 + $0x110] sm:$0xff]  ;;  %v85_v2 = vld [vmem:[%s24655_s1 + $0x198] sm:$0xff]  ;;  %v25337_v56 = vand.u32 4294901760, %v16974_v12  ;;  %v17099_v61 = vand.u32 4294901760, %v69_v27 }
  0x7a   :  { %12901 = vmatpush3.msra.mxu0 %v16818_v40  ;;  %v17084_v40 = vsub.f32 %v16944_v22, %v16993_v11  ;;  %v84_v22 = vld [vmem:[%s24655_s1 + $0x190] sm:$0xff]  ;;  %v1302_v60 = vand.u32 4294901760, %v17057_v34 }
  0x7b   :  { %12928 = vmatpush3.msra.mxu1 %v25332_v37  ;;  %v28_v37 = vld [vmem:[%s24656_s0 + $0x10] sm:$0xff]  ;;  %12902 = vmatprep.subr.mxu0 %v16843_v3  ;;  %v25336_v3 = vand.u32 4294901760, %v16855_v10  ;;  %v17092_v44 = vsub.f32 %v16974_v12, %v25337_v56  ;;  %v17110_v56 = vand.u32 4294901760, %v68_v47  ;;  %v25342_v12 = vand.u32 4294901760, %v16894_v53  ;;  %v67_v53 = vld [vmem:[%s24655_s1 + $0x108] sm:$0xff] }
  0x7c   :  { %12929 = vmatprep.subr.mxu1 %v1267_v26  ;;  %12903 = vmatpush3.msra.mxu0 %v16824_v59  ;;  %v25338_v26 = vand.u32 4294901760, %v16969_v4  ;;  %v17104_v59 = vand.u32 4294901760, %v29_v29 }
  0x7d   :  { %12930 = vmatpush3.msra.mxu1 %v25336_v3  ;;  %12904 = vmatprep.subr.mxu0 %v16889_v18  ;;  %v25340_v3 = vand.u32 4294901760, %v16903_v23  ;;  %v1190_v18 = vand.u32 4294901760, %v17065_v32  ;;  %v17122_v23 = vand.u32 4294901760, %v85_v2  ;;  %v83_v32 = vld [vmem:[%s24655_s1 + $0x188] sm:$0xff]  ;;  %v1309_v34 = vand.u32 4294901760, %v17092_v44 }
  0x7e   :  { %v17097_v39 = vsub.f32 %v16969_v4, %v25338_v26  ;;  %25339 = vst [vmem:[#allocation26_spill] sm:$0xff] %v17104_v59  ;;  %v17113_v26 = vsub.f32 %v87_v33, %v17040_v46  ;;  %v17115_v4 = vand.u32 4294901760, %v28_v37  ;;  %12905 = vmatpush3.msra.mxu0 %v16866_v17  ;;  %v25343_v33 = vand.u32 4294901760, %v17025_v0  ;;  %1368 = vmatprep.mubr.f32.mxu1 %v17104_v59 }
  0x7f   :  { %12931 = vmatprep.subr.mxu1 %v25340_v3  ;;  %12906 = vmatprep.subr.mxu0 %v16911_v9  ;;  %v17131_v17 = vand.u32 4294901760, %v84_v22  ;;  %v17146_v3 = vsub.f32 %v69_v27, %v17099_v61  ;;  %v17152_v9 = vsub.f32 %v29_v29, %v17104_v59  ;;  %v17159_v44 = vsub.f32 %v68_v47, %v17110_v56  ;;  %v82_v27 = vld [vmem:[%s24655_s1 + $0x180] sm:$0xff]  ;;  %v25382_v59 = vld [vmem:[#allocation23_spill] sm:$0xff] }
  0x80   :  { %25341 = vst [vmem:[#allocation27_spill] sm:$0xff] %v17115_v4  ;;  %12932 = vmatpush3.msra.mxu1 %v25342_v12  ;;  %v17129_v10 = vsub.f32 %v17025_v0, %v25343_v33  ;;  %v17138_v12 = vsub.f32 %v86_v52, %v17042_v35  ;;  %12907 = vmatpush3.msra.mxu0 %v16914_v15  ;;  %v1197_v33 = vand.u32 4294901760, %v17097_v39  ;;  %v66_v29 = vld [vmem:[%s24655_s1 + $0x100] sm:$0xff]  ;;  %v25348_v15 = vand.u32 4294901760, %v17084_v40 }
  0x81   :  { %12933 = vmatprep.subr.mxu1 %v1281_v58  ;;  %25344 = vst [vmem:[#allocation28_spill] sm:$0xff] %v17131_v17  ;;  %v25345_v58 = vand.u32 4294901760, %v16930_v54  ;;  %12908 = vmatprep.subr.mxu0 %v16953_v45  ;;  %v25346_v54 = vand.u32 4294901760, %v17015_v41  ;;  %v17179_v45 = vsub.f32 %v85_v2, %v17122_v23  ;;  %v25349_v39 = vand.u32 4294901760, %v17000_v38 }
  0x82   :  { %12909 = vmatpush3.msra.mxu0 %v16955_v7  ;;  %v17186_v7 = vand.u32 4294901760, %v67_v53  ;;  %v17192_v2 = vand.u32 4294901760, %v82_v27  ;;  %v24786_v38 = vand.u32 4294901760, %v17076_v36 }
  0x83   :  { %12934 = vmatpush3.msra.mxu1 %v25345_v58  ;;  %v1203_v52 = vsub.f32 %v17015_v41, %v25346_v54  ;;  %v17169_v58 = vsub.f32 %v28_v37, %v17115_v4  ;;  %v17175_v54 = vand.u32 4294901760, %v83_v32  ;;  %12910 = vmatprep.subr.mxu0 %v16993_v11  ;;  %v1316_v37 = vand.u32 4294901760, %v17129_v10 }
  0x84   :  { %12935 = vmatprep.subr.mxu1 %v1288_v48  ;;  %v25347_v48 = vand.u32 4294901760, %v17031_v20  ;;  %12911 = vmatpush3.msra.mxu0 %v16971_v13  ;;  %v17198_v10 = vsub.f32 %v84_v22, %v17131_v17 }
  0x85   :  { %12936 = vmatpush3.msra.mxu1 %v1176_v51  ;;  %v1322_v51 = vsub.f32 %v17084_v40, %v25348_v15  ;;  %12912 = vmatprep.subr.mxu0 %v17040_v46  ;;  %v1204_v15 = vand.u32 4294901760, %v1203_v52 }
  0x86   :  { %v1210_v47 = vsub.f32 %v17031_v20, %v25347_v48  ;;  %12937 = vmatprep.subr.mxu1 %v1295_v6  ;;  %v17194_v20 = vand.u32 4294901760, %v66_v29  ;;  %v25350_v48 = vand.u32 4294901760, %v17113_v26  ;;  %12913 = vmatpush3.msra.mxu0 %v17006_v31  ;;  %v25351_v6 = vand.u32 4294901760, %v17060_v57 }
  0x87   :  { %12938 = vmatpush3.msra.mxu1 %v25349_v39  ;;  %12914 = vmatprep.subr.mxu0 %v17042_v35  ;;  %v1323_v52 = vand.u32 4294901760, %v1322_v51  ;;  %v25352_v39 = vand.u32 4294901760, %v17138_v12 }
  0x88   :  { %12939 = vmatprep.subr.mxu1 %v1302_v60  ;;  %v1329_v13 = vsub.f32 %v17113_v26, %v25350_v48  ;;  %v1211_v11 = vand.u32 4294901760, %v1210_v47  ;;  %v1217_v22 = vsub.f32 %v17060_v57, %v25351_v6  ;;  %v17212_v60 = vsub.f32 %v83_v32, %v17175_v54  ;;  %12915 = vmatpush3.msra.mxu0 %v17022_v14 }
  0x89   :  { %12940 = vmatpush3.msra.mxu1 %v1190_v18  ;;  %v17216_v48 = vsub.f32 %v67_v53, %v17186_v7  ;;  %v1336_v18 = vsub.f32 %v17138_v12, %v25352_v39  ;;  %v17224_v6 = vsub.f32 %v66_v29, %v17194_v20  ;;  %v25354_v32 = vand.u32 4294901760, %v17152_v9  ;;  %12916 = vmatprep.subr.mxu0 %v17122_v23 }
  0x8a   :  { %12941 = vmatprep.subr.mxu1 %v1309_v34  ;;  %v17231_v53 = vsub.f32 %v82_v27, %v17192_v2  ;;  %v1330_v39 = vand.u32 4294901760, %v1329_v13  ;;  %v25356_v29 = vand.u32 4294901760, %v17169_v58  ;;  %12917 = vmatpush3.msra.mxu0 %v17099_v61  ;;  %v25357_v27 = vand.u32 4294901760, %v17179_v45 }
  0x8b   :  { %12942 = vmatpush3.msra.mxu1 %v1197_v33  ;;  %25353 = vst [vmem:[#allocation29_spill] sm:$0xff] %v17224_v6  ;;  %v1130_v34 = vsub.f32 %v17152_v9, %v25354_v32  ;;  %v1224_v33 = vsub.f32 %v17076_v36, %v24786_v38  ;;  %v1218_v32 = vand.u32 4294901760, %v1217_v22  ;;  %12918 = vmatprep.subr.mxu0 %v17131_v17  ;;  %v25358_v38 = vand.u32 4294901760, %v17146_v3 }
  0x8c   :  { %25355 = vst [vmem:[#allocation30_spill] sm:$0xff] %v17231_v53  ;;  %12943 = vmatprep.subr.mxu1 %v1316_v37  ;;  %v1136_v47 = vsub.f32 %v17169_v58, %v25356_v29  ;;  %v1343_v51 = vsub.f32 %v17179_v45, %v25357_v27  ;;  %v1337_v37 = vand.u32 4294901760, %v1336_v18  ;;  %12919 = vmatpush3.msra.mxu0 %v17110_v56  ;;  %v25359_v22 = vand.u32 4294901760, %v17198_v10 }
  0x8d   :  { %12944 = vmatpush3.msra.mxu1 %v1204_v15  ;;  %v1231_v29 = vsub.f32 %v17146_v3, %v25358_v38  ;;  %v1131_v15 = vand.u32 4294901760, %v1130_v34  ;;  %v24790_v13 = vand.u32 4294901760, %v17231_v53  ;;  %12920 = vmatprep.subr.mxu0 %v17175_v54  ;;  %v25360_v17 = vand.u32 4294901760, %v17159_v44 }
  0x8e   :  { %12945 = vmatprep.subr.mxu1 %v1323_v52  ;;  %v1350_v27 = vsub.f32 %v17198_v10, %v25359_v22  ;;  %v1225_v52 = vand.u32 4294901760, %v1224_v33  ;;  %v1137_v18 = vand.u32 4294901760, %v1136_v47  ;;  %v24789_v46 = vand.u32 4294901760, %v17224_v6  ;;  %12921 = vmatpush3.msra.mxu0 %v17186_v7 }
  0x8f   :  { %12946 = vmatpush3.msra.mxu1 %v1211_v11  ;;  %v1238_v38 = vsub.f32 %v17159_v44, %v25360_v17  ;;  %v1344_v11 = vand.u32 4294901760, %v1343_v51  ;;  %v25361_v34 = vand.u32 4294901760, %v17212_v60  ;;  %12922 = vmatprep.subr.mxu0 %v17192_v2  ;;  %v25362_v47 = vand.u32 4294901760, %v17216_v48 }
  0x90   :  { %12947 = vmatprep.subr.mxu1 %v1330_v39  ;;  %v1232_v39 = vand.u32 4294901760, %v1231_v29  ;;  %12923 = vmatpush3.msra.mxu0 %v17194_v20  ;;  %v1351_v17 = vand.u32 4294901760, %v1350_v27  ;;  %v1364_v51 = vsub.f32 %v17231_v53, %v24790_v13  ;;  %v25380_v13 = vld [vmem:[#allocation17_spill] sm:$0xff] }
  0x91   :  { %12948 = vmatpush3.msra.mxu1 %v1218_v32  ;;  %v1357_v22 = vsub.f32 %v17212_v60, %v25361_v34  ;;  %v1245_v33 = vsub.f32 %v17216_v48, %v25362_v47  ;;  %1132 = vmatprep.mubr.f32.mxu0 %v1131_v15  ;;  %v1239_v32 = vand.u32 4294901760, %v1238_v38  ;;  %v25364_v38 = vld [vmem:[#allocation15_spill] sm:$0xff]  ;;  %v25366_v34 = vld [vmem:[#allocation12_spill] sm:$0xff] }
  0x92   :  { %12949 = vmatprep.subr.mxu1 %v1337_v37  ;;  %1138 = vmatmul.mubr.f32.vlgmr.msra.gmra.mxu0 %v1137_v18  ;;  %v1252_v37 = vsub.f32 %v17224_v6, %v24789_v46  ;;  %v1365_v27 = vand.u32 4294901760, %v1364_v51  ;;  %v25363_v18 = vld [vmem:[#allocation2_spill] sm:$0xff]  ;;  %v25369_v47 = vld [vmem:[#allocation20_spill] sm:$0xff]  ;;  %v25372_v51 = vld [vmem:[#allocation7_spill] sm:$0xff] }
  0x93   :  { %12950 = vmatpush3.msra.mxu1 %v1225_v52  ;;  %12962 = vmatprep.subr.mxu0 %v16759_v19  ;;  %v1358_v29 = vand.u32 4294901760, %v1357_v22  ;;  %v1246_v15 = vand.u32 4294901760, %v1245_v33  ;;  %v25367_v22 = vld [vmem:[#allocation3_spill] sm:$0xff]  ;;  %v25370_v33 = vld [vmem:[#allocation4_spill] sm:$0xff] }
  0x94   :  { %12951 = vmatprep.subr.mxu1 %v1344_v11  ;;  %12963 = vmatpush3.msra.mxu0 %v16754_v24  ;;  %v1253_v52 = vand.u32 4294901760, %v1252_v37  ;;  %v25365_v11 = vld [vmem:[#allocation18_spill] sm:$0xff]  ;;  %v25379_v46 = vld [vmem:[#allocation16_spill] sm:$0xff] }
  0x95   :  { %12952 = vmatpush3.msra.mxu1 %v1232_v39  ;;  %12964 = vmatprep.subr.mxu0 %v16788_v50  ;;  %v25368_v39 = vld [vmem:[#allocation19_spill] sm:$0xff]  ;;  %v25374_v37 = vld [vmem:[#allocation6_spill] sm:$0xff] }
  0x96   :  { %12953 = vmatprep.subr.mxu1 %v1351_v17  ;;  %12965 = vmatpush3.msra.mxu0 %v16765_v62  ;;  %v25371_v17 = vld [vmem:[#allocation5_spill] sm:$0xff] }
  0x97   :  { %12954 = vmatpush3.msra.mxu1 %v1239_v32  ;;  %12966 = vmatprep.subr.mxu0 %v16799_v25  ;;  %v25373_v32 = vld [vmem:[#allocation21_spill] sm:$0xff] }
  0x98   :  { %12955 = vmatprep.subr.mxu1 %v1358_v29  ;;  %12967 = vmatpush3.msra.mxu0 %v16779_v1  ;;  %v25375_v29 = vld [vmem:[#allocation9_spill] sm:$0xff] }
  0x99   :  { %12956 = vmatpush3.msra.mxu1 %v1246_v15  ;;  %12968 = vmatprep.subr.mxu0 %v16858_v8  ;;  %v25376_v15 = vld [vmem:[#allocation8_spill] sm:$0xff] }
  0x9a   :  { %12957 = vmatprep.subr.mxu1 %v1365_v27  ;;  %12969 = vmatpush3.msra.mxu0 %v16814_v43  ;;  %v25377_v27 = vld [vmem:[#allocation10_spill] sm:$0xff] }
  0x9b   :  { %12958 = vmatpush3.msra.mxu1 %v1253_v52  ;;  %12970 = vmatprep.subr.mxu0 %v16876_v30  ;;  %v25378_v52 = vld [vmem:[#allocation11_spill] sm:$0xff] }
  0x9c   :  { %1370 = vmatmul.mubr.f32.vlgmr.msra.gmra.mxu1 %v17115_v4  ;;  %12997 = vmatprep.subr.mxu1 %v16719_v42  ;;  %v25381_v4 = vld [vmem:[#allocation24_spill] sm:$0xff] }
  0x9d   :  { %12971 = vmatpush3.msra.mxu0 %v16864_v21  ;;  %12998 = vmatpush3.msra.mxu1 %v16721_v55 }
  0x9e   :  { %12972 = vmatprep.subr.mxu0 %v16906_v5  ;;  %12999 = vmatprep.subr.mxu1 %v16743_v28 }
  0x9f   :  { %12973 = vmatpush3.msra.mxu0 %v16887_v49  ;;  %13000 = vmatpush3.msra.mxu1 %v16732_v16 }
  0xa0   :  { %12974 = vmatprep.subr.mxu0 %v16948_v63  ;;  %13001 = vmatprep.subr.mxu1 %v25363_v18 }
  0xa1   :  { %12975 = vmatpush3.msra.mxu0 %v25364_v38  ;;  %13002 = vmatpush3.msra.mxu1 %v25365_v11 }
  0xa2   :  { %12976 = vmatprep.subr.mxu0 %v25366_v34  ;;  %13003 = vmatprep.subr.mxu1 %v25367_v22 }
  0xa3   :  { %12977 = vmatpush3.msra.mxu0 %v25368_v39  ;;  %13004 = vmatpush3.msra.mxu1 %v25369_v47 }
  0xa4   :  { %12978 = vmatprep.subr.mxu0 %v17025_v0  ;;  %13005 = vmatprep.subr.mxu1 %v25370_v33 }
  0xa5   :  { %12979 = vmatpush3.msra.mxu0 %v17015_v41  ;;  %13006 = vmatpush3.msra.mxu1 %v25371_v17 }
  0xa6   :  { %12980 = vmatprep.subr.mxu0 %v17084_v40  ;;  %13007 = vmatprep.subr.mxu1 %v25372_v51 }
  0xa7   :  { %12981 = vmatpush3.msra.mxu0 %v25373_v32  ;;  %13008 = vmatpush3.msra.mxu1 %v25374_v37 }
  0xa8   :  { %12982 = vmatprep.subr.mxu0 %v17113_v26  ;;  %13009 = vmatprep.subr.mxu1 %v25375_v29 }
  0xa9   :  { %12983 = vmatpush3.msra.mxu0 %v17060_v57  ;;  %13010 = vmatpush3.msra.mxu1 %v25376_v15 }
  0xaa   :  { %12984 = vmatprep.subr.mxu0 %v17138_v12  ;;  %13011 = vmatprep.subr.mxu1 %v25377_v27 }
  0xab   :  { %12985 = vmatpush3.msra.mxu0 %v17076_v36  ;;  %13012 = vmatpush3.msra.mxu1 %v25378_v52  ;;  %v25383_v36 = vld [vmem:[#allocation14_spill] sm:$0xff] }
  0xac   :  { %12986 = vmatprep.subr.mxu0 %v17179_v45  ;;  %13013 = vmatprep.subr.mxu1 %v25379_v46 }
  0xad   :  { %12987 = vmatpush3.msra.mxu0 %v17146_v3  ;;  %13014 = vmatpush3.msra.mxu1 %v25380_v13 }
  0xae   :  { %12988 = vmatprep.subr.mxu0 %v17198_v10  ;;  %13015 = vmatprep.subr.mxu1 %v25381_v4 }
  0xaf   :  { %12989 = vmatpush3.msra.mxu0 %v17159_v44  ;;  %13016 = vmatpush3.msra.mxu1 %v25382_v59 }
  0xb0   :  { %12990 = vmatprep.subr.mxu0 %v17212_v60  ;;  %13017 = vmatprep.subr.mxu1 %v25383_v36  ;;  %v25384_v36 = vand.u32 4294901760, %v16759_v19  ;;  %v25389_v19 = vand.u32 4294901760, %v16799_v25  ;;  %v25394_v25 = vand.u32 4294901760, %v17169_v58 }
  0xb1   :  { %12991 = vmatpush3.msra.mxu0 %v17216_v48  ;;  %13018 = vmatpush3.msra.mxu1 %v17006_v31  ;;  %v25385_v31 = vand.u32 4294901760, %v16754_v24  ;;  %v25390_v24 = vand.u32 4294901760, %v16779_v1  ;;  %v25396_v1 = vand.u32 4294901760, %v16864_v21 }
  0xb2   :  { %12992 = vmatprep.subr.mxu0 %v17231_v53  ;;  %13019 = vmatprep.subr.mxu1 %v17042_v35  ;;  %v25386_v53 = vld [vmem:[#allocation28_spill] sm:$0xff] }
  0xb3   :  { %12993 = vmatpush3.msra.mxu0 %v17224_v6  ;;  %1505 = vmatprep.mubr.f32.mxu0 %v17152_v9  ;;  %v25387_v6 = vand.u32 4294901760, %v16788_v50  ;;  %v25391_v50 = vand.u32 4294901760, %v16858_v8  ;;  %v25397_v8 = vand.u32 4294901760, %v16906_v5  ;;  %v25403_v5 = vand.u32 4294901760, %v17025_v0 }
  0xb4   :  { %13020 = vmatpush3.msra.mxu1 %v17022_v14  ;;  %1508 = vmatmul.mubr.f32.vlgmr.msra.gmra.mxu0 %v17169_v58  ;;  %v25388_v14 = vand.u32 4294901760, %v16765_v62  ;;  %v25392_v62 = vand.u32 4294901760, %v17152_v9  ;;  %v128_v9 = vld [vmem:[%s24655_s1 + $0x2f0] sm:$0xff]  ;;  %v25405_v0 = vand.u32 4294901760, %v17084_v40  ;;  %v110_v40 = vld [vmem:[%s24655_s1 + $0x260] sm:$0xff] }
  0xb5   :  { %13021 = vmatprep.subr.mxu1 %v17122_v23  ;;  %13032 = vmatprep.subr.mxu0 %v25384_v36  ;;  %v25404_v36 = vand.u32 4294901760, %v17015_v41  ;;  %v111_v41 = vld [vmem:[%s24655_s1 + $0x268] sm:$0xff] }
  0xb6   :  { %13022 = vmatpush3.msra.mxu1 %v17099_v61  ;;  %13033 = vmatpush3.msra.mxu0 %v25385_v31  ;;  %v25393_v31 = vand.u32 4294901760, %v16814_v43  ;;  %v25398_v43 = vand.u32 4294901760, %v16887_v49  ;;  %v112_v49 = vld [vmem:[%s24655_s1 + $0x270] sm:$0xff] }
  0xb7   :  { %13023 = vmatprep.subr.mxu1 %v25386_v53  ;;  %13034 = vmatprep.subr.mxu0 %v25387_v6  ;;  %v127_v6 = vld [vmem:[%s24655_s1 + $0x2e8] sm:$0xff] }
  0xb8   :  { %13024 = vmatpush3.msra.mxu1 %v17110_v56  ;;  %13035 = vmatpush3.msra.mxu0 %v25388_v14  ;;  %v25395_v14 = vand.u32 4294901760, %v16876_v30  ;;  %v25399_v30 = vand.u32 4294901760, %v16948_v63  ;;  %v25402_v63 = vand.u32 4294901760, %v25368_v39  ;;  %v17435_v39 = vand.u32 4294901760, %v127_v6 }
  0xb9   :  { %13025 = vmatprep.subr.mxu1 %v17175_v54  ;;  %13036 = vmatprep.subr.mxu0 %v25389_v19 }
  0xba   :  { %13026 = vmatpush3.msra.mxu1 %v17186_v7  ;;  %13037 = vmatpush3.msra.mxu0 %v25390_v24  ;;  %v25414_v24 = vand.u32 4294901760, %v17179_v45  ;;  %v108_v45 = vld [vmem:[%s24655_s1 + $0x250] sm:$0xff] }
  0xbb   :  { %13027 = vmatprep.subr.mxu1 %v17192_v2  ;;  %13038 = vmatprep.subr.mxu0 %v25391_v50 }
  0xbc   :  { %13028 = vmatpush3.msra.mxu1 %v17194_v20  ;;  %1612 = vmatprep.mubr.f32.mxu1 %v25392_v62  ;;  %v17475_v62 = vsub.f32 %v127_v6, %v17435_v39 }
  0xbd   :  { %13039 = vmatpush3.msra.mxu0 %v25393_v31  ;;  %1616 = vmatmul.mubr.f32.vlgmr.msra.gmra.mxu1 %v25394_v25 }
  0xbe   :  { %13040 = vmatprep.subr.mxu0 %v25395_v14  ;;  %13067 = vmatprep.subr.mxu1 %v16719_v42  ;;  %v113_v42 = vld [vmem:[%s24655_s1 + $0x278] sm:$0xff] }
  0xbf   :  { %13041 = vmatpush3.msra.mxu0 %v25396_v1  ;;  %13068 = vmatpush3.msra.mxu1 %v16721_v55  ;;  %v25400_v55 = vand.u32 4294901760, %v25364_v38  ;;  %v17394_v21 = vand.u32 4294901760, %v113_v42  ;;  %v25406_v38 = vand.u32 4294901760, %v25373_v32 }
  0xc0   :  { %13042 = vmatprep.subr.mxu0 %v25397_v8  ;;  %13069 = vmatprep.subr.mxu1 %v16743_v28  ;;  %v25401_v28 = vand.u32 4294901760, %v25366_v34  ;;  %v17427_v34 = vand.u32 4294901760, %v128_v9 }
  0xc1   :  { %13043 = vmatpush3.msra.mxu0 %v25398_v43  ;;  %13070 = vmatpush3.msra.mxu1 %v16732_v16  ;;  %v129_v16 = vld [vmem:[%s24655_s1 + $0x2f8] sm:$0xff]  ;;  %v25420_v43 = vand.u32 4294901760, %v17159_v44 }
  0xc2   :  { %13044 = vmatprep.subr.mxu0 %v25399_v30  ;;  %13071 = vmatprep.subr.mxu1 %v25363_v18  ;;  %v17408_v58 = vand.u32 4294901760, %v129_v16  ;;  %v17416_v18 = vand.u32 4294901760, %v112_v49  ;;  %v17467_v19 = vsub.f32 %v128_v9, %v17427_v34 }
  0xc3   :  { %13045 = vmatpush3.msra.mxu0 %v25400_v55  ;;  %13072 = vmatpush3.msra.mxu1 %v25365_v11  ;;  %v17425_v11 = vsub.f32 %v113_v42, %v17394_v21  ;;  %v25421_v42 = vand.u32 4294901760, %v17212_v60  ;;  %v25422_v55 = vld [vmem:[#allocation14_spill] sm:$0xff] }
  0xc4   :  { %13046 = vmatprep.subr.mxu0 %v25401_v28  ;;  %13073 = vmatprep.subr.mxu1 %v25367_v22  ;;  %v25407_v22 = vand.u32 4294901760, %v17113_v26  ;;  %v25410_v26 = vand.u32 4294901760, %v17138_v12  ;;  %v17452_v32 = vsub.f32 %v112_v49, %v17416_v18  ;;  %v125_v12 = vld [vmem:[%s24655_s1 + $0x2d8] sm:$0xff]  ;;  %v17518_v28 = vand.u32 4294901760, %v108_v45  ;;  %v106_v60 = vld [vmem:[%s24655_s1 + $0x240] sm:$0xff] }
  0xc5   :  { %13047 = vmatpush3.msra.mxu0 %v25402_v63  ;;  %13074 = vmatpush3.msra.mxu1 %v25369_v47  ;;  %v25408_v47 = vand.u32 4294901760, %v17060_v57  ;;  %v17454_v57 = vand.u32 4294901760, %v110_v40  ;;  %v17498_v1 = vand.u32 4294901760, %v125_v12  ;;  %v25425_v49 = vand.u32 4294901760, %v17216_v48 }
  0xc6   :  { %13048 = vmatprep.subr.mxu0 %v25403_v5  ;;  %13075 = vmatprep.subr.mxu1 %v25370_v33  ;;  %v17440_v33 = vand.u32 4294901760, %v111_v41  ;;  %v24803_v8 = vand.u32 4294901760, %v17452_v32  ;;  %25424 = vst [vmem:[#allocation20_spill] sm:$0xff] %v17518_v28  ;;  %v25426_v5 = vld [vmem:[#allocation13_spill] sm:$0xff] }
  0xc7   :  { %13049 = vmatpush3.msra.mxu0 %v25404_v36  ;;  %13076 = vmatpush3.msra.mxu1 %v25371_v17  ;;  %v126_v17 = vld [vmem:[%s24655_s1 + $0x2e0] sm:$0xff]  ;;  %25411 = vst [vmem:[#allocation15_spill] sm:$0xff] %v17454_v57  ;;  %25419 = vst [vmem:[#allocation3_spill] sm:$0xff] %v17498_v1 }
  0xc8   :  { %13050 = vmatprep.subr.mxu0 %v25405_v0  ;;  %13077 = vmatprep.subr.mxu1 %v25372_v51  ;;  %25409 = vst [vmem:[#allocation2_spill] sm:$0xff] %v17440_v33  ;;  %v17446_v51 = vsub.f32 %v129_v16, %v17408_v58  ;;  %v17472_v50 = vand.u32 4294901760, %v126_v17  ;;  %v17481_v31 = vsub.f32 %v111_v41, %v17440_v33  ;;  %v24802_v16 = vand.u32 4294901760, %v17475_v62  ;;  %v25427_v0 = vld [vmem:[#allocation30_spill] sm:$0xff] }
  0xc9   :  { %13051 = vmatpush3.msra.mxu0 %v25406_v38  ;;  %13078 = vmatpush3.msra.mxu1 %v25374_v37  ;;  %v109_v37 = vld [vmem:[%s24655_s1 + $0x258] sm:$0xff]  ;;  %v25428_v41 = vand.u32 4294901760, %v25427_v0  ;;  %v17548_v48 = vsub.f32 %v17452_v32, %v24803_v8 }
  0xca   :  { %13052 = vmatprep.subr.mxu0 %v25407_v22  ;;  %13079 = vmatprep.subr.mxu1 %v25375_v29  ;;  %v25412_v29 = vld [vmem:[#allocation22_spill] sm:$0xff]  ;;  %25415 = vst [vmem:[#allocation18_spill] sm:$0xff] %v17472_v50  ;;  %v24807_v25 = vand.u32 4294901760, %v17446_v51  ;;  %v17484_v14 = vand.u32 4294901760, %v109_v37  ;;  %v17525_v63 = vsub.f32 %v126_v17, %v17472_v50  ;;  %v24801_v6 = vand.u32 4294901760, %v17481_v31  ;;  %v25430_v17 = vld [vmem:[#allocation29_spill] sm:$0xff] }
  0xcb   :  { %13053 = vmatpush3.msra.mxu0 %v25408_v47  ;;  %13080 = vmatpush3.msra.mxu1 %v25376_v15  ;;  %v25413_v15 = vand.u32 4294901760, %v25412_v29  ;;  %v17557_v47 = vsub.f32 %v125_v12, %v17498_v1  ;;  %v25436_v12 = vld [vmem:[#allocation27_spill] sm:$0xff] }
  0xcc   :  { %13054 = vmatprep.subr.mxu0 %v25410_v26  ;;  %13081 = vmatprep.subr.mxu1 %v25377_v27  ;;  %v24806_v27 = vand.u32 4294901760, %v17425_v11  ;;  %25417 = vst [vmem:[#allocation12_spill] sm:$0xff] %v17484_v14  ;;  %v17536_v9 = vsub.f32 %v17446_v51, %v24807_v25  ;;  %v17539_v36 = vsub.f32 %v109_v37, %v17484_v14  ;;  %v25431_v26 = vand.u32 4294901760, %v25430_v17  ;;  %v121_v17 = vld [vmem:[%s24655_s1 + $0x2b8] sm:$0xff] }
  0xcd   :  { %13055 = vmatpush3.msra.mxu0 %v25413_v15  ;;  %13082 = vmatpush3.msra.mxu1 %v25378_v52  ;;  %v25416_v52 = vand.u32 4294901760, %v17146_v3  ;;  %v25418_v3 = vand.u32 4294901760, %v17198_v10  ;;  %v24805_v10 = vand.u32 4294901760, %v17467_v19  ;;  %v17645_v8 = vand.u32 4294901760, %v121_v17 }
  0xce   :  { %13056 = vmatprep.subr.mxu0 %v25414_v24  ;;  %13083 = vmatprep.subr.mxu1 %v25379_v46  ;;  %v124_v46 = vld [vmem:[%s24655_s1 + $0x2d0] sm:$0xff]  ;;  %v17507_v30 = vsub.f32 %v17425_v11, %v24806_v27  ;;  %v17570_v24 = vand.u32 4294901760, %v106_v60 }
  0xcf   :  { %13057 = vmatpush3.msra.mxu0 %v25416_v52  ;;  %13084 = vmatpush3.msra.mxu1 %v25380_v13  ;;  %v17496_v13 = vsub.f32 %v110_v40, %v17454_v57  ;;  %v17516_v44 = vand.u32 4294901760, %v124_v46  ;;  %v122_v40 = vld [vmem:[%s24655_s1 + $0x2c0] sm:$0xff]  ;;  %v17566_v29 = vsub.f32 %v17467_v19, %v24805_v10  ;;  %v25435_v52 = vld [vmem:[#allocation25_spill] sm:$0xff]  ;;  %25441 = vst [vmem:[#allocation10_spill] sm:$0xff] %v17645_v8  ;;  %v103_v10 = vld [vmem:[%s24655_s1 + $0x228] sm:$0xff] }
  0xd0   :  { %13058 = vmatprep.subr.mxu0 %v25418_v3  ;;  %13085 = vmatprep.subr.mxu1 %v25381_v4  ;;  %v107_v4 = vld [vmem:[%s24655_s1 + $0x248] sm:$0xff]  ;;  %25434 = vst [vmem:[#allocation7_spill] sm:$0xff] %v17570_v24  ;;  %v17575_v3 = vsub.f32 %v108_v45, %v17518_v28  ;;  %v2122_v45 = vand.u32 4294901760, %v17536_v9  ;;  %v17597_v0 = vand.u32 4294901760, %v122_v40 }
  0xd1   :  { %13059 = vmatpush3.msra.mxu0 %v25420_v43  ;;  %13086 = vmatpush3.msra.mxu1 %v25382_v59  ;;  %25423 = vst [vmem:[#allocation19_spill] sm:$0xff] %v17516_v44  ;;  %v123_v59 = vld [vmem:[%s24655_s1 + $0x2c8] sm:$0xff]  ;;  %v17550_v38 = vand.u32 4294901760, %v107_v4  ;;  %v24800_v22 = vand.u32 4294901760, %v17496_v13  ;;  %v17580_v43 = vsub.f32 %v17475_v62, %v24802_v16 }
  0xd2   :  { %13060 = vmatprep.subr.mxu0 %v25421_v42  ;;  %13087 = vmatprep.subr.mxu1 %v25422_v55  ;;  %v17568_v15 = vand.u32 4294901760, %v123_v59  ;;  %v24804_v42 = vand.u32 4294901760, %v17525_v63  ;;  %v105_v55 = vld [vmem:[%s24655_s1 + $0x238] sm:$0xff]  ;;  %25437 = vst [vmem:[#allocation21_spill] sm:$0xff] %v17597_v0  ;;  %v17656_v27 = vsub.f32 %v122_v40, %v17597_v0  ;;  %v17697_v40 = vand.u32 4294901760, %v103_v10 }
  0xd3   :  { %13061 = vmatpush3.msra.mxu0 %v25425_v49  ;;  %13088 = vmatpush3.msra.mxu1 %v25426_v5  ;;  %25429 = vst [vmem:[#allocation4_spill] sm:$0xff] %v17550_v38  ;;  %v17587_v49 = vsub.f32 %v124_v46, %v17516_v44  ;;  %v17595_v5 = vsub.f32 %v17481_v31, %v24801_v6 }
  0xd4   :  { %13062 = vmatprep.subr.mxu0 %v25428_v41  ;;  %13089 = vmatprep.subr.mxu1 %v17042_v35  ;;  %v25432_v35 = vld [vmem:[#allocation26_spill] sm:$0xff]  ;;  %25433 = vst [vmem:[#allocation5_spill] sm:$0xff] %v17568_v15  ;;  %v24808_v41 = vand.u32 4294901760, %v17539_v36  ;;  %v17609_v9 = vsub.f32 %v17496_v13, %v24800_v22  ;;  %v104_v22 = vld [vmem:[%s24655_s1 + $0x230] sm:$0xff]  ;;  %v17627_v6 = vsub.f32 %v123_v59, %v17568_v15  ;;  %v24811_v59 = vand.u32 4294901760, %v17575_v3 }
  0xd5   :  { %13063 = vmatpush3.msra.mxu0 %v25431_v26  ;;  %1782 = vmatprep.mubr.f32.mxu0 %v25432_v35  ;;  %v24809_v26 = vand.u32 4294901760, %v17557_v47  ;;  %v24810_v16 = vand.u32 4294901760, %v17587_v49  ;;  %25442 = vst [vmem:[#allocation11_spill] sm:$0xff] %v17656_v27  ;;  %25446 = vst [vmem:[#allocation23_spill] sm:$0xff] %v17697_v40 }
  0xd6   :  { %13090 = vmatpush3.msra.mxu1 %v25435_v52  ;;  %1784 = vmatmul.mubr.f32.vlgmr.msra.gmra.mxu0 %v25436_v12  ;;  %v17621_v52 = vand.u32 4294901760, %v105_v55 }
  0xd7   :  { %13091 = vmatprep.subr.mxu1 %v17122_v23  ;;  %13102 = vmatprep.subr.mxu0 %v17408_v58  ;;  %v17604_v23 = vsub.f32 %v107_v4, %v17550_v38  ;;  %v17619_v4 = vsub.f32 %v106_v60, %v17570_v24  ;;  %v17635_v60 = vsub.f32 %v17525_v63, %v24804_v42 }
  0xd8   :  { %13092 = vmatpush3.msra.mxu1 %v17099_v61  ;;  %13103 = vmatpush3.msra.mxu0 %v17394_v21  ;;  %v2129_v61 = vand.u32 4294901760, %v17566_v29  ;;  %25440 = vst [vmem:[#allocation8_spill] sm:$0xff] %v17621_v52  ;;  %v120_v29 = vld [vmem:[%s24655_s1 + $0x2b0] sm:$0xff]  ;;  %v17650_v42 = vsub.f32 %v17539_v36, %v24808_v41  ;;  %v17664_v25 = vsub.f32 %v17557_v47, %v24809_v26  ;;  %v17666_v41 = vand.u32 4294901760, %v104_v22 }
  0xd9   :  { %25438 = vst [vmem:[#allocation6_spill] sm:$0xff] %v17604_v23  ;;  %13093 = vmatprep.subr.mxu1 %v25386_v53  ;;  %13104 = vmatprep.subr.mxu0 %v17427_v34  ;;  %25439 = vst [vmem:[#allocation9_spill] sm:$0xff] %v17619_v4  ;;  %v17680_v26 = vand.u32 4294901760, %v120_v29  ;;  %v2143_v37 = vand.u32 4294901760, %v17635_v60 }
  0xda   :  { %13094 = vmatpush3.msra.mxu1 %v17110_v56  ;;  %13105 = vmatpush3.msra.mxu0 %v17416_v18  ;;  %25443 = vst [vmem:[#allocation16_spill] sm:$0xff] %v17666_v41  ;;  %v119_v56 = vld [vmem:[%s24655_s1 + $0x2a8] sm:$0xff]  ;;  %v17713_v53 = vsub.f32 %v104_v22, %v17666_v41  ;;  %v25452_v22 = vand.u32 4294901760, %v17627_v6 }
  0xdb   :  { %13095 = vmatprep.subr.mxu1 %v17175_v54  ;;  %13106 = vmatprep.subr.mxu0 %v17435_v39  ;;  %v17678_v54 = vsub.f32 %v105_v55, %v17621_v52  ;;  %25445 = vst [vmem:[#allocation24_spill] sm:$0xff] %v17680_v26  ;;  %v17695_v55 = vsub.f32 %v17575_v3, %v24811_v59  ;;  %v17705_v60 = vand.u32 4294901760, %v119_v56  ;;  %v2150_v59 = vand.u32 4294901760, %v17664_v25 }
  0xdc   :  { %13096 = vmatpush3.msra.mxu1 %v17186_v7  ;;  %13107 = vmatpush3.msra.mxu0 %v17440_v33  ;;  %v102_v7 = vld [vmem:[%s24655_s1 + $0x220] sm:$0xff]  ;;  %v25451_v25 = vand.u32 4294901760, %v17507_v30  ;;  %v17758_v33 = vsub.f32 %v120_v29, %v17680_v26  ;;  %v100_v29 = vld [vmem:[%s24655_s1 + $0x210] sm:$0xff] }
  0xdd   :  { %13097 = vmatprep.subr.mxu1 %v17192_v2  ;;  %13108 = vmatprep.subr.mxu0 %v17472_v50  ;;  %25444 = vst [vmem:[#allocation17_spill] sm:$0xff] %v17678_v54  ;;  %v17690_v2 = vsub.f32 %v17587_v49, %v24810_v16  ;;  %25447 = vst [vmem:[#allocation28_spill] sm:$0xff] %v17705_v60  ;;  %v17708_v46 = vand.u32 4294901760, %v102_v7  ;;  %v101_v16 = vld [vmem:[%s24655_s1 + $0x218] sm:$0xff] }
  0xde   :  { %13098 = vmatpush3.msra.mxu1 %v17194_v20  ;;  %1886 = vmatprep.mubr.f32.mxu1 %v25432_v35  ;;  %v118_v20 = vld [vmem:[%s24655_s1 + $0x2a0] sm:$0xff]  ;;  %v17721_v35 = vsub.f32 %v121_v17, %v17645_v8 }
  0xdf   :  { %13109 = vmatpush3.msra.mxu0 %v17454_v57  ;;  %1888 = vmatmul.mubr.f32.vlgmr.msra.gmra.mxu1 %v25436_v12  ;;  %25448 = vst [vmem:[#allocation22_spill] sm:$0xff] %v17708_v46  ;;  %v25449_v57 = vand.u32 4294901760, %v17604_v23  ;;  %v17737_v17 = vand.u32 4294901760, %v118_v20  ;;  %v2157_v30 = vand.u32 4294901760, %v17690_v2 }
  0xe0   :  { %13110 = vmatprep.subr.mxu0 %v17498_v1  ;;  %13137 = vmatprep.subr.mxu1 %v2122_v45  ;;  %25450 = vst [vmem:[#allocation14_spill] sm:$0xff] %v17721_v35  ;;  %v31_v45 = vld [vmem:[%s24656_s0 + $0x28] sm:$0xff]  ;;  %v25453_v1 = vand.u32 4294901760, %v17619_v4 }
  0xe1   :  { %v17718_v12 = vsub.f32 %v17604_v23, %v25449_v57  ;;  %13111 = vmatpush3.msra.mxu0 %v17484_v14  ;;  %13138 = vmatpush3.msra.mxu1 %v25451_v25  ;;  %v17735_v57 = vsub.f32 %v17627_v6, %v25452_v22  ;;  %v30_v14 = vld [vmem:[%s24656_s0 + $0x20] sm:$0xff]  ;;  %v2045_v25 = vand.u32 4294901760, %v17695_v55  ;;  %v17752_v22 = vsub.f32 %v103_v10, %v17697_v40 }
  0xe2   :  { %v17742_v50 = vsub.f32 %v17619_v4, %v25453_v1  ;;  %13112 = vmatprep.subr.mxu0 %v17516_v44  ;;  %13139 = vmatprep.subr.mxu1 %v2129_v61  ;;  %v117_v1 = vld [vmem:[%s24655_s1 + $0x298] sm:$0xff]  ;;  %v25454_v4 = vand.u32 4294901760, %v17548_v48  ;;  %v25455_v61 = vand.u32 4294901760, %v17656_v27  ;;  %v17769_v10 = vsub.f32 %v102_v7, %v17708_v46  ;;  %v116_v7 = vld [vmem:[%s24655_s1 + $0x290] sm:$0xff] }
  0xe3   :  { %13113 = vmatpush3.msra.mxu0 %v17518_v28  ;;  %v17771_v55 = vand.u32 4294901760, %v101_v16  ;;  %v17776_v44 = vand.u32 4294901760, %v31_v45  ;;  %v25457_v48 = vand.u32 4294901760, %v17580_v43  ;;  %v17787_v28 = vsub.f32 %v119_v56, %v17705_v60  ;;  %v115_v56 = vld [vmem:[%s24655_s1 + $0x288] sm:$0xff] }
  0xe4   :  { %13140 = vmatpush3.msra.mxu1 %v25454_v4  ;;  %v17766_v2 = vsub.f32 %v17656_v27, %v25455_v61  ;;  %13114 = vmatprep.subr.mxu0 %v17568_v15  ;;  %v2052_v4 = vand.u32 4294901760, %v17718_v12  ;;  %v17789_v27 = vand.u32 4294901760, %v30_v14  ;;  %v25459_v15 = vand.u32 4294901760, %v17595_v5 }
  0xe5   :  { %25456 = vst [vmem:[#allocation13_spill] sm:$0xff] %v17776_v44  ;;  %13141 = vmatprep.subr.mxu1 %v25457_v48  ;;  %13115 = vmatpush3.msra.mxu0 %v17550_v38  ;;  %v2164_v43 = vand.u32 4294901760, %v17735_v57  ;;  %v2059_v12 = vand.u32 4294901760, %v17742_v50  ;;  %v17796_v48 = vand.u32 4294901760, %v117_v1  ;;  %v25460_v61 = vand.u32 4294901760, %v17678_v54  ;;  %v99_v57 = vld [vmem:[%s24655_s1 + $0x208] sm:$0xff] }
  0xe6   :  { %25458 = vst [vmem:[#allocation30_spill] sm:$0xff] %v17789_v27  ;;  %13142 = vmatpush3.msra.mxu1 %v25459_v15  ;;  %13116 = vmatprep.subr.mxu0 %v17597_v0  ;;  %v17808_v5 = vand.u32 4294901760, %v100_v29  ;;  %v25461_v38 = vand.u32 4294901760, %v17609_v9  ;;  %v17822_v15 = vsub.f32 %v101_v16, %v17771_v55  ;;  %v17824_v0 = vand.u32 4294901760, %v116_v7  ;;  %v114_v16 = vld [vmem:[%s24655_s1 + $0x280] sm:$0xff] }
  0xe7   :  { %v17801_v23 = vsub.f32 %v17678_v54, %v25460_v61  ;;  %13143 = vmatprep.subr.mxu1 %v2143_v37  ;;  %v17815_v61 = vsub.f32 %v118_v20, %v17737_v17  ;;  %13117 = vmatpush3.msra.mxu0 %v17570_v24  ;;  %v2171_v37 = vand.u32 4294901760, %v17766_v2  ;;  %v17827_v50 = vsub.f32 %v31_v45, %v17776_v44  ;;  %v98_v9 = vld [vmem:[%s24655_s1 + $0x200] sm:$0xff] }
  0xe8   :  { %13144 = vmatpush3.msra.mxu1 %v25461_v38  ;;  %25462 = vst [vmem:[#allocation29_spill] sm:$0xff] %v17824_v0  ;;  %13118 = vmatprep.subr.mxu0 %v17645_v8  ;;  %v25463_v20 = vand.u32 4294901760, %v17721_v35  ;;  %v17833_v54 = vand.u32 4294901760, %v115_v56  ;;  %v17843_v45 = vsub.f32 %v30_v14, %v17789_v27  ;;  %v17853_v8 = vsub.f32 %v117_v1, %v17796_v48 }
  0xe9   :  { %13145 = vmatprep.subr.mxu1 %v2150_v59  ;;  %13119 = vmatpush3.msra.mxu0 %v17621_v52  ;;  %v25464_v59 = vand.u32 4294901760, %v17650_v42  ;;  %v2066_v2 = vand.u32 4294901760, %v17801_v23  ;;  %v25465_v14 = vand.u32 4294901760, %v17758_v33  ;;  %v17860_v52 = vsub.f32 %v100_v29, %v17808_v5 }
  0xea   :  { %v2177_v24 = vsub.f32 %v17721_v35, %v25463_v20  ;;  %v17849_v20 = vand.u32 4294901760, %v99_v57  ;;  %13120 = vmatprep.subr.mxu0 %v17680_v26  ;;  %v25466_v42 = vand.u32 4294901760, %v17713_v53  ;;  %v17867_v1 = vand.u32 4294901760, %v114_v16  ;;  %2230 = vmatprep.mubr.f32.mxu1 %v17776_v44  ;;  %v25500_v44 = vld [vmem:[#allocation28_spill] sm:$0xff] }
  0xeb   :  { %13146 = vmatpush3.msra.mxu1 %v25464_v59  ;;  %v2184_v35 = vsub.f32 %v17758_v33, %v25465_v14  ;;  %13121 = vmatpush3.msra.mxu0 %v17666_v41  ;;  %v17869_v38 = vand.u32 4294901760, %v98_v9  ;;  %v17873_v14 = vsub.f32 %v116_v7, %v17824_v0  ;;  %v25468_v7 = vand.u32 4294901760, %v17752_v22 }
  0xec   :  { %13147 = vmatprep.subr.mxu1 %v2157_v30  ;;  %v2072_v23 = vsub.f32 %v17713_v53, %v25466_v42  ;;  %13122 = vmatprep.subr.mxu0 %v17705_v60  ;;  %v2178_v29 = vand.u32 4294901760, %v2177_v24  ;;  %v25467_v42 = vand.u32 4294901760, %v17787_v28  ;;  %v17883_v30 = vsub.f32 %v99_v57, %v17849_v20 }
  0xed   :  { %13148 = vmatpush3.msra.mxu1 %v2045_v25  ;;  %13123 = vmatpush3.msra.mxu0 %v17697_v40  ;;  %v2079_v60 = vsub.f32 %v17752_v22, %v25468_v7  ;;  %v25469_v41 = vand.u32 4294901760, %v17815_v61  ;;  %v17899_v7 = vsub.f32 %v98_v9, %v17869_v38  ;;  %v25474_v9 = vand.u32 4294901760, %v17843_v45 }
  0xee   :  { %13149 = vmatprep.subr.mxu1 %v2164_v43  ;;  %v2191_v59 = vsub.f32 %v17787_v28, %v25467_v42  ;;  %v17890_v43 = vsub.f32 %v115_v56, %v17833_v54  ;;  %13124 = vmatprep.subr.mxu0 %v17737_v17  ;;  %v2185_v42 = vand.u32 4294901760, %v2184_v35  ;;  %v2073_v25 = vand.u32 4294901760, %v2072_v23 }
  0xef   :  { %13150 = vmatpush3.msra.mxu1 %v2052_v4  ;;  %v2198_v4 = vsub.f32 %v17815_v61, %v25469_v41  ;;  %13125 = vmatpush3.msra.mxu0 %v17708_v46  ;;  %25470 = vst [vmem:[#allocation26_spill] sm:$0xff] %v17899_v7  ;;  %v25471_v56 = vand.u32 4294901760, %v17827_v50  ;;  %v17906_v35 = vsub.f32 %v114_v16, %v17867_v1  ;;  %v25473_v23 = vand.u32 4294901760, %v17769_v10 }
  0xf0   :  { %13151 = vmatprep.subr.mxu1 %v2171_v37  ;;  %13126 = vmatprep.subr.mxu0 %v17796_v48  ;;  %v2192_v41 = vand.u32 4294901760, %v2191_v59  ;;  %v1998_v57 = vsub.f32 %v17843_v45, %v25474_v9  ;;  %v25475_v16 = vand.u32 4294901760, %v17853_v8  ;;  %v24856_v46 = vand.u32 4294901760, %v17899_v7 }
  0xf1   :  { %13152 = vmatpush3.msra.mxu1 %v2059_v12  ;;  %v1992_v24 = vsub.f32 %v17827_v50, %v25471_v56  ;;  %25472 = vst [vmem:[#allocation25_spill] sm:$0xff] %v17906_v35  ;;  %v2086_v12 = vsub.f32 %v17769_v10, %v25473_v23  ;;  %13127 = vmatpush3.msra.mxu0 %v17771_v55  ;;  %v2080_v56 = vand.u32 4294901760, %v2079_v60  ;;  %v25476_v23 = vand.u32 4294901760, %v17822_v15 }
  0xf2   :  { %13153 = vmatprep.subr.mxu1 %v2178_v29  ;;  %v2205_v37 = vsub.f32 %v17853_v8, %v25475_v16  ;;  %13128 = vmatprep.subr.mxu0 %v17824_v0  ;;  %v2199_v29 = vand.u32 4294901760, %v2198_v4  ;;  %v24857_v59 = vand.u32 4294901760, %v17906_v35  ;;  %v1999_v4 = vand.u32 4294901760, %v1998_v57 }
  0xf3   :  { %13154 = vmatpush3.msra.mxu1 %v2066_v2  ;;  %v2093_v9 = vsub.f32 %v17822_v15, %v25476_v23  ;;  %13129 = vmatpush3.msra.mxu0 %v17808_v5  ;;  %v1993_v60 = vand.u32 4294901760, %v1992_v24  ;;  %v25477_v2 = vand.u32 4294901760, %v17873_v14  ;;  %v25478_v0 = vand.u32 4294901760, %v17860_v52 }
  0xf4   :  { %13155 = vmatprep.subr.mxu1 %v2185_v42  ;;  %13130 = vmatprep.subr.mxu0 %v17833_v54  ;;  %v2087_v42 = vand.u32 4294901760, %v2086_v12  ;;  %v25479_v24 = vand.u32 4294901760, %v17890_v43  ;;  %v25480_v57 = vand.u32 4294901760, %v17883_v30 }
  0xf5   :  { %13156 = vmatpush3.msra.mxu1 %v2073_v25  ;;  %v2212_v16 = vsub.f32 %v17873_v14, %v25477_v2  ;;  %v2100_v23 = vsub.f32 %v17860_v52, %v25478_v0  ;;  %13131 = vmatpush3.msra.mxu0 %v17849_v20  ;;  %v2206_v25 = vand.u32 4294901760, %v2205_v37  ;;  %v2226_v37 = vsub.f32 %v17906_v35, %v24857_v59  ;;  %v25498_v59 = vld [vmem:[#allocation8_spill] sm:$0xff] }
  0xf6   :  { %13157 = vmatprep.subr.mxu1 %v2192_v41  ;;  %v2219_v2 = vsub.f32 %v17890_v43, %v25479_v24  ;;  %13132 = vmatprep.subr.mxu0 %v17867_v1  ;;  %v2094_v41 = vand.u32 4294901760, %v2093_v9  ;;  %v2107_v12 = vsub.f32 %v17883_v30, %v25480_v57  ;;  %v25484_v24 = vld [vmem:[#allocation18_spill] sm:$0xff] }
  0xf7   :  { %13158 = vmatpush3.msra.mxu1 %v2080_v56  ;;  %13133 = vmatpush3.msra.mxu0 %v17869_v38  ;;  %v2213_v0 = vand.u32 4294901760, %v2212_v16  ;;  %v2101_v56 = vand.u32 4294901760, %v2100_v23  ;;  %v2227_v16 = vand.u32 4294901760, %v2226_v37  ;;  %v25482_v23 = vld [vmem:[#allocation2_spill] sm:$0xff]  ;;  %v25490_v37 = vld [vmem:[#allocation12_spill] sm:$0xff] }
  0xf8   :  { %13159 = vmatprep.subr.mxu1 %v2199_v29  ;;  %1994 = vmatprep.mubr.f32.mxu0 %v1993_v60  ;;  %v2114_v29 = vsub.f32 %v17899_v7, %v24856_v46  ;;  %v2220_v9 = vand.u32 4294901760, %v2219_v2  ;;  %v2108_v60 = vand.u32 4294901760, %v2107_v12  ;;  %v25485_v2 = vld [vmem:[#allocation9_spill] sm:$0xff]  ;;  %v25487_v57 = vld [vmem:[#allocation14_spill] sm:$0xff]  ;;  %v25488_v12 = vld [vmem:[#allocation3_spill] sm:$0xff] }
  0xf9   :  { %13160 = vmatpush3.msra.mxu1 %v2087_v42  ;;  %2000 = vmatmul.mubr.f32.vlgmr.msra.gmra.mxu0 %v1999_v4  ;;  %v25481_v4 = vld [vmem:[#allocation6_spill] sm:$0xff] }
  0xfa   :  { %13161 = vmatprep.subr.mxu1 %v2206_v25  ;;  %13172 = vmatprep.subr.mxu0 %v17446_v51  ;;  %v2115_v42 = vand.u32 4294901760, %v2114_v29  ;;  %v25483_v25 = vld [vmem:[#allocation11_spill] sm:$0xff]  ;;  %v25492_v29 = vld [vmem:[#allocation20_spill] sm:$0xff]  ;;  %v25497_v46 = vld [vmem:[#allocation10_spill] sm:$0xff] }
  0xfb   :  { %13162 = vmatpush3.msra.mxu1 %v2094_v41  ;;  %13173 = vmatpush3.msra.mxu0 %v17425_v11  ;;  %v25486_v41 = vld [vmem:[#allocation15_spill] sm:$0xff] }
  0xfc   :  { %13163 = vmatprep.subr.mxu1 %v2213_v0  ;;  %13174 = vmatprep.subr.mxu0 %v17467_v19  ;;  %v25489_v0 = vld [vmem:[#allocation17_spill] sm:$0xff] }
  0xfd   :  { %13164 = vmatpush3.msra.mxu1 %v2101_v56  ;;  %13175 = vmatpush3.msra.mxu0 %v17452_v32  ;;  %v25491_v56 = vld [vmem:[#allocation19_spill] sm:$0xff] }
  0xfe   :  { %13165 = vmatprep.subr.mxu1 %v2220_v9  ;;  %13176 = vmatprep.subr.mxu0 %v17475_v62  ;;  %v25493_v9 = vld [vmem:[#allocation5_spill] sm:$0xff] }
  0xff   :  { %13166 = vmatpush3.msra.mxu1 %v2108_v60  ;;  %13177 = vmatpush3.msra.mxu0 %v17481_v31  ;;  %v25494_v60 = vld [vmem:[#allocation4_spill] sm:$0xff] }
 0x100   :  { %13167 = vmatprep.subr.mxu1 %v2227_v16  ;;  %13178 = vmatprep.subr.mxu0 %v17525_v63  ;;  %v25495_v16 = vld [vmem:[#allocation21_spill] sm:$0xff] }
 0x101   :  { %13168 = vmatpush3.msra.mxu1 %v2115_v42  ;;  %13179 = vmatpush3.msra.mxu0 %v17496_v13  ;;  %v25496_v42 = vld [vmem:[#allocation7_spill] sm:$0xff] }
 0x102   :  { %2232 = vmatmul.mubr.f32.vlgmr.msra.gmra.mxu1 %v17789_v27  ;;  %13180 = vmatprep.subr.mxu0 %v17557_v47  ;;  %v25499_v27 = vld [vmem:[#allocation16_spill] sm:$0xff] }
 0x103   :  { %13207 = vmatprep.subr.mxu1 %v17408_v58  ;;  %13181 = vmatpush3.msra.mxu0 %v17539_v36 }
 0x104   :  { %13208 = vmatpush3.msra.mxu1 %v17394_v21  ;;  %13182 = vmatprep.subr.mxu0 %v17587_v49 }
 0x105   :  { %13209 = vmatprep.subr.mxu1 %v17427_v34  ;;  %13183 = vmatpush3.msra.mxu0 %v17575_v3 }
 0x106   :  { %13210 = vmatpush3.msra.mxu1 %v17416_v18  ;;  %13184 = vmatprep.subr.mxu0 %v17627_v6 }
 0x107   :  { %13211 = vmatprep.subr.mxu1 %v17435_v39  ;;  %13185 = vmatpush3.msra.mxu0 %v25481_v4 }
 0x108   :  { %13212 = vmatpush3.msra.mxu1 %v25482_v23  ;;  %13186 = vmatprep.subr.mxu0 %v25483_v25 }
 0x109   :  { %13213 = vmatprep.subr.mxu1 %v25484_v24  ;;  %13187 = vmatpush3.msra.mxu0 %v25485_v2 }
 0x10a   :  { %13214 = vmatpush3.msra.mxu1 %v25486_v41  ;;  %13188 = vmatprep.subr.mxu0 %v25487_v57 }
 0x10b   :  { %13215 = vmatprep.subr.mxu1 %v25488_v12  ;;  %13189 = vmatpush3.msra.mxu0 %v25489_v0 }
 0x10c   :  { %13216 = vmatpush3.msra.mxu1 %v25490_v37  ;;  %13190 = vmatprep.subr.mxu0 %v17758_v33 }
 0x10d   :  { %13217 = vmatprep.subr.mxu1 %v25491_v56  ;;  %13191 = vmatpush3.msra.mxu0 %v17713_v53 }
 0x10e   :  { %13218 = vmatpush3.msra.mxu1 %v25492_v29  ;;  %13192 = vmatprep.subr.mxu0 %v17787_v28 }
 0x10f   :  { %13219 = vmatprep.subr.mxu1 %v25493_v9  ;;  %13193 = vmatpush3.msra.mxu0 %v17752_v22 }
 0x110   :  { %13220 = vmatpush3.msra.mxu1 %v25494_v60  ;;  %13194 = vmatprep.subr.mxu0 %v17815_v61 }
 0x111   :  { %13221 = vmatprep.subr.mxu1 %v25495_v16  ;;  %13195 = vmatpush3.msra.mxu0 %v17769_v10 }
 0x112   :  { %13222 = vmatpush3.msra.mxu1 %v25496_v42  ;;  %13196 = vmatprep.subr.mxu0 %v17853_v8 }
 0x113   :  { %13223 = vmatprep.subr.mxu1 %v25497_v46  ;;  %13197 = vmatpush3.msra.mxu0 %v17822_v15 }
 0x114   :  { %13224 = vmatpush3.msra.mxu1 %v25498_v59  ;;  %13198 = vmatprep.subr.mxu0 %v17873_v14 }
 0x115   :  { %13225 = vmatprep.subr.mxu1 %v17680_v26  ;;  %13199 = vmatpush3.msra.mxu0 %v17860_v52  ;;  %v25501_v26 = vld [vmem:[#allocation22_spill] sm:$0xff] }
 0x116   :  { %13226 = vmatpush3.msra.mxu1 %v25499_v27  ;;  %13200 = vmatprep.subr.mxu0 %v17890_v43 }
 0x117   :  { %13227 = vmatprep.subr.mxu1 %v25500_v44  ;;  %13201 = vmatpush3.msra.mxu0 %v17883_v30  ;;  %v25502_v44 = vand.u32 4294901760, %v17446_v51  ;;  %v25507_v51 = vand.u32 4294901760, %v17475_v62  ;;  %v25512_v62 = vand.u32 4294901760, %v17843_v45 }
 0x118   :  { %13228 = vmatpush3.msra.mxu1 %v17697_v40  ;;  %13202 = vmatprep.subr.mxu0 %v17906_v35  ;;  %v25503_v40 = vand.u32 4294901760, %v17425_v11  ;;  %v25504_v35 = vld [vmem:[#allocation29_spill] sm:$0xff]  ;;  %v25508_v11 = vand.u32 4294901760, %v17481_v31  ;;  %v25514_v31 = vand.u32 4294901760, %v17539_v36  ;;  %v160_v36 = vld [vmem:[%s24655_s1 + $0x3f0] sm:$0xff] }
 0x119   :  { %13229 = vmatprep.subr.mxu1 %v17737_v17  ;;  %13203 = vmatpush3.msra.mxu0 %v17899_v7  ;;  %v25505_v7 = vand.u32 4294901760, %v17467_v19  ;;  %v25509_v19 = vand.u32 4294901760, %v17525_v63  ;;  %v25515_v63 = vand.u32 4294901760, %v17587_v49  ;;  %v25522_v49 = vand.u32 4294901760, %v25489_v0 }
 0x11a   :  { %2367 = vmatprep.mubr.f32.mxu0 %v17827_v50  ;;  %13230 = vmatpush3.msra.mxu1 %v25501_v26  ;;  %v25506_v26 = vand.u32 4294901760, %v17452_v32  ;;  %v25510_v32 = vand.u32 4294901760, %v17827_v50  ;;  %v144_v50 = vld [vmem:[%s24655_s1 + $0x370] sm:$0xff]  ;;  %v25528_v0 = vand.u32 4294901760, %v17815_v61 }
 0x11b   :  { %2370 = vmatmul.mubr.f32.vlgmr.msra.gmra.mxu0 %v17843_v45  ;;  %13231 = vmatprep.subr.mxu1 %v17796_v48  ;;  %v159_v45 = vld [vmem:[%s24655_s1 + $0x3e8] sm:$0xff] }
 0x11c   :  { %13242 = vmatprep.subr.mxu0 %v25502_v44  ;;  %13232 = vmatpush3.msra.mxu1 %v17771_v55  ;;  %v25511_v44 = vand.u32 4294901760, %v17496_v13  ;;  %v25516_v13 = vand.u32 4294901760, %v17575_v3 }
 0x11d   :  { %13243 = vmatpush3.msra.mxu0 %v25503_v40  ;;  %13233 = vmatprep.subr.mxu1 %v25504_v35 }
 0x11e   :  { %13244 = vmatprep.subr.mxu0 %v25505_v7  ;;  %13234 = vmatpush3.msra.mxu1 %v17808_v5  ;;  %v25523_v7 = vand.u32 4294901760, %v17758_v33  ;;  %v18102_v33 = vand.u32 4294901760, %v144_v50 }
 0x11f   :  { %13245 = vmatpush3.msra.mxu0 %v25506_v26  ;;  %13235 = vmatprep.subr.mxu1 %v17833_v54  ;;  %v25513_v26 = vand.u32 4294901760, %v17557_v47  ;;  %v25517_v47 = vand.u32 4294901760, %v17627_v6  ;;  %v25521_v6 = vand.u32 4294901760, %v25487_v57 }
 0x120   :  { %13246 = vmatprep.subr.mxu0 %v25507_v51  ;;  %13236 = vmatpush3.msra.mxu1 %v17849_v20  ;;  %v25533_v51 = vand.u32 4294901760, %v17853_v8 }
 0x121   :  { %13247 = vmatpush3.msra.mxu0 %v25508_v11  ;;  %13237 = vmatprep.subr.mxu1 %v17867_v1  ;;  %v156_v11 = vld [vmem:[%s24655_s1 + $0x3d0] sm:$0xff] }
 0x122   :  { %13248 = vmatprep.subr.mxu0 %v25509_v19  ;;  %13238 = vmatpush3.msra.mxu1 %v17869_v38 }
 0x123   :  { %2474 = vmatprep.mubr.f32.mxu1 %v25510_v32  ;;  %13249 = vmatpush3.msra.mxu0 %v25511_v44  ;;  %v25534_v32 = vand.u32 4294901760, %v17822_v15  ;;  %v155_v44 = vld [vmem:[%s24655_s1 + $0x3c8] sm:$0xff] }
 0x124   :  { %2478 = vmatmul.mubr.f32.vlgmr.msra.gmra.mxu1 %v25512_v62  ;;  %13250 = vmatprep.subr.mxu0 %v25513_v26  ;;  %v25536_v62 = vand.u32 4294901760, %v17873_v14  ;;  %v25537_v26 = vld [vmem:[#allocation24_spill] sm:$0xff]  ;;  %v18184_v14 = vand.u32 4294901760, %v156_v11 }
 0x125   :  { %13277 = vmatprep.subr.mxu1 %v17408_v58  ;;  %13251 = vmatpush3.msra.mxu0 %v25514_v31  ;;  %v25518_v58 = vand.u32 4294901760, %v25481_v4  ;;  %v18091_v4 = vand.u32 4294901760, %v160_v36 }
 0x126   :  { %13278 = vmatpush3.msra.mxu1 %v17394_v21  ;;  %13252 = vmatprep.subr.mxu0 %v25515_v63  ;;  %v161_v21 = vld [vmem:[%s24655_s1 + $0x3f8] sm:$0xff]  ;;  %25541 = vst [vmem:[#allocation14_spill] sm:$0xff] %v18184_v14 }
 0x127   :  { %13279 = vmatprep.subr.mxu1 %v17427_v34  ;;  %13253 = vmatpush3.msra.mxu0 %v25516_v13  ;;  %v25519_v34 = vand.u32 4294901760, %v25483_v25  ;;  %v18075_v3 = vand.u32 4294901760, %v161_v21  ;;  %v143_v25 = vld [vmem:[%s24655_s1 + $0x368] sm:$0xff]  ;;  %v25540_v13 = vand.u32 4294901760, %v17860_v52 }
 0x128   :  { %13280 = vmatpush3.msra.mxu1 %v17416_v18  ;;  %13254 = vmatprep.subr.mxu0 %v25517_v47  ;;  %v145_v18 = vld [vmem:[%s24655_s1 + $0x378] sm:$0xff] }
 0x129   :  { %13281 = vmatprep.subr.mxu1 %v17435_v39  ;;  %13255 = vmatpush3.msra.mxu0 %v25518_v58  ;;  %v25520_v39 = vand.u32 4294901760, %v25485_v2  ;;  %v18080_v40 = vand.u32 4294901760, %v145_v18  ;;  %v18104_v2 = vand.u32 4294901760, %v159_v45  ;;  %v18113_v57 = vsub.f32 %v161_v21, %v18075_v3 }
 0x12a   :  { %13282 = vmatpush3.msra.mxu1 %v25482_v23  ;;  %13256 = vmatprep.subr.mxu0 %v25519_v34  ;;  %v25524_v23 = vand.u32 4294901760, %v17713_v53  ;;  %v158_v53 = vld [vmem:[%s24655_s1 + $0x3e0] sm:$0xff]  ;;  %v25542_v21 = vand.u32 4294901760, %v17890_v43  ;;  %v25543_v34 = vld [vmem:[#allocation28_spill] sm:$0xff]  ;;  %v25545_v43 = vand.u32 4294901760, %v17883_v30 }
 0x12b   :  { %13283 = vmatprep.subr.mxu1 %v25484_v24  ;;  %13257 = vmatpush3.msra.mxu0 %v25520_v39  ;;  %v25525_v24 = vand.u32 4294901760, %v17787_v28  ;;  %25526 = vst [vmem:[#allocation27_spill] sm:$0xff] %v18104_v2  ;;  %v25527_v28 = vand.u32 4294901760, %v17752_v22  ;;  %v25530_v22 = vand.u32 4294901760, %v17769_v10  ;;  %v18149_v10 = vsub.f32 %v144_v50, %v18102_v33 }
 0x12c   :  { %13284 = vmatpush3.msra.mxu1 %v25486_v41  ;;  %13258 = vmatprep.subr.mxu0 %v25521_v6  ;;  %v142_v41 = vld [vmem:[%s24655_s1 + $0x360] sm:$0xff]  ;;  %v18156_v19 = vsub.f32 %v159_v45, %v18104_v2  ;;  %v25546_v6 = vld [vmem:[#allocation23_spill] sm:$0xff]  ;;  %v25547_v45 = vld [vmem:[#allocation25_spill] sm:$0xff] }
 0x12d   :  { %13285 = vmatprep.subr.mxu1 %v25488_v12  ;;  %13259 = vmatpush3.msra.mxu0 %v25522_v49  ;;  %v18119_v12 = vsub.f32 %v145_v18, %v18080_v40  ;;  %v18137_v61 = vand.u32 4294901760, %v142_v41  ;;  %v18198_v18 = vand.u32 4294901760, %v155_v44 }
 0x12e   :  { %13286 = vmatpush3.msra.mxu1 %v25490_v37  ;;  %13260 = vmatprep.subr.mxu0 %v25523_v7  ;;  %v18124_v37 = vand.u32 4294901760, %v143_v25  ;;  %v24867_v39 = vand.u32 4294901760, %v18156_v19  ;;  %v25548_v7 = vand.u32 4294901760, %v25547_v45 }
 0x12f   :  { %13287 = vmatprep.subr.mxu1 %v25491_v56  ;;  %13261 = vmatpush3.msra.mxu0 %v25524_v23  ;;  %v157_v56 = vld [vmem:[%s24655_s1 + $0x3d8] sm:$0xff]  ;;  %25532 = vst [vmem:[#allocation11_spill] sm:$0xff] %v18137_v61  ;;  %v18182_v47 = vsub.f32 %v142_v41, %v18137_v61  ;;  %25544 = vst [vmem:[#allocation3_spill] sm:$0xff] %v18198_v18  ;;  %v25549_v41 = vld [vmem:[#allocation26_spill] sm:$0xff] }
 0x130   :  { %13288 = vmatpush3.msra.mxu1 %v25492_v29  ;;  %13262 = vmatprep.subr.mxu0 %v25525_v24  ;;  %25529 = vst [vmem:[#allocation6_spill] sm:$0xff] %v18124_v37  ;;  %v18130_v29 = vsub.f32 %v160_v36, %v18091_v4  ;;  %v18161_v8 = vand.u32 4294901760, %v157_v56  ;;  %v18171_v31 = vsub.f32 %v143_v25, %v18124_v37  ;;  %v139_v36 = vld [vmem:[%s24655_s1 + $0x348] sm:$0xff] }
 0x131   :  { %13289 = vmatprep.subr.mxu1 %v25493_v9  ;;  %13263 = vmatpush3.msra.mxu0 %v25527_v28  ;;  %v18135_v9 = vand.u32 4294901760, %v158_v53  ;;  %v25550_v28 = vand.u32 4294901760, %v25549_v41 }
 0x132   :  { %13290 = vmatpush3.msra.mxu1 %v25494_v60  ;;  %13264 = vmatprep.subr.mxu0 %v25528_v0  ;;  %v141_v60 = vld [vmem:[%s24655_s1 + $0x358] sm:$0xff]  ;;  %25535 = vst [vmem:[#allocation18_spill] sm:$0xff] %v18161_v8  ;;  %v18213_v50 = vsub.f32 %v157_v56, %v18161_v8  ;;  %v24866_v24 = vand.u32 4294901760, %v18171_v31  ;;  %v18239_v56 = vand.u32 4294901760, %v139_v36 }
 0x133   :  { %13291 = vmatprep.subr.mxu1 %v25495_v16  ;;  %13265 = vmatpush3.msra.mxu0 %v25530_v22  ;;  %25531 = vst [vmem:[#allocation2_spill] sm:$0xff] %v18135_v9  ;;  %v140_v16 = vld [vmem:[%s24655_s1 + $0x350] sm:$0xff]  ;;  %v18173_v15 = vand.u32 4294901760, %v141_v60  ;;  %v18187_v58 = vsub.f32 %v158_v53, %v18135_v9  ;;  %v154_v53 = vld [vmem:[%s24655_s1 + $0x3c0] sm:$0xff]  ;;  %v25551_v0 = vld [vmem:[#allocation13_spill] sm:$0xff] }
 0x134   :  { %13292 = vmatpush3.msra.mxu1 %v25496_v42  ;;  %13266 = vmatprep.subr.mxu0 %v25533_v51  ;;  %v24873_v42 = vand.u32 4294901760, %v18113_v57  ;;  %v18176_v63 = vand.u32 4294901760, %v140_v16  ;;  %25552 = vst [vmem:[#allocation17_spill] sm:$0xff] %v18239_v56  ;;  %v25553_v51 = vld [vmem:[#allocation22_spill] sm:$0xff]  ;;  %v24874_v45 = vand.u32 4294901760, %v18213_v50 }
 0x135   :  { %13293 = vmatprep.subr.mxu1 %v25497_v46  ;;  %13267 = vmatpush3.msra.mxu0 %v25534_v32  ;;  %v24872_v46 = vand.u32 4294901760, %v18119_v12  ;;  %25538 = vst [vmem:[#allocation9_spill] sm:$0xff] %v18173_v15  ;;  %v18219_v23 = vsub.f32 %v141_v60, %v18173_v15  ;;  %v24868_v22 = vand.u32 4294901760, %v18187_v58  ;;  %v24871_v60 = vand.u32 4294901760, %v18182_v47  ;;  %v25554_v32 = vld [vmem:[#allocation30_spill] sm:$0xff] }
 0x136   :  { %13294 = vmatpush3.msra.mxu1 %v25498_v59  ;;  %13268 = vmatprep.subr.mxu0 %v25536_v62  ;;  %v24870_v59 = vand.u32 4294901760, %v18130_v29  ;;  %25539 = vst [vmem:[#allocation15_spill] sm:$0xff] %v18176_v63  ;;  %v18195_v52 = vsub.f32 %v18113_v57, %v24873_v42  ;;  %v18227_v25 = vsub.f32 %v140_v16, %v18176_v63  ;;  %v33_v62 = vld [vmem:[%s24656_s0 + $0x38] sm:$0xff] }
 0x137   :  { %13295 = vmatprep.subr.mxu1 %v25537_v26  ;;  %13269 = vmatpush3.msra.mxu0 %v25540_v13  ;;  %v18210_v49 = vsub.f32 %v18119_v12, %v24872_v46  ;;  %v18244_v16 = vsub.f32 %v156_v11, %v18184_v14  ;;  %v18257_v13 = vsub.f32 %v18156_v19, %v24867_v39  ;;  %v24875_v41 = vand.u32 4294901760, %v18219_v23 }
 0x138   :  { %13296 = vmatpush3.msra.mxu1 %v25499_v27  ;;  %13270 = vmatprep.subr.mxu0 %v25542_v21  ;;  %v24869_v27 = vand.u32 4294901760, %v18149_v10  ;;  %v18224_v30 = vsub.f32 %v18130_v29, %v24870_v59  ;;  %v18260_v21 = vsub.f32 %v155_v44, %v18198_v18  ;;  %v18279_v44 = vsub.f32 %v18171_v31, %v24866_v24 }
 0x139   :  { %13297 = vmatprep.subr.mxu1 %v25543_v34  ;;  %13271 = vmatpush3.msra.mxu0 %v25545_v43  ;;  %v18265_v34 = vand.u32 4294901760, %v154_v53  ;;  %v18299_v24 = vsub.f32 %v18182_v47, %v24871_v60  ;;  %v24877_v39 = vand.u32 4294901760, %v18244_v16 }
 0x13a   :  { %13298 = vmatpush3.msra.mxu1 %v25546_v6  ;;  %13272 = vmatprep.subr.mxu0 %v25548_v7  ;;  %v18252_v26 = vsub.f32 %v18149_v10, %v24869_v27  ;;  %v153_v6 = vld [vmem:[%s24655_s1 + $0x3b8] sm:$0xff]  ;;  %v24878_v59 = vand.u32 4294901760, %v18260_v21 }
 0x13b   :  { %13299 = vmatprep.subr.mxu1 %v17737_v17  ;;  %v138_v17 = vld [vmem:[%s24655_s1 + $0x340] sm:$0xff]  ;;  %13273 = vmatpush3.msra.mxu0 %v25550_v28  ;;  %25555 = vst [vmem:[#allocation12_spill] sm:$0xff] %v18265_v34  ;;  %v137_v7 = vld [vmem:[%s24655_s1 + $0x338] sm:$0xff]  ;;  %v24876_v28 = vand.u32 4294901760, %v18227_v25  ;;  %v18309_v27 = vand.u32 4294901760, %v153_v6  ;;  %v18331_v42 = vsub.f32 %v154_v53, %v18265_v34 }
 0x13c   :  { %2644 = vmatprep.mubr.f32.mxu0 %v25551_v0  ;;  %13300 = vmatpush3.msra.mxu1 %v25553_v51  ;;  %v18267_v43 = vand.u32 4294901760, %v138_v17  ;;  %v18294_v51 = vsub.f32 %v18187_v58, %v24868_v22  ;;  %v18322_v46 = vand.u32 4294901760, %v137_v7 }
 0x13d   :  { %2646 = vmatmul.mubr.f32.vlgmr.msra.gmra.mxu0 %v25554_v32  ;;  %13301 = vmatprep.subr.mxu1 %v17796_v48  ;;  %25558 = vst [vmem:[#allocation5_spill] sm:$0xff] %v18309_v27  ;;  %25561 = vst [vmem:[#allocation7_spill] sm:$0xff] %v18331_v42  ;;  %v18346_v48 = vsub.f32 %v18227_v25, %v24876_v28  ;;  %v134_v28 = vld [vmem:[%s24655_s1 + $0x320] sm:$0xff] }
 0x13e   :  { %13312 = vmatprep.subr.mxu0 %v18075_v3  ;;  %25556 = vst [vmem:[#allocation19_spill] sm:$0xff] %v18267_v43  ;;  %13302 = vmatpush3.msra.mxu1 %v17771_v55  ;;  %v18289_v55 = vsub.f32 %v139_v36, %v18239_v56  ;;  %v2879_v36 = vand.u32 4294901760, %v18252_v26  ;;  %v18315_v60 = vsub.f32 %v138_v17, %v18267_v43  ;;  %25560 = vst [vmem:[#allocation21_spill] sm:$0xff] %v18322_v46  ;;  %v152_v26 = vld [vmem:[%s24655_s1 + $0x3b0] sm:$0xff] }
 0x13f   :  { %13313 = vmatpush3.msra.mxu0 %v18080_v40  ;;  %13303 = vmatprep.subr.mxu1 %v25504_v35  ;;  %v136_v35 = vld [vmem:[%s24655_s1 + $0x330] sm:$0xff]  ;;  %v2886_v17 = vand.u32 4294901760, %v18279_v44  ;;  %v18355_v44 = vsub.f32 %v18244_v16, %v24877_v39  ;;  %v150_v39 = vld [vmem:[%s24655_s1 + $0x3a0] sm:$0xff]  ;;  %v18416_v11 = vand.u32 4294901760, %v134_v28 }
 0x140   :  { %13314 = vmatprep.subr.mxu0 %v18091_v4  ;;  %25557 = vst [vmem:[#allocation20_spill] sm:$0xff] %v18289_v55  ;;  %13304 = vmatpush3.msra.mxu1 %v17808_v5  ;;  %25559 = vst [vmem:[#allocation4_spill] sm:$0xff] %v18315_v60  ;;  %v18320_v5 = vsub.f32 %v18213_v50, %v24874_v45  ;;  %v18339_v45 = vsub.f32 %v18219_v23, %v24875_v41  ;;  %v18341_v22 = vand.u32 4294901760, %v136_v35  ;;  %v151_v41 = vld [vmem:[%s24655_s1 + $0x3a8] sm:$0xff] }
 0x141   :  { %13315 = vmatpush3.msra.mxu0 %v18102_v33  ;;  %13305 = vmatprep.subr.mxu1 %v17833_v54  ;;  %v135_v54 = vld [vmem:[%s24655_s1 + $0x328] sm:$0xff]  ;;  %25570 = vst [vmem:[#allocation28_spill] sm:$0xff] %v18416_v11 }
 0x142   :  { %13316 = vmatprep.subr.mxu0 %v18104_v2  ;;  %13306 = vmatpush3.msra.mxu1 %v17849_v20  ;;  %25562 = vst [vmem:[#allocation10_spill] sm:$0xff] %v18341_v22  ;;  %v3005_v20 = vand.u32 4294901760, %v18294_v51  ;;  %v18368_v51 = vsub.f32 %v18260_v21, %v24878_v59  ;;  %v18370_v53 = vand.u32 4294901760, %v135_v54  ;;  %v18385_v59 = vsub.f32 %v137_v7, %v18322_v46  ;;  %v133_v7 = vld [vmem:[%s24655_s1 + $0x318] sm:$0xff] }
 0x143   :  { %13317 = vmatpush3.msra.mxu0 %v18124_v37  ;;  %13307 = vmatprep.subr.mxu1 %v17867_v1  ;;  %v18363_v1 = vand.u32 4294901760, %v152_v26  ;;  %v18454_v37 = vand.u32 4294901760, %v33_v62  ;;  %v18470_v2 = vsub.f32 %v134_v28, %v18416_v11  ;;  %v147_v28 = vld [vmem:[%s24655_s1 + $0x388] sm:$0xff] }
 0x144   :  { %13318 = vmatprep.subr.mxu0 %v18135_v9  ;;  %13308 = vmatpush3.msra.mxu1 %v17869_v38  ;;  %25564 = vst [vmem:[#allocation16_spill] sm:$0xff] %v18370_v53  ;;  %v18379_v38 = vsub.f32 %v153_v6, %v18309_v27  ;;  %v25565_v9 = vand.u32 4294901760, %v18195_v52  ;;  %v2900_v6 = vand.u32 4294901760, %v18339_v45  ;;  %v3019_v52 = vand.u32 4294901760, %v18355_v44 }
 0x145   :  { %2748 = vmatprep.mubr.f32.mxu1 %v25551_v0  ;;  %25563 = vst [vmem:[#allocation8_spill] sm:$0xff] %v18363_v1  ;;  %13319 = vmatpush3.msra.mxu0 %v18137_v61  ;;  %v3012_v0 = vand.u32 4294901760, %v18320_v5  ;;  %v18394_v61 = vsub.f32 %v136_v35, %v18341_v22  ;;  %v18397_v5 = vand.u32 4294901760, %v151_v41  ;;  %v25569_v45 = vand.u32 4294901760, %v18289_v55  ;;  %25574 = vst [vmem:[#allocation23_spill] sm:$0xff] %v18454_v37 }
 0x146   :  { %2750 = vmatmul.mubr.f32.vlgmr.msra.gmra.mxu1 %v25554_v32  ;;  %13320 = vmatprep.subr.mxu0 %v18161_v8  ;;  %v18414_v32 = vand.u32 4294901760, %v150_v39  ;;  %v132_v8 = vld [vmem:[%s24655_s1 + $0x310] sm:$0xff]  ;;  %v25571_v44 = vand.u32 4294901760, %v18224_v30  ;;  %v25572_v30 = vand.u32 4294901760, %v18331_v42  ;;  %25577 = vst [vmem:[#allocation26_spill] sm:$0xff] %v18470_v2 }
 0x147   :  { %13347 = vmatprep.subr.mxu1 %v25565_v9  ;;  %25566 = vst [vmem:[#allocation29_spill] sm:$0xff] %v18394_v61  ;;  %25567 = vst [vmem:[#allocation24_spill] sm:$0xff] %v18397_v5  ;;  %13321 = vmatpush3.msra.mxu0 %v18173_v15  ;;  %v25568_v9 = vand.u32 4294901760, %v18210_v49  ;;  %v18412_v35 = vsub.f32 %v18289_v55, %v25569_v45  ;;  %v32_v49 = vld [vmem:[%s24656_s0 + $0x30] sm:$0xff]  ;;  %v18429_v45 = vsub.f32 %v135_v54, %v18370_v53  ;;  %v149_v15 = vld [vmem:[%s24655_s1 + $0x398] sm:$0xff] }
 0x148   :  { %13322 = vmatprep.subr.mxu0 %v18184_v14  ;;  %v18436_v55 = vsub.f32 %v152_v26, %v18363_v1  ;;  %v25573_v54 = vand.u32 4294901760, %v18315_v60  ;;  %v18449_v14 = vand.u32 4294901760, %v133_v7  ;;  %v148_v26 = vld [vmem:[%s24655_s1 + $0x390] sm:$0xff]  ;;  %3092 = vmatprep.mubr.f32.mxu1 %v18454_v37 }
 0x149   :  { %13348 = vmatpush3.msra.mxu1 %v25568_v9  ;;  %13323 = vmatpush3.msra.mxu0 %v18176_v63  ;;  %v18460_v63 = vand.u32 4294901760, %v132_v8 }
 0x14a   :  { %13349 = vmatprep.subr.mxu1 %v25571_v44  ;;  %v18442_v44 = vsub.f32 %v18331_v42, %v25572_v30  ;;  %v18447_v9 = vsub.f32 %v18315_v60, %v25573_v54  ;;  %13324 = vmatprep.subr.mxu0 %v18198_v18  ;;  %v18463_v54 = vsub.f32 %v151_v41, %v18397_v5  ;;  %v18465_v60 = vand.u32 4294901760, %v32_v49 }
 0x14b   :  { %13350 = vmatpush3.msra.mxu1 %v2879_v36  ;;  %v25575_v36 = vand.u32 4294901760, %v18257_v13  ;;  %13325 = vmatpush3.msra.mxu0 %v18239_v56  ;;  %v2914_v42 = vand.u32 4294901760, %v18412_v35  ;;  %v18472_v18 = vand.u32 4294901760, %v149_v15  ;;  %v25578_v41 = vand.u32 4294901760, %v18379_v38 }
 0x14c   :  { %25576 = vst [vmem:[#allocation25_spill] sm:$0xff] %v18465_v60  ;;  %13326 = vmatprep.subr.mxu0 %v18265_v34  ;;  %v18481_v30 = vand.u32 4294901760, %v148_v26  ;;  %v18488_v35 = vsub.f32 %v150_v39, %v18414_v32  ;;  %v3033_v13 = vand.u32 4294901760, %v18442_v44  ;;  %v18496_v34 = vsub.f32 %v133_v7, %v18449_v14 }
 0x14d   :  { %13351 = vmatprep.subr.mxu1 %v25575_v36  ;;  %v18479_v36 = vsub.f32 %v18379_v38, %v25578_v41  ;;  %13327 = vmatpush3.msra.mxu0 %v18267_v43  ;;  %v2921_v41 = vand.u32 4294901760, %v18447_v9  ;;  %v18502_v56 = vsub.f32 %v33_v62, %v18454_v37  ;;  %v25581_v39 = vand.u32 4294901760, %v18385_v59  ;;  %v146_v9 = vld [vmem:[%s24655_s1 + $0x380] sm:$0xff] }
 0x14e   :  { %13352 = vmatpush3.msra.mxu1 %v2886_v17  ;;  %25579 = vst [vmem:[#allocation13_spill] sm:$0xff] %v18481_v30  ;;  %v131_v17 = vld [vmem:[%s24655_s1 + $0x308] sm:$0xff]  ;;  %13328 = vmatprep.subr.mxu0 %v18309_v27  ;;  %v18509_v44 = vsub.f32 %v132_v8, %v18460_v63  ;;  %v130_v62 = vld [vmem:[%s24655_s1 + $0x300] sm:$0xff]  ;;  %v18529_v27 = vsub.f32 %v149_v15, %v18472_v18  ;;  %v25583_v43 = vand.u32 4294901760, %v18436_v55  ;;  %v25584_v7 = vand.u32 4294901760, %v18346_v48 }
 0x14f   :  { %13353 = vmatprep.subr.mxu1 %v3005_v20  ;;  %v25580_v20 = vand.u32 4294901760, %v18299_v24  ;;  %v2927_v24 = vsub.f32 %v18385_v59, %v25581_v39  ;;  %13329 = vmatpush3.msra.mxu0 %v18322_v46  ;;  %v18525_v39 = vand.u32 4294901760, %v147_v28  ;;  %v18536_v46 = vand.u32 4294901760, %v131_v17  ;;  %v25618_v37 = vld [vmem:[#allocation10_spill] sm:$0xff] }
 0x150   :  { %13330 = vmatprep.subr.mxu0 %v18363_v1  ;;  %v18542_v15 = vand.u32 4294901760, %v146_v9  ;;  %v25588_v1 = vand.u32 4294901760, %v18488_v35 }
 0x151   :  { %13354 = vmatpush3.msra.mxu1 %v25580_v20  ;;  %v18519_v20 = vsub.f32 %v32_v49, %v18465_v60  ;;  %v3040_v49 = vand.u32 4294901760, %v18479_v36  ;;  %13331 = vmatpush3.msra.mxu0 %v18341_v22  ;;  %v18548_v36 = vsub.f32 %v148_v26, %v18481_v30  ;;  %v25586_v22 = vand.u32 4294901760, %v18463_v54 }
 0x152   :  { %13355 = vmatprep.subr.mxu1 %v3012_v0  ;;  %v25582_v0 = vand.u32 4294901760, %v18394_v61  ;;  %13332 = vmatprep.subr.mxu0 %v18397_v5  ;;  %v25587_v26 = vand.u32 4294901760, %v18429_v45 }
 0x153   :  { %13356 = vmatpush3.msra.mxu1 %v2900_v6  ;;  %v3046_v6 = vsub.f32 %v18436_v55, %v25583_v43  ;;  %v25585_v43 = vand.u32 4294901760, %v18368_v51  ;;  %v3053_v48 = vsub.f32 %v18463_v54, %v25586_v22  ;;  %13333 = vmatpush3.msra.mxu0 %v18370_v53 }
 0x154   :  { %v2934_v8 = vsub.f32 %v18394_v61, %v25582_v0  ;;  %13357 = vmatprep.subr.mxu1 %v3019_v52  ;;  %v18544_v61 = vand.u32 4294901760, %v130_v62  ;;  %v2928_v0 = vand.u32 4294901760, %v2927_v24  ;;  %v2941_v5 = vsub.f32 %v18429_v45, %v25587_v26  ;;  %13334 = vmatprep.subr.mxu0 %v18414_v32 }
 0x155   :  { %13358 = vmatpush3.msra.mxu1 %v25584_v7  ;;  %v24921_v7 = vand.u32 4294901760, %v18470_v2  ;;  %v18564_v24 = vsub.f32 %v147_v28, %v18525_v39  ;;  %v3047_v22 = vand.u32 4294901760, %v3046_v6  ;;  %13335 = vmatpush3.msra.mxu0 %v18416_v11  ;;  %v25590_v28 = vand.u32 4294901760, %v18502_v56 }
 0x156   :  { %13359 = vmatprep.subr.mxu1 %v25585_v43  ;;  %v2935_v52 = vand.u32 4294901760, %v2934_v8  ;;  %v18568_v43 = vsub.f32 %v131_v17, %v18536_v46  ;;  %v18576_v26 = vsub.f32 %v130_v62, %v18544_v61  ;;  %v18583_v17 = vsub.f32 %v146_v9, %v18542_v15  ;;  %13336 = vmatprep.subr.mxu0 %v18472_v18 }
 0x157   :  { %13360 = vmatpush3.msra.mxu1 %v2914_v42  ;;  %v3060_v42 = vsub.f32 %v18488_v35, %v25588_v1  ;;  %v3054_v1 = vand.u32 4294901760, %v3053_v48  ;;  %v25592_v62 = vand.u32 4294901760, %v18519_v20  ;;  %13337 = vmatpush3.msra.mxu0 %v18449_v14  ;;  %v25593_v9 = vand.u32 4294901760, %v18529_v27 }
 0x158   :  { %13361 = vmatprep.subr.mxu1 %v3033_v13  ;;  %25589 = vst [vmem:[#allocation22_spill] sm:$0xff] %v18576_v26  ;;  %v2854_v13 = vsub.f32 %v18502_v56, %v25590_v28  ;;  %25591 = vst [vmem:[#allocation30_spill] sm:$0xff] %v18583_v17  ;;  %v2942_v28 = vand.u32 4294901760, %v2941_v5  ;;  %13338 = vmatprep.subr.mxu0 %v18481_v30  ;;  %v25596_v30 = vand.u32 4294901760, %v18509_v44  ;;  %v24924_v51 = vand.u32 4294901760, %v18576_v26 }
 0x159   :  { %13362 = vmatpush3.msra.mxu1 %v2921_v41  ;;  %v2948_v41 = vsub.f32 %v18470_v2, %v24921_v7  ;;  %v2860_v8 = vsub.f32 %v18519_v20, %v25592_v62  ;;  %v3067_v6 = vsub.f32 %v18529_v27, %v25593_v9  ;;  %v3061_v48 = vand.u32 4294901760, %v3060_v42  ;;  %13339 = vmatpush3.msra.mxu0 %v18460_v63 }
 0x15a   :  { %13363 = vmatprep.subr.mxu1 %v3040_v49  ;;  %v25594_v7 = vand.u32 4294901760, %v18496_v34  ;;  %v2855_v5 = vand.u32 4294901760, %v2854_v13  ;;  %v24925_v49 = vand.u32 4294901760, %v18583_v17  ;;  %13340 = vmatprep.subr.mxu0 %v18525_v39  ;;  %v25597_v13 = vand.u32 4294901760, %v18564_v24 }
 0x15b   :  { %13364 = vmatpush3.msra.mxu1 %v2928_v0  ;;  %v25595_v0 = vand.u32 4294901760, %v18548_v36  ;;  %v2861_v42 = vand.u32 4294901760, %v2860_v8  ;;  %13341 = vmatpush3.msra.mxu0 %v18536_v46  ;;  %v25598_v8 = vand.u32 4294901760, %v18568_v43 }
 0x15c   :  { %13365 = vmatprep.subr.mxu1 %v3047_v22  ;;  %v2955_v62 = vsub.f32 %v18496_v34, %v25594_v7  ;;  %v2949_v22 = vand.u32 4294901760, %v2948_v41  ;;  %v2962_v7 = vsub.f32 %v18509_v44, %v25596_v30  ;;  %13342 = vmatprep.subr.mxu0 %v18542_v15 }
 0x15d   :  { %13366 = vmatpush3.msra.mxu1 %v2935_v52  ;;  %v3074_v9 = vsub.f32 %v18548_v36, %v25595_v0  ;;  %v3068_v52 = vand.u32 4294901760, %v3067_v6  ;;  %v3081_v0 = vsub.f32 %v18564_v24, %v25597_v13  ;;  %v2969_v41 = vsub.f32 %v18568_v43, %v25598_v8  ;;  %13343 = vmatpush3.msra.mxu0 %v18544_v61  ;;  %v25602_v13 = vld [vmem:[#allocation7_spill] sm:$0xff] }
 0x15e   :  { %13367 = vmatprep.subr.mxu1 %v3054_v1  ;;  %v2956_v1 = vand.u32 4294901760, %v2955_v62  ;;  %2856 = vmatprep.mubr.f32.mxu0 %v2855_v5  ;;  %v3088_v6 = vsub.f32 %v18583_v17, %v24925_v49  ;;  %v25605_v8 = vld [vmem:[#allocation11_spill] sm:$0xff]  ;;  %v25616_v49 = vld [vmem:[#allocation21_spill] sm:$0xff] }
 0x15f   :  { %13368 = vmatpush3.msra.mxu1 %v2942_v28  ;;  %v3075_v30 = vand.u32 4294901760, %v3074_v9  ;;  %2862 = vmatmul.mubr.f32.vlgmr.msra.gmra.mxu0 %v2861_v42  ;;  %v2963_v28 = vand.u32 4294901760, %v2962_v7  ;;  %v3082_v62 = vand.u32 4294901760, %v3081_v0  ;;  %v2970_v5 = vand.u32 4294901760, %v2969_v41  ;;  %v25599_v42 = vld [vmem:[#allocation27_spill] sm:$0xff]  ;;  %v25600_v7 = vld [vmem:[#allocation20_spill] sm:$0xff] }
 0x160   :  { %13369 = vmatprep.subr.mxu1 %v3061_v48  ;;  %v2976_v48 = vsub.f32 %v18576_v26, %v24924_v51  ;;  %13382 = vmatprep.subr.mxu0 %v18113_v57  ;;  %v3089_v9 = vand.u32 4294901760, %v3088_v6  ;;  %v25603_v0 = vld [vmem:[#allocation2_spill] sm:$0xff]  ;;  %v25615_v51 = vld [vmem:[#allocation5_spill] sm:$0xff] }
 0x161   :  { %13370 = vmatpush3.msra.mxu1 %v2949_v22  ;;  %13383 = vmatpush3.msra.mxu0 %v18119_v12  ;;  %v25606_v41 = vld [vmem:[#allocation18_spill] sm:$0xff] }
 0x162   :  { %13371 = vmatprep.subr.mxu1 %v3068_v52  ;;  %13384 = vmatprep.subr.mxu0 %v18130_v29  ;;  %v2977_v22 = vand.u32 4294901760, %v2976_v48  ;;  %v25601_v52 = vld [vmem:[#allocation6_spill] sm:$0xff]  ;;  %v25610_v48 = vld [vmem:[#allocation15_spill] sm:$0xff] }
 0x163   :  { %13372 = vmatpush3.msra.mxu1 %v2956_v1  ;;  %13385 = vmatpush3.msra.mxu0 %v18149_v10  ;;  %v25604_v1 = vld [vmem:[#allocation4_spill] sm:$0xff]  ;;  %v25608_v6 = vld [vmem:[#allocation14_spill] sm:$0xff] }
 0x164   :  { %13373 = vmatprep.subr.mxu1 %v3075_v30  ;;  %13386 = vmatprep.subr.mxu0 %v18156_v19  ;;  %v25607_v30 = vld [vmem:[#allocation9_spill] sm:$0xff] }
 0x165   :  { %13374 = vmatpush3.msra.mxu1 %v2963_v28  ;;  %13387 = vmatpush3.msra.mxu0 %v18171_v31  ;;  %v25609_v28 = vld [vmem:[#allocation29_spill] sm:$0xff] }
 0x166   :  { %13375 = vmatprep.subr.mxu1 %v3082_v62  ;;  %13388 = vmatprep.subr.mxu0 %v18187_v58  ;;  %v25611_v62 = vld [vmem:[#allocation3_spill] sm:$0xff] }
 0x167   :  { %13376 = vmatpush3.msra.mxu1 %v2970_v5  ;;  %13389 = vmatpush3.msra.mxu0 %v18182_v47  ;;  %v25612_v5 = vld [vmem:[#allocation17_spill] sm:$0xff] }
 0x168   :  { %13377 = vmatprep.subr.mxu1 %v3089_v9  ;;  %13390 = vmatprep.subr.mxu0 %v18213_v50  ;;  %v25613_v9 = vld [vmem:[#allocation12_spill] sm:$0xff] }
 0x169   :  { %13378 = vmatpush3.msra.mxu1 %v2977_v22  ;;  %13391 = vmatpush3.msra.mxu0 %v18219_v23  ;;  %v25614_v22 = vld [vmem:[#allocation19_spill] sm:$0xff] }
 0x16a   :  { %3094 = vmatmul.mubr.f32.vlgmr.msra.gmra.mxu1 %v18465_v60  ;;  %13417 = vmatprep.subr.mxu1 %v18075_v3  ;;  %v25617_v60 = vld [vmem:[#allocation8_spill] sm:$0xff] }
 0x16b   :  { %13418 = vmatpush3.msra.mxu1 %v18080_v40  ;;  %13392 = vmatprep.subr.mxu0 %v18244_v16 }
 0x16c   :  { %13419 = vmatprep.subr.mxu1 %v18091_v4  ;;  %13393 = vmatpush3.msra.mxu0 %v18227_v25 }
 0x16d   :  { %13420 = vmatpush3.msra.mxu1 %v18102_v33  ;;  %13394 = vmatprep.subr.mxu0 %v18260_v21 }
 0x16e   :  { %13421 = vmatprep.subr.mxu1 %v25599_v42  ;;  %13395 = vmatpush3.msra.mxu0 %v25600_v7 }
 0x16f   :  { %13422 = vmatpush3.msra.mxu1 %v25601_v52  ;;  %13396 = vmatprep.subr.mxu0 %v25602_v13 }
 0x170   :  { %13423 = vmatprep.subr.mxu1 %v25603_v0  ;;  %13397 = vmatpush3.msra.mxu0 %v25604_v1 }
 0x171   :  { %13424 = vmatpush3.msra.mxu1 %v25605_v8  ;;  %13398 = vmatprep.subr.mxu0 %v18379_v38 }
 0x172   :  { %13425 = vmatprep.subr.mxu1 %v25606_v41  ;;  %13399 = vmatpush3.msra.mxu0 %v18385_v59 }
 0x173   :  { %13426 = vmatpush3.msra.mxu1 %v25607_v30  ;;  %13400 = vmatprep.subr.mxu0 %v18436_v55 }
 0x174   :  { %13427 = vmatprep.subr.mxu1 %v25608_v6  ;;  %13401 = vmatpush3.msra.mxu0 %v25609_v28 }
 0x175   :  { %13428 = vmatpush3.msra.mxu1 %v25610_v48  ;;  %13402 = vmatprep.subr.mxu0 %v18463_v54 }
 0x176   :  { %13429 = vmatprep.subr.mxu1 %v25611_v62  ;;  %13403 = vmatpush3.msra.mxu0 %v18429_v45 }
 0x177   :  { %13430 = vmatpush3.msra.mxu1 %v25612_v5  ;;  %13404 = vmatprep.subr.mxu0 %v18488_v35 }
 0x178   :  { %13431 = vmatprep.subr.mxu1 %v25613_v9  ;;  %13405 = vmatpush3.msra.mxu0 %v18470_v2  ;;  %v25619_v2 = vld [vmem:[#allocation24_spill] sm:$0xff] }
 0x179   :  { %13432 = vmatpush3.msra.mxu1 %v25614_v22  ;;  %13406 = vmatprep.subr.mxu0 %v18529_v27 }
 0x17a   :  { %13433 = vmatprep.subr.mxu1 %v25615_v51  ;;  %13407 = vmatpush3.msra.mxu0 %v18496_v34 }
 0x17b   :  { %13434 = vmatpush3.msra.mxu1 %v25616_v49  ;;  %13408 = vmatprep.subr.mxu0 %v18548_v36 }
 0x17c   :  { %13435 = vmatprep.subr.mxu1 %v25617_v60  ;;  %13409 = vmatpush3.msra.mxu0 %v18509_v44 }
 0x17d   :  { %13436 = vmatpush3.msra.mxu1 %v25618_v37  ;;  %13410 = vmatprep.subr.mxu0 %v18564_v24 }
 0x17e   :  { %13437 = vmatprep.subr.mxu1 %v25619_v2  ;;  %13411 = vmatpush3.msra.mxu0 %v18568_v43  ;;  %v25620_v2 = vand.u32 4294901760, %v18113_v57  ;;  %v25625_v57 = vand.u32 4294901760, %v18156_v19  ;;  %v25630_v19 = vand.u32 4294901760, %v18519_v20 }
 0x17f   :  { %13438 = vmatpush3.msra.mxu1 %v18370_v53  ;;  %13412 = vmatprep.subr.mxu0 %v18583_v17  ;;  %v25621_v53 = vand.u32 4294901760, %v18119_v12  ;;  %v25622_v17 = vld [vmem:[#allocation13_spill] sm:$0xff]  ;;  %v25627_v12 = vand.u32 4294901760, %v18187_v58  ;;  %v25633_v58 = vand.u32 4294901760, %v18244_v16  ;;  %v25643_v16 = vand.u32 4294901760, %v18463_v54 }
 0x180   :  { %13439 = vmatprep.subr.mxu1 %v18414_v32  ;;  %13413 = vmatpush3.msra.mxu0 %v18576_v26  ;;  %v25623_v26 = vand.u32 4294901760, %v18130_v29  ;;  %v25628_v29 = vand.u32 4294901760, %v18502_v56  ;;  %v25650_v54 = vand.u32 4294901760, %v18548_v36 }
 0x181   :  { %3229 = vmatprep.mubr.f32.mxu0 %v18502_v56  ;;  %13440 = vmatpush3.msra.mxu1 %v18416_v11  ;;  %v25624_v11 = vand.u32 4294901760, %v18149_v10  ;;  %v25629_v10 = vand.u32 4294901760, %v18182_v47  ;;  %v25634_v47 = vand.u32 4294901760, %v18227_v25  ;;  %v25641_v25 = vand.u32 4294901760, %v18436_v55  ;;  %v25646_v55 = vld [vmem:[#allocation26_spill] sm:$0xff] }
 0x182   :  { %3232 = vmatmul.mubr.f32.vlgmr.msra.gmra.mxu0 %v18519_v20  ;;  %13441 = vmatprep.subr.mxu1 %v18472_v18  ;;  %v25642_v56 = vand.u32 4294901760, %v25609_v28  ;;  %v25653_v20 = vld [vmem:[#allocation24_spill] sm:$0xff] }
 0x183   :  { %13452 = vmatprep.subr.mxu0 %v25620_v2  ;;  %13442 = vmatpush3.msra.mxu1 %v18449_v14  ;;  %v25626_v2 = vand.u32 4294901760, %v18171_v31  ;;  %v25632_v31 = vand.u32 4294901760, %v18219_v23  ;;  %v25640_v23 = vand.u32 4294901760, %v18385_v59  ;;  %v25644_v59 = vand.u32 4294901760, %v18429_v45 }
 0x184   :  { %13453 = vmatpush3.msra.mxu0 %v25621_v53  ;;  %13443 = vmatprep.subr.mxu1 %v25622_v17  ;;  %v25647_v53 = vand.u32 4294901760, %v25646_v55  ;;  %v25649_v45 = vand.u32 4294901760, %v18496_v34  ;;  %v25654_v34 = vand.u32 4294901760, %v18568_v43  ;;  %v24951_v43 = vmov 0.0   ;;  %v3624_v55 = vld [vmem:[%s24657_s3 + $0x30] sm:$0xff] }
 0x185   :  { %13454 = vmatprep.subr.mxu0 %v25623_v26  ;;  %13444 = vmatpush3.msra.mxu1 %v18460_v63  ;;  %v25656_v26 = vld [vmem:[#allocation30_spill] sm:$0xff] }
 0x186   :  { %13455 = vmatpush3.msra.mxu0 %v25624_v11  ;;  %13445 = vmatprep.subr.mxu1 %v18525_v39  ;;  %v25631_v11 = vand.u32 4294901760, %v18213_v50  ;;  %v25635_v50 = vand.u32 4294901760, %v18260_v21  ;;  %v25645_v21 = vand.u32 4294901760, %v18488_v35  ;;  %v25651_v35 = vand.u32 4294901760, %v18509_v44 }
 0x187   :  { %13456 = vmatprep.subr.mxu0 %v25625_v57  ;;  %13446 = vmatpush3.msra.mxu1 %v18536_v46  ;;  %v25657_v36 = vand.u32 4294901760, %v25656_v26  ;;  %v3622_v26 = vld [vmem:[%s24657_s3 + $0x20] sm:$0xff] }
 0x188   :  { %13457 = vmatpush3.msra.mxu0 %v25626_v2  ;;  %13447 = vmatprep.subr.mxu1 %v18542_v15 }
 0x189   :  { %13458 = vmatprep.subr.mxu0 %v25627_v12  ;;  %13448 = vmatpush3.msra.mxu1 %v18544_v61 }
 0x18a   :  { %3336 = vmatprep.mubr.f32.mxu1 %v25628_v29  ;;  %13459 = vmatpush3.msra.mxu0 %v25629_v10 }
 0x18b   :  { %3340 = vmatmul.mubr.f32.vlgmr.msra.gmra.mxu1 %v25630_v19  ;;  %13460 = vmatprep.subr.mxu0 %v25631_v11 }
 0x18c   :  { %13487 = vmatprep.subr.mxu1 %v18075_v3  ;;  %13461 = vmatpush3.msra.mxu0 %v25632_v31  ;;  %v25636_v3 = vand.u32 4294901760, %v25600_v7 }
 0x18d   :  { %13488 = vmatpush3.msra.mxu1 %v18080_v40  ;;  %13462 = vmatprep.subr.mxu0 %v25633_v58  ;;  %v25637_v40 = vand.u32 4294901760, %v25602_v13  ;;  %v3627_v13 = vld [vmem:[%s24657_s3 + $0x48] sm:$0xff] }
 0x18e   :  { %13489 = vmatprep.subr.mxu1 %v18091_v4  ;;  %13463 = vmatpush3.msra.mxu0 %v25634_v47  ;;  %v25638_v4 = vand.u32 4294901760, %v25604_v1 }
 0x18f   :  { %13490 = vmatpush3.msra.mxu1 %v18102_v33  ;;  %13464 = vmatprep.subr.mxu0 %v25635_v50  ;;  %v25639_v33 = vand.u32 4294901760, %v18379_v38  ;;  %v25648_v38 = vand.u32 4294901760, %v18529_v27  ;;  %v25652_v27 = vand.u32 4294901760, %v18564_v24  ;;  %v25662_v24 = vld [vmem:[#allocation25_spill] sm:$0xff] }
 0x190   :  { %13491 = vmatprep.subr.mxu1 %v25599_v42  ;;  %13465 = vmatpush3.msra.mxu0 %v25636_v3 }
 0x191   :  { %13492 = vmatpush3.msra.mxu1 %v25601_v52  ;;  %13466 = vmatprep.subr.mxu0 %v25637_v40  ;;  %v3628_v52 = vld [vmem:[%s24657_s3 + $0x50] sm:$0xff] }
 0x192   :  { %13493 = vmatprep.subr.mxu1 %v25603_v0  ;;  %13467 = vmatpush3.msra.mxu0 %v25638_v4  ;;  %v3626_v4 = vld [vmem:[%s24657_s3 + $0x40] sm:$0xff] }
 0x193   :  { %13494 = vmatpush3.msra.mxu1 %v25605_v8  ;;  %13468 = vmatprep.subr.mxu0 %v25639_v33  ;;  %v18841_v8 = vand.u32 4294901760, %v3628_v52 }
 0x194   :  { %13495 = vmatprep.subr.mxu1 %v25606_v41  ;;  %13469 = vmatpush3.msra.mxu0 %v25640_v23  ;;  %v18843_v41 = vand.u32 4294901760, %v3627_v13 }
 0x195   :  { %13496 = vmatpush3.msra.mxu1 %v25607_v30  ;;  %13470 = vmatprep.subr.mxu0 %v25641_v25  ;;  %v18901_v25 = vand.u32 4294901760, %v3626_v4 }
 0x196   :  { %13497 = vmatprep.subr.mxu1 %v25608_v6  ;;  %13471 = vmatpush3.msra.mxu0 %v25642_v56  ;;  %v3625_v56 = vld [vmem:[%s24657_s3 + $0x38] sm:$0xff] }
 0x197   :  { %13498 = vmatpush3.msra.mxu1 %v25610_v48  ;;  %13472 = vmatprep.subr.mxu0 %v25643_v16 }
 0x198   :  { %13499 = vmatprep.subr.mxu1 %v25611_v62  ;;  %13473 = vmatpush3.msra.mxu0 %v25644_v59  ;;  %v18910_v59 = vsub.f32 %v3626_v4, %v18901_v25  ;;  %v3618_v4 = vld [vmem:[%s24657_s3] sm:$0xff] }
 0x199   :  { %13500 = vmatpush3.msra.mxu1 %v25612_v5  ;;  %13474 = vmatprep.subr.mxu0 %v25645_v21  ;;  %v18861_v5 = vsub.f32 %v3628_v52, %v18841_v8  ;;  %v18912_v21 = vand.u32 4294901760, %v3625_v56  ;;  %v3620_v52 = vld [vmem:[%s24657_s3 + $0x10] sm:$0xff] }
 0x19a   :  { %13501 = vmatprep.subr.mxu1 %v25613_v9  ;;  %13475 = vmatpush3.msra.mxu0 %v25647_v53  ;;  %v18864_v9 = vsub.f32 %v3627_v13, %v18843_v41 }
 0x19b   :  { %13502 = vmatpush3.msra.mxu1 %v25614_v22  ;;  %13476 = vmatprep.subr.mxu0 %v25648_v38  ;;  %v24945_v10 = vand.u32 4294901760, %v18861_v5  ;;  %v24943_v38 = vand.u32 4294901760, %v18910_v59 }
 0x19c   :  { %13503 = vmatprep.subr.mxu1 %v25615_v51  ;;  %13477 = vmatpush3.msra.mxu0 %v25649_v45  ;;  %v25655_v51 = vld [vmem:[#allocation16_spill] sm:$0xff]  ;;  %v24944_v47 = vand.u32 4294901760, %v18864_v9  ;;  %v18922_v45 = vsub.f32 %v3625_v56, %v18912_v21  ;;  %v19013_v56 = vand.u32 4294901760, %v3618_v4 }
 0x19d   :  { %13504 = vmatpush3.msra.mxu1 %v25616_v49  ;;  %13478 = vmatprep.subr.mxu0 %v25650_v54  ;;  %v25660_v49 = vld [vmem:[#allocation23_spill] sm:$0xff]  ;;  %v3771_v40 = vsub.f32 %v18861_v5, %v24945_v10  ;;  %v18924_v54 = vand.u32 4294901760, %v3624_v55 }
 0x19e   :  { %13505 = vmatprep.subr.mxu1 %v25617_v60  ;;  %13479 = vmatpush3.msra.mxu0 %v25651_v35  ;;  %v25658_v60 = vld [vmem:[#allocation22_spill] sm:$0xff]  ;;  %v3778_v23 = vsub.f32 %v18864_v9, %v24944_v47  ;;  %v3623_v35 = vld [vmem:[%s24657_s3 + $0x28] sm:$0xff]  ;;  %25669 = vst [vmem:[#allocation11_spill] sm:$0xff] %v19013_v56 }
 0x19f   :  { %13506 = vmatpush3.msra.mxu1 %v25618_v37  ;;  %13480 = vmatprep.subr.mxu0 %v25652_v27  ;;  %v25659_v44 = vand.u32 4294901760, %v25658_v60  ;;  %v25661_v37 = vld [vmem:[#allocation28_spill] sm:$0xff]  ;;  %v3772_v16 = vand.u32 4294901760, %v3771_v40  ;;  %v3785_v27 = vsub.f32 %v18910_v59, %v24943_v38 }
 0x1a0   :  { %13507 = vmatprep.subr.mxu1 %v25653_v20  ;;  %13481 = vmatpush3.msra.mxu0 %v25654_v34  ;;  %v3779_v53 = vand.u32 4294901760, %v3778_v23  ;;  %v24942_v20 = vand.u32 4294901760, %v18922_v45  ;;  %v18937_v34 = vsub.f32 %v3624_v55, %v18924_v54 }
 0x1a1   :  { %13508 = vmatpush3.msra.mxu1 %v25655_v51  ;;  %13482 = vmatprep.subr.mxu0 %v25657_v36  ;;  %v18939_v51 = vand.u32 4294901760, %v3623_v35  ;;  %v3786_v36 = vand.u32 4294901760, %v3785_v27  ;;  %v19021_v27 = vsub.f32 %v3618_v4, %v19013_v56 }
 0x1a2   :  { %13509 = vmatprep.subr.mxu1 %v18414_v32  ;;  %13483 = vmatpush3.msra.mxu0 %v25659_v44  ;;  %v3792_v60 = vsub.f32 %v18922_v45, %v24942_v20  ;;  %v24941_v44 = vand.u32 4294901760, %v18937_v34 }
 0x1a3   :  { %3506 = vmatprep.mubr.f32.mxu0 %v25660_v49  ;;  %13510 = vmatpush3.msra.mxu1 %v25661_v37  ;;  %v18956_v37 = vand.u32 4294901760, %v3622_v26  ;;  %25670 = vst [vmem:[#allocation18_spill] sm:$0xff] %v19021_v27 }
 0x1a4   :  { %3508 = vmatmul.mubr.f32.vlgmr.msra.gmra.mxu0 %v25662_v24  ;;  %13511 = vmatprep.subr.mxu1 %v18472_v18  ;;  %v3633_v18 = vld [vmem:[%s24657_s3 + $0x78] sm:$0xff] }
 0x1a5   :  { %3610 = vmatprep.mubr.f32.mxu1 %v25660_v49  ;;  %13512 = vmatpush3.msra.mxu1 %v18449_v14  ;;  %v18803_v32 = vand.u32 4294901760, %v3633_v18  ;;  %v18952_v49 = vsub.f32 %v3623_v35, %v18939_v51 }
 0x1a6   :  { %13513 = vmatprep.subr.mxu1 %v25622_v17  ;;  %14338 = vmatprep.subr.mxu0 %v24951_v43 }
 0x1a7   :  { %13514 = vmatpush3.msra.mxu1 %v18460_v63  ;;  %v3632_v63 = vld [vmem:[%s24657_s3 + $0x70] sm:$0xff]  ;;  %v18809_v14 = vsub.f32 %v3633_v18, %v18803_v32  ;;  %14339 = vmatpush3.msra.mxu0 %v18803_v32  ;;  %25663 = vst [vmem:[#allocation27_spill] sm:$0xff] %v18952_v49  ;;  %v3793_v18 = vand.u32 4294901760, %v3792_v60  ;;  %v24935_v60 = vand.u32 4294901760, %v19021_v27 }
 0x1a8   :  { %13515 = vmatprep.subr.mxu1 %v18525_v39  ;;  %v3630_v39 = vld [vmem:[%s24657_s3 + $0x60] sm:$0xff]  ;;  %14340 = vmatprep.subr.mxu0 %v24951_v43 }
 0x1a9   :  { %13516 = vmatpush3.msra.mxu1 %v18536_v46  ;;  %v18811_v46 = vand.u32 4294901760, %v3632_v63  ;;  %v18825_v42 = vand.u32 4294901760, %v3630_v39  ;;  %v24950_v0 = vand.u32 4294901760, %v18809_v14  ;;  %14370 = vmatprep.mubr.msk.f32.mxu0 %vm16022_vm0, %v24951_v43 }
 0x1aa   :  { %13517 = vmatprep.subr.mxu1 %v18542_v15  ;;  %v3629_v15 = vld [vmem:[%s24657_s3 + $0x58] sm:$0xff] }
 0x1ab   :  { %13518 = vmatpush3.msra.mxu1 %v18544_v61  ;;  %v3631_v61 = vld [vmem:[%s24657_s3 + $0x68] sm:$0xff]  ;;  %v18828_v7 = vand.u32 4294901760, %v3629_v15  ;;  %v18838_v1 = vsub.f32 %v3632_v63, %v18811_v46  ;;  %v18849_v6 = vsub.f32 %v3630_v39, %v18825_v42  ;;  %v3736_v48 = vsub.f32 %v18809_v14, %v24950_v0  ;;  %14341 = vmatpush3.msra.mxu0 %v18811_v46 }
 0x1ac   :  { %3612 = vmatmul.mubr.f32.vlgmr.msra.gmra.mxu1 %v25662_v24  ;;  %14373 = vmatprep.subr.mxu1 %v24951_v43  ;;  %v18823_v17 = vand.u32 4294901760, %v3631_v61  ;;  %v3621_v24 = vld [vmem:[%s24657_s3 + $0x18] sm:$0xff]  ;;  %v3799_v63 = vsub.f32 %v18937_v34, %v24941_v44 }
 0x1ad   :  { %v18852_v28 = vsub.f32 %v3629_v15, %v18828_v7  ;;  %v24949_v62 = vand.u32 4294901760, %v18838_v1  ;;  %v24947_v57 = vand.u32 4294901760, %v18849_v6  ;;  %14342 = vmatprep.subr.mxu0 %v24951_v43  ;;  %v3737_v12 = vand.u32 4294901760, %v3736_v48  ;;  %14405 = vmatprep.mubr.msk.f32.mxu1 %vm16022_vm0, %v24951_v43 }
 0x1ae   :  { %v18846_v30 = vsub.f32 %v3631_v61, %v18823_v17  ;;  %14343 = vmatpush3.msra.mxu0 %v18823_v17  ;;  %v24940_v61 = vand.u32 4294901760, %v18952_v49  ;;  %v18966_v39 = vand.u32 4294901760, %v3621_v24  ;;  %v18971_v15 = vsub.f32 %v3622_v26, %v18956_v37 }
 0x1af   :  { %v24946_v2 = vand.u32 4294901760, %v18852_v28  ;;  %v3743_v29 = vsub.f32 %v18838_v1, %v24949_v62  ;;  %v3757_v11 = vsub.f32 %v18849_v6, %v24947_v57  ;;  %14344 = vmatprep.subr.mxu0 %v24951_v43  ;;  %14374 = vmatpush3.msra.mxu1 %v3737_v12  ;;  %v3800_v13 = vand.u32 4294901760, %v3799_v63 }
 0x1b0   :  { %v24948_v22 = vand.u32 4294901760, %v18846_v30  ;;  %14345 = vmatpush3.msra.mxu0 %v18825_v42  ;;  %14375 = vmatprep.subr.mxu1 %v24951_v43  ;;  %25664 = vst [vmem:[#allocation20_spill] sm:$0xff] %v18971_v15  ;;  %v3806_v48 = vsub.f32 %v18952_v49, %v24940_v61  ;;  %v18981_v12 = vsub.f32 %v3621_v24, %v18966_v39 }
 0x1b1   :  { %v3744_v31 = vand.u32 4294901760, %v3743_v29  ;;  %v3764_v58 = vsub.f32 %v18852_v28, %v24946_v2  ;;  %14346 = vmatprep.subr.mxu0 %v24951_v43  ;;  %v3758_v3 = vand.u32 4294901760, %v3757_v11  ;;  %v24939_v29 = vand.u32 4294901760, %v18971_v15  ;;  %v3619_v11 = vld [vmem:[%s24657_s3 + $0x8] sm:$0xff] }
 0x1b2   :  { %v3750_v19 = vsub.f32 %v18846_v30, %v24948_v22  ;;  %14347 = vmatpush3.msra.mxu0 %v18828_v7  ;;  %25665 = vst [vmem:[#allocation6_spill] sm:$0xff] %v18981_v12  ;;  %v3841_v63 = vsub.f32 %v19021_v27, %v24935_v60 }
 0x1b3   :  { %14376 = vmatpush3.msra.mxu1 %v3744_v31  ;;  %14348 = vmatprep.subr.mxu0 %v24951_v43  ;;  %v3765_v33 = vand.u32 4294901760, %v3764_v58  ;;  %v3807_v31 = vand.u32 4294901760, %v3806_v48  ;;  %v24938_v58 = vand.u32 4294901760, %v18981_v12 }
 0x1b4   :  { %v3751_v50 = vand.u32 4294901760, %v3750_v19  ;;  %14377 = vmatprep.subr.mxu1 %v24951_v43  ;;  %14349 = vmatpush3.msra.mxu0 %v18841_v8  ;;  %v18986_v19 = vand.u32 4294901760, %v3620_v52 }
 0x1b5   :  { %14350 = vmatprep.subr.mxu0 %v24951_v43 }
 0x1b6   :  { %14378 = vmatpush3.msra.mxu1 %v3751_v50  ;;  %14351 = vmatpush3.msra.mxu0 %v18843_v41  ;;  %v18993_v50 = vand.u32 4294901760, %v3619_v11  ;;  %v19001_v40 = vsub.f32 %v3620_v52, %v18986_v19  ;;  %v3842_v52 = vand.u32 4294901760, %v3841_v63 }
 0x1b7   :  { %14379 = vmatprep.subr.mxu1 %v24951_v43  ;;  %14352 = vmatprep.subr.mxu0 %v24951_v43 }
 0x1b8   :  { %14380 = vmatpush3.msra.mxu1 %v3758_v3  ;;  %14353 = vmatpush3.msra.mxu0 %v18901_v25  ;;  %25666 = vst [vmem:[#allocation7_spill] sm:$0xff] %v18993_v50  ;;  %v3813_v3 = vsub.f32 %v18971_v15, %v24939_v29  ;;  %25667 = vst [vmem:[#allocation2_spill] sm:$0xff] %v19001_v40  ;;  %v19011_v23 = vsub.f32 %v3619_v11, %v18993_v50  ;;  %v24937_v55 = vand.u32 4294901760, %v19001_v40  ;;  %v12749_v11 = vpop.f32.mrf.mxu1 }
 0x1b9   :  { %14381 = vmatprep.subr.mxu1 %v24951_v43  ;;  %14354 = vmatprep.subr.mxu0 %v24951_v43 }
 0x1ba   :  { %14382 = vmatpush3.msra.mxu1 %v3765_v33  ;;  %14355 = vmatpush3.msra.mxu0 %v18912_v21  ;;  %v3820_v33 = vsub.f32 %v18981_v12, %v24938_v58  ;;  %25668 = vst [vmem:[#allocation4_spill] sm:$0xff] %v19011_v23  ;;  %v24936_v35 = vand.u32 4294901760, %v19011_v23  ;;  %v3827_v26 = vsub.f32 %v19001_v40, %v24937_v55  ;;  %v12554_v58 = vld [vmem:[%s24658_s2] ss:$0 sm:$0xff] }
 0x1bb   :  { %14383 = vmatprep.subr.mxu1 %v24951_v43  ;;  %14356 = vmatprep.subr.mxu0 %v24951_v43 }
 0x1bc   :  { %14384 = vmatpush3.msra.mxu1 %v3772_v16  ;;  %14357 = vmatpush3.msra.mxu0 %v18924_v54  ;;  %v3814_v16 = vand.u32 4294901760, %v3813_v3  ;;  %v3828_v24 = vand.u32 4294901760, %v3827_v26  ;;  %v12750_v3 = vpop.f32.mrf.mxu1 }
 0x1bd   :  { %14385 = vmatprep.subr.mxu1 %v24951_v43  ;;  %14358 = vmatprep.subr.mxu0 %v24951_v43  ;;  %v12751_v38 = vadd.f32 %v12750_v3, %v12749_v11 }
 0x1be   :  { %14386 = vmatpush3.msra.mxu1 %v3779_v53  ;;  %14359 = vmatpush3.msra.mxu0 %v18939_v51  ;;  %v3821_v53 = vand.u32 4294901760, %v3820_v33  ;;  %v12819_v33 = vpop.f32.mrf.mxu1 }
 0x1bf   :  { %14387 = vmatprep.subr.mxu1 %v24951_v43  ;;  %14360 = vmatprep.subr.mxu0 %v24951_v43 }
 0x1c0   :  { %14388 = vmatpush3.msra.mxu1 %v3786_v36  ;;  %14361 = vmatpush3.msra.mxu0 %v18956_v37  ;;  %v3834_v36 = vsub.f32 %v19011_v23, %v24936_v35 }
 0x1c1   :  { %14389 = vmatprep.subr.mxu1 %v24951_v43  ;;  %14362 = vmatprep.subr.mxu0 %v24951_v43 }
 0x1c2   :  { %14390 = vmatpush3.msra.mxu1 %v3793_v18  ;;  %14363 = vmatpush3.msra.mxu0 %v18966_v39  ;;  %v3835_v18 = vand.u32 4294901760, %v3834_v36 }
 0x1c3   :  { %14391 = vmatprep.subr.mxu1 %v24951_v43  ;;  %14364 = vmatprep.subr.mxu0 %v24951_v43 }
 0x1c4   :  { %14392 = vmatpush3.msra.mxu1 %v3800_v13  ;;  %14365 = vmatpush3.msra.mxu0 %v18986_v19  ;;  %v12714_v13 = vpop.f32.mrf.mxu0 }
 0x1c5   :  { %14393 = vmatprep.subr.mxu1 %v24951_v43  ;;  %14366 = vmatprep.subr.mxu0 %v24951_v43 }
 0x1c6   :  { %14394 = vmatpush3.msra.mxu1 %v3807_v31  ;;  %14367 = vmatpush3.msra.mxu0 %v18993_v50  ;;  %v12715_v48 = vpop.f32.mrf.mxu0 }
 0x1c7   :  { %14395 = vmatprep.subr.mxu1 %v24951_v43  ;;  %14368 = vmatprep.subr.mxu0 %v24951_v43  ;;  %v12716_v55 = vadd.f32 %v12715_v48, %v12714_v13 }
 0x1c8   :  { %14396 = vmatpush3.msra.mxu1 %v3814_v16  ;;  %14369 = vmatpush3.msra.mxu0 %v19013_v56  ;;  %v12784_v31 = vpop.f32.mrf.mxu0 }
 0x1c9   :  { %14397 = vmatprep.subr.mxu1 %v24951_v43  ;;  %14408 = vmatprep.subr.mxu0 %v24951_v43  ;;  %v278_v20 = vadd.f32 %v12716_v55, %v12554_v58 }
 0x1ca   :  { %14398 = vmatpush3.msra.mxu1 %v3821_v53  ;;  %v12785_v4 = vpop.f32.mrf.mxu0  ;;  %v12820_v53 = vpop.f32.mrf.mxu1 }
 0x1cb   :  { %14399 = vmatprep.subr.mxu1 %v24951_v43  ;;  %v12786_v10 = vadd.f32 %v12785_v4, %v12784_v31  ;;  %v510_v22 = vadd.f32 %v12751_v38, %v278_v20  ;;  %v12821_v62 = vadd.f32 %v12820_v53, %v12819_v33 }
 0x1cc   :  { %14400 = vmatpush3.msra.mxu1 %v3828_v24  ;;  %v12854_v16 = vpop.f32.mrf.mxu0  ;;  %v12889_v36 = vpop.f32.mrf.mxu1 }
 0x1cd   :  { %14401 = vmatprep.subr.mxu1 %v24951_v43 }
 0x1ce   :  { %14402 = vmatpush3.msra.mxu1 %v3835_v18  ;;  %v12855_v26 = vpop.f32.mrf.mxu0  ;;  %v12890_v18 = vpop.f32.mrf.mxu1 }
 0x1cf   :  { %14403 = vmatprep.subr.mxu1 %v24951_v43  ;;  %v12856_v27 = vadd.f32 %v12855_v26, %v12854_v16  ;;  %v12891_v48 = vadd.f32 %v12890_v18, %v12889_v36 }
 0x1d0   :  { %14404 = vmatpush3.msra.mxu1 %v3842_v52  ;;  %v12924_v24 = vpop.f32.mrf.mxu0  ;;  %v12959_v52 = vpop.f32.mrf.mxu1 }
 0x1d1   :  { %14443 = vmatprep.subr.mxu1 %v24951_v43  ;;  %v648_v43 = vadd.f32 %v12786_v10, %v510_v22 }
 0x1d2   :  { %v12925_v63 = vpop.f32.mrf.mxu0  ;;  %v12960_v35 = vpop.f32.mrf.mxu1 }
 0x1d3   :  { %v756_v13 = vadd.f32 %v12821_v62, %v648_v43  ;;  %v12926_v15 = vadd.f32 %v12925_v63, %v12924_v24  ;;  %v12961_v58 = vadd.f32 %v12960_v35, %v12959_v52 }
 0x1d4   :  { %v12994_v60 = vpop.f32.mrf.mxu0  ;;  %v13029_v61 = vpop.f32.mrf.mxu1 }
 0x1d5   :  { %v924_v56 = vadd.f32 %v12856_v27, %v756_v13 }
 0x1d6   :  { %v12995_v29 = vpop.f32.mrf.mxu0  ;;  %v13030_v47 = vpop.f32.mrf.mxu1 }
 0x1d7   :  { %v1028_v49 = vadd.f32 %v12891_v48, %v924_v56  ;;  %v12996_v31 = vadd.f32 %v12995_v29, %v12994_v60  ;;  %v13031_v20 = vadd.f32 %v13030_v47, %v13029_v61 }
 0x1d8   :  { %v13064_v44 = vpop.f32.mrf.mxu0  ;;  %v13099_v57 = vpop.f32.mrf.mxu1 }
 0x1d9   :  { %v1140_v11 = vadd.f32 %v12926_v15, %v1028_v49 }
 0x1da   :  { %v13065_v2 = vpop.f32.mrf.mxu0  ;;  %v13100_v23 = vpop.f32.mrf.mxu1 }
 0x1db   :  { %v1372_v38 = vadd.f32 %v12961_v58, %v1140_v11  ;;  %v13066_v10 = vadd.f32 %v13065_v2, %v13064_v44  ;;  %v13101_v62 = vadd.f32 %v13100_v23, %v13099_v57 }
 0x1dc   :  { %v13134_v0 = vpop.f32.mrf.mxu0  ;;  %v13169_v12 = vpop.f32.mrf.mxu1 }
 0x1dd   :  { %v1510_v22 = vadd.f32 %v12996_v31, %v1372_v38 }
 0x1de   :  { %v13135_v40 = vpop.f32.mrf.mxu0  ;;  %v13170_v55 = vpop.f32.mrf.mxu1 }
 0x1df   :  { %v1618_v43 = vadd.f32 %v13031_v20, %v1510_v22  ;;  %v13136_v36 = vadd.f32 %v13135_v40, %v13134_v0  ;;  %v13171_v35 = vadd.f32 %v13170_v55, %v13169_v12 }
 0x1e0   :  { %v13204_v50 = vpop.f32.mrf.mxu0 }
 0x1e1   :  { %v1786_v27 = vadd.f32 %v13066_v10, %v1618_v43 }
 0x1e2   :  { %v13205_v3 = vpop.f32.mrf.mxu0 }
 0x1e3   :  { %v1890_v56 = vadd.f32 %v13101_v62, %v1786_v27  ;;  %v13206_v15 = vadd.f32 %v13205_v3, %v13204_v50 }
 0x1e4   :  { %v13239_v4 = vpop.f32.mrf.mxu1 }
 0x1e5   :  { %v2002_v49 = vadd.f32 %v13136_v36, %v1890_v56 }
 0x1e6   :  { %v13240_v16 = vpop.f32.mrf.mxu1 }
 0x1e7   :  { %v2234_v63 = vadd.f32 %v13171_v35, %v2002_v49  ;;  %v13241_v47 = vadd.f32 %v13240_v16, %v13239_v4  ;;  %v25672_v49 = vld [vmem:[#allocation27_spill] sm:$0xff] }
 0x1e9   :  { %v2372_v52 = vadd.f32 %v13206_v15, %v2234_v63  ;;  %v25673_v15 = vld [vmem:[#allocation7_spill] sm:$0xff]  ;;  %v25676_v63 = vld [vmem:[#allocation6_spill] sm:$0xff] }
 0x1eb   :  { %v2480_v13 = vadd.f32 %v13241_v47, %v2372_v52  ;;  %v25677_v47 = vld [vmem:[#allocation2_spill] sm:$0xff]  ;;  %v12567_v52 = vld [vmem:[%s24657_s3 + $0xd8] sm:$0xff] }
 0x1fd   :  { %v13274_v33 = vpop.f32.mrf.mxu0 }
 0x1ff   :  { %v13275_v53 = vpop.f32.mrf.mxu0 }
 0x200   :  { %v13276_v2 = vadd.f32 %v13275_v53, %v13274_v33 }
 0x202   :  { %v2648_v58 = vadd.f32 %v13276_v2, %v2480_v13  ;;  %v19243_v13 = vand.u32 4294901760, %v12567_v52 }
 0x206   :  { %v13309_v26 = vpop.f32.mrf.mxu1 }
 0x208   :  { %v13310_v18 = vpop.f32.mrf.mxu1 }
 0x209   :  { %v13311_v57 = vadd.f32 %v13310_v18, %v13309_v26 }
 0x20b   :  { %v2752_v11 = vadd.f32 %v13311_v57, %v2648_v58  ;;  %v12566_v57 = vld [vmem:[%s24657_s3 + $0xd0] sm:$0xff] }
 0x21f   :  { %v13344_v24 = vpop.f32.mrf.mxu0 }
 0x221   :  { %v13345_v29 = vpop.f32.mrf.mxu0 }
 0x222   :  { %v13346_v0 = vadd.f32 %v13345_v29, %v13344_v24  ;;  %v25671_v24 = vmov 0.0   ;;  %v25674_v29 = vld [vmem:[#allocation20_spill] sm:$0xff] }
 0x224   :  { %v2864_v31 = vadd.f32 %v13346_v0, %v2752_v11 }
 0x22a   :  { %v13379_v60 = vpop.f32.mrf.mxu1 }
 0x22c   :  { %v13380_v44 = vpop.f32.mrf.mxu1 }
 0x22d   :  { %v13381_v12 = vadd.f32 %v13380_v44, %v13379_v60  ;;  %v25675_v60 = vld [vmem:[#allocation11_spill] sm:$0xff] }
 0x22f   :  { %v3096_v38 = vadd.f32 %v13381_v12, %v2864_v31  ;;  %v19271_v31 = vsub.f32 %v12567_v52, %v19243_v13 }
 0x242   :  { %v13414_v61 = vpop.f32.mrf.mxu0 }
 0x244   :  { %v13415_v23 = vpop.f32.mrf.mxu0 }
 0x245   :  { %v13416_v50 = vadd.f32 %v13415_v23, %v13414_v61  ;;  %v25678_v61 = vld [vmem:[#allocation4_spill] sm:$0xff]  ;;  %v12565_v23 = vld [vmem:[%s24657_s3 + $0xc8] sm:$0xff] }
 0x246   :  { %v19262_v11 = vand.u32 4294901760, %v12565_v23 }
 0x247   :  { %v3234_v4 = vadd.f32 %v13416_v50, %v3096_v38 }
 0x24b   :  { %v13449_v48 = vpop.f32.mrf.mxu1 }
 0x24d   :  { %v13450_v55 = vpop.f32.mrf.mxu1 }
 0x24e   :  { %v13451_v20 = vadd.f32 %v13450_v55, %v13449_v48  ;;  %v12564_v48 = vld [vmem:[%s24657_s3 + $0xc0] sm:$0xff] }
 0x24f   :  { %v19274_v50 = vand.u32 4294901760, %v12564_v48 }
 0x250   :  { %v3342_v33 = vadd.f32 %v13451_v20, %v3234_v4  ;;  %v19285_v4 = vsub.f32 %v12565_v23, %v19262_v11 }
 0x264   :  { %v13484_v40 = vpop.f32.mrf.mxu0 }
 0x266   :  { %v13485_v3 = vpop.f32.mrf.mxu0 }
 0x267   :  { %v13486_v22 = vadd.f32 %v13485_v3, %v13484_v40  ;;  %v19260_v40 = vand.u32 4294901760, %v12566_v57 }
 0x269   :  { %v3510_v43 = vadd.f32 %v13486_v22, %v3342_v33  ;;  %v19281_v20 = vsub.f32 %v12566_v57, %v19260_v40  ;;  %v4430_v33 = vand.u32 4294901760, %v19271_v31  ;;  %v12558_v57 = vld [vmem:[%s24657_s3 + $0x90] sm:$0xff] }
 0x26c   :  { %v13519_v10 = vpop.f32.mrf.mxu1 }
 0x26e   :  { %v13520_v16 = vpop.f32.mrf.mxu1 }
 0x26f   :  { %v13521_v62 = vadd.f32 %v13520_v16, %v13519_v10 }
 0x271   :  { %v3614_v53 = vadd.f32 %v13521_v62, %v3510_v43  ;;  %v4437_v62 = vand.u32 4294901760, %v19281_v20 }
 0x273   :  { %v3617_v26 = vmax.f32 %v3614_v53, 0.0  ;;  %v19297_v53 = vsub.f32 %v12564_v48, %v19274_v50 }
 0x275   :  { %v19049_v27 = vand.u32 4294901760, %v3617_v26 }
 0x277   :  { %v19052_v36 = vsub.f32 %v3617_v26, %v19049_v27  ;;  %14406 = vmatmul.mubr.f32.vlgmr.msra.gmra.mxu1 %v19049_v27 }
 0x278   :  { %14444 = vmatpush3.msra.mxu1 %v18803_v32  ;;  %14475 = vmatprep.mubr.msk.f32.mxu1 %vm16022_vm0, %v25671_v24 }
 0x279   :  { %v3724_v56 = vand.u32 4294901760, %v19052_v36  ;;  %14445 = vmatprep.subr.mxu1 %v25671_v24 }
 0x27a   :  { %14446 = vmatpush3.msra.mxu1 %v18811_v46 }
 0x27b   :  { %14447 = vmatprep.subr.mxu1 %v25671_v24  ;;  %v3725_v35 = vsub.f32 %v19052_v36, %v3724_v56 }
 0x27c   :  { %14448 = vmatpush3.msra.mxu1 %v18823_v17 }
 0x27d   :  { %14449 = vmatprep.subr.mxu1 %v25671_v24  ;;  %v3726_v18 = vand.u32 4294901760, %v3725_v35  ;;  %v4444_v35 = vand.u32 4294901760, %v19285_v4 }
 0x27e   :  { %14450 = vmatpush3.msra.mxu1 %v18825_v42 }
 0x27f   :  { %14451 = vmatprep.subr.mxu1 %v25671_v24  ;;  %14371 = vmatmul.mubr.f32.vlgmr.msra.gmra.mxu0 %v3726_v18 }
 0x280   :  { %14409 = vmatpush3.msra.mxu0 %v18809_v14  ;;  %14452 = vmatpush3.msra.mxu1 %v18828_v7 }
 0x281   :  { %14410 = vmatprep.subr.mxu0 %v25671_v24  ;;  %14453 = vmatprep.subr.mxu1 %v25671_v24 }
 0x282   :  { %14411 = vmatpush3.msra.mxu0 %v18838_v1  ;;  %14454 = vmatpush3.msra.mxu1 %v18841_v8 }
 0x283   :  { %14412 = vmatprep.subr.mxu0 %v25671_v24  ;;  %14455 = vmatprep.subr.mxu1 %v25671_v24 }
 0x284   :  { %14413 = vmatpush3.msra.mxu0 %v18846_v30  ;;  %14456 = vmatpush3.msra.mxu1 %v18843_v41 }
 0x285   :  { %14414 = vmatprep.subr.mxu0 %v25671_v24  ;;  %14457 = vmatprep.subr.mxu1 %v25671_v24 }
 0x286   :  { %14415 = vmatpush3.msra.mxu0 %v18849_v6  ;;  %14458 = vmatpush3.msra.mxu1 %v18901_v25 }
 0x287   :  { %14416 = vmatprep.subr.mxu0 %v25671_v24  ;;  %14459 = vmatprep.subr.mxu1 %v25671_v24 }
 0x288   :  { %14417 = vmatpush3.msra.mxu0 %v18852_v28  ;;  %14460 = vmatpush3.msra.mxu1 %v18912_v21 }
 0x289   :  { %14418 = vmatprep.subr.mxu0 %v25671_v24  ;;  %14461 = vmatprep.subr.mxu1 %v25671_v24 }
 0x28a   :  { %14419 = vmatpush3.msra.mxu0 %v18861_v5  ;;  %14462 = vmatpush3.msra.mxu1 %v18924_v54 }
 0x28b   :  { %14420 = vmatprep.subr.mxu0 %v25671_v24  ;;  %14463 = vmatprep.subr.mxu1 %v25671_v24 }
 0x28c   :  { %14421 = vmatpush3.msra.mxu0 %v18864_v9  ;;  %14464 = vmatpush3.msra.mxu1 %v18939_v51 }
 0x28d   :  { %14422 = vmatprep.subr.mxu0 %v25671_v24  ;;  %14465 = vmatprep.subr.mxu1 %v25671_v24 }
 0x28e   :  { %14423 = vmatpush3.msra.mxu0 %v18910_v59  ;;  %14466 = vmatpush3.msra.mxu1 %v18956_v37 }
 0x28f   :  { %14424 = vmatprep.subr.mxu0 %v25671_v24  ;;  %14467 = vmatprep.subr.mxu1 %v25671_v24 }
 0x290   :  { %14425 = vmatpush3.msra.mxu0 %v18922_v45  ;;  %14468 = vmatpush3.msra.mxu1 %v18966_v39 }
 0x291   :  { %14426 = vmatprep.subr.mxu0 %v25671_v24  ;;  %14469 = vmatprep.subr.mxu1 %v25671_v24 }
 0x292   :  { %14427 = vmatpush3.msra.mxu0 %v18937_v34  ;;  %14470 = vmatpush3.msra.mxu1 %v18986_v19 }
 0x293   :  { %14428 = vmatprep.subr.mxu0 %v25671_v24  ;;  %14471 = vmatprep.subr.mxu1 %v25671_v24 }
 0x294   :  { %14429 = vmatpush3.msra.mxu0 %v25672_v49  ;;  %14472 = vmatpush3.msra.mxu1 %v25673_v15 }
 0x295   :  { %14430 = vmatprep.subr.mxu0 %v25671_v24  ;;  %14473 = vmatprep.subr.mxu1 %v25671_v24 }
 0x296   :  { %14431 = vmatpush3.msra.mxu0 %v25674_v29  ;;  %14474 = vmatpush3.msra.mxu1 %v25675_v60 }
 0x297   :  { %14432 = vmatprep.subr.mxu0 %v25671_v24  ;;  %14476 = vmatmul.mubr.f32.vlgmr.msra.gmra.mxu1 %v3724_v56  ;;  %v4431_v56 = vsub.f32 %v19271_v31, %v4430_v33 }
 0x298   :  { %14513 = vmatprep.subr.mxu1 %v25671_v24  ;;  %14433 = vmatpush3.msra.mxu0 %v25676_v63 }
 0x299   :  { %14514 = vmatpush3.msra.mxu1 %v18803_v32  ;;  %14434 = vmatprep.subr.mxu0 %v25671_v24  ;;  %v25679_v32 = vld [vmem:[#allocation18_spill] sm:$0xff] }
 0x29a   :  { %14515 = vmatprep.subr.mxu1 %v25671_v24  ;;  %14435 = vmatpush3.msra.mxu0 %v25677_v47 }
 0x29b   :  { %14516 = vmatpush3.msra.mxu1 %v18811_v46  ;;  %14436 = vmatprep.subr.mxu0 %v25671_v24  ;;  %v25680_v46 = vand.u32 4294901760, %v18809_v14  ;;  %v25683_v14 = vand.u32 4294901760, %v18849_v6  ;;  %v25689_v6 = vand.u32 4294901760, %v18937_v34  ;;  %v12570_v34 = vld [vmem:[%s24657_s3 + $0xf0] sm:$0xff] }
 0x29c   :  { %14517 = vmatprep.subr.mxu1 %v25671_v24  ;;  %14437 = vmatpush3.msra.mxu0 %v25678_v61 }
 0x29d   :  { %14518 = vmatpush3.msra.mxu1 %v18823_v17  ;;  %14438 = vmatprep.subr.mxu0 %v25671_v24  ;;  %v25681_v17 = vand.u32 4294901760, %v18838_v1  ;;  %v25685_v1 = vand.u32 4294901760, %v18861_v5  ;;  %v25691_v5 = vand.u32 4294901760, %v25674_v29  ;;  %v4451_v29 = vand.u32 4294901760, %v19297_v53 }
 0x29e   :  { %14519 = vmatprep.subr.mxu1 %v25671_v24  ;;  %14439 = vmatpush3.msra.mxu0 %v25679_v32 }
 0x29f   :  { %14440 = vmatprep.mubr.msk.f32.mxu0 %vm16022_vm0, %v25671_v24  ;;  %14520 = vmatpush3.msra.mxu1 %v18825_v42  ;;  %v25682_v42 = vand.u32 4294901760, %v18846_v30  ;;  %v25688_v30 = vand.u32 4294901760, %v18922_v45  ;;  %v12571_v45 = vld [vmem:[%s24657_s3 + $0xf8] sm:$0xff] }
 0x2a0   :  { %14441 = vmatmul.mubr.f32.vlgmr.msra.gmra.mxu0 %v19052_v36  ;;  %14478 = vmatprep.subr.mxu0 %v25671_v24 }
 0x2a1   :  { %14521 = vmatprep.subr.mxu1 %v25671_v24  ;;  %14479 = vmatpush3.msra.mxu0 %v25680_v46 }
 0x2a2   :  { %14522 = vmatpush3.msra.mxu1 %v18828_v7  ;;  %14480 = vmatprep.subr.mxu0 %v25671_v24  ;;  %v25684_v7 = vand.u32 4294901760, %v18852_v28  ;;  %v25690_v28 = vand.u32 4294901760, %v25672_v49 }
 0x2a3   :  { %14523 = vmatprep.subr.mxu1 %v25671_v24  ;;  %14481 = vmatpush3.msra.mxu0 %v25681_v17  ;;  %v12562_v17 = vld [vmem:[%s24657_s3 + $0xb0] sm:$0xff] }
 0x2a4   :  { %14524 = vmatpush3.msra.mxu1 %v18841_v8  ;;  %14482 = vmatprep.subr.mxu0 %v25671_v24  ;;  %v25686_v8 = vand.u32 4294901760, %v18864_v9  ;;  %v25692_v9 = vand.u32 4294901760, %v25676_v63  ;;  %v4445_v63 = vsub.f32 %v19285_v4, %v4444_v35 }
 0x2a5   :  { %14525 = vmatprep.subr.mxu1 %v25671_v24  ;;  %14483 = vmatpush3.msra.mxu0 %v25682_v42 }
 0x2a6   :  { %14526 = vmatpush3.msra.mxu1 %v18843_v41  ;;  %14484 = vmatprep.subr.mxu0 %v25671_v24  ;;  %v25687_v41 = vand.u32 4294901760, %v18910_v59  ;;  %v25694_v59 = vand.u32 4294901760, %v25678_v61  ;;  %v4446_v42 = vand.u32 4294901760, %v4445_v63 }
 0x2a7   :  { %14527 = vmatprep.subr.mxu1 %v25671_v24  ;;  %14485 = vmatpush3.msra.mxu0 %v25683_v14 }
 0x2a8   :  { %14528 = vmatpush3.msra.mxu1 %v18901_v25  ;;  %14486 = vmatprep.subr.mxu0 %v25671_v24  ;;  %v25693_v25 = vand.u32 4294901760, %v25677_v47  ;;  %v12563_v47 = vld [vmem:[%s24657_s3 + $0xb8] sm:$0xff] }
 0x2a9   :  { %14529 = vmatprep.subr.mxu1 %v25671_v24  ;;  %14487 = vmatpush3.msra.mxu0 %v25684_v7  ;;  %v19332_v46 = vand.u32 4294901760, %v12563_v47  ;;  %v19343_v7 = vand.u32 4294901760, %v12562_v17 }
 0x2aa   :  { %14530 = vmatpush3.msra.mxu1 %v18912_v21  ;;  %14488 = vmatprep.subr.mxu0 %v25671_v24  ;;  %v25695_v21 = vand.u32 4294901760, %v25679_v32  ;;  %v4452_v32 = vsub.f32 %v19297_v53, %v4451_v29 }
 0x2ab   :  { %14531 = vmatprep.subr.mxu1 %v25671_v24  ;;  %14489 = vmatpush3.msra.mxu0 %v25685_v1  ;;  %v19341_v14 = vsub.f32 %v12563_v47, %v19332_v46  ;;  %v12561_v1 = vld [vmem:[%s24657_s3 + $0xa8] sm:$0xff] }
 0x2ac   :  { %14532 = vmatpush3.msra.mxu1 %v18924_v54  ;;  %14490 = vmatprep.subr.mxu0 %v25671_v24  ;;  %v19219_v54 = vand.u32 4294901760, %v12571_v45 }
 0x2ad   :  { %14533 = vmatprep.subr.mxu1 %v25671_v24  ;;  %14491 = vmatpush3.msra.mxu0 %v25686_v8  ;;  %v4453_v8 = vand.u32 4294901760, %v4452_v32 }
 0x2ae   :  { %14534 = vmatpush3.msra.mxu1 %v18939_v51  ;;  %14492 = vmatprep.subr.mxu0 %v25671_v24  ;;  %v19225_v51 = vsub.f32 %v12571_v45, %v19219_v54 }
 0x2af   :  { %14535 = vmatprep.subr.mxu1 %v25671_v24  ;;  %14493 = vmatpush3.msra.mxu0 %v25687_v41  ;;  %v4458_v41 = vand.u32 4294901760, %v19341_v14 }
 0x2b0   :  { %14536 = vmatpush3.msra.mxu1 %v18956_v37  ;;  %14494 = vmatprep.subr.mxu0 %v25671_v24  ;;  %v19227_v37 = vand.u32 4294901760, %v12570_v34  ;;  %v4402_v58 = vand.u32 4294901760, %v19225_v51 }
 0x2b1   :  { %14537 = vmatprep.subr.mxu1 %v25671_v24  ;;  %14495 = vmatpush3.msra.mxu0 %v25688_v30  ;;  %v19353_v30 = vsub.f32 %v12562_v17, %v19343_v7 }
 0x2b2   :  { %14538 = vmatpush3.msra.mxu1 %v18966_v39  ;;  %14496 = vmatprep.subr.mxu0 %v25671_v24  ;;  %v12569_v39 = vld [vmem:[%s24657_s3 + $0xe8] sm:$0xff]  ;;  %v19257_v0 = vsub.f32 %v12570_v34, %v19227_v37  ;;  %v4403_v3 = vsub.f32 %v19225_v51, %v4402_v58 }
 0x2b3   :  { %14539 = vmatprep.subr.mxu1 %v25671_v24  ;;  %14497 = vmatpush3.msra.mxu0 %v25689_v6  ;;  %v19239_v2 = vand.u32 4294901760, %v12569_v39  ;;  %v19355_v6 = vand.u32 4294901760, %v12561_v1 }
 0x2b4   :  { %14540 = vmatpush3.msra.mxu1 %v18986_v19  ;;  %14498 = vmatprep.subr.mxu0 %v25671_v24  ;;  %v12568_v19 = vld [vmem:[%s24657_s3 + $0xe0] sm:$0xff]  ;;  %v4409_v38 = vand.u32 4294901760, %v19257_v0  ;;  %v4404_v16 = vand.u32 4294901760, %v4403_v3 }
 0x2b5   :  { %14541 = vmatprep.subr.mxu1 %v25671_v24  ;;  %14499 = vmatpush3.msra.mxu0 %v25690_v28  ;;  %v19241_v44 = vand.u32 4294901760, %v12568_v19  ;;  %v19265_v12 = vsub.f32 %v12569_v39, %v19239_v2  ;;  %v12560_v28 = vld [vmem:[%s24657_s3 + $0xa0] sm:$0xff] }
 0x2b6   :  { %14542 = vmatpush3.msra.mxu1 %v25673_v15  ;;  %14500 = vmatprep.subr.mxu0 %v25671_v24  ;;  %v4410_v43 = vsub.f32 %v19257_v0, %v4409_v38  ;;  %v4438_v15 = vsub.f32 %v19281_v20, %v4437_v62 }
 0x2b7   :  { %14543 = vmatprep.subr.mxu1 %v25671_v24  ;;  %14501 = vmatpush3.msra.mxu0 %v25691_v5  ;;  %v19268_v55 = vsub.f32 %v12568_v19, %v19241_v44  ;;  %v4416_v22 = vand.u32 4294901760, %v19265_v12  ;;  %v4459_v5 = vsub.f32 %v19341_v14, %v4458_v41 }
 0x2b8   :  { %14544 = vmatpush3.msra.mxu1 %v25675_v60  ;;  %14545 = vmatprep.mubr.msk.f32.mxu1 %vm16022_vm0, %v25671_v24  ;;  %v4411_v36 = vand.u32 4294901760, %v4410_v43  ;;  %v4432_v60 = vand.u32 4294901760, %v4431_v56  ;;  %v4439_v61 = vand.u32 4294901760, %v4438_v15  ;;  %v12556_v15 = vld [vmem:[%s24657_s3 + $0x80] sm:$0xff] }
 0x2b9   :  { %14502 = vmatprep.subr.mxu0 %v25671_v24  ;;  %14546 = vmatmul.mubr.f32.vlgmr.msra.gmra.mxu1 %v19049_v27  ;;  %v4423_v10 = vand.u32 4294901760, %v19268_v55  ;;  %v4417_v26 = vsub.f32 %v19265_v12, %v4416_v22  ;;  %v4460_v45 = vand.u32 4294901760, %v4459_v5 }
 0x2ba   :  { %14503 = vmatpush3.msra.mxu0 %v25692_v9  ;;  %14510 = vmatprep.mubr.msk.f32.mxu0 %vm16022_vm0, %v25671_v24  ;;  %v4465_v9 = vand.u32 4294901760, %v19353_v30 }
 0x2bb   :  { %14504 = vmatprep.subr.mxu0 %v25671_v24  ;;  %14583 = vmatprep.subr.mxu1 %v25671_v24  ;;  %v4418_v18 = vand.u32 4294901760, %v4417_v26  ;;  %v12557_v26 = vld [vmem:[%s24657_s3 + $0x88] sm:$0xff] }
 0x2bc   :  { %14505 = vmatpush3.msra.mxu0 %v25693_v25  ;;  %14615 = vmatprep.mubr.msk.f32.mxu1 %vm16022_vm0, %v25671_v24  ;;  %v19368_v25 = vsub.f32 %v12561_v1, %v19355_v6  ;;  %v4466_v34 = vsub.f32 %v19353_v30, %v4465_v9 }
 0x2bd   :  { %14506 = vmatprep.subr.mxu0 %v25671_v24  ;;  %14584 = vmatpush3.msra.mxu1 %v4404_v16  ;;  %v19397_v16 = vand.u32 4294901760, %v12558_v57 }
 0x2be   :  { %14507 = vmatpush3.msra.mxu0 %v25694_v59  ;;  %14585 = vmatprep.subr.mxu1 %v25671_v24  ;;  %v19370_v59 = vand.u32 4294901760, %v12560_v28  ;;  %v4472_v39 = vand.u32 4294901760, %v19368_v25  ;;  %v4467_v23 = vand.u32 4294901760, %v4466_v34 }
 0x2bf   :  { %14508 = vmatprep.subr.mxu0 %v25671_v24  ;;  %14586 = vmatpush3.msra.mxu1 %v4411_v36  ;;  %v19411_v56 = vsub.f32 %v12558_v57, %v19397_v16 }
 0x2c0   :  { %14509 = vmatpush3.msra.mxu0 %v25695_v21  ;;  %14587 = vmatprep.subr.mxu1 %v25671_v24  ;;  %v12559_v21 = vld [vmem:[%s24657_s3 + $0x98] sm:$0xff]  ;;  %v19383_v19 = vsub.f32 %v12560_v28, %v19370_v59  ;;  %v4473_v48 = vsub.f32 %v19368_v25, %v4472_v39 }
 0x2c1   :  { %14511 = vmatmul.mubr.f32.vlgmr.msra.gmra.mxu0 %v19049_v27  ;;  %14548 = vmatprep.subr.mxu0 %v25671_v24  ;;  %v4424_v27 = vsub.f32 %v19268_v55, %v4423_v10  ;;  %v19387_v52 = vand.u32 4294901760, %v12559_v21  ;;  %v24971_v63 = vand.u32 4294901760, %v19411_v56 }
 0x2c2   :  { %14580 = vmatprep.mubr.msk.f32.mxu0 %vm16022_vm0, %v25671_v24  ;;  %14549 = vmatpush3.msra.mxu0 %v19219_v54  ;;  %v4479_v3 = vand.u32 4294901760, %v19383_v19 }
 0x2c3   :  { %14550 = vmatprep.subr.mxu0 %v25671_v24  ;;  %v4425_v49 = vand.u32 4294901760, %v4424_v27  ;;  %14588 = vmatpush3.msra.mxu1 %v4418_v18  ;;  %v19401_v43 = vsub.f32 %v12559_v21, %v19387_v52  ;;  %v4474_v27 = vand.u32 4294901760, %v4473_v48  ;;  %v19413_v18 = vand.u32 4294901760, %v12557_v26 }
 0x2c4   :  { %14551 = vmatpush3.msra.mxu0 %v19227_v37  ;;  %14589 = vmatprep.subr.mxu1 %v25671_v24  ;;  %v4480_v36 = vsub.f32 %v19383_v19, %v4479_v3  ;;  %v4494_v17 = vsub.f32 %v19411_v56, %v24971_v63 }
 0x2c5   :  { %14552 = vmatprep.subr.mxu0 %v25671_v24  ;;  %14590 = vmatpush3.msra.mxu1 %v4425_v49  ;;  %v24972_v49 = vand.u32 4294901760, %v19401_v43  ;;  %v19424_v47 = vsub.f32 %v12557_v26, %v19413_v18 }
 0x2c6   :  { %14553 = vmatpush3.msra.mxu0 %v19239_v2  ;;  %14591 = vmatprep.subr.mxu1 %v25671_v24  ;;  %v4495_v28 = vand.u32 4294901760, %v4494_v17  ;;  %v12555_v17 = vld [vmem:[%s24659_s4] ss:$0 sm:$0xff] }
 0x2c7   :  { %14554 = vmatprep.subr.mxu0 %v25671_v24  ;;  %14592 = vmatpush3.msra.mxu1 %v4432_v60  ;;  %v4481_v60 = vand.u32 4294901760, %v4480_v36  ;;  %v4487_v32 = vsub.f32 %v19401_v43, %v24972_v49 }
 0x2c8   :  { %14555 = vmatpush3.msra.mxu0 %v19241_v44  ;;  %14593 = vmatprep.subr.mxu1 %v25671_v24 }
 0x2c9   :  { %14556 = vmatprep.subr.mxu0 %v25671_v24  ;;  %14594 = vmatpush3.msra.mxu1 %v4439_v61  ;;  %v19426_v61 = vand.u32 4294901760, %v12556_v15 }
 0x2ca   :  { %14557 = vmatpush3.msra.mxu0 %v19243_v13  ;;  %14595 = vmatprep.subr.mxu1 %v25671_v24 }
 0x2cb   :  { %14558 = vmatprep.subr.mxu0 %v25671_v24  ;;  %14596 = vmatpush3.msra.mxu1 %v4446_v42  ;;  %v24970_v42 = vand.u32 4294901760, %v19424_v47  ;;  %v19439_v1 = vsub.f32 %v12556_v15, %v19426_v61 }
 0x2cc   :  { %14559 = vmatpush3.msra.mxu0 %v19260_v40  ;;  %14597 = vmatprep.subr.mxu1 %v25671_v24 }
 0x2cd   :  { %14560 = vmatprep.subr.mxu0 %v25671_v24  ;;  %14598 = vmatpush3.msra.mxu1 %v4453_v8  ;;  %v4488_v8 = vand.u32 4294901760, %v4487_v32  ;;  %v4501_v5 = vsub.f32 %v19424_v47, %v24970_v42  ;;  %v24969_v21 = vand.u32 4294901760, %v19439_v1 }
 0x2ce   :  { %14561 = vmatpush3.msra.mxu0 %v19262_v11  ;;  %14599 = vmatprep.subr.mxu1 %v25671_v24 }
 0x2cf   :  { %14562 = vmatprep.subr.mxu0 %v25671_v24  ;;  %14600 = vmatpush3.msra.mxu1 %v4460_v45  ;;  %v4502_v45 = vand.u32 4294901760, %v4501_v5  ;;  %v4508_v34 = vsub.f32 %v19439_v1, %v24969_v21 }
 0x2d0   :  { %14563 = vmatpush3.msra.mxu0 %v19274_v50  ;;  %14601 = vmatprep.subr.mxu1 %v25671_v24 }
 0x2d1   :  { %14564 = vmatprep.subr.mxu0 %v25671_v24  ;;  %14602 = vmatpush3.msra.mxu1 %v4467_v23  ;;  %v4509_v57 = vand.u32 4294901760, %v4508_v34 }
 0x2d2   :  { %14565 = vmatpush3.msra.mxu0 %v19332_v46  ;;  %14603 = vmatprep.subr.mxu1 %v25671_v24 }
 0x2d3   :  { %14566 = vmatprep.subr.mxu0 %v25671_v24  ;;  %14604 = vmatpush3.msra.mxu1 %v4474_v27 }
 0x2d4   :  { %14567 = vmatpush3.msra.mxu0 %v19343_v7  ;;  %14605 = vmatprep.subr.mxu1 %v25671_v24 }
 0x2d5   :  { %14568 = vmatprep.subr.mxu0 %v25671_v24  ;;  %14606 = vmatpush3.msra.mxu1 %v4481_v60 }
 0x2d6   :  { %14569 = vmatpush3.msra.mxu0 %v19355_v6  ;;  %14607 = vmatprep.subr.mxu1 %v25671_v24 }
 0x2d7   :  { %14570 = vmatprep.subr.mxu0 %v25671_v24  ;;  %14608 = vmatpush3.msra.mxu1 %v4488_v8 }
 0x2d8   :  { %14571 = vmatpush3.msra.mxu0 %v19370_v59  ;;  %14609 = vmatprep.subr.mxu1 %v25671_v24 }
 0x2d9   :  { %14572 = vmatprep.subr.mxu0 %v25671_v24  ;;  %14610 = vmatpush3.msra.mxu1 %v4495_v28 }
 0x2da   :  { %14573 = vmatpush3.msra.mxu0 %v19387_v52  ;;  %14611 = vmatprep.subr.mxu1 %v25671_v24 }
 0x2db   :  { %14574 = vmatprep.subr.mxu0 %v25671_v24  ;;  %14612 = vmatpush3.msra.mxu1 %v4502_v45 }
 0x2dc   :  { %14575 = vmatpush3.msra.mxu0 %v19397_v16  ;;  %14613 = vmatprep.subr.mxu1 %v25671_v24 }
 0x2dd   :  { %14576 = vmatprep.subr.mxu0 %v25671_v24  ;;  %14614 = vmatpush3.msra.mxu1 %v4509_v57 }
 0x2de   :  { %14577 = vmatpush3.msra.mxu0 %v19413_v18  ;;  %14653 = vmatprep.subr.mxu1 %v25671_v24 }
 0x2df   :  { %14578 = vmatprep.subr.mxu0 %v25671_v24 }
 0x2e0   :  { %14579 = vmatpush3.msra.mxu0 %v19426_v61 }
 0x2e1   :  { %14618 = vmatprep.subr.mxu0 %v25671_v24 }
 0x337   :  { %v3879_v23 = vpop.f32.mrf.mxu1 }
 0x339   :  { %v14407_v48 = vpop.f32.mrf.mxu1 }
 0x33f   :  { %v3728_v26 = vpop.f32.mrf.mxu0 }
 0x340   :  { %v3729_v8 = vadd.f32 %v12555_v17, %v3728_v26 }
 0x341   :  { %v14372_v27 = vpop.f32.mrf.mxu0 }
 0x342   :  { %v3880_v5 = vadd.f32 %v3879_v23, %v3729_v8 }
 0x357   :  { %v4072_v36 = vpop.f32.mrf.mxu1 }
 0x359   :  { %v14477_v15 = vpop.f32.mrf.mxu1 }
 0x360   :  { %v3983_v60 = vpop.f32.mrf.mxu0 }
 0x361   :  { %v3984_v34 = vadd.f32 %v3983_v60, %v3880_v5  ;;  %v12581_v60 = vld [vmem:[%s24657_s3 + $0x138] sm:$0xff] }
 0x362   :  { %v14442_v32 = vpop.f32.mrf.mxu0  ;;  %v19742_v8 = vand.u32 4294901760, %v12581_v60 }
 0x363   :  { %v4073_v57 = vadd.f32 %v4072_v36, %v3984_v34 }
 0x379   :  { %v4278_v28 = vpop.f32.mrf.mxu1 }
 0x37b   :  { %v14547_v45 = vpop.f32.mrf.mxu1 }
 0x37c   :  { %v19751_v45 = vsub.f32 %v12581_v60, %v19742_v8 }
 0x381   :  { %v4191_v21 = vpop.f32.mrf.mxu0 }
 0x382   :  { %v4192_v42 = vadd.f32 %v4191_v21, %v4073_v57  ;;  %v12579_v57 = vld [vmem:[%s24657_s3 + $0x128] sm:$0xff] }
 0x383   :  { %v14512_v63 = vpop.f32.mrf.mxu0 }
 0x384   :  { %v4279_v48 = vadd.f32 %v4278_v28, %v4192_v42  ;;  %v12580_v28 = vld [vmem:[%s24657_s3 + $0x130] sm:$0xff] }
 0x385   :  { %v19753_v34 = vand.u32 4294901760, %v12580_v28 }
 0x386   :  { %v4282_v49 = vmax.f32 %v4279_v48, 0.0 }
 0x388   :  { %v19459_v27 = vand.u32 4294901760, %v4282_v49 }
 0x38a   :  { %v19462_v15 = vsub.f32 %v4282_v49, %v19459_v27  ;;  %14616 = vmatmul.mubr.f32.vlgmr.msra.gmra.mxu1 %v19459_v27 }
 0x38b   :  { %14654 = vmatpush3.msra.mxu1 %v19219_v54  ;;  %14685 = vmatprep.mubr.msk.f32.mxu1 %vm16022_vm0, %v25671_v24 }
 0x38c   :  { %v4391_v23 = vand.u32 4294901760, %v19462_v15  ;;  %14655 = vmatprep.subr.mxu1 %v25671_v24 }
 0x38d   :  { %14656 = vmatpush3.msra.mxu1 %v19227_v37 }
 0x38e   :  { %14657 = vmatprep.subr.mxu1 %v25671_v24  ;;  %v4392_v63 = vsub.f32 %v19462_v15, %v4391_v23 }
 0x38f   :  { %14658 = vmatpush3.msra.mxu1 %v19239_v2 }
 0x390   :  { %14659 = vmatprep.subr.mxu1 %v25671_v24  ;;  %v4393_v49 = vand.u32 4294901760, %v4392_v63  ;;  %v12578_v63 = vld [vmem:[%s24657_s3 + $0x120] sm:$0xff] }
 0x391   :  { %14660 = vmatpush3.msra.mxu1 %v19241_v44 }
 0x392   :  { %14661 = vmatprep.subr.mxu1 %v25671_v24  ;;  %14581 = vmatmul.mubr.f32.vlgmr.msra.gmra.mxu0 %v4393_v49 }
 0x393   :  { %14619 = vmatpush3.msra.mxu0 %v19225_v51  ;;  %14662 = vmatpush3.msra.mxu1 %v19243_v13  ;;  %v25697_v51 = vand.u32 4294901760, %v19411_v56 }
 0x394   :  { %14620 = vmatprep.subr.mxu0 %v25671_v24  ;;  %14663 = vmatprep.subr.mxu1 %v25671_v24 }
 0x395   :  { %14621 = vmatpush3.msra.mxu0 %v19257_v0  ;;  %14664 = vmatpush3.msra.mxu1 %v19260_v40 }
 0x396   :  { %14622 = vmatprep.subr.mxu0 %v25671_v24  ;;  %14665 = vmatprep.subr.mxu1 %v25671_v24 }
 0x397   :  { %14623 = vmatpush3.msra.mxu0 %v19265_v12  ;;  %14666 = vmatpush3.msra.mxu1 %v19262_v11  ;;  %v12586_v12 = vld [vmem:[%s24657_s3 + $0x160] sm:$0xff] }
 0x398   :  { %14624 = vmatprep.subr.mxu0 %v25671_v24  ;;  %14667 = vmatprep.subr.mxu1 %v25671_v24 }
 0x399   :  { %14625 = vmatpush3.msra.mxu0 %v19268_v55  ;;  %14668 = vmatpush3.msra.mxu1 %v19274_v50  ;;  %v12585_v55 = vld [vmem:[%s24657_s3 + $0x158] sm:$0xff] }
 0x39a   :  { %14626 = vmatprep.subr.mxu0 %v25671_v24  ;;  %14669 = vmatprep.subr.mxu1 %v25671_v24 }
 0x39b   :  { %14627 = vmatpush3.msra.mxu0 %v19271_v31  ;;  %14670 = vmatpush3.msra.mxu1 %v19332_v46 }
 0x39c   :  { %14628 = vmatprep.subr.mxu0 %v25671_v24  ;;  %14671 = vmatprep.subr.mxu1 %v25671_v24 }
 0x39d   :  { %14629 = vmatpush3.msra.mxu0 %v19281_v20  ;;  %14672 = vmatpush3.msra.mxu1 %v19343_v7  ;;  %v12584_v20 = vld [vmem:[%s24657_s3 + $0x150] sm:$0xff] }
 0x39e   :  { %14630 = vmatprep.subr.mxu0 %v25671_v24  ;;  %14673 = vmatprep.subr.mxu1 %v25671_v24 }
 0x39f   :  { %14631 = vmatpush3.msra.mxu0 %v19285_v4  ;;  %14674 = vmatpush3.msra.mxu1 %v19355_v6  ;;  %v12583_v4 = vld [vmem:[%s24657_s3 + $0x148] sm:$0xff] }
 0x3a0   :  { %14632 = vmatprep.subr.mxu0 %v25671_v24  ;;  %14675 = vmatprep.subr.mxu1 %v25671_v24 }
 0x3a1   :  { %14633 = vmatpush3.msra.mxu0 %v19297_v53  ;;  %14676 = vmatpush3.msra.mxu1 %v19370_v59  ;;  %v19672_v53 = vand.u32 4294901760, %v12583_v4 }
 0x3a2   :  { %14634 = vmatprep.subr.mxu0 %v25671_v24  ;;  %14677 = vmatprep.subr.mxu1 %v25671_v24 }
 0x3a3   :  { %14635 = vmatpush3.msra.mxu0 %v19341_v14  ;;  %14678 = vmatpush3.msra.mxu1 %v19387_v52 }
 0x3a4   :  { %14636 = vmatprep.subr.mxu0 %v25671_v24  ;;  %14679 = vmatprep.subr.mxu1 %v25671_v24 }
 0x3a5   :  { %14637 = vmatpush3.msra.mxu0 %v19353_v30  ;;  %14680 = vmatpush3.msra.mxu1 %v19397_v16 }
 0x3a6   :  { %14638 = vmatprep.subr.mxu0 %v25671_v24  ;;  %14681 = vmatprep.subr.mxu1 %v25671_v24 }
 0x3a7   :  { %14639 = vmatpush3.msra.mxu0 %v19368_v25  ;;  %14682 = vmatpush3.msra.mxu1 %v19413_v18 }
 0x3a8   :  { %14640 = vmatprep.subr.mxu0 %v25671_v24  ;;  %14683 = vmatprep.subr.mxu1 %v25671_v24 }
 0x3a9   :  { %14641 = vmatpush3.msra.mxu0 %v19383_v19  ;;  %14684 = vmatpush3.msra.mxu1 %v19426_v61 }
 0x3aa   :  { %14642 = vmatprep.subr.mxu0 %v25671_v24  ;;  %14686 = vmatmul.mubr.f32.vlgmr.msra.gmra.mxu1 %v4391_v23  ;;  %v19765_v23 = vand.u32 4294901760, %v12579_v57 }
 0x3ab   :  { %14723 = vmatprep.subr.mxu1 %v25671_v24  ;;  %14643 = vmatpush3.msra.mxu0 %v19401_v43 }
 0x3ac   :  { %14724 = vmatpush3.msra.mxu1 %v19219_v54  ;;  %14644 = vmatprep.subr.mxu0 %v25671_v24  ;;  %v25696_v54 = vand.u32 4294901760, %v19401_v43 }
 0x3ad   :  { %14725 = vmatprep.subr.mxu1 %v25671_v24  ;;  %14645 = vmatpush3.msra.mxu0 %v19411_v56 }
 0x3ae   :  { %14726 = vmatpush3.msra.mxu1 %v19227_v37  ;;  %14646 = vmatprep.subr.mxu0 %v25671_v24  ;;  %v25698_v37 = vand.u32 4294901760, %v19424_v47 }
 0x3af   :  { %14727 = vmatprep.subr.mxu1 %v25671_v24  ;;  %14647 = vmatpush3.msra.mxu0 %v19424_v47 }
 0x3b0   :  { %14728 = vmatpush3.msra.mxu1 %v19239_v2  ;;  %14648 = vmatprep.subr.mxu0 %v25671_v24  ;;  %v25699_v2 = vand.u32 4294901760, %v19439_v1 }
 0x3b1   :  { %14729 = vmatprep.subr.mxu1 %v25671_v24  ;;  %14649 = vmatpush3.msra.mxu0 %v19439_v1 }
 0x3b2   :  { %14650 = vmatprep.mubr.msk.f32.mxu0 %vm16022_vm0, %v25671_v24  ;;  %14730 = vmatpush3.msra.mxu1 %v19241_v44  ;;  %v12589_v44 = vld [vmem:[%s24657_s3 + $0x178] sm:$0xff] }
 0x3b3   :  { %14651 = vmatmul.mubr.f32.vlgmr.msra.gmra.mxu0 %v19462_v15  ;;  %14688 = vmatprep.subr.mxu0 %v25671_v24  ;;  %v19763_v15 = vsub.f32 %v12580_v28, %v19753_v34 }
 0x3b4   :  { %14731 = vmatprep.subr.mxu1 %v25671_v24  ;;  %14689 = vmatpush3.msra.mxu0 %v4402_v58  ;;  %v12588_v58 = vld [vmem:[%s24657_s3 + $0x170] sm:$0xff] }
 0x3b5   :  { %14732 = vmatpush3.msra.mxu1 %v19243_v13  ;;  %14690 = vmatprep.subr.mxu0 %v25671_v24  ;;  %v19629_v13 = vand.u32 4294901760, %v12589_v44 }
 0x3b6   :  { %14733 = vmatprep.subr.mxu1 %v25671_v24  ;;  %14691 = vmatpush3.msra.mxu0 %v4409_v38  ;;  %v19653_v38 = vand.u32 4294901760, %v12585_v55 }
 0x3b7   :  { %14734 = vmatpush3.msra.mxu1 %v19260_v40  ;;  %14692 = vmatprep.subr.mxu0 %v25671_v24  ;;  %v19635_v0 = vsub.f32 %v12589_v44, %v19629_v13  ;;  %v19637_v40 = vand.u32 4294901760, %v12588_v58 }
 0x3b8   :  { %14735 = vmatprep.subr.mxu1 %v25671_v24  ;;  %14693 = vmatpush3.msra.mxu0 %v4416_v22  ;;  %v12582_v22 = vld [vmem:[%s24657_s3 + $0x140] sm:$0xff] }
 0x3b9   :  { %14736 = vmatpush3.msra.mxu1 %v19262_v11  ;;  %14694 = vmatprep.subr.mxu0 %v25671_v24  ;;  %v12587_v11 = vld [vmem:[%s24657_s3 + $0x168] sm:$0xff]  ;;  %v19684_v14 = vand.u32 4294901760, %v12582_v22 }
 0x3ba   :  { %14737 = vmatprep.subr.mxu1 %v25671_v24  ;;  %14695 = vmatpush3.msra.mxu0 %v4423_v10  ;;  %v19649_v31 = vand.u32 4294901760, %v12587_v11  ;;  %v5069_v10 = vand.u32 4294901760, %v19635_v0 }
 0x3bb   :  { %14738 = vmatpush3.msra.mxu1 %v19274_v50  ;;  %14696 = vmatprep.subr.mxu0 %v25671_v24  ;;  %v19651_v50 = vand.u32 4294901760, %v12586_v12 }
 0x3bc   :  { %14739 = vmatprep.subr.mxu1 %v25671_v24  ;;  %14697 = vmatpush3.msra.mxu0 %v4430_v33  ;;  %v19667_v33 = vsub.f32 %v12588_v58, %v19637_v40 }
 0x3bd   :  { %14740 = vmatpush3.msra.mxu1 %v19332_v46  ;;  %14698 = vmatprep.subr.mxu0 %v25671_v24  ;;  %v19681_v46 = vsub.f32 %v12585_v55, %v19653_v38 }
 0x3be   :  { %14741 = vmatprep.subr.mxu1 %v25671_v24  ;;  %14699 = vmatpush3.msra.mxu0 %v4437_v62  ;;  %v19670_v62 = vand.u32 4294901760, %v12584_v20 }
 0x3bf   :  { %14742 = vmatpush3.msra.mxu1 %v19343_v7  ;;  %14700 = vmatprep.subr.mxu0 %v25671_v24  ;;  %v5070_v7 = vsub.f32 %v19635_v0, %v5069_v10 }
 0x3c0   :  { %14743 = vmatprep.subr.mxu1 %v25671_v24  ;;  %14701 = vmatpush3.msra.mxu0 %v4444_v35  ;;  %v19675_v35 = vsub.f32 %v12587_v11, %v19649_v31  ;;  %v19691_v30 = vsub.f32 %v12584_v20, %v19670_v62  ;;  %v12576_v20 = vld [vmem:[%s24657_s3 + $0x110] sm:$0xff] }
 0x3c1   :  { %14744 = vmatpush3.msra.mxu1 %v19355_v6  ;;  %14702 = vmatprep.subr.mxu0 %v25671_v24  ;;  %v19695_v6 = vsub.f32 %v12583_v4, %v19672_v53 }
 0x3c2   :  { %14745 = vmatprep.subr.mxu1 %v25671_v24  ;;  %14703 = vmatpush3.msra.mxu0 %v4451_v29  ;;  %v19678_v29 = vsub.f32 %v12586_v12, %v19651_v50 }
 0x3c3   :  { %14746 = vmatpush3.msra.mxu1 %v19370_v59  ;;  %14704 = vmatprep.subr.mxu0 %v25671_v24  ;;  %v5097_v59 = vand.u32 4294901760, %v19681_v46  ;;  %v5111_v47 = vand.u32 4294901760, %v19695_v6 }
 0x3c4   :  { %14747 = vmatprep.subr.mxu1 %v25671_v24  ;;  %14705 = vmatpush3.msra.mxu0 %v4458_v41  ;;  %v5076_v41 = vand.u32 4294901760, %v19667_v33  ;;  %v5090_v25 = vand.u32 4294901760, %v19678_v29 }
 0x3c5   :  { %14748 = vmatpush3.msra.mxu1 %v19387_v52  ;;  %14706 = vmatprep.subr.mxu0 %v25671_v24  ;;  %v5104_v52 = vand.u32 4294901760, %v19691_v30  ;;  %v5112_v36 = vsub.f32 %v19695_v6, %v5111_v47 }
 0x3c6   :  { %14749 = vmatprep.subr.mxu1 %v25671_v24  ;;  %14707 = vmatpush3.msra.mxu0 %v4465_v9  ;;  %v5083_v9 = vand.u32 4294901760, %v19675_v35  ;;  %v5077_v19 = vsub.f32 %v19667_v33, %v5076_v41  ;;  %v5091_v43 = vsub.f32 %v19678_v29, %v5090_v25 }
 0x3c7   :  { %14750 = vmatpush3.msra.mxu1 %v19397_v16  ;;  %14708 = vmatprep.subr.mxu0 %v25671_v24  ;;  %v5105_v1 = vsub.f32 %v19691_v30, %v5104_v52  ;;  %v5113_v5 = vand.u32 4294901760, %v5112_v36 }
 0x3c8   :  { %14751 = vmatprep.subr.mxu1 %v25671_v24  ;;  %14709 = vmatpush3.msra.mxu0 %v4472_v39  ;;  %v5071_v39 = vand.u32 4294901760, %v5070_v7  ;;  %v5084_v16 = vsub.f32 %v19675_v35, %v5083_v9  ;;  %v5078_v56 = vand.u32 4294901760, %v5077_v19  ;;  %v5092_v42 = vand.u32 4294901760, %v5091_v43 }
 0x3c9   :  { %14752 = vmatpush3.msra.mxu1 %v19413_v18  ;;  %14710 = vmatprep.subr.mxu0 %v25671_v24  ;;  %v5098_v18 = vsub.f32 %v19681_v46, %v5097_v59  ;;  %v5106_v32 = vand.u32 4294901760, %v5105_v1  ;;  %v12574_v1 = vld [vmem:[%s24657_s3 + $0x100] sm:$0xff] }
 0x3ca   :  { %14753 = vmatprep.subr.mxu1 %v25671_v24  ;;  %14711 = vmatpush3.msra.mxu0 %v4479_v3  ;;  %v19707_v3 = vsub.f32 %v12582_v22, %v19684_v14 }
 0x3cb   :  { %14754 = vmatpush3.msra.mxu1 %v19426_v61  ;;  %14755 = vmatprep.mubr.msk.f32.mxu1 %vm16022_vm0, %v25671_v24  ;;  %v5085_v61 = vand.u32 4294901760, %v5084_v16  ;;  %v5099_v26 = vand.u32 4294901760, %v5098_v18  ;;  %v12575_v16 = vld [vmem:[%s24657_s3 + $0x108] sm:$0xff] }
 0x3cc   :  { %14712 = vmatprep.subr.mxu0 %v25671_v24  ;;  %14756 = vmatmul.mubr.f32.vlgmr.msra.gmra.mxu1 %v19459_v27  ;;  %v5118_v21 = vand.u32 4294901760, %v19707_v3 }
 0x3cd   :  { %14713 = vmatpush3.msra.mxu0 %v25696_v54  ;;  %14720 = vmatprep.mubr.msk.f32.mxu0 %vm16022_vm0, %v25671_v24  ;;  %v5132_v54 = vand.u32 4294901760, %v19763_v15 }
 0x3ce   :  { %14714 = vmatprep.subr.mxu0 %v25671_v24  ;;  %14793 = vmatprep.subr.mxu1 %v25671_v24  ;;  %v5119_v17 = vsub.f32 %v19707_v3, %v5118_v21 }
 0x3cf   :  { %14715 = vmatpush3.msra.mxu0 %v25697_v51  ;;  %14825 = vmatprep.mubr.msk.f32.mxu1 %vm16022_vm0, %v25671_v24  ;;  %v19778_v51 = vsub.f32 %v12579_v57, %v19765_v23  ;;  %v5133_v58 = vsub.f32 %v19763_v15, %v5132_v54 }
 0x3d0   :  { %14716 = vmatprep.subr.mxu0 %v25671_v24  ;;  %14794 = vmatpush3.msra.mxu1 %v5071_v39  ;;  %v5120_v48 = vand.u32 4294901760, %v5119_v17  ;;  %v19807_v39 = vand.u32 4294901760, %v12576_v20 }
 0x3d1   :  { %14717 = vmatpush3.msra.mxu0 %v25698_v37  ;;  %14795 = vmatprep.subr.mxu1 %v25671_v24  ;;  %v19780_v37 = vand.u32 4294901760, %v12578_v63  ;;  %v5139_v11 = vand.u32 4294901760, %v19778_v51  ;;  %v5134_v4 = vand.u32 4294901760, %v5133_v58 }
 0x3d2   :  { %14718 = vmatprep.subr.mxu0 %v25671_v24  ;;  %14796 = vmatpush3.msra.mxu1 %v5078_v56  ;;  %v19821_v18 = vsub.f32 %v12576_v20, %v19807_v39 }
 0x3d3   :  { %14719 = vmatpush3.msra.mxu0 %v25699_v2  ;;  %14797 = vmatprep.subr.mxu1 %v25671_v24  ;;  %v12577_v2 = vld [vmem:[%s24657_s3 + $0x118] sm:$0xff]  ;;  %v19793_v12 = vsub.f32 %v12578_v63, %v19780_v37  ;;  %v5140_v22 = vsub.f32 %v19778_v51, %v5139_v11 }
 0x3d4   :  { %14721 = vmatmul.mubr.f32.vlgmr.msra.gmra.mxu0 %v19459_v27  ;;  %14758 = vmatprep.subr.mxu0 %v25671_v24  ;;  %v5125_v27 = vand.u32 4294901760, %v19751_v45  ;;  %v19797_v55 = vand.u32 4294901760, %v12577_v2  ;;  %v24975_v36 = vand.u32 4294901760, %v19821_v18 }
 0x3d5   :  { %14790 = vmatprep.mubr.msk.f32.mxu0 %vm16022_vm0, %v25671_v24  ;;  %14759 = vmatpush3.msra.mxu0 %v19629_v13  ;;  %v5146_v7 = vand.u32 4294901760, %v19793_v12  ;;  %v5141_v43 = vand.u32 4294901760, %v5140_v22 }
 0x3d6   :  { %14760 = vmatprep.subr.mxu0 %v25671_v24  ;;  %14798 = vmatpush3.msra.mxu1 %v5085_v61  ;;  %v5126_v49 = vsub.f32 %v19751_v45, %v5125_v27  ;;  %v19811_v19 = vsub.f32 %v12577_v2, %v19797_v55  ;;  %v19823_v61 = vand.u32 4294901760, %v12575_v16  ;;  %v5161_v28 = vsub.f32 %v19821_v18, %v24975_v36 }
 0x3d7   :  { %14761 = vmatpush3.msra.mxu0 %v19637_v40  ;;  %14799 = vmatprep.subr.mxu1 %v25671_v24  ;;  %v5147_v56 = vsub.f32 %v19793_v12, %v5146_v7 }
 0x3d8   :  { %14762 = vmatprep.subr.mxu0 %v25671_v24  ;;  %14800 = vmatpush3.msra.mxu1 %v5092_v42  ;;  %v5127_v44 = vand.u32 4294901760, %v5126_v49  ;;  %v24976_v42 = vand.u32 4294901760, %v19811_v19  ;;  %v19834_v60 = vsub.f32 %v12575_v16, %v19823_v61  ;;  %v5162_v63 = vand.u32 4294901760, %v5161_v28  ;;  %v12573_v28 = vld [vmem:[%s24659_s4 + $0x1] ss:$0 sm:$0xff] }
 0x3d9   :  { %14763 = vmatpush3.msra.mxu0 %v19649_v31  ;;  %14801 = vmatprep.subr.mxu1 %v25671_v24 }
 0x3da   :  { %14764 = vmatprep.subr.mxu0 %v25671_v24  ;;  %14802 = vmatpush3.msra.mxu1 %v5099_v26  ;;  %v5148_v26 = vand.u32 4294901760, %v5147_v56  ;;  %v5154_v17 = vsub.f32 %v19811_v19, %v24976_v42 }
 0x3db   :  { %14765 = vmatpush3.msra.mxu0 %v19651_v50  ;;  %14803 = vmatprep.subr.mxu1 %v25671_v24 }
 0x3dc   :  { %14766 = vmatprep.subr.mxu0 %v25671_v24  ;;  %14804 = vmatpush3.msra.mxu1 %v5106_v32  ;;  %v19836_v32 = vand.u32 4294901760, %v12574_v1 }
 0x3dd   :  { %14767 = vmatpush3.msra.mxu0 %v19653_v38  ;;  %14805 = vmatprep.subr.mxu1 %v25671_v24 }
 0x3de   :  { %14768 = vmatprep.subr.mxu0 %v25671_v24  ;;  %14806 = vmatpush3.msra.mxu1 %v5113_v5  ;;  %v24974_v5 = vand.u32 4294901760, %v19834_v60  ;;  %v19849_v57 = vsub.f32 %v12574_v1, %v19836_v32 }
 0x3df   :  { %14769 = vmatpush3.msra.mxu0 %v19670_v62  ;;  %14807 = vmatprep.subr.mxu1 %v25671_v24 }
 0x3e0   :  { %14770 = vmatprep.subr.mxu0 %v25671_v24  ;;  %14808 = vmatpush3.msra.mxu1 %v5120_v48  ;;  %v5155_v48 = vand.u32 4294901760, %v5154_v17  ;;  %v5168_v49 = vsub.f32 %v19834_v60, %v24974_v5  ;;  %v24973_v2 = vand.u32 4294901760, %v19849_v57 }
 0x3e1   :  { %14771 = vmatpush3.msra.mxu0 %v19672_v53  ;;  %14809 = vmatprep.subr.mxu1 %v25671_v24 }
 0x3e2   :  { %14772 = vmatprep.subr.mxu0 %v25671_v24  ;;  %14810 = vmatpush3.msra.mxu1 %v5127_v44  ;;  %v5169_v44 = vand.u32 4294901760, %v5168_v49  ;;  %v5175_v58 = vsub.f32 %v19849_v57, %v24973_v2 }
 0x3e3   :  { %14773 = vmatpush3.msra.mxu0 %v19684_v14  ;;  %14811 = vmatprep.subr.mxu1 %v25671_v24 }
 0x3e4   :  { %14774 = vmatprep.subr.mxu0 %v25671_v24  ;;  %14812 = vmatpush3.msra.mxu1 %v5134_v4  ;;  %v5176_v20 = vand.u32 4294901760, %v5175_v58 }
 0x3e5   :  { %14775 = vmatpush3.msra.mxu0 %v19742_v8  ;;  %14813 = vmatprep.subr.mxu1 %v25671_v24 }
 0x3e6   :  { %14776 = vmatprep.subr.mxu0 %v25671_v24  ;;  %14814 = vmatpush3.msra.mxu1 %v5141_v43 }
 0x3e7   :  { %14777 = vmatpush3.msra.mxu0 %v19753_v34  ;;  %14815 = vmatprep.subr.mxu1 %v25671_v24 }
 0x3e8   :  { %14778 = vmatprep.subr.mxu0 %v25671_v24  ;;  %14816 = vmatpush3.msra.mxu1 %v5148_v26 }
 0x3e9   :  { %14779 = vmatpush3.msra.mxu0 %v19765_v23  ;;  %14817 = vmatprep.subr.mxu1 %v25671_v24 }
 0x3ea   :  { %14780 = vmatprep.subr.mxu0 %v25671_v24  ;;  %14818 = vmatpush3.msra.mxu1 %v5155_v48 }
 0x3eb   :  { %14781 = vmatpush3.msra.mxu0 %v19780_v37  ;;  %14819 = vmatprep.subr.mxu1 %v25671_v24 }
 0x3ec   :  { %14782 = vmatprep.subr.mxu0 %v25671_v24  ;;  %14820 = vmatpush3.msra.mxu1 %v5162_v63 }
 0x3ed   :  { %14783 = vmatpush3.msra.mxu0 %v19797_v55  ;;  %14821 = vmatprep.subr.mxu1 %v25671_v24 }
 0x3ee   :  { %14784 = vmatprep.subr.mxu0 %v25671_v24  ;;  %14822 = vmatpush3.msra.mxu1 %v5169_v44 }
 0x3ef   :  { %14785 = vmatpush3.msra.mxu0 %v19807_v39  ;;  %14823 = vmatprep.subr.mxu1 %v25671_v24 }
 0x3f0   :  { %14786 = vmatprep.subr.mxu0 %v25671_v24  ;;  %14824 = vmatpush3.msra.mxu1 %v5176_v20 }
 0x3f1   :  { %14787 = vmatpush3.msra.mxu0 %v19823_v61  ;;  %14863 = vmatprep.subr.mxu1 %v25671_v24 }
 0x3f2   :  { %14788 = vmatprep.subr.mxu0 %v25671_v24 }
 0x3f3   :  { %14789 = vmatpush3.msra.mxu0 %v19836_v32 }
 0x3f4   :  { %14828 = vmatprep.subr.mxu0 %v25671_v24 }
 0x44a   :  { %v4546_v4 = vpop.f32.mrf.mxu1 }
 0x44c   :  { %v14617_v22 = vpop.f32.mrf.mxu1 }
 0x452   :  { %v4395_v16 = vpop.f32.mrf.mxu0 }
 0x453   :  { %v4396_v48 = vadd.f32 %v12573_v28, %v4395_v16 }
 0x454   :  { %v14582_v43 = vpop.f32.mrf.mxu0 }
 0x455   :  { %v4547_v49 = vadd.f32 %v4546_v4, %v4396_v48 }
 0x46a   :  { %v4739_v56 = vpop.f32.mrf.mxu1 }
 0x46c   :  { %v14687_v1 = vpop.f32.mrf.mxu1 }
 0x473   :  { %v4650_v26 = vpop.f32.mrf.mxu0 }
 0x474   :  { %v4651_v58 = vadd.f32 %v4650_v26, %v4547_v49  ;;  %v12599_v26 = vld [vmem:[%s24657_s3 + $0x1b8] sm:$0xff] }
 0x475   :  { %v14652_v17 = vpop.f32.mrf.mxu0  ;;  %v20152_v48 = vand.u32 4294901760, %v12599_v26 }
 0x476   :  { %v4740_v20 = vadd.f32 %v4739_v56, %v4651_v58 }
 0x48c   :  { %v4945_v63 = vpop.f32.mrf.mxu1 }
 0x48e   :  { %v14757_v44 = vpop.f32.mrf.mxu1 }
 0x48f   :  { %v20161_v44 = vsub.f32 %v12599_v26, %v20152_v48 }
 0x494   :  { %v4858_v2 = vpop.f32.mrf.mxu0 }
 0x495   :  { %v4859_v5 = vadd.f32 %v4858_v2, %v4740_v20  ;;  %v12597_v20 = vld [vmem:[%s24657_s3 + $0x1a8] sm:$0xff] }
 0x496   :  { %v14722_v36 = vpop.f32.mrf.mxu0 }
 0x497   :  { %v4946_v22 = vadd.f32 %v4945_v63, %v4859_v5  ;;  %v12598_v63 = vld [vmem:[%s24657_s3 + $0x1b0] sm:$0xff] }
 0x498   :  { %v20163_v58 = vand.u32 4294901760, %v12598_v63 }
 0x499   :  { %v4949_v42 = vmax.f32 %v4946_v22, 0.0 }
 0x49b   :  { %v19869_v43 = vand.u32 4294901760, %v4949_v42 }
 0x49d   :  { %v19872_v1 = vsub.f32 %v4949_v42, %v19869_v43  ;;  %14826 = vmatmul.mubr.f32.vlgmr.msra.gmra.mxu1 %v19869_v43 }
 0x49e   :  { %14864 = vmatpush3.msra.mxu1 %v19629_v13  ;;  %14895 = vmatprep.mubr.msk.f32.mxu1 %vm16022_vm0, %v25671_v24 }
 0x49f   :  { %v5058_v4 = vand.u32 4294901760, %v19872_v1  ;;  %14865 = vmatprep.subr.mxu1 %v25671_v24 }
 0x4a0   :  { %14866 = vmatpush3.msra.mxu1 %v19637_v40 }
 0x4a1   :  { %14867 = vmatprep.subr.mxu1 %v25671_v24  ;;  %v5059_v36 = vsub.f32 %v19872_v1, %v5058_v4 }
 0x4a2   :  { %14868 = vmatpush3.msra.mxu1 %v19649_v31 }
 0x4a3   :  { %14869 = vmatprep.subr.mxu1 %v25671_v24  ;;  %v5060_v42 = vand.u32 4294901760, %v5059_v36  ;;  %v12596_v36 = vld [vmem:[%s24657_s3 + $0x1a0] sm:$0xff] }
 0x4a4   :  { %14870 = vmatpush3.msra.mxu1 %v19651_v50 }
 0x4a5   :  { %14871 = vmatprep.subr.mxu1 %v25671_v24  ;;  %14791 = vmatmul.mubr.f32.vlgmr.msra.gmra.mxu0 %v5060_v42 }
 0x4a6   :  { %14829 = vmatpush3.msra.mxu0 %v19635_v0  ;;  %14872 = vmatpush3.msra.mxu1 %v19653_v38  ;;  %v25701_v0 = vand.u32 4294901760, %v19821_v18 }
 0x4a7   :  { %14830 = vmatprep.subr.mxu0 %v25671_v24  ;;  %14873 = vmatprep.subr.mxu1 %v25671_v24 }
 0x4a8   :  { %14831 = vmatpush3.msra.mxu0 %v19667_v33  ;;  %14874 = vmatpush3.msra.mxu1 %v19670_v62 }
 0x4a9   :  { %14832 = vmatprep.subr.mxu0 %v25671_v24  ;;  %14875 = vmatprep.subr.mxu1 %v25671_v24 }
 0x4aa   :  { %14833 = vmatpush3.msra.mxu0 %v19675_v35  ;;  %14876 = vmatpush3.msra.mxu1 %v19672_v53  ;;  %v12604_v35 = vld [vmem:[%s24657_s3 + $0x1e0] sm:$0xff] }
 0x4ab   :  { %14834 = vmatprep.subr.mxu0 %v25671_v24  ;;  %14877 = vmatprep.subr.mxu1 %v25671_v24 }
 0x4ac   :  { %14835 = vmatpush3.msra.mxu0 %v19678_v29  ;;  %14878 = vmatpush3.msra.mxu1 %v19684_v14  ;;  %v12603_v29 = vld [vmem:[%s24657_s3 + $0x1d8] sm:$0xff] }
 0x4ad   :  { %14836 = vmatprep.subr.mxu0 %v25671_v24  ;;  %14879 = vmatprep.subr.mxu1 %v25671_v24 }
 0x4ae   :  { %14837 = vmatpush3.msra.mxu0 %v19681_v46  ;;  %14880 = vmatpush3.msra.mxu1 %v19742_v8 }
 0x4af   :  { %14838 = vmatprep.subr.mxu0 %v25671_v24  ;;  %14881 = vmatprep.subr.mxu1 %v25671_v24 }
 0x4b0   :  { %14839 = vmatpush3.msra.mxu0 %v19691_v30  ;;  %14882 = vmatpush3.msra.mxu1 %v19753_v34  ;;  %v12602_v30 = vld [vmem:[%s24657_s3 + $0x1d0] sm:$0xff] }
 0x4b1   :  { %14840 = vmatprep.subr.mxu0 %v25671_v24  ;;  %14883 = vmatprep.subr.mxu1 %v25671_v24 }
 0x4b2   :  { %14841 = vmatpush3.msra.mxu0 %v19695_v6  ;;  %14884 = vmatpush3.msra.mxu1 %v19765_v23  ;;  %v12601_v6 = vld [vmem:[%s24657_s3 + $0x1c8] sm:$0xff] }
 0x4b3   :  { %14842 = vmatprep.subr.mxu0 %v25671_v24  ;;  %14885 = vmatprep.subr.mxu1 %v25671_v24 }
 0x4b4   :  { %14843 = vmatpush3.msra.mxu0 %v19707_v3  ;;  %14886 = vmatpush3.msra.mxu1 %v19780_v37  ;;  %v20082_v3 = vand.u32 4294901760, %v12601_v6 }
 0x4b5   :  { %14844 = vmatprep.subr.mxu0 %v25671_v24  ;;  %14887 = vmatprep.subr.mxu1 %v25671_v24 }
 0x4b6   :  { %14845 = vmatpush3.msra.mxu0 %v19751_v45  ;;  %14888 = vmatpush3.msra.mxu1 %v19797_v55 }
 0x4b7   :  { %14846 = vmatprep.subr.mxu0 %v25671_v24  ;;  %14889 = vmatprep.subr.mxu1 %v25671_v24 }
 0x4b8   :  { %14847 = vmatpush3.msra.mxu0 %v19763_v15  ;;  %14890 = vmatpush3.msra.mxu1 %v19807_v39 }
 0x4b9   :  { %14848 = vmatprep.subr.mxu0 %v25671_v24  ;;  %14891 = vmatprep.subr.mxu1 %v25671_v24 }
 0x4ba   :  { %14849 = vmatpush3.msra.mxu0 %v19778_v51  ;;  %14892 = vmatpush3.msra.mxu1 %v19823_v61 }
 0x4bb   :  { %14850 = vmatprep.subr.mxu0 %v25671_v24  ;;  %14893 = vmatprep.subr.mxu1 %v25671_v24 }
 0x4bc   :  { %14851 = vmatpush3.msra.mxu0 %v19793_v12  ;;  %14894 = vmatpush3.msra.mxu1 %v19836_v32 }
 0x4bd   :  { %14852 = vmatprep.subr.mxu0 %v25671_v24  ;;  %14896 = vmatmul.mubr.f32.vlgmr.msra.gmra.mxu1 %v5058_v4  ;;  %v20175_v4 = vand.u32 4294901760, %v12597_v20 }
 0x4be   :  { %14933 = vmatprep.subr.mxu1 %v25671_v24  ;;  %14853 = vmatpush3.msra.mxu0 %v19811_v19 }
 0x4bf   :  { %14934 = vmatpush3.msra.mxu1 %v19629_v13  ;;  %14854 = vmatprep.subr.mxu0 %v25671_v24  ;;  %v25700_v13 = vand.u32 4294901760, %v19811_v19 }
 0x4c0   :  { %14935 = vmatprep.subr.mxu1 %v25671_v24  ;;  %14855 = vmatpush3.msra.mxu0 %v19821_v18 }
 0x4c1   :  { %14936 = vmatpush3.msra.mxu1 %v19637_v40  ;;  %14856 = vmatprep.subr.mxu0 %v25671_v24  ;;  %v25702_v40 = vand.u32 4294901760, %v19834_v60 }
 0x4c2   :  { %14937 = vmatprep.subr.mxu1 %v25671_v24  ;;  %14857 = vmatpush3.msra.mxu0 %v19834_v60 }
 0x4c3   :  { %14938 = vmatpush3.msra.mxu1 %v19649_v31  ;;  %14858 = vmatprep.subr.mxu0 %v25671_v24  ;;  %v25703_v31 = vand.u32 4294901760, %v19849_v57 }
 0x4c4   :  { %14939 = vmatprep.subr.mxu1 %v25671_v24  ;;  %14859 = vmatpush3.msra.mxu0 %v19849_v57 }
 0x4c5   :  { %14860 = vmatprep.mubr.msk.f32.mxu0 %vm16022_vm0, %v25671_v24  ;;  %14940 = vmatpush3.msra.mxu1 %v19651_v50  ;;  %v12607_v50 = vld [vmem:[%s24657_s3 + $0x1f8] sm:$0xff] }
 0x4c6   :  { %14861 = vmatmul.mubr.f32.vlgmr.msra.gmra.mxu0 %v19872_v1  ;;  %14898 = vmatprep.subr.mxu0 %v25671_v24  ;;  %v20173_v1 = vsub.f32 %v12598_v63, %v20163_v58 }
 0x4c7   :  { %14941 = vmatprep.subr.mxu1 %v25671_v24  ;;  %14899 = vmatpush3.msra.mxu0 %v5069_v10  ;;  %v12606_v10 = vld [vmem:[%s24657_s3 + $0x1f0] sm:$0xff] }
 0x4c8   :  { %14942 = vmatpush3.msra.mxu1 %v19653_v38  ;;  %14900 = vmatprep.subr.mxu0 %v25671_v24  ;;  %v20039_v38 = vand.u32 4294901760, %v12607_v50 }
 0x4c9   :  { %14943 = vmatprep.subr.mxu1 %v25671_v24  ;;  %14901 = vmatpush3.msra.mxu0 %v5076_v41  ;;  %v20063_v41 = vand.u32 4294901760, %v12603_v29 }
 0x4ca   :  { %14944 = vmatpush3.msra.mxu1 %v19670_v62  ;;  %14902 = vmatprep.subr.mxu0 %v25671_v24  ;;  %v20045_v33 = vsub.f32 %v12607_v50, %v20039_v38  ;;  %v20047_v62 = vand.u32 4294901760, %v12606_v10 }
 0x4cb   :  { %14945 = vmatprep.subr.mxu1 %v25671_v24  ;;  %14903 = vmatpush3.msra.mxu0 %v5083_v9  ;;  %v12600_v9 = vld [vmem:[%s24657_s3 + $0x1c0] sm:$0xff] }
 0x4cc   :  { %14946 = vmatpush3.msra.mxu1 %v19672_v53  ;;  %14904 = vmatprep.subr.mxu0 %v25671_v24  ;;  %v12605_v53 = vld [vmem:[%s24657_s3 + $0x1e8] sm:$0xff]  ;;  %v20094_v45 = vand.u32 4294901760, %v12600_v9 }
 0x4cd   :  { %14947 = vmatprep.subr.mxu1 %v25671_v24  ;;  %14905 = vmatpush3.msra.mxu0 %v5090_v25  ;;  %v20059_v46 = vand.u32 4294901760, %v12605_v53  ;;  %v5736_v25 = vand.u32 4294901760, %v20045_v33 }
 0x4ce   :  { %14948 = vmatpush3.msra.mxu1 %v19684_v14  ;;  %14906 = vmatprep.subr.mxu0 %v25671_v24  ;;  %v20061_v14 = vand.u32 4294901760, %v12604_v35 }
 0x4cf   :  { %14949 = vmatprep.subr.mxu1 %v25671_v24  ;;  %14907 = vmatpush3.msra.mxu0 %v5097_v59  ;;  %v20077_v59 = vsub.f32 %v12606_v10, %v20047_v62 }
 0x4d0   :  { %14950 = vmatpush3.msra.mxu1 %v19742_v8  ;;  %14908 = vmatprep.subr.mxu0 %v25671_v24  ;;  %v20091_v8 = vsub.f32 %v12603_v29, %v20063_v41 }
 0x4d1   :  { %14951 = vmatprep.subr.mxu1 %v25671_v24  ;;  %14909 = vmatpush3.msra.mxu0 %v5104_v52  ;;  %v20080_v52 = vand.u32 4294901760, %v12602_v30 }
 0x4d2   :  { %14952 = vmatpush3.msra.mxu1 %v19753_v34  ;;  %14910 = vmatprep.subr.mxu0 %v25671_v24  ;;  %v5737_v34 = vsub.f32 %v20045_v33, %v5736_v25 }
 0x4d3   :  { %14953 = vmatprep.subr.mxu1 %v25671_v24  ;;  %14911 = vmatpush3.msra.mxu0 %v5111_v47  ;;  %v20085_v47 = vsub.f32 %v12605_v53, %v20059_v46  ;;  %v20101_v15 = vsub.f32 %v12602_v30, %v20080_v52  ;;  %v12594_v30 = vld [vmem:[%s24657_s3 + $0x190] sm:$0xff] }
 0x4d4   :  { %14954 = vmatpush3.msra.mxu1 %v19765_v23  ;;  %14912 = vmatprep.subr.mxu0 %v25671_v24  ;;  %v20105_v23 = vsub.f32 %v12601_v6, %v20082_v3 }
 0x4d5   :  { %14955 = vmatprep.subr.mxu1 %v25671_v24  ;;  %14913 = vmatpush3.msra.mxu0 %v5118_v21  ;;  %v20088_v21 = vsub.f32 %v12604_v35, %v20061_v14 }
 0x4d6   :  { %14956 = vmatpush3.msra.mxu1 %v19780_v37  ;;  %14914 = vmatprep.subr.mxu0 %v25671_v24  ;;  %v5764_v37 = vand.u32 4294901760, %v20091_v8  ;;  %v5778_v60 = vand.u32 4294901760, %v20105_v23 }
 0x4d7   :  { %14957 = vmatprep.subr.mxu1 %v25671_v24  ;;  %14915 = vmatpush3.msra.mxu0 %v5125_v27  ;;  %v5743_v27 = vand.u32 4294901760, %v20077_v59  ;;  %v5757_v51 = vand.u32 4294901760, %v20088_v21 }
 0x4d8   :  { %14958 = vmatpush3.msra.mxu1 %v19797_v55  ;;  %14916 = vmatprep.subr.mxu0 %v25671_v24  ;;  %v5771_v55 = vand.u32 4294901760, %v20101_v15  ;;  %v5779_v56 = vsub.f32 %v20105_v23, %v5778_v60 }
 0x4d9   :  { %14959 = vmatprep.subr.mxu1 %v25671_v24  ;;  %14917 = vmatpush3.msra.mxu0 %v5132_v54  ;;  %v5750_v54 = vand.u32 4294901760, %v20085_v47  ;;  %v5744_v12 = vsub.f32 %v20077_v59, %v5743_v27  ;;  %v5758_v19 = vsub.f32 %v20088_v21, %v5757_v51 }
 0x4da   :  { %14960 = vmatpush3.msra.mxu1 %v19807_v39  ;;  %14918 = vmatprep.subr.mxu0 %v25671_v24  ;;  %v5772_v57 = vsub.f32 %v20101_v15, %v5771_v55  ;;  %v5780_v49 = vand.u32 4294901760, %v5779_v56 }
 0x4db   :  { %14961 = vmatprep.subr.mxu1 %v25671_v24  ;;  %14919 = vmatpush3.msra.mxu0 %v5139_v11  ;;  %v5738_v11 = vand.u32 4294901760, %v5737_v34  ;;  %v5751_v39 = vsub.f32 %v20085_v47, %v5750_v54  ;;  %v5745_v18 = vand.u32 4294901760, %v5744_v12  ;;  %v5759_v5 = vand.u32 4294901760, %v5758_v19 }
 0x4dc   :  { %14962 = vmatpush3.msra.mxu1 %v19823_v61  ;;  %14920 = vmatprep.subr.mxu0 %v25671_v24  ;;  %v5765_v61 = vsub.f32 %v20091_v8, %v5764_v37  ;;  %v5773_v17 = vand.u32 4294901760, %v5772_v57  ;;  %v12592_v57 = vld [vmem:[%s24657_s3 + $0x180] sm:$0xff] }
 0x4dd   :  { %14963 = vmatprep.subr.mxu1 %v25671_v24  ;;  %14921 = vmatpush3.msra.mxu0 %v5146_v7  ;;  %v20117_v7 = vsub.f32 %v12600_v9, %v20094_v45 }
 0x4de   :  { %14964 = vmatpush3.msra.mxu1 %v19836_v32  ;;  %14965 = vmatprep.mubr.msk.f32.mxu1 %vm16022_vm0, %v25671_v24  ;;  %v5752_v32 = vand.u32 4294901760, %v5751_v39  ;;  %v5766_v16 = vand.u32 4294901760, %v5765_v61  ;;  %v12593_v39 = vld [vmem:[%s24657_s3 + $0x188] sm:$0xff] }
 0x4df   :  { %14922 = vmatprep.subr.mxu0 %v25671_v24  ;;  %14966 = vmatmul.mubr.f32.vlgmr.msra.gmra.mxu1 %v19869_v43  ;;  %v5785_v2 = vand.u32 4294901760, %v20117_v7 }
 0x4e0   :  { %14923 = vmatpush3.msra.mxu0 %v25700_v13  ;;  %14930 = vmatprep.mubr.msk.f32.mxu0 %vm16022_vm0, %v25671_v24  ;;  %v5799_v13 = vand.u32 4294901760, %v20173_v1 }
 0x4e1   :  { %14924 = vmatprep.subr.mxu0 %v25671_v24  ;;  %15003 = vmatprep.subr.mxu1 %v25671_v24  ;;  %v5786_v28 = vsub.f32 %v20117_v7, %v5785_v2 }
 0x4e2   :  { %14925 = vmatpush3.msra.mxu0 %v25701_v0  ;;  %15035 = vmatprep.mubr.msk.f32.mxu1 %vm16022_vm0, %v25671_v24  ;;  %v20188_v0 = vsub.f32 %v12597_v20, %v20175_v4  ;;  %v5800_v10 = vsub.f32 %v20173_v1, %v5799_v13 }
 0x4e3   :  { %14926 = vmatprep.subr.mxu0 %v25671_v24  ;;  %15004 = vmatpush3.msra.mxu1 %v5738_v11  ;;  %v5787_v22 = vand.u32 4294901760, %v5786_v28  ;;  %v20217_v11 = vand.u32 4294901760, %v12594_v30 }
 0x4e4   :  { %14927 = vmatpush3.msra.mxu0 %v25702_v40  ;;  %15005 = vmatprep.subr.mxu1 %v25671_v24  ;;  %v20190_v40 = vand.u32 4294901760, %v12596_v36  ;;  %v5806_v53 = vand.u32 4294901760, %v20188_v0  ;;  %v5801_v6 = vand.u32 4294901760, %v5800_v10 }
 0x4e5   :  { %14928 = vmatprep.subr.mxu0 %v25671_v24  ;;  %15006 = vmatpush3.msra.mxu1 %v5745_v18  ;;  %v20231_v61 = vsub.f32 %v12594_v30, %v20217_v11 }
 0x4e6   :  { %14929 = vmatpush3.msra.mxu0 %v25703_v31  ;;  %15007 = vmatprep.subr.mxu1 %v25671_v24  ;;  %v12595_v31 = vld [vmem:[%s24657_s3 + $0x198] sm:$0xff]  ;;  %v20203_v35 = vsub.f32 %v12596_v36, %v20190_v40  ;;  %v5807_v9 = vsub.f32 %v20188_v0, %v5806_v53 }
 0x4e7   :  { %14931 = vmatmul.mubr.f32.vlgmr.msra.gmra.mxu0 %v19869_v43  ;;  %14968 = vmatprep.subr.mxu0 %v25671_v24  ;;  %v5792_v43 = vand.u32 4294901760, %v20161_v44  ;;  %v20207_v29 = vand.u32 4294901760, %v12595_v31  ;;  %v24979_v56 = vand.u32 4294901760, %v20231_v61 }
 0x4e8   :  { %15000 = vmatprep.mubr.msk.f32.mxu0 %vm16022_vm0, %v25671_v24  ;;  %14969 = vmatpush3.msra.mxu0 %v20039_v38  ;;  %v5813_v34 = vand.u32 4294901760, %v20203_v35  ;;  %v5808_v19 = vand.u32 4294901760, %v5807_v9 }
 0x4e9   :  { %14970 = vmatprep.subr.mxu0 %v25671_v24  ;;  %15008 = vmatpush3.msra.mxu1 %v5752_v32  ;;  %v5793_v42 = vsub.f32 %v20161_v44, %v5792_v43  ;;  %v20221_v12 = vsub.f32 %v12595_v31, %v20207_v29  ;;  %v20233_v32 = vand.u32 4294901760, %v12593_v39  ;;  %v5828_v63 = vsub.f32 %v20231_v61, %v24979_v56 }
 0x4ea   :  { %14971 = vmatpush3.msra.mxu0 %v20047_v62  ;;  %15009 = vmatprep.subr.mxu1 %v25671_v24  ;;  %v5814_v18 = vsub.f32 %v20203_v35, %v5813_v34 }
 0x4eb   :  { %14972 = vmatprep.subr.mxu0 %v25671_v24  ;;  %15010 = vmatpush3.msra.mxu1 %v5759_v5  ;;  %v5794_v50 = vand.u32 4294901760, %v5793_v42  ;;  %v24980_v5 = vand.u32 4294901760, %v20221_v12  ;;  %v20244_v26 = vsub.f32 %v12593_v39, %v20233_v32  ;;  %v5829_v36 = vand.u32 4294901760, %v5828_v63  ;;  %v12591_v63 = vld [vmem:[%s24659_s4 + $0x2] ss:$0 sm:$0xff] }
 0x4ec   :  { %14973 = vmatpush3.msra.mxu0 %v20059_v46  ;;  %15011 = vmatprep.subr.mxu1 %v25671_v24 }
 0x4ed   :  { %14974 = vmatprep.subr.mxu0 %v25671_v24  ;;  %15012 = vmatpush3.msra.mxu1 %v5766_v16  ;;  %v5815_v16 = vand.u32 4294901760, %v5814_v18  ;;  %v5821_v28 = vsub.f32 %v20221_v12, %v24980_v5 }
 0x4ee   :  { %14975 = vmatpush3.msra.mxu0 %v20061_v14  ;;  %15013 = vmatprep.subr.mxu1 %v25671_v24 }
 0x4ef   :  { %14976 = vmatprep.subr.mxu0 %v25671_v24  ;;  %15014 = vmatpush3.msra.mxu1 %v5773_v17  ;;  %v20246_v17 = vand.u32 4294901760, %v12592_v57 }
 0x4f0   :  { %14977 = vmatpush3.msra.mxu0 %v20063_v41  ;;  %15015 = vmatprep.subr.mxu1 %v25671_v24 }
 0x4f1   :  { %14978 = vmatprep.subr.mxu0 %v25671_v24  ;;  %15016 = vmatpush3.msra.mxu1 %v5780_v49  ;;  %v24978_v49 = vand.u32 4294901760, %v20244_v26  ;;  %v20259_v20 = vsub.f32 %v12592_v57, %v20246_v17 }
 0x4f2   :  { %14979 = vmatpush3.msra.mxu0 %v20080_v52  ;;  %15017 = vmatprep.subr.mxu1 %v25671_v24 }
 0x4f3   :  { %14980 = vmatprep.subr.mxu0 %v25671_v24  ;;  %15018 = vmatpush3.msra.mxu1 %v5787_v22  ;;  %v5822_v22 = vand.u32 4294901760, %v5821_v28  ;;  %v5835_v42 = vsub.f32 %v20244_v26, %v24978_v49  ;;  %v24977_v31 = vand.u32 4294901760, %v20259_v20 }
 0x4f4   :  { %14981 = vmatpush3.msra.mxu0 %v20082_v3  ;;  %15019 = vmatprep.subr.mxu1 %v25671_v24 }
 0x4f5   :  { %14982 = vmatprep.subr.mxu0 %v25671_v24  ;;  %15020 = vmatpush3.msra.mxu1 %v5794_v50  ;;  %v5836_v50 = vand.u32 4294901760, %v5835_v42  ;;  %v5842_v10 = vsub.f32 %v20259_v20, %v24977_v31 }
 0x4f6   :  { %14983 = vmatpush3.msra.mxu0 %v20094_v45  ;;  %15021 = vmatprep.subr.mxu1 %v25671_v24 }
 0x4f7   :  { %14984 = vmatprep.subr.mxu0 %v25671_v24  ;;  %15022 = vmatpush3.msra.mxu1 %v5801_v6  ;;  %v5843_v30 = vand.u32 4294901760, %v5842_v10 }
 0x4f8   :  { %14985 = vmatpush3.msra.mxu0 %v20152_v48  ;;  %15023 = vmatprep.subr.mxu1 %v25671_v24 }
 0x4f9   :  { %14986 = vmatprep.subr.mxu0 %v25671_v24  ;;  %15024 = vmatpush3.msra.mxu1 %v5808_v19 }
 0x4fa   :  { %14987 = vmatpush3.msra.mxu0 %v20163_v58  ;;  %15025 = vmatprep.subr.mxu1 %v25671_v24 }
 0x4fb   :  { %14988 = vmatprep.subr.mxu0 %v25671_v24  ;;  %15026 = vmatpush3.msra.mxu1 %v5815_v16 }
 0x4fc   :  { %14989 = vmatpush3.msra.mxu0 %v20175_v4  ;;  %15027 = vmatprep.subr.mxu1 %v25671_v24 }
 0x4fd   :  { %14990 = vmatprep.subr.mxu0 %v25671_v24  ;;  %15028 = vmatpush3.msra.mxu1 %v5822_v22 }
 0x4fe   :  { %14991 = vmatpush3.msra.mxu0 %v20190_v40  ;;  %15029 = vmatprep.subr.mxu1 %v25671_v24 }
 0x4ff   :  { %14992 = vmatprep.subr.mxu0 %v25671_v24  ;;  %15030 = vmatpush3.msra.mxu1 %v5829_v36 }
 0x500   :  { %14993 = vmatpush3.msra.mxu0 %v20207_v29  ;;  %15031 = vmatprep.subr.mxu1 %v25671_v24 }
 0x501   :  { %14994 = vmatprep.subr.mxu0 %v25671_v24  ;;  %15032 = vmatpush3.msra.mxu1 %v5836_v50 }
 0x502   :  { %14995 = vmatpush3.msra.mxu0 %v20217_v11  ;;  %15033 = vmatprep.subr.mxu1 %v25671_v24 }
 0x503   :  { %14996 = vmatprep.subr.mxu0 %v25671_v24  ;;  %15034 = vmatpush3.msra.mxu1 %v5843_v30 }
 0x504   :  { %14997 = vmatpush3.msra.mxu0 %v20233_v32  ;;  %15073 = vmatprep.subr.mxu1 %v25671_v24 }
 0x505   :  { %14998 = vmatprep.subr.mxu0 %v25671_v24 }
 0x506   :  { %14999 = vmatpush3.msra.mxu0 %v20246_v17 }
 0x507   :  { %15038 = vmatprep.subr.mxu0 %v25671_v24 }
 0x55d   :  { %v5213_v6 = vpop.f32.mrf.mxu1 }
 0x55f   :  { %v14827_v9 = vpop.f32.mrf.mxu1 }
 0x565   :  { %v5062_v39 = vpop.f32.mrf.mxu0 }
 0x566   :  { %v5063_v22 = vadd.f32 %v12591_v63, %v5062_v39 }
 0x567   :  { %v14792_v19 = vpop.f32.mrf.mxu0 }
 0x568   :  { %v5214_v42 = vadd.f32 %v5213_v6, %v5063_v22 }
 0x57d   :  { %v5406_v18 = vpop.f32.mrf.mxu1 }
 0x57f   :  { %v14897_v57 = vpop.f32.mrf.mxu1 }
 0x586   :  { %v5317_v16 = vpop.f32.mrf.mxu0 }
 0x587   :  { %v5318_v10 = vadd.f32 %v5317_v16, %v5214_v42  ;;  %v12617_v16 = vld [vmem:[%s24657_s3 + $0x238] sm:$0xff] }
 0x588   :  { %v14862_v28 = vpop.f32.mrf.mxu0  ;;  %v20562_v22 = vand.u32 4294901760, %v12617_v16 }
 0x589   :  { %v5407_v30 = vadd.f32 %v5406_v18, %v5318_v10 }
 0x59f   :  { %v5612_v36 = vpop.f32.mrf.mxu1 }
 0x5a1   :  { %v14967_v50 = vpop.f32.mrf.mxu1 }
 0x5a2   :  { %v20571_v50 = vsub.f32 %v12617_v16, %v20562_v22 }
 0x5a7   :  { %v5525_v31 = vpop.f32.mrf.mxu0 }
 0x5a8   :  { %v5526_v49 = vadd.f32 %v5525_v31, %v5407_v30  ;;  %v12615_v30 = vld [vmem:[%s24657_s3 + $0x228] sm:$0xff] }
 0x5a9   :  { %v14932_v56 = vpop.f32.mrf.mxu0 }
 0x5aa   :  { %v5613_v9 = vadd.f32 %v5612_v36, %v5526_v49  ;;  %v12616_v36 = vld [vmem:[%s24657_s3 + $0x230] sm:$0xff] }
 0x5ab   :  { %v20573_v10 = vand.u32 4294901760, %v12616_v36 }
 0x5ac   :  { %v5616_v5 = vmax.f32 %v5613_v9, 0.0 }
 0x5ae   :  { %v20279_v19 = vand.u32 4294901760, %v5616_v5 }
 0x5b0   :  { %v20282_v57 = vsub.f32 %v5616_v5, %v20279_v19  ;;  %15036 = vmatmul.mubr.f32.vlgmr.msra.gmra.mxu1 %v20279_v19 }
 0x5b1   :  { %15074 = vmatpush3.msra.mxu1 %v20039_v38  ;;  %15105 = vmatprep.mubr.msk.f32.mxu1 %vm16022_vm0, %v25671_v24 }
 0x5b2   :  { %v5725_v6 = vand.u32 4294901760, %v20282_v57  ;;  %15075 = vmatprep.subr.mxu1 %v25671_v24 }
 0x5b3   :  { %15076 = vmatpush3.msra.mxu1 %v20047_v62 }
 0x5b4   :  { %15077 = vmatprep.subr.mxu1 %v25671_v24  ;;  %v5726_v56 = vsub.f32 %v20282_v57, %v5725_v6 }
 0x5b5   :  { %15078 = vmatpush3.msra.mxu1 %v20059_v46 }
 0x5b6   :  { %15079 = vmatprep.subr.mxu1 %v25671_v24  ;;  %v5727_v5 = vand.u32 4294901760, %v5726_v56  ;;  %v12614_v56 = vld [vmem:[%s24657_s3 + $0x220] sm:$0xff] }
 0x5b7   :  { %15080 = vmatpush3.msra.mxu1 %v20061_v14 }
 0x5b8   :  { %15081 = vmatprep.subr.mxu1 %v25671_v24  ;;  %15001 = vmatmul.mubr.f32.vlgmr.msra.gmra.mxu0 %v5727_v5 }
 0x5b9   :  { %15039 = vmatpush3.msra.mxu0 %v20045_v33  ;;  %15082 = vmatpush3.msra.mxu1 %v20063_v41  ;;  %v25705_v33 = vand.u32 4294901760, %v20231_v61 }
 0x5ba   :  { %15040 = vmatprep.subr.mxu0 %v25671_v24  ;;  %15083 = vmatprep.subr.mxu1 %v25671_v24 }
 0x5bb   :  { %15041 = vmatpush3.msra.mxu0 %v20077_v59  ;;  %15084 = vmatpush3.msra.mxu1 %v20080_v52 }
 0x5bc   :  { %15042 = vmatprep.subr.mxu0 %v25671_v24  ;;  %15085 = vmatprep.subr.mxu1 %v25671_v24 }
 0x5bd   :  { %15043 = vmatpush3.msra.mxu0 %v20085_v47  ;;  %15086 = vmatpush3.msra.mxu1 %v20082_v3  ;;  %v12622_v47 = vld [vmem:[%s24657_s3 + $0x260] sm:$0xff] }
 0x5be   :  { %15044 = vmatprep.subr.mxu0 %v25671_v24  ;;  %15087 = vmatprep.subr.mxu1 %v25671_v24 }
 0x5bf   :  { %15045 = vmatpush3.msra.mxu0 %v20088_v21  ;;  %15088 = vmatpush3.msra.mxu1 %v20094_v45  ;;  %v12621_v21 = vld [vmem:[%s24657_s3 + $0x258] sm:$0xff] }
 0x5c0   :  { %15046 = vmatprep.subr.mxu0 %v25671_v24  ;;  %15089 = vmatprep.subr.mxu1 %v25671_v24 }
 0x5c1   :  { %15047 = vmatpush3.msra.mxu0 %v20091_v8  ;;  %15090 = vmatpush3.msra.mxu1 %v20152_v48 }
 0x5c2   :  { %15048 = vmatprep.subr.mxu0 %v25671_v24  ;;  %15091 = vmatprep.subr.mxu1 %v25671_v24 }
 0x5c3   :  { %15049 = vmatpush3.msra.mxu0 %v20101_v15  ;;  %15092 = vmatpush3.msra.mxu1 %v20163_v58  ;;  %v12620_v15 = vld [vmem:[%s24657_s3 + $0x250] sm:$0xff] }
 0x5c4   :  { %15050 = vmatprep.subr.mxu0 %v25671_v24  ;;  %15093 = vmatprep.subr.mxu1 %v25671_v24 }
 0x5c5   :  { %15051 = vmatpush3.msra.mxu0 %v20105_v23  ;;  %15094 = vmatpush3.msra.mxu1 %v20175_v4  ;;  %v12619_v23 = vld [vmem:[%s24657_s3 + $0x248] sm:$0xff] }
 0x5c6   :  { %15052 = vmatprep.subr.mxu0 %v25671_v24  ;;  %15095 = vmatprep.subr.mxu1 %v25671_v24 }
 0x5c7   :  { %15053 = vmatpush3.msra.mxu0 %v20117_v7  ;;  %15096 = vmatpush3.msra.mxu1 %v20190_v40  ;;  %v20492_v7 = vand.u32 4294901760, %v12619_v23 }
 0x5c8   :  { %15054 = vmatprep.subr.mxu0 %v25671_v24  ;;  %15097 = vmatprep.subr.mxu1 %v25671_v24 }
 0x5c9   :  { %15055 = vmatpush3.msra.mxu0 %v20161_v44  ;;  %15098 = vmatpush3.msra.mxu1 %v20207_v29 }
 0x5ca   :  { %15056 = vmatprep.subr.mxu0 %v25671_v24  ;;  %15099 = vmatprep.subr.mxu1 %v25671_v24 }
 0x5cb   :  { %15057 = vmatpush3.msra.mxu0 %v20173_v1  ;;  %15100 = vmatpush3.msra.mxu1 %v20217_v11 }
 0x5cc   :  { %15058 = vmatprep.subr.mxu0 %v25671_v24  ;;  %15101 = vmatprep.subr.mxu1 %v25671_v24 }
 0x5cd   :  { %15059 = vmatpush3.msra.mxu0 %v20188_v0  ;;  %15102 = vmatpush3.msra.mxu1 %v20233_v32 }
 0x5ce   :  { %15060 = vmatprep.subr.mxu0 %v25671_v24  ;;  %15103 = vmatprep.subr.mxu1 %v25671_v24 }
 0x5cf   :  { %15061 = vmatpush3.msra.mxu0 %v20203_v35  ;;  %15104 = vmatpush3.msra.mxu1 %v20246_v17 }
 0x5d0   :  { %15062 = vmatprep.subr.mxu0 %v25671_v24  ;;  %15106 = vmatmul.mubr.f32.vlgmr.msra.gmra.mxu1 %v5725_v6  ;;  %v20585_v6 = vand.u32 4294901760, %v12615_v30 }
 0x5d1   :  { %15143 = vmatprep.subr.mxu1 %v25671_v24  ;;  %15063 = vmatpush3.msra.mxu0 %v20221_v12 }
 0x5d2   :  { %15144 = vmatpush3.msra.mxu1 %v20039_v38  ;;  %15064 = vmatprep.subr.mxu0 %v25671_v24  ;;  %v25704_v38 = vand.u32 4294901760, %v20221_v12 }
 0x5d3   :  { %15145 = vmatprep.subr.mxu1 %v25671_v24  ;;  %15065 = vmatpush3.msra.mxu0 %v20231_v61 }
 0x5d4   :  { %15146 = vmatpush3.msra.mxu1 %v20047_v62  ;;  %15066 = vmatprep.subr.mxu0 %v25671_v24  ;;  %v25706_v62 = vand.u32 4294901760, %v20244_v26 }
 0x5d5   :  { %15147 = vmatprep.subr.mxu1 %v25671_v24  ;;  %15067 = vmatpush3.msra.mxu0 %v20244_v26 }
 0x5d6   :  { %15148 = vmatpush3.msra.mxu1 %v20059_v46  ;;  %15068 = vmatprep.subr.mxu0 %v25671_v24  ;;  %v25707_v46 = vand.u32 4294901760, %v20259_v20 }
 0x5d7   :  { %15149 = vmatprep.subr.mxu1 %v25671_v24  ;;  %15069 = vmatpush3.msra.mxu0 %v20259_v20 }
 0x5d8   :  { %15070 = vmatprep.mubr.msk.f32.mxu0 %vm16022_vm0, %v25671_v24  ;;  %15150 = vmatpush3.msra.mxu1 %v20061_v14  ;;  %v12625_v14 = vld [vmem:[%s24657_s3 + $0x278] sm:$0xff] }
 0x5d9   :  { %15071 = vmatmul.mubr.f32.vlgmr.msra.gmra.mxu0 %v20282_v57  ;;  %15108 = vmatprep.subr.mxu0 %v25671_v24  ;;  %v20583_v57 = vsub.f32 %v12616_v36, %v20573_v10 }
 0x5da   :  { %15151 = vmatprep.subr.mxu1 %v25671_v24  ;;  %15109 = vmatpush3.msra.mxu0 %v5736_v25  ;;  %v12624_v25 = vld [vmem:[%s24657_s3 + $0x270] sm:$0xff] }
 0x5db   :  { %15152 = vmatpush3.msra.mxu1 %v20063_v41  ;;  %15110 = vmatprep.subr.mxu0 %v25671_v24  ;;  %v20449_v41 = vand.u32 4294901760, %v12625_v14 }
 0x5dc   :  { %15153 = vmatprep.subr.mxu1 %v25671_v24  ;;  %15111 = vmatpush3.msra.mxu0 %v5743_v27  ;;  %v20473_v27 = vand.u32 4294901760, %v12621_v21 }
 0x5dd   :  { %15154 = vmatpush3.msra.mxu1 %v20080_v52  ;;  %15112 = vmatprep.subr.mxu0 %v25671_v24  ;;  %v20455_v59 = vsub.f32 %v12625_v14, %v20449_v41  ;;  %v20457_v52 = vand.u32 4294901760, %v12624_v25 }
 0x5de   :  { %15155 = vmatprep.subr.mxu1 %v25671_v24  ;;  %15113 = vmatpush3.msra.mxu0 %v5750_v54  ;;  %v12618_v54 = vld [vmem:[%s24657_s3 + $0x240] sm:$0xff] }
 0x5df   :  { %15156 = vmatpush3.msra.mxu1 %v20082_v3  ;;  %15114 = vmatprep.subr.mxu0 %v25671_v24  ;;  %v12623_v3 = vld [vmem:[%s24657_s3 + $0x268] sm:$0xff]  ;;  %v20504_v44 = vand.u32 4294901760, %v12618_v54 }
 0x5e0   :  { %15157 = vmatprep.subr.mxu1 %v25671_v24  ;;  %15115 = vmatpush3.msra.mxu0 %v5757_v51  ;;  %v20469_v8 = vand.u32 4294901760, %v12623_v3  ;;  %v6403_v51 = vand.u32 4294901760, %v20455_v59 }
 0x5e1   :  { %15158 = vmatpush3.msra.mxu1 %v20094_v45  ;;  %15116 = vmatprep.subr.mxu0 %v25671_v24  ;;  %v20471_v45 = vand.u32 4294901760, %v12622_v47 }
 0x5e2   :  { %15159 = vmatprep.subr.mxu1 %v25671_v24  ;;  %15117 = vmatpush3.msra.mxu0 %v5764_v37  ;;  %v20487_v37 = vsub.f32 %v12624_v25, %v20457_v52 }
 0x5e3   :  { %15160 = vmatpush3.msra.mxu1 %v20152_v48  ;;  %15118 = vmatprep.subr.mxu0 %v25671_v24  ;;  %v20501_v48 = vsub.f32 %v12621_v21, %v20473_v27 }
 0x5e4   :  { %15161 = vmatprep.subr.mxu1 %v25671_v24  ;;  %15119 = vmatpush3.msra.mxu0 %v5771_v55  ;;  %v20490_v55 = vand.u32 4294901760, %v12620_v15 }
 0x5e5   :  { %15162 = vmatpush3.msra.mxu1 %v20163_v58  ;;  %15120 = vmatprep.subr.mxu0 %v25671_v24  ;;  %v6404_v58 = vsub.f32 %v20455_v59, %v6403_v51 }
 0x5e6   :  { %15163 = vmatprep.subr.mxu1 %v25671_v24  ;;  %15121 = vmatpush3.msra.mxu0 %v5778_v60  ;;  %v20495_v60 = vsub.f32 %v12623_v3, %v20469_v8  ;;  %v20511_v1 = vsub.f32 %v12620_v15, %v20490_v55  ;;  %v12612_v15 = vld [vmem:[%s24657_s3 + $0x210] sm:$0xff] }
 0x5e7   :  { %15164 = vmatpush3.msra.mxu1 %v20175_v4  ;;  %15122 = vmatprep.subr.mxu0 %v25671_v24  ;;  %v20515_v4 = vsub.f32 %v12619_v23, %v20492_v7 }
 0x5e8   :  { %15165 = vmatprep.subr.mxu1 %v25671_v24  ;;  %15123 = vmatpush3.msra.mxu0 %v5785_v2  ;;  %v20498_v2 = vsub.f32 %v12622_v47, %v20471_v45 }
 0x5e9   :  { %15166 = vmatpush3.msra.mxu1 %v20190_v40  ;;  %15124 = vmatprep.subr.mxu0 %v25671_v24  ;;  %v6431_v40 = vand.u32 4294901760, %v20501_v48  ;;  %v6445_v26 = vand.u32 4294901760, %v20515_v4 }
 0x5ea   :  { %15167 = vmatprep.subr.mxu1 %v25671_v24  ;;  %15125 = vmatpush3.msra.mxu0 %v5792_v43  ;;  %v6410_v43 = vand.u32 4294901760, %v20487_v37  ;;  %v6424_v0 = vand.u32 4294901760, %v20498_v2 }
 0x5eb   :  { %15168 = vmatpush3.msra.mxu1 %v20207_v29  ;;  %15126 = vmatprep.subr.mxu0 %v25671_v24  ;;  %v6438_v29 = vand.u32 4294901760, %v20511_v1  ;;  %v6446_v18 = vsub.f32 %v20515_v4, %v6445_v26 }
 0x5ec   :  { %15169 = vmatprep.subr.mxu1 %v25671_v24  ;;  %15127 = vmatpush3.msra.mxu0 %v5799_v13  ;;  %v6417_v13 = vand.u32 4294901760, %v20495_v60  ;;  %v6411_v35 = vsub.f32 %v20487_v37, %v6410_v43  ;;  %v6425_v12 = vsub.f32 %v20498_v2, %v6424_v0 }
 0x5ed   :  { %15170 = vmatpush3.msra.mxu1 %v20217_v11  ;;  %15128 = vmatprep.subr.mxu0 %v25671_v24  ;;  %v6439_v20 = vsub.f32 %v20511_v1, %v6438_v29  ;;  %v6447_v42 = vand.u32 4294901760, %v6446_v18 }
 0x5ee   :  { %15171 = vmatprep.subr.mxu1 %v25671_v24  ;;  %15129 = vmatpush3.msra.mxu0 %v5806_v53  ;;  %v6405_v53 = vand.u32 4294901760, %v6404_v58  ;;  %v6418_v11 = vsub.f32 %v20495_v60, %v6417_v13  ;;  %v6412_v61 = vand.u32 4294901760, %v6411_v35  ;;  %v6426_v49 = vand.u32 4294901760, %v6425_v12 }
 0x5ef   :  { %15172 = vmatpush3.msra.mxu1 %v20233_v32  ;;  %15130 = vmatprep.subr.mxu0 %v25671_v24  ;;  %v6432_v32 = vsub.f32 %v20501_v48, %v6431_v40  ;;  %v6440_v28 = vand.u32 4294901760, %v6439_v20  ;;  %v12610_v20 = vld [vmem:[%s24657_s3 + $0x200] sm:$0xff] }
 0x5f0   :  { %15173 = vmatprep.subr.mxu1 %v25671_v24  ;;  %15131 = vmatpush3.msra.mxu0 %v5813_v34  ;;  %v20527_v34 = vsub.f32 %v12618_v54, %v20504_v44 }
 0x5f1   :  { %15174 = vmatpush3.msra.mxu1 %v20246_v17  ;;  %15175 = vmatprep.mubr.msk.f32.mxu1 %vm16022_vm0, %v25671_v24  ;;  %v6419_v17 = vand.u32 4294901760, %v6418_v11  ;;  %v6433_v39 = vand.u32 4294901760, %v6432_v32  ;;  %v12611_v11 = vld [vmem:[%s24657_s3 + $0x208] sm:$0xff] }
 0x5f2   :  { %15132 = vmatprep.subr.mxu0 %v25671_v24  ;;  %15176 = vmatmul.mubr.f32.vlgmr.msra.gmra.mxu1 %v20279_v19  ;;  %v6452_v31 = vand.u32 4294901760, %v20527_v34 }
 0x5f3   :  { %15133 = vmatpush3.msra.mxu0 %v25704_v38  ;;  %15140 = vmatprep.mubr.msk.f32.mxu0 %vm16022_vm0, %v25671_v24  ;;  %v6466_v38 = vand.u32 4294901760, %v20583_v57 }
 0x5f4   :  { %15134 = vmatprep.subr.mxu0 %v25671_v24  ;;  %15213 = vmatprep.subr.mxu1 %v25671_v24  ;;  %v6453_v63 = vsub.f32 %v20527_v34, %v6452_v31 }
 0x5f5   :  { %15135 = vmatpush3.msra.mxu0 %v25705_v33  ;;  %15245 = vmatprep.mubr.msk.f32.mxu1 %vm16022_vm0, %v25671_v24  ;;  %v20598_v33 = vsub.f32 %v12615_v30, %v20585_v6  ;;  %v6467_v25 = vsub.f32 %v20583_v57, %v6466_v38 }
 0x5f6   :  { %15136 = vmatprep.subr.mxu0 %v25671_v24  ;;  %15214 = vmatpush3.msra.mxu1 %v6405_v53  ;;  %v6454_v9 = vand.u32 4294901760, %v6453_v63  ;;  %v20627_v53 = vand.u32 4294901760, %v12612_v15 }
 0x5f7   :  { %15137 = vmatpush3.msra.mxu0 %v25706_v62  ;;  %15215 = vmatprep.subr.mxu1 %v25671_v24  ;;  %v20600_v62 = vand.u32 4294901760, %v12614_v56  ;;  %v6473_v3 = vand.u32 4294901760, %v20598_v33  ;;  %v6468_v23 = vand.u32 4294901760, %v6467_v25 }
 0x5f8   :  { %15138 = vmatprep.subr.mxu0 %v25671_v24  ;;  %15216 = vmatpush3.msra.mxu1 %v6412_v61  ;;  %v20641_v32 = vsub.f32 %v12612_v15, %v20627_v53 }
 0x5f9   :  { %15139 = vmatpush3.msra.mxu0 %v25707_v46  ;;  %15217 = vmatprep.subr.mxu1 %v25671_v24  ;;  %v12613_v46 = vld [vmem:[%s24657_s3 + $0x218] sm:$0xff]  ;;  %v20613_v47 = vsub.f32 %v12614_v56, %v20600_v62  ;;  %v6474_v54 = vsub.f32 %v20598_v33, %v6473_v3 }
 0x5fa   :  { %15141 = vmatmul.mubr.f32.vlgmr.msra.gmra.mxu0 %v20279_v19  ;;  %15178 = vmatprep.subr.mxu0 %v25671_v24  ;;  %v6459_v19 = vand.u32 4294901760, %v20571_v50  ;;  %v20617_v21 = vand.u32 4294901760, %v12613_v46  ;;  %v24983_v18 = vand.u32 4294901760, %v20641_v32 }
 0x5fb   :  { %15210 = vmatprep.mubr.msk.f32.mxu0 %vm16022_vm0, %v25671_v24  ;;  %15179 = vmatpush3.msra.mxu0 %v20449_v41  ;;  %v6480_v58 = vand.u32 4294901760, %v20613_v47  ;;  %v6475_v12 = vand.u32 4294901760, %v6474_v54 }
 0x5fc   :  { %15180 = vmatprep.subr.mxu0 %v25671_v24  ;;  %15218 = vmatpush3.msra.mxu1 %v6419_v17  ;;  %v6460_v5 = vsub.f32 %v20571_v50, %v6459_v19  ;;  %v20631_v35 = vsub.f32 %v12613_v46, %v20617_v21  ;;  %v20643_v17 = vand.u32 4294901760, %v12611_v11  ;;  %v6495_v36 = vsub.f32 %v20641_v32, %v24983_v18 }
 0x5fd   :  { %15181 = vmatpush3.msra.mxu0 %v20457_v52  ;;  %15219 = vmatprep.subr.mxu1 %v25671_v24  ;;  %v6481_v61 = vsub.f32 %v20613_v47, %v6480_v58 }
 0x5fe   :  { %15182 = vmatprep.subr.mxu0 %v25671_v24  ;;  %15220 = vmatpush3.msra.mxu1 %v6426_v49  ;;  %v6461_v14 = vand.u32 4294901760, %v6460_v5  ;;  %v24984_v49 = vand.u32 4294901760, %v20631_v35  ;;  %v20654_v16 = vsub.f32 %v12611_v11, %v20643_v17  ;;  %v6496_v56 = vand.u32 4294901760, %v6495_v36  ;;  %v12609_v36 = vld [vmem:[%s24659_s4 + $0x3] ss:$0 sm:$0xff] }
 0x5ff   :  { %15183 = vmatpush3.msra.mxu0 %v20469_v8  ;;  %15221 = vmatprep.subr.mxu1 %v25671_v24 }
 0x600   :  { %15184 = vmatprep.subr.mxu0 %v25671_v24  ;;  %15222 = vmatpush3.msra.mxu1 %v6433_v39  ;;  %v6482_v39 = vand.u32 4294901760, %v6481_v61  ;;  %v6488_v63 = vsub.f32 %v20631_v35, %v24984_v49 }
 0x601   :  { %15185 = vmatpush3.msra.mxu0 %v20471_v45  ;;  %15223 = vmatprep.subr.mxu1 %v25671_v24 }
 0x602   :  { %15186 = vmatprep.subr.mxu0 %v25671_v24  ;;  %15224 = vmatpush3.msra.mxu1 %v6440_v28  ;;  %v20656_v28 = vand.u32 4294901760, %v12610_v20 }
 0x603   :  { %15187 = vmatpush3.msra.mxu0 %v20473_v27  ;;  %15225 = vmatprep.subr.mxu1 %v25671_v24 }
 0x604   :  { %15188 = vmatprep.subr.mxu0 %v25671_v24  ;;  %15226 = vmatpush3.msra.mxu1 %v6447_v42  ;;  %v24982_v42 = vand.u32 4294901760, %v20654_v16  ;;  %v20669_v30 = vsub.f32 %v12610_v20, %v20656_v28 }
 0x605   :  { %15189 = vmatpush3.msra.mxu0 %v20490_v55  ;;  %15227 = vmatprep.subr.mxu1 %v25671_v24 }
 0x606   :  { %15190 = vmatprep.subr.mxu0 %v25671_v24  ;;  %15228 = vmatpush3.msra.mxu1 %v6454_v9  ;;  %v6489_v9 = vand.u32 4294901760, %v6488_v63  ;;  %v6502_v5 = vsub.f32 %v20654_v16, %v24982_v42  ;;  %v24981_v46 = vand.u32 4294901760, %v20669_v30 }
 0x607   :  { %15191 = vmatpush3.msra.mxu0 %v20492_v7  ;;  %15229 = vmatprep.subr.mxu1 %v25671_v24 }
 0x608   :  { %15192 = vmatprep.subr.mxu0 %v25671_v24  ;;  %15230 = vmatpush3.msra.mxu1 %v6461_v14  ;;  %v6503_v14 = vand.u32 4294901760, %v6502_v5  ;;  %v6509_v25 = vsub.f32 %v20669_v30, %v24981_v46 }
 0x609   :  { %15193 = vmatpush3.msra.mxu0 %v20504_v44  ;;  %15231 = vmatprep.subr.mxu1 %v25671_v24 }
 0x60a   :  { %15194 = vmatprep.subr.mxu0 %v25671_v24  ;;  %15232 = vmatpush3.msra.mxu1 %v6468_v23  ;;  %v6510_v15 = vand.u32 4294901760, %v6509_v25 }
 0x60b   :  { %15195 = vmatpush3.msra.mxu0 %v20562_v22  ;;  %15233 = vmatprep.subr.mxu1 %v25671_v24 }
 0x60c   :  { %15196 = vmatprep.subr.mxu0 %v25671_v24  ;;  %15234 = vmatpush3.msra.mxu1 %v6475_v12 }
 0x60d   :  { %15197 = vmatpush3.msra.mxu0 %v20573_v10  ;;  %15235 = vmatprep.subr.mxu1 %v25671_v24 }
 0x60e   :  { %15198 = vmatprep.subr.mxu0 %v25671_v24  ;;  %15236 = vmatpush3.msra.mxu1 %v6482_v39 }
 0x60f   :  { %15199 = vmatpush3.msra.mxu0 %v20585_v6  ;;  %15237 = vmatprep.subr.mxu1 %v25671_v24 }
 0x610   :  { %15200 = vmatprep.subr.mxu0 %v25671_v24  ;;  %15238 = vmatpush3.msra.mxu1 %v6489_v9 }
 0x611   :  { %15201 = vmatpush3.msra.mxu0 %v20600_v62  ;;  %15239 = vmatprep.subr.mxu1 %v25671_v24 }
 0x612   :  { %15202 = vmatprep.subr.mxu0 %v25671_v24  ;;  %15240 = vmatpush3.msra.mxu1 %v6496_v56 }
 0x613   :  { %15203 = vmatpush3.msra.mxu0 %v20617_v21  ;;  %15241 = vmatprep.subr.mxu1 %v25671_v24 }
 0x614   :  { %15204 = vmatprep.subr.mxu0 %v25671_v24  ;;  %15242 = vmatpush3.msra.mxu1 %v6503_v14 }
 0x615   :  { %15205 = vmatpush3.msra.mxu0 %v20627_v53  ;;  %15243 = vmatprep.subr.mxu1 %v25671_v24 }
 0x616   :  { %15206 = vmatprep.subr.mxu0 %v25671_v24  ;;  %15244 = vmatpush3.msra.mxu1 %v6510_v15 }
 0x617   :  { %15207 = vmatpush3.msra.mxu0 %v20643_v17  ;;  %15283 = vmatprep.subr.mxu1 %v25671_v24 }
 0x618   :  { %15208 = vmatprep.subr.mxu0 %v25671_v24 }
 0x619   :  { %15209 = vmatpush3.msra.mxu0 %v20656_v28 }
 0x61a   :  { %15248 = vmatprep.subr.mxu0 %v25671_v24 }
 0x670   :  { %v5880_v23 = vpop.f32.mrf.mxu1 }
 0x672   :  { %v15037_v54 = vpop.f32.mrf.mxu1 }
 0x678   :  { %v5729_v11 = vpop.f32.mrf.mxu0 }
 0x679   :  { %v5730_v9 = vadd.f32 %v12609_v36, %v5729_v11 }
 0x67a   :  { %v15002_v12 = vpop.f32.mrf.mxu0 }
 0x67b   :  { %v5881_v5 = vadd.f32 %v5880_v23, %v5730_v9 }
 0x690   :  { %v6073_v61 = vpop.f32.mrf.mxu1 }
 0x692   :  { %v15107_v20 = vpop.f32.mrf.mxu1 }
 0x699   :  { %v5984_v39 = vpop.f32.mrf.mxu0 }
 0x69a   :  { %v5985_v25 = vadd.f32 %v5984_v39, %v5881_v5  ;;  %v12635_v39 = vld [vmem:[%s24657_s3 + $0x2b8] sm:$0xff] }
 0x69b   :  { %v15072_v63 = vpop.f32.mrf.mxu0  ;;  %v20972_v9 = vand.u32 4294901760, %v12635_v39 }
 0x69c   :  { %v6074_v15 = vadd.f32 %v6073_v61, %v5985_v25 }
 0x6b2   :  { %v6279_v56 = vpop.f32.mrf.mxu1 }
 0x6b4   :  { %v15177_v14 = vpop.f32.mrf.mxu1 }
 0x6b5   :  { %v20981_v14 = vsub.f32 %v12635_v39, %v20972_v9 }
 0x6ba   :  { %v6192_v46 = vpop.f32.mrf.mxu0 }
 0x6bb   :  { %v6193_v42 = vadd.f32 %v6192_v46, %v6074_v15  ;;  %v12633_v15 = vld [vmem:[%s24657_s3 + $0x2a8] sm:$0xff] }
 0x6bc   :  { %v15142_v18 = vpop.f32.mrf.mxu0 }
 0x6bd   :  { %v6280_v54 = vadd.f32 %v6279_v56, %v6193_v42  ;;  %v12634_v56 = vld [vmem:[%s24657_s3 + $0x2b0] sm:$0xff] }
 0x6be   :  { %v20983_v25 = vand.u32 4294901760, %v12634_v56 }
 0x6bf   :  { %v6283_v49 = vmax.f32 %v6280_v54, 0.0 }
 0x6c1   :  { %v20689_v12 = vand.u32 4294901760, %v6283_v49 }
 0x6c3   :  { %v20692_v20 = vsub.f32 %v6283_v49, %v20689_v12  ;;  %15246 = vmatmul.mubr.f32.vlgmr.msra.gmra.mxu1 %v20689_v12 }
 0x6c4   :  { %15284 = vmatpush3.msra.mxu1 %v20449_v41  ;;  %15315 = vmatprep.mubr.msk.f32.mxu1 %vm16022_vm0, %v25671_v24 }
 0x6c5   :  { %v6392_v23 = vand.u32 4294901760, %v20692_v20  ;;  %15285 = vmatprep.subr.mxu1 %v25671_v24 }
 0x6c6   :  { %15286 = vmatpush3.msra.mxu1 %v20457_v52 }
 0x6c7   :  { %15287 = vmatprep.subr.mxu1 %v25671_v24  ;;  %v6393_v18 = vsub.f32 %v20692_v20, %v6392_v23 }
 0x6c8   :  { %15288 = vmatpush3.msra.mxu1 %v20469_v8 }
 0x6c9   :  { %15289 = vmatprep.subr.mxu1 %v25671_v24  ;;  %v6394_v49 = vand.u32 4294901760, %v6393_v18  ;;  %v12632_v18 = vld [vmem:[%s24657_s3 + $0x2a0] sm:$0xff] }
 0x6ca   :  { %15290 = vmatpush3.msra.mxu1 %v20471_v45 }
 0x6cb   :  { %15291 = vmatprep.subr.mxu1 %v25671_v24  ;;  %15211 = vmatmul.mubr.f32.vlgmr.msra.gmra.mxu0 %v6394_v49 }
 0x6cc   :  { %15249 = vmatpush3.msra.mxu0 %v20455_v59  ;;  %15292 = vmatpush3.msra.mxu1 %v20473_v27  ;;  %v25709_v59 = vand.u32 4294901760, %v20641_v32 }
 0x6cd   :  { %15250 = vmatprep.subr.mxu0 %v25671_v24  ;;  %15293 = vmatprep.subr.mxu1 %v25671_v24 }
 0x6ce   :  { %15251 = vmatpush3.msra.mxu0 %v20487_v37  ;;  %15294 = vmatpush3.msra.mxu1 %v20490_v55 }
 0x6cf   :  { %15252 = vmatprep.subr.mxu0 %v25671_v24  ;;  %15295 = vmatprep.subr.mxu1 %v25671_v24 }
 0x6d0   :  { %15253 = vmatpush3.msra.mxu0 %v20495_v60  ;;  %15296 = vmatpush3.msra.mxu1 %v20492_v7  ;;  %v12640_v60 = vld [vmem:[%s24657_s3 + $0x2e0] sm:$0xff] }
 0x6d1   :  { %15254 = vmatprep.subr.mxu0 %v25671_v24  ;;  %15297 = vmatprep.subr.mxu1 %v25671_v24 }
 0x6d2   :  { %15255 = vmatpush3.msra.mxu0 %v20498_v2  ;;  %15298 = vmatpush3.msra.mxu1 %v20504_v44  ;;  %v12639_v2 = vld [vmem:[%s24657_s3 + $0x2d8] sm:$0xff] }
 0x6d3   :  { %15256 = vmatprep.subr.mxu0 %v25671_v24  ;;  %15299 = vmatprep.subr.mxu1 %v25671_v24 }
 0x6d4   :  { %15257 = vmatpush3.msra.mxu0 %v20501_v48  ;;  %15300 = vmatpush3.msra.mxu1 %v20562_v22 }
 0x6d5   :  { %15258 = vmatprep.subr.mxu0 %v25671_v24  ;;  %15301 = vmatprep.subr.mxu1 %v25671_v24 }
 0x6d6   :  { %15259 = vmatpush3.msra.mxu0 %v20511_v1  ;;  %15302 = vmatpush3.msra.mxu1 %v20573_v10  ;;  %v12638_v1 = vld [vmem:[%s24657_s3 + $0x2d0] sm:$0xff] }
 0x6d7   :  { %15260 = vmatprep.subr.mxu0 %v25671_v24  ;;  %15303 = vmatprep.subr.mxu1 %v25671_v24 }
 0x6d8   :  { %15261 = vmatpush3.msra.mxu0 %v20515_v4  ;;  %15304 = vmatpush3.msra.mxu1 %v20585_v6  ;;  %v12637_v4 = vld [vmem:[%s24657_s3 + $0x2c8] sm:$0xff] }
 0x6d9   :  { %15262 = vmatprep.subr.mxu0 %v25671_v24  ;;  %15305 = vmatprep.subr.mxu1 %v25671_v24 }
 0x6da   :  { %15263 = vmatpush3.msra.mxu0 %v20527_v34  ;;  %15306 = vmatpush3.msra.mxu1 %v20600_v62  ;;  %v20902_v34 = vand.u32 4294901760, %v12637_v4 }
 0x6db   :  { %15264 = vmatprep.subr.mxu0 %v25671_v24  ;;  %15307 = vmatprep.subr.mxu1 %v25671_v24 }
 0x6dc   :  { %15265 = vmatpush3.msra.mxu0 %v20571_v50  ;;  %15308 = vmatpush3.msra.mxu1 %v20617_v21 }
 0x6dd   :  { %15266 = vmatprep.subr.mxu0 %v25671_v24  ;;  %15309 = vmatprep.subr.mxu1 %v25671_v24 }
 0x6de   :  { %15267 = vmatpush3.msra.mxu0 %v20583_v57  ;;  %15310 = vmatpush3.msra.mxu1 %v20627_v53 }
 0x6df   :  { %15268 = vmatprep.subr.mxu0 %v25671_v24  ;;  %15311 = vmatprep.subr.mxu1 %v25671_v24 }
 0x6e0   :  { %15269 = vmatpush3.msra.mxu0 %v20598_v33  ;;  %15312 = vmatpush3.msra.mxu1 %v20643_v17 }
 0x6e1   :  { %15270 = vmatprep.subr.mxu0 %v25671_v24  ;;  %15313 = vmatprep.subr.mxu1 %v25671_v24 }
 0x6e2   :  { %15271 = vmatpush3.msra.mxu0 %v20613_v47  ;;  %15314 = vmatpush3.msra.mxu1 %v20656_v28 }
 0x6e3   :  { %15272 = vmatprep.subr.mxu0 %v25671_v24  ;;  %15316 = vmatmul.mubr.f32.vlgmr.msra.gmra.mxu1 %v6392_v23  ;;  %v20995_v23 = vand.u32 4294901760, %v12633_v15 }
 0x6e4   :  { %15353 = vmatprep.subr.mxu1 %v25671_v24  ;;  %15273 = vmatpush3.msra.mxu0 %v20631_v35 }
 0x6e5   :  { %15354 = vmatpush3.msra.mxu1 %v20449_v41  ;;  %15274 = vmatprep.subr.mxu0 %v25671_v24  ;;  %v25708_v41 = vand.u32 4294901760, %v20631_v35 }
 0x6e6   :  { %15355 = vmatprep.subr.mxu1 %v25671_v24  ;;  %15275 = vmatpush3.msra.mxu0 %v20641_v32 }
 0x6e7   :  { %15356 = vmatpush3.msra.mxu1 %v20457_v52  ;;  %15276 = vmatprep.subr.mxu0 %v25671_v24  ;;  %v25710_v52 = vand.u32 4294901760, %v20654_v16 }
 0x6e8   :  { %15357 = vmatprep.subr.mxu1 %v25671_v24  ;;  %15277 = vmatpush3.msra.mxu0 %v20654_v16 }
 0x6e9   :  { %15358 = vmatpush3.msra.mxu1 %v20469_v8  ;;  %15278 = vmatprep.subr.mxu0 %v25671_v24  ;;  %v25711_v8 = vand.u32 4294901760, %v20669_v30 }
 0x6ea   :  { %15359 = vmatprep.subr.mxu1 %v25671_v24  ;;  %15279 = vmatpush3.msra.mxu0 %v20669_v30 }
 0x6eb   :  { %15280 = vmatprep.mubr.msk.f32.mxu0 %vm16022_vm0, %v25671_v24  ;;  %15360 = vmatpush3.msra.mxu1 %v20471_v45  ;;  %v12643_v45 = vld [vmem:[%s24657_s3 + $0x2f8] sm:$0xff] }
 0x6ec   :  { %15281 = vmatmul.mubr.f32.vlgmr.msra.gmra.mxu0 %v20692_v20  ;;  %15318 = vmatprep.subr.mxu0 %v25671_v24  ;;  %v20993_v20 = vsub.f32 %v12634_v56, %v20983_v25 }
 0x6ed   :  { %15361 = vmatprep.subr.mxu1 %v25671_v24  ;;  %15319 = vmatpush3.msra.mxu0 %v6403_v51  ;;  %v12642_v51 = vld [vmem:[%s24657_s3 + $0x2f0] sm:$0xff] }
 0x6ee   :  { %15362 = vmatpush3.msra.mxu1 %v20473_v27  ;;  %15320 = vmatprep.subr.mxu0 %v25671_v24  ;;  %v20859_v27 = vand.u32 4294901760, %v12643_v45 }
 0x6ef   :  { %15363 = vmatprep.subr.mxu1 %v25671_v24  ;;  %15321 = vmatpush3.msra.mxu0 %v6410_v43  ;;  %v20883_v43 = vand.u32 4294901760, %v12639_v2 }
 0x6f0   :  { %15364 = vmatpush3.msra.mxu1 %v20490_v55  ;;  %15322 = vmatprep.subr.mxu0 %v25671_v24  ;;  %v20865_v37 = vsub.f32 %v12643_v45, %v20859_v27  ;;  %v20867_v55 = vand.u32 4294901760, %v12642_v51 }
 0x6f1   :  { %15365 = vmatprep.subr.mxu1 %v25671_v24  ;;  %15323 = vmatpush3.msra.mxu0 %v6417_v13  ;;  %v12636_v13 = vld [vmem:[%s24657_s3 + $0x2c0] sm:$0xff] }
 0x6f2   :  { %15366 = vmatpush3.msra.mxu1 %v20492_v7  ;;  %15324 = vmatprep.subr.mxu0 %v25671_v24  ;;  %v12641_v7 = vld [vmem:[%s24657_s3 + $0x2e8] sm:$0xff]  ;;  %v20914_v50 = vand.u32 4294901760, %v12636_v13 }
 0x6f3   :  { %15367 = vmatprep.subr.mxu1 %v25671_v24  ;;  %15325 = vmatpush3.msra.mxu0 %v6424_v0  ;;  %v20879_v48 = vand.u32 4294901760, %v12641_v7  ;;  %v7070_v0 = vand.u32 4294901760, %v20865_v37 }
 0x6f4   :  { %15368 = vmatpush3.msra.mxu1 %v20504_v44  ;;  %15326 = vmatprep.subr.mxu0 %v25671_v24  ;;  %v20881_v44 = vand.u32 4294901760, %v12640_v60 }
 0x6f5   :  { %15369 = vmatprep.subr.mxu1 %v25671_v24  ;;  %15327 = vmatpush3.msra.mxu0 %v6431_v40  ;;  %v20897_v40 = vsub.f32 %v12642_v51, %v20867_v55 }
 0x6f6   :  { %15370 = vmatpush3.msra.mxu1 %v20562_v22  ;;  %15328 = vmatprep.subr.mxu0 %v25671_v24  ;;  %v20911_v22 = vsub.f32 %v12639_v2, %v20883_v43 }
 0x6f7   :  { %15371 = vmatprep.subr.mxu1 %v25671_v24  ;;  %15329 = vmatpush3.msra.mxu0 %v6438_v29  ;;  %v20900_v29 = vand.u32 4294901760, %v12638_v1 }
 0x6f8   :  { %15372 = vmatpush3.msra.mxu1 %v20573_v10  ;;  %15330 = vmatprep.subr.mxu0 %v25671_v24  ;;  %v7071_v10 = vsub.f32 %v20865_v37, %v7070_v0 }
 0x6f9   :  { %15373 = vmatprep.subr.mxu1 %v25671_v24  ;;  %15331 = vmatpush3.msra.mxu0 %v6445_v26  ;;  %v20905_v26 = vsub.f32 %v12641_v7, %v20879_v48  ;;  %v20921_v57 = vsub.f32 %v12638_v1, %v20900_v29  ;;  %v12630_v1 = vld [vmem:[%s24657_s3 + $0x290] sm:$0xff] }
 0x6fa   :  { %15374 = vmatpush3.msra.mxu1 %v20585_v6  ;;  %15332 = vmatprep.subr.mxu0 %v25671_v24  ;;  %v20925_v6 = vsub.f32 %v12637_v4, %v20902_v34 }
 0x6fb   :  { %15375 = vmatprep.subr.mxu1 %v25671_v24  ;;  %15333 = vmatpush3.msra.mxu0 %v6452_v31  ;;  %v20908_v31 = vsub.f32 %v12640_v60, %v20881_v44 }
 0x6fc   :  { %15376 = vmatpush3.msra.mxu1 %v20600_v62  ;;  %15334 = vmatprep.subr.mxu0 %v25671_v24  ;;  %v7098_v62 = vand.u32 4294901760, %v20911_v22  ;;  %v7112_v16 = vand.u32 4294901760, %v20925_v6 }
 0x6fd   :  { %15377 = vmatprep.subr.mxu1 %v25671_v24  ;;  %15335 = vmatpush3.msra.mxu0 %v6459_v19  ;;  %v7077_v19 = vand.u32 4294901760, %v20897_v40  ;;  %v7091_v33 = vand.u32 4294901760, %v20908_v31 }
 0x6fe   :  { %15378 = vmatpush3.msra.mxu1 %v20617_v21  ;;  %15336 = vmatprep.subr.mxu0 %v25671_v24  ;;  %v7105_v21 = vand.u32 4294901760, %v20921_v57  ;;  %v7113_v61 = vsub.f32 %v20925_v6, %v7112_v16 }
 0x6ff   :  { %15379 = vmatprep.subr.mxu1 %v25671_v24  ;;  %15337 = vmatpush3.msra.mxu0 %v6466_v38  ;;  %v7084_v38 = vand.u32 4294901760, %v20905_v26  ;;  %v7078_v47 = vsub.f32 %v20897_v40, %v7077_v19  ;;  %v7092_v35 = vsub.f32 %v20908_v31, %v7091_v33 }
 0x700   :  { %15380 = vmatpush3.msra.mxu1 %v20627_v53  ;;  %15338 = vmatprep.subr.mxu0 %v25671_v24  ;;  %v7106_v30 = vsub.f32 %v20921_v57, %v7105_v21  ;;  %v7114_v5 = vand.u32 4294901760, %v7113_v61 }
 0x701   :  { %15381 = vmatprep.subr.mxu1 %v25671_v24  ;;  %15339 = vmatpush3.msra.mxu0 %v6473_v3  ;;  %v7072_v3 = vand.u32 4294901760, %v7071_v10  ;;  %v7085_v53 = vsub.f32 %v20905_v26, %v7084_v38  ;;  %v7079_v32 = vand.u32 4294901760, %v7078_v47  ;;  %v7093_v42 = vand.u32 4294901760, %v7092_v35 }
 0x702   :  { %15382 = vmatpush3.msra.mxu1 %v20643_v17  ;;  %15340 = vmatprep.subr.mxu0 %v25671_v24  ;;  %v7099_v17 = vsub.f32 %v20911_v22, %v7098_v62  ;;  %v7107_v63 = vand.u32 4294901760, %v7106_v30  ;;  %v12628_v30 = vld [vmem:[%s24657_s3 + $0x280] sm:$0xff] }
 0x703   :  { %15383 = vmatprep.subr.mxu1 %v25671_v24  ;;  %15341 = vmatpush3.msra.mxu0 %v6480_v58  ;;  %v20937_v58 = vsub.f32 %v12636_v13, %v20914_v50 }
 0x704   :  { %15384 = vmatpush3.msra.mxu1 %v20656_v28  ;;  %15385 = vmatprep.mubr.msk.f32.mxu1 %vm16022_vm0, %v25671_v24  ;;  %v7086_v28 = vand.u32 4294901760, %v7085_v53  ;;  %v7100_v11 = vand.u32 4294901760, %v7099_v17  ;;  %v12629_v53 = vld [vmem:[%s24657_s3 + $0x288] sm:$0xff] }
 0x705   :  { %15342 = vmatprep.subr.mxu0 %v25671_v24  ;;  %15386 = vmatmul.mubr.f32.vlgmr.msra.gmra.mxu1 %v20689_v12  ;;  %v7119_v46 = vand.u32 4294901760, %v20937_v58 }
 0x706   :  { %15343 = vmatpush3.msra.mxu0 %v25708_v41  ;;  %15350 = vmatprep.mubr.msk.f32.mxu0 %vm16022_vm0, %v25671_v24  ;;  %v7133_v41 = vand.u32 4294901760, %v20993_v20 }
 0x707   :  { %15344 = vmatprep.subr.mxu0 %v25671_v24  ;;  %15423 = vmatprep.subr.mxu1 %v25671_v24  ;;  %v7120_v36 = vsub.f32 %v20937_v58, %v7119_v46 }
 0x708   :  { %15345 = vmatpush3.msra.mxu0 %v25709_v59  ;;  %15455 = vmatprep.mubr.msk.f32.mxu1 %vm16022_vm0, %v25671_v24  ;;  %v21008_v59 = vsub.f32 %v12633_v15, %v20995_v23  ;;  %v7134_v51 = vsub.f32 %v20993_v20, %v7133_v41 }
 0x709   :  { %15346 = vmatprep.subr.mxu0 %v25671_v24  ;;  %15424 = vmatpush3.msra.mxu1 %v7072_v3  ;;  %v7121_v54 = vand.u32 4294901760, %v7120_v36  ;;  %v21037_v3 = vand.u32 4294901760, %v12630_v1 }
 0x70a   :  { %15347 = vmatpush3.msra.mxu0 %v25710_v52  ;;  %15425 = vmatprep.subr.mxu1 %v25671_v24  ;;  %v21010_v52 = vand.u32 4294901760, %v12632_v18  ;;  %v7140_v7 = vand.u32 4294901760, %v21008_v59  ;;  %v7135_v4 = vand.u32 4294901760, %v7134_v51 }
 0x70b   :  { %15348 = vmatprep.subr.mxu0 %v25671_v24  ;;  %15426 = vmatpush3.msra.mxu1 %v7079_v32  ;;  %v21051_v17 = vsub.f32 %v12630_v1, %v21037_v3 }
 0x70c   :  { %15349 = vmatpush3.msra.mxu0 %v25711_v8  ;;  %15427 = vmatprep.subr.mxu1 %v25671_v24  ;;  %v12631_v8 = vld [vmem:[%s24657_s3 + $0x298] sm:$0xff]  ;;  %v21023_v60 = vsub.f32 %v12632_v18, %v21010_v52  ;;  %v7141_v13 = vsub.f32 %v21008_v59, %v7140_v7 }
 0x70d   :  { %15351 = vmatmul.mubr.f32.vlgmr.msra.gmra.mxu0 %v20689_v12  ;;  %15388 = vmatprep.subr.mxu0 %v25671_v24  ;;  %v7126_v12 = vand.u32 4294901760, %v20981_v14  ;;  %v21027_v2 = vand.u32 4294901760, %v12631_v8  ;;  %v24987_v61 = vand.u32 4294901760, %v21051_v17 }
 0x70e   :  { %15420 = vmatprep.mubr.msk.f32.mxu0 %vm16022_vm0, %v25671_v24  ;;  %15389 = vmatpush3.msra.mxu0 %v20859_v27  ;;  %v7147_v10 = vand.u32 4294901760, %v21023_v60  ;;  %v7142_v35 = vand.u32 4294901760, %v7141_v13 }
 0x70f   :  { %15390 = vmatprep.subr.mxu0 %v25671_v24  ;;  %15428 = vmatpush3.msra.mxu1 %v7086_v28  ;;  %v7127_v49 = vsub.f32 %v20981_v14, %v7126_v12  ;;  %v21041_v47 = vsub.f32 %v12631_v8, %v21027_v2  ;;  %v21053_v28 = vand.u32 4294901760, %v12629_v53  ;;  %v7162_v56 = vsub.f32 %v21051_v17, %v24987_v61 }
 0x710   :  { %15391 = vmatpush3.msra.mxu0 %v20867_v55  ;;  %15429 = vmatprep.subr.mxu1 %v25671_v24  ;;  %v7148_v32 = vsub.f32 %v21023_v60, %v7147_v10 }
 0x711   :  { %15392 = vmatprep.subr.mxu0 %v25671_v24  ;;  %15430 = vmatpush3.msra.mxu1 %v7093_v42  ;;  %v7128_v45 = vand.u32 4294901760, %v7127_v49  ;;  %v24988_v42 = vand.u32 4294901760, %v21041_v47  ;;  %v21064_v39 = vsub.f32 %v12629_v53, %v21053_v28  ;;  %v7163_v18 = vand.u32 4294901760, %v7162_v56  ;;  %v12627_v56 = vld [vmem:[%s24659_s4 + $0x4] ss:$0 sm:$0xff] }
 0x712   :  { %15393 = vmatpush3.msra.mxu0 %v20879_v48  ;;  %15431 = vmatprep.subr.mxu1 %v25671_v24 }
 0x713   :  { %15394 = vmatprep.subr.mxu0 %v25671_v24  ;;  %15432 = vmatpush3.msra.mxu1 %v7100_v11  ;;  %v7149_v11 = vand.u32 4294901760, %v7148_v32  ;;  %v7155_v36 = vsub.f32 %v21041_v47, %v24988_v42 }
 0x714   :  { %15395 = vmatpush3.msra.mxu0 %v20881_v44  ;;  %15433 = vmatprep.subr.mxu1 %v25671_v24 }
 0x715   :  { %15396 = vmatprep.subr.mxu0 %v25671_v24  ;;  %15434 = vmatpush3.msra.mxu1 %v7107_v63  ;;  %v21066_v63 = vand.u32 4294901760, %v12628_v30 }
 0x716   :  { %15397 = vmatpush3.msra.mxu0 %v20883_v43  ;;  %15435 = vmatprep.subr.mxu1 %v25671_v24 }
 0x717   :  { %15398 = vmatprep.subr.mxu0 %v25671_v24  ;;  %15436 = vmatpush3.msra.mxu1 %v7114_v5  ;;  %v24986_v5 = vand.u32 4294901760, %v21064_v39  ;;  %v21079_v15 = vsub.f32 %v12628_v30, %v21066_v63 }
 0x718   :  { %15399 = vmatpush3.msra.mxu0 %v20900_v29  ;;  %15437 = vmatprep.subr.mxu1 %v25671_v24 }
 0x719   :  { %15400 = vmatprep.subr.mxu0 %v25671_v24  ;;  %15438 = vmatpush3.msra.mxu1 %v7121_v54  ;;  %v7156_v54 = vand.u32 4294901760, %v7155_v36  ;;  %v7169_v49 = vsub.f32 %v21064_v39, %v24986_v5  ;;  %v24985_v8 = vand.u32 4294901760, %v21079_v15 }
 0x71a   :  { %15401 = vmatpush3.msra.mxu0 %v20902_v34  ;;  %15439 = vmatprep.subr.mxu1 %v25671_v24 }
 0x71b   :  { %15402 = vmatprep.subr.mxu0 %v25671_v24  ;;  %15440 = vmatpush3.msra.mxu1 %v7128_v45  ;;  %v7170_v45 = vand.u32 4294901760, %v7169_v49  ;;  %v7176_v51 = vsub.f32 %v21079_v15, %v24985_v8 }
 0x71c   :  { %15403 = vmatpush3.msra.mxu0 %v20914_v50  ;;  %15441 = vmatprep.subr.mxu1 %v25671_v24 }
 0x71d   :  { %15404 = vmatprep.subr.mxu0 %v25671_v24  ;;  %15442 = vmatpush3.msra.mxu1 %v7135_v4  ;;  %v7177_v1 = vand.u32 4294901760, %v7176_v51 }
 0x71e   :  { %15405 = vmatpush3.msra.mxu0 %v20972_v9  ;;  %15443 = vmatprep.subr.mxu1 %v25671_v24 }
 0x71f   :  { %15406 = vmatprep.subr.mxu0 %v25671_v24  ;;  %15444 = vmatpush3.msra.mxu1 %v7142_v35 }
 0x720   :  { %15407 = vmatpush3.msra.mxu0 %v20983_v25  ;;  %15445 = vmatprep.subr.mxu1 %v25671_v24 }
 0x721   :  { %15408 = vmatprep.subr.mxu0 %v25671_v24  ;;  %15446 = vmatpush3.msra.mxu1 %v7149_v11 }
 0x722   :  { %15409 = vmatpush3.msra.mxu0 %v20995_v23  ;;  %15447 = vmatprep.subr.mxu1 %v25671_v24 }
 0x723   :  { %15410 = vmatprep.subr.mxu0 %v25671_v24  ;;  %15448 = vmatpush3.msra.mxu1 %v7156_v54 }
 0x724   :  { %15411 = vmatpush3.msra.mxu0 %v21010_v52  ;;  %15449 = vmatprep.subr.mxu1 %v25671_v24 }
 0x725   :  { %15412 = vmatprep.subr.mxu0 %v25671_v24  ;;  %15450 = vmatpush3.msra.mxu1 %v7163_v18 }
 0x726   :  { %15413 = vmatpush3.msra.mxu0 %v21027_v2  ;;  %15451 = vmatprep.subr.mxu1 %v25671_v24 }
 0x727   :  { %15414 = vmatprep.subr.mxu0 %v25671_v24  ;;  %15452 = vmatpush3.msra.mxu1 %v7170_v45 }
 0x728   :  { %15415 = vmatpush3.msra.mxu0 %v21037_v3  ;;  %15453 = vmatprep.subr.mxu1 %v25671_v24 }
 0x729   :  { %15416 = vmatprep.subr.mxu0 %v25671_v24  ;;  %15454 = vmatpush3.msra.mxu1 %v7177_v1 }
 0x72a   :  { %15417 = vmatpush3.msra.mxu0 %v21053_v28  ;;  %15493 = vmatprep.subr.mxu1 %v25671_v24 }
 0x72b   :  { %15418 = vmatprep.subr.mxu0 %v25671_v24 }
 0x72c   :  { %15419 = vmatpush3.msra.mxu0 %v21066_v63 }
 0x72d   :  { %15458 = vmatprep.subr.mxu0 %v25671_v24 }
 0x783   :  { %v6547_v4 = vpop.f32.mrf.mxu1 }
 0x785   :  { %v15247_v13 = vpop.f32.mrf.mxu1 }
 0x78b   :  { %v6396_v53 = vpop.f32.mrf.mxu0 }
 0x78c   :  { %v6397_v54 = vadd.f32 %v12627_v56, %v6396_v53 }
 0x78d   :  { %v15212_v35 = vpop.f32.mrf.mxu0 }
 0x78e   :  { %v6548_v49 = vadd.f32 %v6547_v4, %v6397_v54 }
 0x7a3   :  { %v6740_v32 = vpop.f32.mrf.mxu1 }
 0x7a5   :  { %v15317_v30 = vpop.f32.mrf.mxu1 }
 0x7ac   :  { %v6651_v11 = vpop.f32.mrf.mxu0 }
 0x7ad   :  { %v6652_v51 = vadd.f32 %v6651_v11, %v6548_v49  ;;  %v12653_v11 = vld [vmem:[%s24657_s3 + $0x338] sm:$0xff] }
 0x7ae   :  { %v15282_v36 = vpop.f32.mrf.mxu0  ;;  %v21382_v54 = vand.u32 4294901760, %v12653_v11 }
 0x7af   :  { %v6741_v1 = vadd.f32 %v6740_v32, %v6652_v51 }
 0x7c5   :  { %v6946_v18 = vpop.f32.mrf.mxu1 }
 0x7c7   :  { %v15387_v45 = vpop.f32.mrf.mxu1 }
 0x7c8   :  { %v21391_v45 = vsub.f32 %v12653_v11, %v21382_v54 }
 0x7cd   :  { %v6859_v8 = vpop.f32.mrf.mxu0 }
 0x7ce   :  { %v6860_v5 = vadd.f32 %v6859_v8, %v6741_v1  ;;  %v12651_v1 = vld [vmem:[%s24657_s3 + $0x328] sm:$0xff] }
 0x7cf   :  { %v15352_v61 = vpop.f32.mrf.mxu0 }
 0x7d0   :  { %v6947_v13 = vadd.f32 %v6946_v18, %v6860_v5  ;;  %v12652_v18 = vld [vmem:[%s24657_s3 + $0x330] sm:$0xff] }
 0x7d1   :  { %v21393_v51 = vand.u32 4294901760, %v12652_v18 }
 0x7d2   :  { %v6950_v42 = vmax.f32 %v6947_v13, 0.0 }
 0x7d4   :  { %v21099_v35 = vand.u32 4294901760, %v6950_v42 }
 0x7d6   :  { %v21102_v30 = vsub.f32 %v6950_v42, %v21099_v35  ;;  %15456 = vmatmul.mubr.f32.vlgmr.msra.gmra.mxu1 %v21099_v35 }
 0x7d7   :  { %15494 = vmatpush3.msra.mxu1 %v20859_v27  ;;  %15525 = vmatprep.mubr.msk.f32.mxu1 %vm16022_vm0, %v25671_v24 }
 0x7d8   :  { %v7059_v4 = vand.u32 4294901760, %v21102_v30  ;;  %15495 = vmatprep.subr.mxu1 %v25671_v24 }
 0x7d9   :  { %15496 = vmatpush3.msra.mxu1 %v20867_v55 }
 0x7da   :  { %15497 = vmatprep.subr.mxu1 %v25671_v24  ;;  %v7060_v61 = vsub.f32 %v21102_v30, %v7059_v4 }
 0x7db   :  { %15498 = vmatpush3.msra.mxu1 %v20879_v48 }
 0x7dc   :  { %15499 = vmatprep.subr.mxu1 %v25671_v24  ;;  %v7061_v42 = vand.u32 4294901760, %v7060_v61  ;;  %v12650_v61 = vld [vmem:[%s24657_s3 + $0x320] sm:$0xff] }
 0x7dd   :  { %15500 = vmatpush3.msra.mxu1 %v20881_v44 }
 0x7de   :  { %15501 = vmatprep.subr.mxu1 %v25671_v24  ;;  %15421 = vmatmul.mubr.f32.vlgmr.msra.gmra.mxu0 %v7061_v42 }
 0x7df   :  { %15459 = vmatpush3.msra.mxu0 %v20865_v37  ;;  %15502 = vmatpush3.msra.mxu1 %v20883_v43  ;;  %v25713_v37 = vand.u32 4294901760, %v21051_v17 }
 0x7e0   :  { %15460 = vmatprep.subr.mxu0 %v25671_v24  ;;  %15503 = vmatprep.subr.mxu1 %v25671_v24 }
 0x7e1   :  { %15461 = vmatpush3.msra.mxu0 %v20897_v40  ;;  %15504 = vmatpush3.msra.mxu1 %v20900_v29 }
 0x7e2   :  { %15462 = vmatprep.subr.mxu0 %v25671_v24  ;;  %15505 = vmatprep.subr.mxu1 %v25671_v24 }
 0x7e3   :  { %15463 = vmatpush3.msra.mxu0 %v20905_v26  ;;  %15506 = vmatpush3.msra.mxu1 %v20902_v34  ;;  %v12658_v26 = vld [vmem:[%s24657_s3 + $0x360] sm:$0xff] }
 0x7e4   :  { %15464 = vmatprep.subr.mxu0 %v25671_v24  ;;  %15507 = vmatprep.subr.mxu1 %v25671_v24 }
 0x7e5   :  { %15465 = vmatpush3.msra.mxu0 %v20908_v31  ;;  %15508 = vmatpush3.msra.mxu1 %v20914_v50  ;;  %v12657_v31 = vld [vmem:[%s24657_s3 + $0x358] sm:$0xff] }
 0x7e6   :  { %15466 = vmatprep.subr.mxu0 %v25671_v24  ;;  %15509 = vmatprep.subr.mxu1 %v25671_v24 }
 0x7e7   :  { %15467 = vmatpush3.msra.mxu0 %v20911_v22  ;;  %15510 = vmatpush3.msra.mxu1 %v20972_v9 }
 0x7e8   :  { %15468 = vmatprep.subr.mxu0 %v25671_v24  ;;  %15511 = vmatprep.subr.mxu1 %v25671_v24 }
 0x7e9   :  { %15469 = vmatpush3.msra.mxu0 %v20921_v57  ;;  %15512 = vmatpush3.msra.mxu1 %v20983_v25  ;;  %v12656_v57 = vld [vmem:[%s24657_s3 + $0x350] sm:$0xff] }
 0x7ea   :  { %15470 = vmatprep.subr.mxu0 %v25671_v24  ;;  %15513 = vmatprep.subr.mxu1 %v25671_v24 }
 0x7eb   :  { %15471 = vmatpush3.msra.mxu0 %v20925_v6  ;;  %15514 = vmatpush3.msra.mxu1 %v20995_v23  ;;  %v12655_v6 = vld [vmem:[%s24657_s3 + $0x348] sm:$0xff] }
 0x7ec   :  { %15472 = vmatprep.subr.mxu0 %v25671_v24  ;;  %15515 = vmatprep.subr.mxu1 %v25671_v24 }
 0x7ed   :  { %15473 = vmatpush3.msra.mxu0 %v20937_v58  ;;  %15516 = vmatpush3.msra.mxu1 %v21010_v52  ;;  %v21312_v58 = vand.u32 4294901760, %v12655_v6 }
 0x7ee   :  { %15474 = vmatprep.subr.mxu0 %v25671_v24  ;;  %15517 = vmatprep.subr.mxu1 %v25671_v24 }
 0x7ef   :  { %15475 = vmatpush3.msra.mxu0 %v20981_v14  ;;  %15518 = vmatpush3.msra.mxu1 %v21027_v2 }
 0x7f0   :  { %15476 = vmatprep.subr.mxu0 %v25671_v24  ;;  %15519 = vmatprep.subr.mxu1 %v25671_v24 }
 0x7f1   :  { %15477 = vmatpush3.msra.mxu0 %v20993_v20  ;;  %15520 = vmatpush3.msra.mxu1 %v21037_v3 }
 0x7f2   :  { %15478 = vmatprep.subr.mxu0 %v25671_v24  ;;  %15521 = vmatprep.subr.mxu1 %v25671_v24 }
 0x7f3   :  { %15479 = vmatpush3.msra.mxu0 %v21008_v59  ;;  %15522 = vmatpush3.msra.mxu1 %v21053_v28 }
 0x7f4   :  { %15480 = vmatprep.subr.mxu0 %v25671_v24  ;;  %15523 = vmatprep.subr.mxu1 %v25671_v24 }
 0x7f5   :  { %15481 = vmatpush3.msra.mxu0 %v21023_v60  ;;  %15524 = vmatpush3.msra.mxu1 %v21066_v63 }
 0x7f6   :  { %15482 = vmatprep.subr.mxu0 %v25671_v24  ;;  %15526 = vmatmul.mubr.f32.vlgmr.msra.gmra.mxu1 %v7059_v4  ;;  %v21405_v4 = vand.u32 4294901760, %v12651_v1 }
 0x7f7   :  { %15563 = vmatprep.subr.mxu1 %v25671_v24  ;;  %15483 = vmatpush3.msra.mxu0 %v21041_v47 }
 0x7f8   :  { %15564 = vmatpush3.msra.mxu1 %v20859_v27  ;;  %15484 = vmatprep.subr.mxu0 %v25671_v24  ;;  %v25712_v27 = vand.u32 4294901760, %v21041_v47 }
 0x7f9   :  { %15565 = vmatprep.subr.mxu1 %v25671_v24  ;;  %15485 = vmatpush3.msra.mxu0 %v21051_v17 }
 0x7fa   :  { %15566 = vmatpush3.msra.mxu1 %v20867_v55  ;;  %15486 = vmatprep.subr.mxu0 %v25671_v24  ;;  %v25714_v55 = vand.u32 4294901760, %v21064_v39 }
 0x7fb   :  { %15567 = vmatprep.subr.mxu1 %v25671_v24  ;;  %15487 = vmatpush3.msra.mxu0 %v21064_v39 }
 0x7fc   :  { %15568 = vmatpush3.msra.mxu1 %v20879_v48  ;;  %15488 = vmatprep.subr.mxu0 %v25671_v24  ;;  %v25715_v48 = vand.u32 4294901760, %v21079_v15 }
 0x7fd   :  { %15569 = vmatprep.subr.mxu1 %v25671_v24  ;;  %15489 = vmatpush3.msra.mxu0 %v21079_v15 }
 0x7fe   :  { %15490 = vmatprep.mubr.msk.f32.mxu0 %vm16022_vm0, %v25671_v24  ;;  %15570 = vmatpush3.msra.mxu1 %v20881_v44  ;;  %v12661_v44 = vld [vmem:[%s24657_s3 + $0x378] sm:$0xff] }
 0x7ff   :  { %15491 = vmatmul.mubr.f32.vlgmr.msra.gmra.mxu0 %v21102_v30  ;;  %15528 = vmatprep.subr.mxu0 %v25671_v24  ;;  %v21403_v30 = vsub.f32 %v12652_v18, %v21393_v51 }
 0x800   :  { %15571 = vmatprep.subr.mxu1 %v25671_v24  ;;  %15529 = vmatpush3.msra.mxu0 %v7070_v0  ;;  %v12660_v0 = vld [vmem:[%s24657_s3 + $0x370] sm:$0xff] }
 0x801   :  { %15572 = vmatpush3.msra.mxu1 %v20883_v43  ;;  %15530 = vmatprep.subr.mxu0 %v25671_v24  ;;  %v21269_v43 = vand.u32 4294901760, %v12661_v44 }
 0x802   :  { %15573 = vmatprep.subr.mxu1 %v25671_v24  ;;  %15531 = vmatpush3.msra.mxu0 %v7077_v19  ;;  %v21293_v19 = vand.u32 4294901760, %v12657_v31 }
 0x803   :  { %15574 = vmatpush3.msra.mxu1 %v20900_v29  ;;  %15532 = vmatprep.subr.mxu0 %v25671_v24  ;;  %v21275_v40 = vsub.f32 %v12661_v44, %v21269_v43  ;;  %v21277_v29 = vand.u32 4294901760, %v12660_v0 }
 0x804   :  { %15575 = vmatprep.subr.mxu1 %v25671_v24  ;;  %15533 = vmatpush3.msra.mxu0 %v7084_v38  ;;  %v12654_v38 = vld [vmem:[%s24657_s3 + $0x340] sm:$0xff] }
 0x805   :  { %15576 = vmatpush3.msra.mxu1 %v20902_v34  ;;  %15534 = vmatprep.subr.mxu0 %v25671_v24  ;;  %v12659_v34 = vld [vmem:[%s24657_s3 + $0x368] sm:$0xff]  ;;  %v21324_v14 = vand.u32 4294901760, %v12654_v38 }
 0x806   :  { %15577 = vmatprep.subr.mxu1 %v25671_v24  ;;  %15535 = vmatpush3.msra.mxu0 %v7091_v33  ;;  %v21289_v22 = vand.u32 4294901760, %v12659_v34  ;;  %v7737_v33 = vand.u32 4294901760, %v21275_v40 }
 0x807   :  { %15578 = vmatpush3.msra.mxu1 %v20914_v50  ;;  %15536 = vmatprep.subr.mxu0 %v25671_v24  ;;  %v21291_v50 = vand.u32 4294901760, %v12658_v26 }
 0x808   :  { %15579 = vmatprep.subr.mxu1 %v25671_v24  ;;  %15537 = vmatpush3.msra.mxu0 %v7098_v62  ;;  %v21307_v62 = vsub.f32 %v12660_v0, %v21277_v29 }
 0x809   :  { %15580 = vmatpush3.msra.mxu1 %v20972_v9  ;;  %15538 = vmatprep.subr.mxu0 %v25671_v24  ;;  %v21321_v9 = vsub.f32 %v12657_v31, %v21293_v19 }
 0x80a   :  { %15581 = vmatprep.subr.mxu1 %v25671_v24  ;;  %15539 = vmatpush3.msra.mxu0 %v7105_v21  ;;  %v21310_v21 = vand.u32 4294901760, %v12656_v57 }
 0x80b   :  { %15582 = vmatpush3.msra.mxu1 %v20983_v25  ;;  %15540 = vmatprep.subr.mxu0 %v25671_v24  ;;  %v7738_v25 = vsub.f32 %v21275_v40, %v7737_v33 }
 0x80c   :  { %15583 = vmatprep.subr.mxu1 %v25671_v24  ;;  %15541 = vmatpush3.msra.mxu0 %v7112_v16  ;;  %v21315_v16 = vsub.f32 %v12659_v34, %v21289_v22  ;;  %v21331_v20 = vsub.f32 %v12656_v57, %v21310_v21  ;;  %v12648_v57 = vld [vmem:[%s24657_s3 + $0x310] sm:$0xff] }
 0x80d   :  { %15584 = vmatpush3.msra.mxu1 %v20995_v23  ;;  %15542 = vmatprep.subr.mxu0 %v25671_v24  ;;  %v21335_v23 = vsub.f32 %v12655_v6, %v21312_v58 }
 0x80e   :  { %15585 = vmatprep.subr.mxu1 %v25671_v24  ;;  %15543 = vmatpush3.msra.mxu0 %v7119_v46  ;;  %v21318_v46 = vsub.f32 %v12658_v26, %v21291_v50 }
 0x80f   :  { %15586 = vmatpush3.msra.mxu1 %v21010_v52  ;;  %15544 = vmatprep.subr.mxu0 %v25671_v24  ;;  %v7765_v52 = vand.u32 4294901760, %v21321_v9  ;;  %v7779_v39 = vand.u32 4294901760, %v21335_v23 }
 0x810   :  { %15587 = vmatprep.subr.mxu1 %v25671_v24  ;;  %15545 = vmatpush3.msra.mxu0 %v7126_v12  ;;  %v7744_v12 = vand.u32 4294901760, %v21307_v62  ;;  %v7758_v59 = vand.u32 4294901760, %v21318_v46 }
 0x811   :  { %15588 = vmatpush3.msra.mxu1 %v21027_v2  ;;  %15546 = vmatprep.subr.mxu0 %v25671_v24  ;;  %v7772_v2 = vand.u32 4294901760, %v21331_v20  ;;  %v7780_v32 = vsub.f32 %v21335_v23, %v7779_v39 }
 0x812   :  { %15589 = vmatprep.subr.mxu1 %v25671_v24  ;;  %15547 = vmatpush3.msra.mxu0 %v7133_v41  ;;  %v7751_v41 = vand.u32 4294901760, %v21315_v16  ;;  %v7745_v60 = vsub.f32 %v21307_v62, %v7744_v12  ;;  %v7759_v47 = vsub.f32 %v21318_v46, %v7758_v59 }
 0x813   :  { %15590 = vmatpush3.msra.mxu1 %v21037_v3  ;;  %15548 = vmatprep.subr.mxu0 %v25671_v24  ;;  %v7773_v15 = vsub.f32 %v21331_v20, %v7772_v2  ;;  %v7781_v49 = vand.u32 4294901760, %v7780_v32 }
 0x814   :  { %15591 = vmatprep.subr.mxu1 %v25671_v24  ;;  %15549 = vmatpush3.msra.mxu0 %v7140_v7  ;;  %v7739_v7 = vand.u32 4294901760, %v7738_v25  ;;  %v7752_v3 = vsub.f32 %v21315_v16, %v7751_v41  ;;  %v7746_v17 = vand.u32 4294901760, %v7745_v60  ;;  %v7760_v5 = vand.u32 4294901760, %v7759_v47 }
 0x815   :  { %15592 = vmatpush3.msra.mxu1 %v21053_v28  ;;  %15550 = vmatprep.subr.mxu0 %v25671_v24  ;;  %v7766_v28 = vsub.f32 %v21321_v9, %v7765_v52  ;;  %v7774_v36 = vand.u32 4294901760, %v7773_v15  ;;  %v12646_v15 = vld [vmem:[%s24657_s3 + $0x300] sm:$0xff] }
 0x816   :  { %15593 = vmatprep.subr.mxu1 %v25671_v24  ;;  %15551 = vmatpush3.msra.mxu0 %v7147_v10  ;;  %v21347_v10 = vsub.f32 %v12654_v38, %v21324_v14 }
 0x817   :  { %15594 = vmatpush3.msra.mxu1 %v21066_v63  ;;  %15595 = vmatprep.mubr.msk.f32.mxu1 %vm16022_vm0, %v25671_v24  ;;  %v7753_v63 = vand.u32 4294901760, %v7752_v3  ;;  %v7767_v53 = vand.u32 4294901760, %v7766_v28  ;;  %v12647_v3 = vld [vmem:[%s24657_s3 + $0x308] sm:$0xff] }
 0x818   :  { %15552 = vmatprep.subr.mxu0 %v25671_v24  ;;  %15596 = vmatmul.mubr.f32.vlgmr.msra.gmra.mxu1 %v21099_v35  ;;  %v7786_v8 = vand.u32 4294901760, %v21347_v10 }
 0x819   :  { %15553 = vmatpush3.msra.mxu0 %v25712_v27  ;;  %15560 = vmatprep.mubr.msk.f32.mxu0 %vm16022_vm0, %v25671_v24  ;;  %v7800_v27 = vand.u32 4294901760, %v21403_v30 }
 0x81a   :  { %15554 = vmatprep.subr.mxu0 %v25671_v24  ;;  %15633 = vmatprep.subr.mxu1 %v25671_v24  ;;  %v7787_v56 = vsub.f32 %v21347_v10, %v7786_v8 }
 0x81b   :  { %15555 = vmatpush3.msra.mxu0 %v25713_v37  ;;  %15665 = vmatprep.mubr.msk.f32.mxu1 %vm16022_vm0, %v25671_v24  ;;  %v21418_v37 = vsub.f32 %v12651_v1, %v21405_v4  ;;  %v7801_v0 = vsub.f32 %v21403_v30, %v7800_v27 }
 0x81c   :  { %15556 = vmatprep.subr.mxu0 %v25671_v24  ;;  %15634 = vmatpush3.msra.mxu1 %v7739_v7  ;;  %v7788_v13 = vand.u32 4294901760, %v7787_v56  ;;  %v21447_v7 = vand.u32 4294901760, %v12648_v57 }
 0x81d   :  { %15557 = vmatpush3.msra.mxu0 %v25714_v55  ;;  %15635 = vmatprep.subr.mxu1 %v25671_v24  ;;  %v21420_v55 = vand.u32 4294901760, %v12650_v61  ;;  %v7807_v34 = vand.u32 4294901760, %v21418_v37  ;;  %v7802_v6 = vand.u32 4294901760, %v7801_v0 }
 0x81e   :  { %15558 = vmatprep.subr.mxu0 %v25671_v24  ;;  %15636 = vmatpush3.msra.mxu1 %v7746_v17  ;;  %v21461_v28 = vsub.f32 %v12648_v57, %v21447_v7 }
 0x81f   :  { %15559 = vmatpush3.msra.mxu0 %v25715_v48  ;;  %15637 = vmatprep.subr.mxu1 %v25671_v24  ;;  %v12649_v48 = vld [vmem:[%s24657_s3 + $0x318] sm:$0xff]  ;;  %v21433_v26 = vsub.f32 %v12650_v61, %v21420_v55  ;;  %v7808_v38 = vsub.f32 %v21418_v37, %v7807_v34 }
 0x820   :  { %15561 = vmatmul.mubr.f32.vlgmr.msra.gmra.mxu0 %v21099_v35  ;;  %15598 = vmatprep.subr.mxu0 %v25671_v24  ;;  %v7793_v35 = vand.u32 4294901760, %v21391_v45  ;;  %v21437_v31 = vand.u32 4294901760, %v12649_v48  ;;  %v24991_v32 = vand.u32 4294901760, %v21461_v28 }
 0x821   :  { %15630 = vmatprep.mubr.msk.f32.mxu0 %vm16022_vm0, %v25671_v24  ;;  %15599 = vmatpush3.msra.mxu0 %v21269_v43  ;;  %v7814_v25 = vand.u32 4294901760, %v21433_v26  ;;  %v7809_v47 = vand.u32 4294901760, %v7808_v38 }
 0x822   :  { %15600 = vmatprep.subr.mxu0 %v25671_v24  ;;  %15638 = vmatpush3.msra.mxu1 %v7753_v63  ;;  %v7794_v42 = vsub.f32 %v21391_v45, %v7793_v35  ;;  %v21451_v60 = vsub.f32 %v12649_v48, %v21437_v31  ;;  %v21463_v63 = vand.u32 4294901760, %v12647_v3  ;;  %v7829_v18 = vsub.f32 %v21461_v28, %v24991_v32 }
 0x823   :  { %15601 = vmatpush3.msra.mxu0 %v21277_v29  ;;  %15639 = vmatprep.subr.mxu1 %v25671_v24  ;;  %v7815_v17 = vsub.f32 %v21433_v26, %v7814_v25 }
 0x824   :  { %15602 = vmatprep.subr.mxu0 %v25671_v24  ;;  %15640 = vmatpush3.msra.mxu1 %v7760_v5  ;;  %v7795_v44 = vand.u32 4294901760, %v7794_v42  ;;  %v24992_v5 = vand.u32 4294901760, %v21451_v60  ;;  %v21474_v11 = vsub.f32 %v12647_v3, %v21463_v63  ;;  %v7830_v61 = vand.u32 4294901760, %v7829_v18  ;;  %v12645_v18 = vld [vmem:[%s24659_s4 + $0x5] ss:$0 sm:$0xff] }
 0x825   :  { %15603 = vmatpush3.msra.mxu0 %v21289_v22  ;;  %15641 = vmatprep.subr.mxu1 %v25671_v24 }
 0x826   :  { %15604 = vmatprep.subr.mxu0 %v25671_v24  ;;  %15642 = vmatpush3.msra.mxu1 %v7767_v53  ;;  %v7816_v53 = vand.u32 4294901760, %v7815_v17  ;;  %v7822_v56 = vsub.f32 %v21451_v60, %v24992_v5 }
 0x827   :  { %15605 = vmatpush3.msra.mxu0 %v21291_v50  ;;  %15643 = vmatprep.subr.mxu1 %v25671_v24 }
 0x828   :  { %15606 = vmatprep.subr.mxu0 %v25671_v24  ;;  %15644 = vmatpush3.msra.mxu1 %v7774_v36  ;;  %v21476_v36 = vand.u32 4294901760, %v12646_v15 }
 0x829   :  { %15607 = vmatpush3.msra.mxu0 %v21293_v19  ;;  %15645 = vmatprep.subr.mxu1 %v25671_v24 }
 0x82a   :  { %15608 = vmatprep.subr.mxu0 %v25671_v24  ;;  %15646 = vmatpush3.msra.mxu1 %v7781_v49  ;;  %v24990_v49 = vand.u32 4294901760, %v21474_v11  ;;  %v21489_v1 = vsub.f32 %v12646_v15, %v21476_v36 }
 0x82b   :  { %15609 = vmatpush3.msra.mxu0 %v21310_v21  ;;  %15647 = vmatprep.subr.mxu1 %v25671_v24 }
 0x82c   :  { %15610 = vmatprep.subr.mxu0 %v25671_v24  ;;  %15648 = vmatpush3.msra.mxu1 %v7788_v13  ;;  %v7823_v13 = vand.u32 4294901760, %v7822_v56  ;;  %v7836_v42 = vsub.f32 %v21474_v11, %v24990_v49  ;;  %v24989_v48 = vand.u32 4294901760, %v21489_v1 }
 0x82d   :  { %15611 = vmatpush3.msra.mxu0 %v21312_v58  ;;  %15649 = vmatprep.subr.mxu1 %v25671_v24 }
 0x82e   :  { %15612 = vmatprep.subr.mxu0 %v25671_v24  ;;  %15650 = vmatpush3.msra.mxu1 %v7795_v44  ;;  %v7837_v44 = vand.u32 4294901760, %v7836_v42  ;;  %v7843_v0 = vsub.f32 %v21489_v1, %v24989_v48 }
 0x82f   :  { %15613 = vmatpush3.msra.mxu0 %v21324_v14  ;;  %15651 = vmatprep.subr.mxu1 %v25671_v24 }
 0x830   :  { %15614 = vmatprep.subr.mxu0 %v25671_v24  ;;  %15652 = vmatpush3.msra.mxu1 %v7802_v6  ;;  %v7844_v57 = vand.u32 4294901760, %v7843_v0 }
 0x831   :  { %15615 = vmatpush3.msra.mxu0 %v21382_v54  ;;  %15653 = vmatprep.subr.mxu1 %v25671_v24 }
 0x832   :  { %15616 = vmatprep.subr.mxu0 %v25671_v24  ;;  %15654 = vmatpush3.msra.mxu1 %v7809_v47 }
 0x833   :  { %15617 = vmatpush3.msra.mxu0 %v21393_v51  ;;  %15655 = vmatprep.subr.mxu1 %v25671_v24 }
 0x834   :  { %15618 = vmatprep.subr.mxu0 %v25671_v24  ;;  %15656 = vmatpush3.msra.mxu1 %v7816_v53 }
 0x835   :  { %15619 = vmatpush3.msra.mxu0 %v21405_v4  ;;  %15657 = vmatprep.subr.mxu1 %v25671_v24 }
 0x836   :  { %15620 = vmatprep.subr.mxu0 %v25671_v24  ;;  %15658 = vmatpush3.msra.mxu1 %v7823_v13 }
 0x837   :  { %15621 = vmatpush3.msra.mxu0 %v21420_v55  ;;  %15659 = vmatprep.subr.mxu1 %v25671_v24 }
 0x838   :  { %15622 = vmatprep.subr.mxu0 %v25671_v24  ;;  %15660 = vmatpush3.msra.mxu1 %v7830_v61 }
 0x839   :  { %15623 = vmatpush3.msra.mxu0 %v21437_v31  ;;  %15661 = vmatprep.subr.mxu1 %v25671_v24 }
 0x83a   :  { %15624 = vmatprep.subr.mxu0 %v25671_v24  ;;  %15662 = vmatpush3.msra.mxu1 %v7837_v44 }
 0x83b   :  { %15625 = vmatpush3.msra.mxu0 %v21447_v7  ;;  %15663 = vmatprep.subr.mxu1 %v25671_v24 }
 0x83c   :  { %15626 = vmatprep.subr.mxu0 %v25671_v24  ;;  %15664 = vmatpush3.msra.mxu1 %v7844_v57 }
 0x83d   :  { %15627 = vmatpush3.msra.mxu0 %v21463_v63  ;;  %15703 = vmatprep.subr.mxu1 %v25671_v24 }
 0x83e   :  { %15628 = vmatprep.subr.mxu0 %v25671_v24 }
 0x83f   :  { %15629 = vmatpush3.msra.mxu0 %v21476_v36 }
 0x840   :  { %15668 = vmatprep.subr.mxu0 %v25671_v24 }
 0x896   :  { %v7214_v6 = vpop.f32.mrf.mxu1 }
 0x898   :  { %v15457_v38 = vpop.f32.mrf.mxu1 }
 0x89e   :  { %v7063_v3 = vpop.f32.mrf.mxu0 }
 0x89f   :  { %v7064_v13 = vadd.f32 %v12645_v18, %v7063_v3 }
 0x8a0   :  { %v15422_v47 = vpop.f32.mrf.mxu0 }
 0x8a1   :  { %v7215_v42 = vadd.f32 %v7214_v6, %v7064_v13 }
 0x8b6   :  { %v7407_v17 = vpop.f32.mrf.mxu1 }
 0x8b8   :  { %v15527_v15 = vpop.f32.mrf.mxu1 }
 0x8bf   :  { %v7318_v53 = vpop.f32.mrf.mxu0 }
 0x8c0   :  { %v7319_v0 = vadd.f32 %v7318_v53, %v7215_v42  ;;  %v12671_v53 = vld [vmem:[%s24657_s3 + $0x3b8] sm:$0xff] }
 0x8c1   :  { %v15492_v56 = vpop.f32.mrf.mxu0  ;;  %v21792_v13 = vand.u32 4294901760, %v12671_v53 }
 0x8c2   :  { %v7408_v57 = vadd.f32 %v7407_v17, %v7319_v0 }
 0x8d8   :  { %v7613_v61 = vpop.f32.mrf.mxu1 }
 0x8da   :  { %v15597_v44 = vpop.f32.mrf.mxu1 }
 0x8db   :  { %v21801_v44 = vsub.f32 %v12671_v53, %v21792_v13 }
 0x8e0   :  { %v7526_v48 = vpop.f32.mrf.mxu0 }
 0x8e1   :  { %v7527_v49 = vadd.f32 %v7526_v48, %v7408_v57  ;;  %v12669_v57 = vld [vmem:[%s24657_s3 + $0x3a8] sm:$0xff] }
 0x8e2   :  { %v15562_v32 = vpop.f32.mrf.mxu0 }
 0x8e3   :  { %v7614_v38 = vadd.f32 %v7613_v61, %v7527_v49  ;;  %v12670_v61 = vld [vmem:[%s24657_s3 + $0x3b0] sm:$0xff] }
 0x8e4   :  { %v21803_v0 = vand.u32 4294901760, %v12670_v61 }
 0x8e5   :  { %v7617_v5 = vmax.f32 %v7614_v38, 0.0 }
 0x8e7   :  { %v21509_v47 = vand.u32 4294901760, %v7617_v5 }
 0x8e9   :  { %v21512_v15 = vsub.f32 %v7617_v5, %v21509_v47  ;;  %15666 = vmatmul.mubr.f32.vlgmr.msra.gmra.mxu1 %v21509_v47 }
 0x8ea   :  { %15704 = vmatpush3.msra.mxu1 %v21269_v43  ;;  %15735 = vmatprep.mubr.msk.f32.mxu1 %vm16022_vm0, %v25671_v24 }
 0x8eb   :  { %v7726_v6 = vand.u32 4294901760, %v21512_v15  ;;  %15705 = vmatprep.subr.mxu1 %v25671_v24 }
 0x8ec   :  { %15706 = vmatpush3.msra.mxu1 %v21277_v29 }
 0x8ed   :  { %15707 = vmatprep.subr.mxu1 %v25671_v24  ;;  %v7727_v32 = vsub.f32 %v21512_v15, %v7726_v6 }
 0x8ee   :  { %15708 = vmatpush3.msra.mxu1 %v21289_v22 }
 0x8ef   :  { %15709 = vmatprep.subr.mxu1 %v25671_v24  ;;  %v7728_v5 = vand.u32 4294901760, %v7727_v32  ;;  %v12668_v32 = vld [vmem:[%s24657_s3 + $0x3a0] sm:$0xff] }
 0x8f0   :  { %15710 = vmatpush3.msra.mxu1 %v21291_v50 }
 0x8f1   :  { %15711 = vmatprep.subr.mxu1 %v25671_v24  ;;  %15631 = vmatmul.mubr.f32.vlgmr.msra.gmra.mxu0 %v7728_v5 }
 0x8f2   :  { %15669 = vmatpush3.msra.mxu0 %v21275_v40  ;;  %15712 = vmatpush3.msra.mxu1 %v21293_v19  ;;  %v25717_v40 = vand.u32 4294901760, %v21461_v28 }
 0x8f3   :  { %15670 = vmatprep.subr.mxu0 %v25671_v24  ;;  %15713 = vmatprep.subr.mxu1 %v25671_v24 }
 0x8f4   :  { %15671 = vmatpush3.msra.mxu0 %v21307_v62  ;;  %15714 = vmatpush3.msra.mxu1 %v21310_v21 }
 0x8f5   :  { %15672 = vmatprep.subr.mxu0 %v25671_v24  ;;  %15715 = vmatprep.subr.mxu1 %v25671_v24 }
 0x8f6   :  { %15673 = vmatpush3.msra.mxu0 %v21315_v16  ;;  %15716 = vmatpush3.msra.mxu1 %v21312_v58  ;;  %v12676_v16 = vld [vmem:[%s24657_s3 + $0x3e0] sm:$0xff] }
 0x8f7   :  { %15674 = vmatprep.subr.mxu0 %v25671_v24  ;;  %15717 = vmatprep.subr.mxu1 %v25671_v24 }
 0x8f8   :  { %15675 = vmatpush3.msra.mxu0 %v21318_v46  ;;  %15718 = vmatpush3.msra.mxu1 %v21324_v14  ;;  %v12675_v46 = vld [vmem:[%s24657_s3 + $0x3d8] sm:$0xff] }
 0x8f9   :  { %15676 = vmatprep.subr.mxu0 %v25671_v24  ;;  %15719 = vmatprep.subr.mxu1 %v25671_v24 }
 0x8fa   :  { %15677 = vmatpush3.msra.mxu0 %v21321_v9  ;;  %15720 = vmatpush3.msra.mxu1 %v21382_v54 }
 0x8fb   :  { %15678 = vmatprep.subr.mxu0 %v25671_v24  ;;  %15721 = vmatprep.subr.mxu1 %v25671_v24 }
 0x8fc   :  { %15679 = vmatpush3.msra.mxu0 %v21331_v20  ;;  %15722 = vmatpush3.msra.mxu1 %v21393_v51  ;;  %v12674_v20 = vld [vmem:[%s24657_s3 + $0x3d0] sm:$0xff] }
 0x8fd   :  { %15680 = vmatprep.subr.mxu0 %v25671_v24  ;;  %15723 = vmatprep.subr.mxu1 %v25671_v24 }
 0x8fe   :  { %15681 = vmatpush3.msra.mxu0 %v21335_v23  ;;  %15724 = vmatpush3.msra.mxu1 %v21405_v4  ;;  %v12673_v23 = vld [vmem:[%s24657_s3 + $0x3c8] sm:$0xff] }
 0x8ff   :  { %15682 = vmatprep.subr.mxu0 %v25671_v24  ;;  %15725 = vmatprep.subr.mxu1 %v25671_v24 }
 0x900   :  { %15683 = vmatpush3.msra.mxu0 %v21347_v10  ;;  %15726 = vmatpush3.msra.mxu1 %v21420_v55  ;;  %v21722_v10 = vand.u32 4294901760, %v12673_v23 }
 0x901   :  { %15684 = vmatprep.subr.mxu0 %v25671_v24  ;;  %15727 = vmatprep.subr.mxu1 %v25671_v24 }
 0x902   :  { %15685 = vmatpush3.msra.mxu0 %v21391_v45  ;;  %15728 = vmatpush3.msra.mxu1 %v21437_v31 }
 0x903   :  { %15686 = vmatprep.subr.mxu0 %v25671_v24  ;;  %15729 = vmatprep.subr.mxu1 %v25671_v24 }
 0x904   :  { %15687 = vmatpush3.msra.mxu0 %v21403_v30  ;;  %15730 = vmatpush3.msra.mxu1 %v21447_v7 }
 0x905   :  { %15688 = vmatprep.subr.mxu0 %v25671_v24  ;;  %15731 = vmatprep.subr.mxu1 %v25671_v24 }
 0x906   :  { %15689 = vmatpush3.msra.mxu0 %v21418_v37  ;;  %15732 = vmatpush3.msra.mxu1 %v21463_v63 }
 0x907   :  { %15690 = vmatprep.subr.mxu0 %v25671_v24  ;;  %15733 = vmatprep.subr.mxu1 %v25671_v24 }
 0x908   :  { %15691 = vmatpush3.msra.mxu0 %v21433_v26  ;;  %15734 = vmatpush3.msra.mxu1 %v21476_v36 }
 0x909   :  { %15692 = vmatprep.subr.mxu0 %v25671_v24  ;;  %15736 = vmatmul.mubr.f32.vlgmr.msra.gmra.mxu1 %v7726_v6  ;;  %v21815_v6 = vand.u32 4294901760, %v12669_v57 }
 0x90a   :  { %15773 = vmatprep.subr.mxu1 %v25671_v24  ;;  %15693 = vmatpush3.msra.mxu0 %v21451_v60 }
 0x90b   :  { %15774 = vmatpush3.msra.mxu1 %v21269_v43  ;;  %15694 = vmatprep.subr.mxu0 %v25671_v24  ;;  %v25716_v43 = vand.u32 4294901760, %v21451_v60 }
 0x90c   :  { %15775 = vmatprep.subr.mxu1 %v25671_v24  ;;  %15695 = vmatpush3.msra.mxu0 %v21461_v28 }
 0x90d   :  { %15776 = vmatpush3.msra.mxu1 %v21277_v29  ;;  %15696 = vmatprep.subr.mxu0 %v25671_v24  ;;  %v25718_v29 = vand.u32 4294901760, %v21474_v11 }
 0x90e   :  { %15777 = vmatprep.subr.mxu1 %v25671_v24  ;;  %15697 = vmatpush3.msra.mxu0 %v21474_v11 }
 0x90f   :  { %15778 = vmatpush3.msra.mxu1 %v21289_v22  ;;  %15698 = vmatprep.subr.mxu0 %v25671_v24  ;;  %v25719_v22 = vand.u32 4294901760, %v21489_v1 }
 0x910   :  { %15779 = vmatprep.subr.mxu1 %v25671_v24  ;;  %15699 = vmatpush3.msra.mxu0 %v21489_v1 }
 0x911   :  { %15700 = vmatprep.mubr.msk.f32.mxu0 %vm16022_vm0, %v25671_v24  ;;  %15780 = vmatpush3.msra.mxu1 %v21291_v50  ;;  %v12679_v50 = vld [vmem:[%s24657_s3 + $0x3f8] sm:$0xff] }
 0x912   :  { %15701 = vmatmul.mubr.f32.vlgmr.msra.gmra.mxu0 %v21512_v15  ;;  %15738 = vmatprep.subr.mxu0 %v25671_v24  ;;  %v21813_v15 = vsub.f32 %v12670_v61, %v21803_v0 }
 0x913   :  { %15781 = vmatprep.subr.mxu1 %v25671_v24  ;;  %15739 = vmatpush3.msra.mxu0 %v7737_v33  ;;  %v12678_v33 = vld [vmem:[%s24657_s3 + $0x3f0] sm:$0xff] }
 0x914   :  { %15782 = vmatpush3.msra.mxu1 %v21293_v19  ;;  %15740 = vmatprep.subr.mxu0 %v25671_v24  ;;  %v21679_v19 = vand.u32 4294901760, %v12679_v50 }
 0x915   :  { %15783 = vmatprep.subr.mxu1 %v25671_v24  ;;  %15741 = vmatpush3.msra.mxu0 %v7744_v12  ;;  %v21703_v12 = vand.u32 4294901760, %v12675_v46 }
 0x916   :  { %15784 = vmatpush3.msra.mxu1 %v21310_v21  ;;  %15742 = vmatprep.subr.mxu0 %v25671_v24  ;;  %v21685_v62 = vsub.f32 %v12679_v50, %v21679_v19  ;;  %v21687_v21 = vand.u32 4294901760, %v12678_v33 }
 0x917   :  { %15785 = vmatprep.subr.mxu1 %v25671_v24  ;;  %15743 = vmatpush3.msra.mxu0 %v7751_v41  ;;  %v12672_v41 = vld [vmem:[%s24657_s3 + $0x3c0] sm:$0xff] }
 0x918   :  { %15786 = vmatpush3.msra.mxu1 %v21312_v58  ;;  %15744 = vmatprep.subr.mxu0 %v25671_v24  ;;  %v12677_v58 = vld [vmem:[%s24657_s3 + $0x3e8] sm:$0xff]  ;;  %v21734_v45 = vand.u32 4294901760, %v12672_v41 }
 0x919   :  { %15787 = vmatprep.subr.mxu1 %v25671_v24  ;;  %15745 = vmatpush3.msra.mxu0 %v7758_v59  ;;  %v21699_v9 = vand.u32 4294901760, %v12677_v58  ;;  %v8404_v59 = vand.u32 4294901760, %v21685_v62 }
 0x91a   :  { %15788 = vmatpush3.msra.mxu1 %v21324_v14  ;;  %15746 = vmatprep.subr.mxu0 %v25671_v24  ;;  %v21701_v14 = vand.u32 4294901760, %v12676_v16 }
 0x91b   :  { %15789 = vmatprep.subr.mxu1 %v25671_v24  ;;  %15747 = vmatpush3.msra.mxu0 %v7765_v52  ;;  %v21717_v52 = vsub.f32 %v12678_v33, %v21687_v21 }
 0x91c   :  { %15790 = vmatpush3.msra.mxu1 %v21382_v54  ;;  %15748 = vmatprep.subr.mxu0 %v25671_v24  ;;  %v21731_v54 = vsub.f32 %v12675_v46, %v21703_v12 }
 0x91d   :  { %15791 = vmatprep.subr.mxu1 %v25671_v24  ;;  %15749 = vmatpush3.msra.mxu0 %v7772_v2  ;;  %v21720_v2 = vand.u32 4294901760, %v12674_v20 }
 0x91e   :  { %15792 = vmatpush3.msra.mxu1 %v21393_v51  ;;  %15750 = vmatprep.subr.mxu0 %v25671_v24  ;;  %v8405_v51 = vsub.f32 %v21685_v62, %v8404_v59 }
 0x91f   :  { %15793 = vmatprep.subr.mxu1 %v25671_v24  ;;  %15751 = vmatpush3.msra.mxu0 %v7779_v39  ;;  %v21725_v39 = vsub.f32 %v12677_v58, %v21699_v9  ;;  %v21741_v30 = vsub.f32 %v12674_v20, %v21720_v2  ;;  %v12666_v20 = vld [vmem:[%s24657_s3 + $0x390] sm:$0xff] }
 0x920   :  { %15794 = vmatpush3.msra.mxu1 %v21405_v4  ;;  %15752 = vmatprep.subr.mxu0 %v25671_v24  ;;  %v21745_v4 = vsub.f32 %v12673_v23, %v21722_v10 }
 0x921   :  { %15795 = vmatprep.subr.mxu1 %v25671_v24  ;;  %15753 = vmatpush3.msra.mxu0 %v7786_v8  ;;  %v21728_v8 = vsub.f32 %v12676_v16, %v21701_v14 }
 0x922   :  { %15796 = vmatpush3.msra.mxu1 %v21420_v55  ;;  %15754 = vmatprep.subr.mxu0 %v25671_v24  ;;  %v8432_v55 = vand.u32 4294901760, %v21731_v54  ;;  %v8446_v11 = vand.u32 4294901760, %v21745_v4 }
 0x923   :  { %15797 = vmatprep.subr.mxu1 %v25671_v24  ;;  %15755 = vmatpush3.msra.mxu0 %v7793_v35  ;;  %v8411_v35 = vand.u32 4294901760, %v21717_v52  ;;  %v8425_v37 = vand.u32 4294901760, %v21728_v8 }
 0x924   :  { %15798 = vmatpush3.msra.mxu1 %v21437_v31  ;;  %15756 = vmatprep.subr.mxu0 %v25671_v24  ;;  %v8439_v31 = vand.u32 4294901760, %v21741_v30  ;;  %v8447_v17 = vsub.f32 %v21745_v4, %v8446_v11 }
 0x925   :  { %15799 = vmatprep.subr.mxu1 %v25671_v24  ;;  %15757 = vmatpush3.msra.mxu0 %v7800_v27  ;;  %v8418_v27 = vand.u32 4294901760, %v21725_v39  ;;  %v8412_v26 = vsub.f32 %v21717_v52, %v8411_v35  ;;  %v8426_v60 = vsub.f32 %v21728_v8, %v8425_v37 }
 0x926   :  { %15800 = vmatpush3.msra.mxu1 %v21447_v7  ;;  %15758 = vmatprep.subr.mxu0 %v25671_v24  ;;  %v8440_v1 = vsub.f32 %v21741_v30, %v8439_v31  ;;  %v8448_v42 = vand.u32 4294901760, %v8447_v17 }
 0x927   :  { %15801 = vmatprep.subr.mxu1 %v25671_v24  ;;  %15759 = vmatpush3.msra.mxu0 %v7807_v34  ;;  %v8406_v34 = vand.u32 4294901760, %v8405_v51  ;;  %v8419_v7 = vsub.f32 %v21725_v39, %v8418_v27  ;;  %v8413_v28 = vand.u32 4294901760, %v8412_v26  ;;  %v8427_v49 = vand.u32 4294901760, %v8426_v60 }
 0x928   :  { %15802 = vmatpush3.msra.mxu1 %v21463_v63  ;;  %15760 = vmatprep.subr.mxu0 %v25671_v24  ;;  %v8433_v63 = vsub.f32 %v21731_v54, %v8432_v55  ;;  %v8441_v56 = vand.u32 4294901760, %v8440_v1  ;;  %v12664_v1 = vld [vmem:[%s24657_s3 + $0x380] sm:$0xff] }
 0x929   :  { %15803 = vmatprep.subr.mxu1 %v25671_v24  ;;  %15761 = vmatpush3.msra.mxu0 %v7814_v25  ;;  %v21757_v25 = vsub.f32 %v12672_v41, %v21734_v45 }
 0x92a   :  { %15804 = vmatpush3.msra.mxu1 %v21476_v36  ;;  %15805 = vmatprep.mubr.msk.f32.mxu1 %vm16022_vm0, %v25671_v24  ;;  %v8420_v36 = vand.u32 4294901760, %v8419_v7  ;;  %v8434_v3 = vand.u32 4294901760, %v8433_v63  ;;  %v12665_v7 = vld [vmem:[%s24657_s3 + $0x388] sm:$0xff] }
 0x92b   :  { %15762 = vmatprep.subr.mxu0 %v25671_v24  ;;  %15806 = vmatmul.mubr.f32.vlgmr.msra.gmra.mxu1 %v21509_v47  ;;  %v8453_v48 = vand.u32 4294901760, %v21757_v25 }
 0x92c   :  { %15763 = vmatpush3.msra.mxu0 %v25716_v43  ;;  %15770 = vmatprep.mubr.msk.f32.mxu0 %vm16022_vm0, %v25671_v24  ;;  %v8467_v43 = vand.u32 4294901760, %v21813_v15 }
 0x92d   :  { %15764 = vmatprep.subr.mxu0 %v25671_v24  ;;  %15843 = vmatprep.subr.mxu1 %v25671_v24  ;;  %v8454_v18 = vsub.f32 %v21757_v25, %v8453_v48 }
 0x92e   :  { %15765 = vmatpush3.msra.mxu0 %v25717_v40  ;;  %15875 = vmatprep.mubr.msk.f32.mxu1 %vm16022_vm0, %v25671_v24  ;;  %v21828_v40 = vsub.f32 %v12669_v57, %v21815_v6  ;;  %v8468_v33 = vsub.f32 %v21813_v15, %v8467_v43 }
 0x92f   :  { %15766 = vmatprep.subr.mxu0 %v25671_v24  ;;  %15844 = vmatpush3.msra.mxu1 %v8406_v34  ;;  %v8455_v38 = vand.u32 4294901760, %v8454_v18  ;;  %v21857_v34 = vand.u32 4294901760, %v12666_v20 }
 0x930   :  { %15767 = vmatpush3.msra.mxu0 %v25718_v29  ;;  %15845 = vmatprep.subr.mxu1 %v25671_v24  ;;  %v21830_v29 = vand.u32 4294901760, %v12668_v32  ;;  %v8474_v58 = vand.u32 4294901760, %v21828_v40  ;;  %v8469_v23 = vand.u32 4294901760, %v8468_v33 }
 0x931   :  { %15768 = vmatprep.subr.mxu0 %v25671_v24  ;;  %15846 = vmatpush3.msra.mxu1 %v8413_v28  ;;  %v21871_v63 = vsub.f32 %v12666_v20, %v21857_v34 }
 0x932   :  { %15769 = vmatpush3.msra.mxu0 %v25719_v22  ;;  %15847 = vmatprep.subr.mxu1 %v25671_v24  ;;  %v12667_v22 = vld [vmem:[%s24657_s3 + $0x398] sm:$0xff]  ;;  %v21843_v16 = vsub.f32 %v12668_v32, %v21830_v29  ;;  %v8475_v41 = vsub.f32 %v21828_v40, %v8474_v58 }
 0x933   :  { %15771 = vmatmul.mubr.f32.vlgmr.msra.gmra.mxu0 %v21509_v47  ;;  %15808 = vmatprep.subr.mxu0 %v25671_v24  ;;  %v8460_v47 = vand.u32 4294901760, %v21801_v44  ;;  %v21847_v46 = vand.u32 4294901760, %v12667_v22  ;;  %v24995_v17 = vand.u32 4294901760, %v21871_v63 }
 0x934   :  { %15840 = vmatprep.mubr.msk.f32.mxu0 %vm16022_vm0, %v25671_v24  ;;  %15809 = vmatpush3.msra.mxu0 %v21679_v19  ;;  %v8481_v51 = vand.u32 4294901760, %v21843_v16  ;;  %v8476_v60 = vand.u32 4294901760, %v8475_v41 }
 0x935   :  { %15810 = vmatprep.subr.mxu0 %v25671_v24  ;;  %15848 = vmatpush3.msra.mxu1 %v8420_v36  ;;  %v8461_v5 = vsub.f32 %v21801_v44, %v8460_v47  ;;  %v21861_v26 = vsub.f32 %v12667_v22, %v21847_v46  ;;  %v21873_v36 = vand.u32 4294901760, %v12665_v7  ;;  %v8496_v61 = vsub.f32 %v21871_v63, %v24995_v17 }
 0x936   :  { %15811 = vmatpush3.msra.mxu0 %v21687_v21  ;;  %15849 = vmatprep.subr.mxu1 %v25671_v24  ;;  %v8482_v28 = vsub.f32 %v21843_v16, %v8481_v51 }
 0x937   :  { %15812 = vmatprep.subr.mxu0 %v25671_v24  ;;  %15850 = vmatpush3.msra.mxu1 %v8427_v49  ;;  %v8462_v50 = vand.u32 4294901760, %v8461_v5  ;;  %v24996_v49 = vand.u32 4294901760, %v21861_v26  ;;  %v21884_v53 = vsub.f32 %v12665_v7, %v21873_v36  ;;  %v8497_v32 = vand.u32 4294901760, %v8496_v61  ;;  %v12663_v61 = vld [vmem:[%s24659_s4 + $0x6] ss:$0 sm:$0xff] }
 0x938   :  { %15813 = vmatpush3.msra.mxu0 %v21699_v9  ;;  %15851 = vmatprep.subr.mxu1 %v25671_v24 }
 0x939   :  { %15814 = vmatprep.subr.mxu0 %v25671_v24  ;;  %15852 = vmatpush3.msra.mxu1 %v8434_v3  ;;  %v8483_v3 = vand.u32 4294901760, %v8482_v28  ;;  %v8489_v18 = vsub.f32 %v21861_v26, %v24996_v49 }
 0x93a   :  { %15815 = vmatpush3.msra.mxu0 %v21701_v14  ;;  %15853 = vmatprep.subr.mxu1 %v25671_v24 }
 0x93b   :  { %15816 = vmatprep.subr.mxu0 %v25671_v24  ;;  %15854 = vmatpush3.msra.mxu1 %v8441_v56  ;;  %v21886_v56 = vand.u32 4294901760, %v12664_v1 }
 0x93c   :  { %15817 = vmatpush3.msra.mxu0 %v21703_v12  ;;  %15855 = vmatprep.subr.mxu1 %v25671_v24 }
 0x93d   :  { %15818 = vmatprep.subr.mxu0 %v25671_v24  ;;  %15856 = vmatpush3.msra.mxu1 %v8448_v42  ;;  %v24994_v42 = vand.u32 4294901760, %v21884_v53  ;;  %v21899_v57 = vsub.f32 %v12664_v1, %v21886_v56 }
 0x93e   :  { %15819 = vmatpush3.msra.mxu0 %v21720_v2  ;;  %15857 = vmatprep.subr.mxu1 %v25671_v24 }
 0x93f   :  { %15820 = vmatprep.subr.mxu0 %v25671_v24  ;;  %15858 = vmatpush3.msra.mxu1 %v8455_v38  ;;  %v8490_v38 = vand.u32 4294901760, %v8489_v18  ;;  %v8503_v5 = vsub.f32 %v21884_v53, %v24994_v42  ;;  %v24993_v22 = vand.u32 4294901760, %v21899_v57 }
 0x940   :  { %15821 = vmatpush3.msra.mxu0 %v21722_v10  ;;  %15859 = vmatprep.subr.mxu1 %v25671_v24 }
 0x941   :  { %15822 = vmatprep.subr.mxu0 %v25671_v24  ;;  %15860 = vmatpush3.msra.mxu1 %v8462_v50  ;;  %v8504_v50 = vand.u32 4294901760, %v8503_v5  ;;  %v8510_v33 = vsub.f32 %v21899_v57, %v24993_v22 }
 0x942   :  { %15823 = vmatpush3.msra.mxu0 %v21734_v45  ;;  %15861 = vmatprep.subr.mxu1 %v25671_v24 }
 0x943   :  { %15824 = vmatprep.subr.mxu0 %v25671_v24  ;;  %15862 = vmatpush3.msra.mxu1 %v8469_v23  ;;  %v8511_v20 = vand.u32 4294901760, %v8510_v33 }
 0x944   :  { %15825 = vmatpush3.msra.mxu0 %v21792_v13  ;;  %15863 = vmatprep.subr.mxu1 %v25671_v24 }
 0x945   :  { %15826 = vmatprep.subr.mxu0 %v25671_v24  ;;  %15864 = vmatpush3.msra.mxu1 %v8476_v60 }
 0x946   :  { %15827 = vmatpush3.msra.mxu0 %v21803_v0  ;;  %15865 = vmatprep.subr.mxu1 %v25671_v24 }
 0x947   :  { %15828 = vmatprep.subr.mxu0 %v25671_v24  ;;  %15866 = vmatpush3.msra.mxu1 %v8483_v3 }
 0x948   :  { %15829 = vmatpush3.msra.mxu0 %v21815_v6  ;;  %15867 = vmatprep.subr.mxu1 %v25671_v24 }
 0x949   :  { %15830 = vmatprep.subr.mxu0 %v25671_v24  ;;  %15868 = vmatpush3.msra.mxu1 %v8490_v38 }
 0x94a   :  { %15831 = vmatpush3.msra.mxu0 %v21830_v29  ;;  %15869 = vmatprep.subr.mxu1 %v25671_v24 }
 0x94b   :  { %15832 = vmatprep.subr.mxu0 %v25671_v24  ;;  %15870 = vmatpush3.msra.mxu1 %v8497_v32 }
 0x94c   :  { %15833 = vmatpush3.msra.mxu0 %v21847_v46  ;;  %15871 = vmatprep.subr.mxu1 %v25671_v24 }
 0x94d   :  { %15834 = vmatprep.subr.mxu0 %v25671_v24  ;;  %15872 = vmatpush3.msra.mxu1 %v8504_v50 }
 0x94e   :  { %15835 = vmatpush3.msra.mxu0 %v21857_v34  ;;  %15873 = vmatprep.subr.mxu1 %v25671_v24 }
 0x94f   :  { %15836 = vmatprep.subr.mxu0 %v25671_v24  ;;  %15874 = vmatpush3.msra.mxu1 %v8511_v20 }
 0x950   :  { %15837 = vmatpush3.msra.mxu0 %v21873_v36  ;;  %15913 = vmatprep.subr.mxu1 %v25671_v24 }
 0x951   :  { %15838 = vmatprep.subr.mxu0 %v25671_v24 }
 0x952   :  { %15839 = vmatpush3.msra.mxu0 %v21886_v56 }
 0x953   :  { %15878 = vmatprep.subr.mxu0 %v25671_v24 }
 0x9a9   :  { %v7881_v23 = vpop.f32.mrf.mxu1 }
 0x9ab   :  { %v15667_v41 = vpop.f32.mrf.mxu1 }
 0x9b1   :  { %v7730_v7 = vpop.f32.mrf.mxu0 }
 0x9b2   :  { %v7731_v38 = vadd.f32 %v12663_v61, %v7730_v7 }
 0x9b3   :  { %v15632_v60 = vpop.f32.mrf.mxu0 }
 0x9b4   :  { %v7882_v5 = vadd.f32 %v7881_v23, %v7731_v38 }
 0x9c9   :  { %v8074_v28 = vpop.f32.mrf.mxu1 }
 0x9cb   :  { %v15737_v1 = vpop.f32.mrf.mxu1 }
 0x9d2   :  { %v7985_v3 = vpop.f32.mrf.mxu0 }
 0x9d3   :  { %v7986_v33 = vadd.f32 %v7985_v3, %v7882_v5 }
 0x9d4   :  { %v15702_v18 = vpop.f32.mrf.mxu0 }
 0x9d5   :  { %v8075_v20 = vadd.f32 %v8074_v28, %v7986_v33  ;;  %v9032_v18 = vld [vmem:[%s24660_s5 + $0x280] sm:$0xff] }
 0x9d6   :  { %v9024_v33 = vld [vmem:[%s24660_s5 + $0x240] sm:$0xff] }
 0x9eb   :  { %v8280_v32 = vpop.f32.mrf.mxu1 }
 0x9ed   :  { %v15807_v50 = vpop.f32.mrf.mxu1 }
 0x9ee   :  { %v9025_v50 = vld [vmem:[%s24660_s5 + $0x248] sm:$0xff] }
 0x9f3   :  { %v8193_v22 = vpop.f32.mrf.mxu0 }
 0x9f4   :  { %v8194_v42 = vadd.f32 %v8193_v22, %v8075_v20 }
 0x9f5   :  { %v15772_v17 = vpop.f32.mrf.mxu0 }
 0x9f6   :  { %v8281_v41 = vadd.f32 %v8280_v32, %v8194_v42 }
 0x9f8   :  { %v8284_v49 = vmax.f32 %v8281_v41, 0.0 }
 0x9fa   :  { %v21919_v60 = vand.u32 4294901760, %v8284_v49 }
 0x9fc   :  { %v21922_v1 = vsub.f32 %v8284_v49, %v21919_v60  ;;  %15876 = vmatmul.mubr.f32.vlgmr.msra.gmra.mxu1 %v21919_v60 }
 0x9fd   :  { %15914 = vmatpush3.msra.mxu1 %v21679_v19  ;;  %15945 = vmatprep.mubr.msk.f32.mxu1 %vm16022_vm0, %v25671_v24 }
 0x9fe   :  { %v8393_v23 = vand.u32 4294901760, %v21922_v1  ;;  %15915 = vmatprep.subr.mxu1 %v25671_v24 }
 0x9ff   :  { %15916 = vmatpush3.msra.mxu1 %v21687_v21 }
 0xa00   :  { %15917 = vmatprep.subr.mxu1 %v25671_v24  ;;  %v8394_v17 = vsub.f32 %v21922_v1, %v8393_v23 }
 0xa01   :  { %15918 = vmatpush3.msra.mxu1 %v21699_v9 }
 0xa02   :  { %15919 = vmatprep.subr.mxu1 %v25671_v24  ;;  %v8395_v49 = vand.u32 4294901760, %v8394_v17  ;;  %v9016_v17 = vld [vmem:[%s24660_s5 + $0x200] sm:$0xff] }
 0xa03   :  { %15920 = vmatpush3.msra.mxu1 %v21701_v14 }
 0xa04   :  { %15921 = vmatprep.subr.mxu1 %v25671_v24  ;;  %15841 = vmatmul.mubr.f32.vlgmr.msra.gmra.mxu0 %v8395_v49 }
 0xa05   :  { %15879 = vmatpush3.msra.mxu0 %v21685_v62  ;;  %15922 = vmatpush3.msra.mxu1 %v21703_v12  ;;  %v25721_v62 = vand.u32 4294901760, %v21871_v63 }
 0xa06   :  { %15880 = vmatprep.subr.mxu0 %v25671_v24  ;;  %15923 = vmatprep.subr.mxu1 %v25671_v24 }
 0xa07   :  { %15881 = vmatpush3.msra.mxu0 %v21717_v52  ;;  %15924 = vmatpush3.msra.mxu1 %v21720_v2 }
 0xa08   :  { %15882 = vmatprep.subr.mxu0 %v25671_v24  ;;  %15925 = vmatprep.subr.mxu1 %v25671_v24 }
 0xa09   :  { %15883 = vmatpush3.msra.mxu0 %v21725_v39  ;;  %15926 = vmatpush3.msra.mxu1 %v21722_v10 }
 0xa0a   :  { %15884 = vmatprep.subr.mxu0 %v25671_v24  ;;  %15927 = vmatprep.subr.mxu1 %v25671_v24 }
 0xa0b   :  { %15885 = vmatpush3.msra.mxu0 %v21728_v8  ;;  %15928 = vmatpush3.msra.mxu1 %v21734_v45  ;;  %v9064_v8 = vld [vmem:[%s24660_s5 + $0x380] sm:$0xff] }
 0xa0c   :  { %15886 = vmatprep.subr.mxu0 %v25671_v24  ;;  %15929 = vmatprep.subr.mxu1 %v25671_v24 }
 0xa0d   :  { %15887 = vmatpush3.msra.mxu0 %v21731_v54  ;;  %15930 = vmatpush3.msra.mxu1 %v21792_v13 }
 0xa0e   :  { %15888 = vmatprep.subr.mxu0 %v25671_v24  ;;  %15931 = vmatprep.subr.mxu1 %v25671_v24 }
 0xa0f   :  { %15889 = vmatpush3.msra.mxu0 %v21741_v30  ;;  %15932 = vmatpush3.msra.mxu1 %v21803_v0  ;;  %v9056_v30 = vld [vmem:[%s24660_s5 + $0x340] sm:$0xff] }
 0xa10   :  { %15890 = vmatprep.subr.mxu0 %v25671_v24  ;;  %15933 = vmatprep.subr.mxu1 %v25671_v24 }
 0xa11   :  { %15891 = vmatpush3.msra.mxu0 %v21745_v4  ;;  %15934 = vmatpush3.msra.mxu1 %v21815_v6  ;;  %v9049_v4 = vld [vmem:[%s24660_s5 + $0x308] sm:$0xff] }
 0xa12   :  { %15892 = vmatprep.subr.mxu0 %v25671_v24  ;;  %15935 = vmatprep.subr.mxu1 %v25671_v24 }
 0xa13   :  { %15893 = vmatpush3.msra.mxu0 %v21757_v25  ;;  %15936 = vmatpush3.msra.mxu1 %v21830_v29  ;;  %v9048_v25 = vld [vmem:[%s24660_s5 + $0x300] sm:$0xff] }
 0xa14   :  { %15894 = vmatprep.subr.mxu0 %v25671_v24  ;;  %15937 = vmatprep.subr.mxu1 %v25671_v24 }
 0xa15   :  { %15895 = vmatpush3.msra.mxu0 %v21801_v44  ;;  %15938 = vmatpush3.msra.mxu1 %v21847_v46  ;;  %v22137_v44 = vand.u32 4294901760, %v9048_v25 }
 0xa16   :  { %15896 = vmatprep.subr.mxu0 %v25671_v24  ;;  %15939 = vmatprep.subr.mxu1 %v25671_v24 }
 0xa17   :  { %15897 = vmatpush3.msra.mxu0 %v21813_v15  ;;  %15940 = vmatpush3.msra.mxu1 %v21857_v34 }
 0xa18   :  { %15898 = vmatprep.subr.mxu0 %v25671_v24  ;;  %15941 = vmatprep.subr.mxu1 %v25671_v24 }
 0xa19   :  { %15899 = vmatpush3.msra.mxu0 %v21828_v40  ;;  %15942 = vmatpush3.msra.mxu1 %v21873_v36 }
 0xa1a   :  { %15900 = vmatprep.subr.mxu0 %v25671_v24  ;;  %15943 = vmatprep.subr.mxu1 %v25671_v24 }
 0xa1b   :  { %15901 = vmatpush3.msra.mxu0 %v21843_v16  ;;  %15944 = vmatpush3.msra.mxu1 %v21886_v56  ;;  %v9041_v16 = vld [vmem:[%s24660_s5 + $0x2c8] sm:$0xff] }
 0xa1c   :  { %15902 = vmatprep.subr.mxu0 %v25671_v24  ;;  %15946 = vmatmul.mubr.f32.vlgmr.msra.gmra.mxu1 %v8393_v23  ;;  %v22189_v3 = vand.u32 4294901760, %v9041_v16  ;;  %v9017_v23 = vld [vmem:[%s24660_s5 + $0x208] sm:$0xff] }
 0xa1d   :  { %15983 = vmatprep.subr.mxu1 %v25671_v24  ;;  %15903 = vmatpush3.msra.mxu0 %v21861_v26 }
 0xa1e   :  { %15984 = vmatpush3.msra.mxu1 %v21679_v19  ;;  %15904 = vmatprep.subr.mxu0 %v25671_v24  ;;  %v25720_v19 = vand.u32 4294901760, %v21861_v26 }
 0xa1f   :  { %15985 = vmatprep.subr.mxu1 %v25671_v24  ;;  %15905 = vmatpush3.msra.mxu0 %v21871_v63  ;;  %v9040_v63 = vld [vmem:[%s24660_s5 + $0x2c0] sm:$0xff] }
 0xa20   :  { %15986 = vmatpush3.msra.mxu1 %v21687_v21  ;;  %15906 = vmatprep.subr.mxu0 %v25671_v24  ;;  %v25722_v21 = vand.u32 4294901760, %v21884_v53  ;;  %v22200_v5 = vand.u32 4294901760, %v9040_v63 }
 0xa21   :  { %15987 = vmatprep.subr.mxu1 %v25671_v24  ;;  %15907 = vmatpush3.msra.mxu0 %v21884_v53 }
 0xa22   :  { %15988 = vmatpush3.msra.mxu1 %v21699_v9  ;;  %15908 = vmatprep.subr.mxu0 %v25671_v24  ;;  %v25723_v9 = vand.u32 4294901760, %v21899_v57 }
 0xa23   :  { %15989 = vmatprep.subr.mxu1 %v25671_v24  ;;  %15909 = vmatpush3.msra.mxu0 %v21899_v57  ;;  %v9033_v57 = vld [vmem:[%s24660_s5 + $0x288] sm:$0xff] }
 0xa24   :  { %15910 = vmatprep.mubr.msk.f32.mxu0 %vm16022_vm0, %v25671_v24  ;;  %15990 = vmatpush3.msra.mxu1 %v21701_v14  ;;  %v9073_v14 = vld [vmem:[%s24660_s5 + $0x3c8] sm:$0xff] }
 0xa25   :  { %15911 = vmatmul.mubr.f32.vlgmr.msra.gmra.mxu0 %v21922_v1  ;;  %15948 = vmatprep.subr.mxu0 %v25671_v24  ;;  %v22211_v1 = vand.u32 4294901760, %v9033_v57 }
 0xa26   :  { %15991 = vmatprep.subr.mxu1 %v25671_v24  ;;  %15949 = vmatpush3.msra.mxu0 %v8404_v59  ;;  %v9072_v59 = vld [vmem:[%s24660_s5 + $0x3c0] sm:$0xff] }
 0xa27   :  { %15992 = vmatpush3.msra.mxu1 %v21703_v12  ;;  %15950 = vmatprep.subr.mxu0 %v25671_v24  ;;  %v22085_v12 = vand.u32 4294901760, %v9073_v14  ;;  %v22090_v52 = vand.u32 4294901760, %v9072_v59 }
 0xa28   :  { %15993 = vmatprep.subr.mxu1 %v25671_v24  ;;  %15951 = vmatpush3.msra.mxu0 %v8411_v35  ;;  %v9057_v35 = vld [vmem:[%s24660_s5 + $0x348] sm:$0xff] }
 0xa29   :  { %15994 = vmatpush3.msra.mxu1 %v21720_v2  ;;  %15952 = vmatprep.subr.mxu0 %v25671_v24  ;;  %v9065_v2 = vld [vmem:[%s24660_s5 + $0x388] sm:$0xff]  ;;  %v22105_v54 = vsub.f32 %v9072_v59, %v22090_v52  ;;  %v22230_v59 = vand.u32 4294901760, %v9025_v50 }
 0xa2a   :  { %15995 = vmatprep.subr.mxu1 %v25671_v24  ;;  %15953 = vmatpush3.msra.mxu0 %v8418_v27  ;;  %v22098_v39 = vand.u32 4294901760, %v9065_v2 }
 0xa2b   :  { %15996 = vmatpush3.msra.mxu1 %v21722_v10  ;;  %15954 = vmatprep.subr.mxu0 %v25671_v24  ;;  %v22096_v10 = vsub.f32 %v9073_v14, %v22085_v12  ;;  %v22228_v14 = vsub.f32 %v9033_v57, %v22211_v1 }
 0xa2c   :  { %15997 = vmatprep.subr.mxu1 %v25671_v24  ;;  %15955 = vmatpush3.msra.mxu0 %v8425_v37  ;;  %v22121_v37 = vsub.f32 %v9065_v2, %v22098_v39  ;;  %v22232_v2 = vand.u32 4294901760, %v9024_v33 }
 0xa2d   :  { %15998 = vmatpush3.msra.mxu1 %v21734_v45  ;;  %15956 = vmatprep.subr.mxu0 %v25671_v24  ;;  %25724 = vst [vmem:[#allocation9_spill] sm:$0xff] %v22096_v10  ;;  %v22107_v45 = vand.u32 4294901760, %v9064_v8  ;;  %v25016_v27 = vand.u32 4294901760, %v22096_v10 }
 0xa2e   :  { %15999 = vmatprep.subr.mxu1 %v25671_v24  ;;  %15957 = vmatpush3.msra.mxu0 %v8432_v55  ;;  %v22123_v55 = vand.u32 4294901760, %v9057_v35 }
 0xa2f   :  { %16000 = vmatpush3.msra.mxu1 %v21792_v13  ;;  %15958 = vmatprep.subr.mxu0 %v25671_v24  ;;  %v22135_v13 = vand.u32 4294901760, %v9049_v4 }
 0xa30   :  { %16001 = vmatprep.subr.mxu1 %v25671_v24  ;;  %15959 = vmatpush3.msra.mxu0 %v8439_v31  ;;  %v22125_v31 = vand.u32 4294901760, %v9056_v30  ;;  %v22145_v15 = vsub.f32 %v9057_v35, %v22123_v55 }
 0xa31   :  { %16002 = vmatpush3.msra.mxu1 %v21803_v0  ;;  %15960 = vmatprep.subr.mxu0 %v25671_v24  ;;  %v9233_v0 = vsub.f32 %v22096_v10, %v25016_v27 }
 0xa32   :  { %16003 = vmatprep.subr.mxu1 %v25671_v24  ;;  %15961 = vmatpush3.msra.mxu0 %v8446_v11  ;;  %v25014_v11 = vand.u32 4294901760, %v22105_v54 }
 0xa33   :  { %16004 = vmatpush3.msra.mxu1 %v21815_v6  ;;  %15962 = vmatprep.subr.mxu0 %v25671_v24  ;;  %v22148_v6 = vsub.f32 %v9056_v30, %v22125_v31  ;;  %v22239_v30 = vand.u32 4294901760, %v9017_v23 }
 0xa34   :  { %16005 = vmatprep.subr.mxu1 %v25671_v24  ;;  %15963 = vmatpush3.msra.mxu0 %v8453_v48  ;;  %v22133_v48 = vsub.f32 %v9064_v8, %v22107_v45 }
 0xa35   :  { %16006 = vmatpush3.msra.mxu1 %v21830_v29  ;;  %15964 = vmatprep.subr.mxu0 %v25671_v24  ;;  %v22156_v29 = vsub.f32 %v9049_v4, %v22135_v13  ;;  %v25007_v26 = vand.u32 4294901760, %v22148_v6  ;;  %v22241_v4 = vand.u32 4294901760, %v9016_v17 }
 0xa36   :  { %16007 = vmatprep.subr.mxu1 %v25671_v24  ;;  %15965 = vmatpush3.msra.mxu0 %v8460_v47  ;;  %v25012_v47 = vand.u32 4294901760, %v22121_v37  ;;  %v25011_v40 = vand.u32 4294901760, %v22133_v48 }
 0xa37   :  { %16008 = vmatpush3.msra.mxu1 %v21847_v46  ;;  %15966 = vmatprep.subr.mxu0 %v25671_v24  ;;  %v9234_v46 = vand.u32 4294901760, %v9233_v0  ;;  %v9263_v28 = vsub.f32 %v22148_v6, %v25007_v26  ;;  %v25002_v0 = vand.u32 4294901760, %v22228_v14 }
 0xa38   :  { %16009 = vmatprep.subr.mxu1 %v25671_v24  ;;  %15967 = vmatpush3.msra.mxu0 %v8467_v43  ;;  %v9239_v43 = vsub.f32 %v22105_v54, %v25014_v11  ;;  %v9251_v53 = vsub.f32 %v22133_v48, %v25011_v40 }
 0xa39   :  { %16010 = vmatpush3.msra.mxu1 %v21857_v34  ;;  %15968 = vmatprep.subr.mxu0 %v25671_v24  ;;  %v25010_v34 = vand.u32 4294901760, %v22145_v15  ;;  %v9264_v41 = vand.u32 4294901760, %v9263_v28 }
 0xa3a   :  { %16011 = vmatprep.subr.mxu1 %v25671_v24  ;;  %15969 = vmatpush3.msra.mxu0 %v8474_v58  ;;  %v22159_v58 = vsub.f32 %v9048_v25, %v22137_v44  ;;  %v9252_v61 = vand.u32 4294901760, %v9251_v53  ;;  %v9009_v53 = vld [vmem:[%s24660_s5 + $0x1c8] sm:$0xff] }
 0xa3b   :  { %16012 = vmatpush3.msra.mxu1 %v21873_v36  ;;  %15970 = vmatprep.subr.mxu0 %v25671_v24  ;;  %v9240_v36 = vand.u32 4294901760, %v9239_v43  ;;  %v9257_v7 = vsub.f32 %v22145_v15, %v25010_v34  ;;  %v22249_v43 = vsub.f32 %v9025_v50, %v22230_v59 }
 0xa3c   :  { %16013 = vmatprep.subr.mxu1 %v25671_v24  ;;  %15971 = vmatpush3.msra.mxu0 %v8481_v51  ;;  %v9245_v51 = vsub.f32 %v22121_v37, %v25012_v47  ;;  %v25005_v42 = vand.u32 4294901760, %v22159_v58  ;;  %v8968_v47 = vld [vmem:[%s24660_s5 + $0x80] sm:$0xff] }
 0xa3d   :  { %16014 = vmatpush3.msra.mxu1 %v21886_v56  ;;  %16015 = vmatprep.mubr.msk.f32.mxu1 %vm16022_vm0, %v25671_v24  ;;  %v25006_v56 = vand.u32 4294901760, %v22156_v29  ;;  %v9258_v20 = vand.u32 4294901760, %v9257_v7  ;;  %v24998_v7 = vand.u32 4294901760, %v22249_v43 }
 0xa3e   :  { %15972 = vmatprep.subr.mxu0 %v25671_v24  ;;  %16016 = vmatmul.mubr.f32.vlgmr.msra.gmra.mxu1 %v21919_v60  ;;  %v9246_v22 = vand.u32 4294901760, %v9245_v51  ;;  %v9275_v32 = vsub.f32 %v22159_v58, %v25005_v42 }
 0xa3f   :  { %15973 = vmatpush3.msra.mxu0 %v25720_v19  ;;  %15980 = vmatprep.mubr.msk.f32.mxu0 %vm16022_vm0, %v25671_v24  ;;  %v9269_v38 = vsub.f32 %v22156_v29, %v25006_v56 }
 0xa40   :  { %15974 = vmatprep.subr.mxu0 %v25671_v24  ;;  %9454 = vmatprep.mubr.f32.mxu1 %v25671_v24  ;;  %v9276_v19 = vand.u32 4294901760, %v9275_v32 }
 0xa41   :  { %15975 = vmatpush3.msra.mxu0 %v25721_v62  ;;  %9235 = vmatprep.subr.mxu1 %v9234_v46  ;;  %v9270_v49 = vand.u32 4294901760, %v9269_v38  ;;  %v22221_v62 = vsub.f32 %v9040_v63, %v22200_v5  ;;  %v22260_v63 = vsub.f32 %v9017_v23, %v22239_v30 }
 0xa42   :  { %15976 = vmatprep.subr.mxu0 %v25671_v24  ;;  %9241 = vmatpush1.msra.mxu1 %v9240_v36  ;;  %v22263_v36 = vsub.f32 %v9016_v17, %v22241_v4  ;;  %v22293_v17 = vand.u32 4294901760, %v9009_v53 }
 0xa43   :  { %15977 = vmatpush3.msra.mxu0 %v25722_v21  ;;  %9247 = vmatprep.subr.mxu1 %v9246_v22  ;;  %v22223_v21 = vand.u32 4294901760, %v9032_v18  ;;  %v25003_v8 = vand.u32 4294901760, %v22221_v62  ;;  %v9293_v22 = vsub.f32 %v22228_v14, %v25002_v0  ;;  %v24999_v32 = vand.u32 4294901760, %v22260_v63 }
 0xa44   :  { %15978 = vmatprep.subr.mxu0 %v25671_v24  ;;  %9253 = vmatpush1.msra.mxu1 %v9252_v61  ;;  %v25000_v50 = vand.u32 4294901760, %v22263_v36 }
 0xa45   :  { %15979 = vmatpush3.msra.mxu0 %v25723_v9  ;;  %9259 = vmatprep.subr.mxu1 %v9258_v20  ;;  %v22237_v35 = vsub.f32 %v9032_v18, %v22223_v21  ;;  %v9287_v46 = vsub.f32 %v22221_v62, %v25003_v8  ;;  %v9008_v18 = vld [vmem:[%s24660_s5 + $0x1c0] sm:$0xff]  ;;  %v9294_v20 = vand.u32 4294901760, %v9293_v22  ;;  %v8993_v22 = vld [vmem:[%s24660_s5 + $0x148] sm:$0xff] }
 0xa46   :  { %15981 = vmatmul.mubr.f32.vlgmr.msra.gmra.mxu0 %v21919_v60  ;;  %9123 = vmatprep.subr.mxu0 %v22085_v12  ;;  %v22209_v60 = vsub.f32 %v9041_v16, %v22189_v3  ;;  %v22252_v16 = vsub.f32 %v9024_v33, %v22232_v2  ;;  %v9001_v33 = vld [vmem:[%s24660_s5 + $0x188] sm:$0xff] }
 0xa47   :  { %9218 = vmatprep.mubr.f32.mxu0 %v25671_v24  ;;  %9125 = vmatpush1.msra.mxu0 %v22090_v52  ;;  %v25001_v51 = vand.u32 4294901760, %v22237_v35  ;;  %v9288_v61 = vand.u32 4294901760, %v9287_v46  ;;  %v9323_v46 = vsub.f32 %v22263_v36, %v25000_v50  ;;  %v8985_v50 = vld [vmem:[%s24660_s5 + $0x108] sm:$0xff] }
 0xa48   :  { %9127 = vmatprep.subr.mxu0 %v22098_v39  ;;  %v25004_v9 = vand.u32 4294901760, %v22209_v60  ;;  %9265 = vmatpush1.msra.mxu1 %v9264_v41  ;;  %v24997_v28 = vand.u32 4294901760, %v22252_v16  ;;  %v9305_v41 = vsub.f32 %v22249_v43, %v24998_v7  ;;  %v22313_v7 = vsub.f32 %v9009_v53, %v22293_v17 }
 0xa49   :  { %9129 = vmatpush1.msra.mxu0 %v22107_v45  ;;  %9271 = vmatprep.subr.mxu1 %v9270_v49  ;;  %v9299_v38 = vsub.f32 %v22237_v35, %v25001_v51  ;;  %v9000_v49 = vld [vmem:[%s24660_s5 + $0x180] sm:$0xff] }
 0xa4a   :  { %9131 = vmatprep.subr.mxu0 %v22123_v55  ;;  %v9281_v25 = vsub.f32 %v22209_v60, %v25004_v9  ;;  %9277 = vmatpush1.msra.mxu1 %v9276_v19  ;;  %v9311_v23 = vsub.f32 %v22252_v16, %v24997_v28  ;;  %v8992_v28 = vld [vmem:[%s24660_s5 + $0x140] sm:$0xff]  ;;  %25725 = vst [vmem:[#allocation14_spill] sm:$0xff] %v22313_v7  ;;  %v22327_v53 = vand.u32 4294901760, %v9000_v49  ;;  %v22334_v9 = vand.u32 4294901760, %v8993_v22 }
 0xa4b   :  { %9133 = vmatpush1.msra.mxu0 %v22125_v31  ;;  %v9300_v19 = vand.u32 4294901760, %v9299_v38  ;;  %v8984_v51 = vld [vmem:[%s24660_s5 + $0x100] sm:$0xff]  ;;  %v22336_v42 = vand.u32 4294901760, %v8992_v28 }
 0xa4c   :  { %9135 = vmatprep.subr.mxu0 %v22135_v13  ;;  %v9282_v57 = vand.u32 4294901760, %v9281_v25  ;;  %v9317_v25 = vsub.f32 %v22260_v63, %v24999_v32  ;;  %v9312_v38 = vand.u32 4294901760, %v9311_v23  ;;  %v22315_v32 = vand.u32 4294901760, %v9001_v33 }
 0xa4d   :  { %9137 = vmatpush1.msra.mxu0 %v22137_v44  ;;  %v25008_v23 = vand.u32 4294901760, %v22313_v7  ;;  %v22356_v56 = vsub.f32 %v8992_v28, %v22336_v42  ;;  %v8977_v28 = vld [vmem:[%s24660_s5 + $0xc8] sm:$0xff] }
 0xa4e   :  { %9139 = vmatprep.subr.mxu0 %v22189_v3  ;;  %9283 = vmatprep.subr.mxu1 %v9282_v57  ;;  %v22304_v57 = vand.u32 4294901760, %v9008_v18  ;;  %v9318_v0 = vand.u32 4294901760, %v9317_v25  ;;  %v22332_v8 = vsub.f32 %v9001_v33, %v22315_v32  ;;  %v22343_v25 = vand.u32 4294901760, %v8985_v50 }
 0xa4f   :  { %9141 = vmatpush1.msra.mxu0 %v22200_v5  ;;  %9289 = vmatpush1.msra.mxu1 %v9288_v61  ;;  %v9306_v61 = vand.u32 4294901760, %v9305_v41  ;;  %v9329_v33 = vsub.f32 %v22313_v7, %v25008_v23  ;;  %25731 = vst [vmem:[#allocation19_spill] sm:$0xff] %v22356_v56  ;;  %v25022_v34 = vand.u32 4294901760, %v22356_v56  ;;  %v22397_v27 = vand.u32 4294901760, %v8977_v28 }
 0xa50   :  { %9143 = vmatprep.subr.mxu0 %v22211_v1  ;;  %9295 = vmatprep.subr.mxu1 %v9294_v20  ;;  %v9324_v20 = vand.u32 4294901760, %v9323_v46  ;;  %v22325_v41 = vsub.f32 %v9008_v18, %v22304_v57  ;;  %25727 = vst [vmem:[#allocation15_spill] sm:$0xff] %v22332_v8  ;;  %v22345_v46 = vand.u32 4294901760, %v8984_v51  ;;  %v22364_v26 = vsub.f32 %v8985_v50, %v22343_v25 }
 0xa51   :  { %9145 = vmatpush1.msra.mxu0 %v22223_v21  ;;  %9301 = vmatpush1.msra.mxu1 %v9300_v19  ;;  %v22341_v19 = vsub.f32 %v9000_v49, %v22327_v53 }
 0xa52   :  { %9147 = vmatprep.subr.mxu0 %v22230_v59  ;;  %25726 = vst [vmem:[#allocation29_spill] sm:$0xff] %v22325_v41  ;;  %9307 = vmatprep.subr.mxu1 %v9306_v61  ;;  %v25009_v18 = vand.u32 4294901760, %v22325_v41  ;;  %25729 = vst [vmem:[#allocation17_spill] sm:$0xff] %v22345_v46  ;;  %v25013_v61 = vand.u32 4294901760, %v22332_v8  ;;  %v22367_v23 = vsub.f32 %v8984_v51, %v22345_v46  ;;  %v8976_v51 = vld [vmem:[%s24660_s5 + $0xc0] sm:$0xff] }
 0xa53   :  { %9149 = vmatpush1.msra.mxu0 %v22232_v2  ;;  %9313 = vmatpush1.msra.mxu1 %v9312_v38  ;;  %25728 = vst [vmem:[#allocation3_spill] sm:$0xff] %v22341_v19  ;;  %v22353_v38 = vsub.f32 %v8993_v22, %v22334_v9  ;;  %25732 = vst [vmem:[#allocation5_spill] sm:$0xff] %v22364_v26  ;;  %v9330_v22 = vand.u32 4294901760, %v9329_v33 }
 0xa54   :  { %9151 = vmatprep.subr.mxu0 %v22239_v30  ;;  %9319 = vmatprep.subr.mxu1 %v9318_v0  ;;  %v9335_v49 = vsub.f32 %v22325_v41, %v25009_v18  ;;  %v25015_v0 = vand.u32 4294901760, %v22341_v19  ;;  %25733 = vst [vmem:[#allocation21_spill] sm:$0xff] %v22367_v23 }
 0xa55   :  { %9153 = vmatpush1.msra.mxu0 %v22241_v4  ;;  %25730 = vst [vmem:[#allocation12_spill] sm:$0xff] %v22353_v38  ;;  %9325 = vmatpush1.msra.mxu1 %v9324_v20  ;;  %v9341_v20 = vsub.f32 %v22332_v8, %v25013_v61  ;;  %v25019_v18 = vand.u32 4294901760, %v22353_v38  ;;  %v8969_v61 = vld [vmem:[%s24660_s5 + $0x88] sm:$0xff]  ;;  %v22417_v8 = vsub.f32 %v8977_v28, %v22397_v27  ;;  %v22431_v28 = vand.u32 4294901760, %v8968_v47 }
 0xa56   :  { %9155 = vmatprep.subr.mxu0 %v22293_v17  ;;  %v9336_v50 = vand.u32 4294901760, %v9335_v49  ;;  %v9347_v40 = vsub.f32 %v22341_v19, %v25015_v0  ;;  %9331 = vmatprep.subr.mxu1 %v9330_v22  ;;  %v9359_v0 = vsub.f32 %v22356_v56, %v25022_v34  ;;  %v25734_v19 = vand.u32 4294901760, %v22364_v26  ;;  %v8961_v34 = vld [vmem:[%s24660_s5 + $0x48] sm:$0xff]  ;;  %v8960_v56 = vld [vmem:[%s24660_s5 + $0x40] sm:$0xff] }
 0xa57   :  { %9157 = vmatpush1.msra.mxu0 %v22304_v57  ;;  %v9342_v11 = vand.u32 4294901760, %v9341_v20  ;;  %v9353_v49 = vsub.f32 %v22353_v38, %v25019_v18  ;;  %v25735_v20 = vand.u32 4294901760, %v22367_v23  ;;  %v22408_v38 = vand.u32 4294901760, %v8976_v51  ;;  %25736 = vst [vmem:[#allocation8_spill] sm:$0xff] %v22417_v8  ;;  %25739 = vst [vmem:[#allocation26_spill] sm:$0xff] %v22431_v28 }
 0xa58   :  { %9159 = vmatprep.subr.mxu0 %v22315_v32  ;;  %9337 = vmatpush1.msra.mxu1 %v9336_v50  ;;  %v9348_v33 = vand.u32 4294901760, %v9347_v40  ;;  %v9365_v22 = vsub.f32 %v22364_v26, %v25734_v19  ;;  %v9360_v50 = vand.u32 4294901760, %v9359_v0  ;;  %v22419_v19 = vand.u32 4294901760, %v8969_v61 }
 0xa59   :  { %9161 = vmatpush1.msra.mxu0 %v22327_v53  ;;  %v9371_v18 = vsub.f32 %v22367_v23, %v25735_v20  ;;  %9343 = vmatprep.subr.mxu1 %v9342_v11  ;;  %v9354_v40 = vand.u32 4294901760, %v9353_v49  ;;  %v8953_v20 = vld [vmem:[%s24660_s5 + $0x8] sm:$0xff]  ;;  %v8952_v23 = vld [vmem:[%s24660_s5] sm:$0xff]  ;;  %v22429_v0 = vsub.f32 %v8976_v51, %v22408_v38  ;;  %v25041_v49 = vand.u32 4294901760, %v22417_v8 }
 0xa5a   :  { %9163 = vmatprep.subr.mxu0 %v22334_v9  ;;  %25737 = vst [vmem:[#allocation10_spill] sm:$0xff] %v22419_v19  ;;  %9349 = vmatpush1.msra.mxu1 %v9348_v33  ;;  %v9366_v26 = vand.u32 4294901760, %v9365_v22  ;;  %v22436_v41 = vsub.f32 %v8969_v61, %v22419_v19  ;;  %v22438_v7 = vand.u32 4294901760, %v8961_v34  ;;  %v22445_v51 = vsub.f32 %v8968_v47, %v22431_v28 }
 0xa5b   :  { %9165 = vmatpush1.msra.mxu0 %v22336_v42  ;;  %v9372_v11 = vand.u32 4294901760, %v9371_v18  ;;  %25738 = vst [vmem:[#allocation13_spill] sm:$0xff] %v22429_v0  ;;  %9355 = vmatprep.subr.mxu1 %v9354_v40  ;;  %v22447_v33 = vand.u32 4294901760, %v8953_v20  ;;  %v22449_v22 = vand.u32 4294901760, %v8952_v23  ;;  %v9377_v61 = vsub.f32 %v22417_v8, %v25041_v49 }
 0xa5c   :  { %9167 = vmatprep.subr.mxu0 %v22343_v25  ;;  %25740 = vst [vmem:[#allocation24_spill] sm:$0xff] %v22436_v41  ;;  %9361 = vmatpush1.msra.mxu1 %v9360_v50  ;;  %25741 = vst [vmem:[#allocation16_spill] sm:$0xff] %v22445_v51  ;;  %v25046_v40 = vand.u32 4294901760, %v22436_v41  ;;  %v22457_v50 = vsub.f32 %v8961_v34, %v22438_v7  ;;  %v25744_v47 = vand.u32 4294901760, %v22429_v0 }
 0xa5d   :  { %9169 = vmatpush1.msra.mxu0 %v22345_v46  ;;  %v22440_v46 = vand.u32 4294901760, %v8960_v56  ;;  %9367 = vmatprep.subr.mxu1 %v9366_v26  ;;  %v25047_v26 = vand.u32 4294901760, %v22445_v51  ;;  %v22471_v49 = vsub.f32 %v8952_v23, %v22449_v22  ;;  %v9378_v34 = vand.u32 4294901760, %v9377_v61 }
 0xa5e   :  { %9171 = vmatprep.subr.mxu0 %v22397_v27  ;;  %25742 = vst [vmem:[#allocation30_spill] sm:$0xff] %v22457_v50  ;;  %9373 = vmatpush1.msra.mxu1 %v9372_v11  ;;  %v25052_v11 = vand.u32 4294901760, %v22457_v50 }
 0xa5f   :  { %9173 = vmatpush1.msra.mxu0 %v22408_v38  ;;  %v22460_v18 = vsub.f32 %v8960_v56, %v22440_v46  ;;  %25746 = vst [vmem:[#allocation28_spill] sm:$0xff] %v22471_v49  ;;  %v9389_v56 = vsub.f32 %v22436_v41, %v25046_v40  ;;  %9379 = vmatprep.subr.mxu1 %v9378_v34 }
 0xa60   :  { %9175 = vmatprep.subr.mxu0 %v22419_v19  ;;  %v22468_v19 = vsub.f32 %v8953_v20, %v22447_v33  ;;  %v9395_v20 = vsub.f32 %v22445_v51, %v25047_v26  ;;  %v9401_v40 = vsub.f32 %v22457_v50, %v25052_v11  ;;  %v25747_v51 = vand.u32 4294901760, %v22471_v49 }
 0xa61   :  { %9177 = vmatpush1.msra.mxu0 %v22431_v28  ;;  %25743 = vst [vmem:[#allocation22_spill] sm:$0xff] %v22460_v18  ;;  %v9383_v28 = vsub.f32 %v22429_v0, %v25744_v47  ;;  %v25055_v8 = vand.u32 4294901760, %v22460_v18  ;;  %v9390_v61 = vand.u32 4294901760, %v9389_v56 }
 0xa62   :  { %9179 = vmatprep.subr.mxu0 %v22438_v7  ;;  %25745 = vst [vmem:[#allocation23_spill] sm:$0xff] %v22468_v19  ;;  %v25056_v23 = vand.u32 4294901760, %v22468_v19  ;;  %v9396_v26 = vand.u32 4294901760, %v9395_v20  ;;  %v9419_v34 = vsub.f32 %v22471_v49, %v25747_v51  ;;  %v9402_v56 = vand.u32 4294901760, %v9401_v40  ;;  %v12681_v40 = vld [vmem:[%s24659_s4 + $0x7] ss:$0 sm:$0xff] }
 0xa63   :  { %9181 = vmatpush1.msra.mxu0 %v22440_v46  ;;  %v9384_v47 = vand.u32 4294901760, %v9383_v28  ;;  %v9407_v28 = vsub.f32 %v22460_v18, %v25055_v8 }
 0xa64   :  { %9183 = vmatprep.subr.mxu0 %v22447_v33  ;;  %v9413_v0 = vsub.f32 %v22468_v19, %v25056_v23  ;;  %v9420_v50 = vand.u32 4294901760, %v9419_v34 }
 0xa65   :  { %9185 = vmatpush1.msra.mxu0 %v22449_v22  ;;  %9385 = vmatpush1.msra.mxu1 %v9384_v47  ;;  %v9408_v41 = vand.u32 4294901760, %v9407_v28 }
 0xa66   :  { %9464 = vmatprep.subr.mxu0 %v22096_v10  ;;  %9391 = vmatprep.subr.mxu1 %v9390_v61  ;;  %v9414_v11 = vand.u32 4294901760, %v9413_v0 }
 0xa67   :  { %9397 = vmatpush1.msra.mxu1 %v9396_v26 }
 0xa68   :  { %9403 = vmatprep.subr.mxu1 %v9402_v56 }
 0xa69   :  { %9409 = vmatpush1.msra.mxu1 %v9408_v41 }
 0xa6a   :  { %9415 = vmatprep.subr.mxu1 %v9414_v11 }
 0xa6b   :  { %9421 = vmatpush1.msra.mxu1 %v9420_v50 }
 0xa6c   :  { %9600 = vmatprep.subr.mxu1 %v22085_v12 }
 0xabc   :  { %v8548_v47 = vpop.f32.mrf.mxu1 }
 0xabe   :  { %v15877_v20 = vpop.f32.mrf.mxu1 }
 0xac4   :  { %v8397_v8 = vpop.f32.mrf.mxu0 }
 0xac5   :  { %v8398_v0 = vadd.f32 %v12681_v40, %v8397_v8  ;;  %v25755_v40 = vld [vmem:[#allocation15_spill] sm:$0xff] }
 0xac6   :  { %v15842_v23 = vpop.f32.mrf.mxu0 }
 0xac7   :  { %v8549_v61 = vadd.f32 %v8548_v47, %v8398_v0  ;;  %v25753_v47 = vld [vmem:[#allocation14_spill] sm:$0xff] }
 0xac8   :  { %v25756_v0 = vld [vmem:[#allocation10_spill] sm:$0xff] }
 0xadc   :  { %v8741_v10 = vpop.f32.mrf.mxu1 }
 0xade   :  { %v15947_v19 = vpop.f32.mrf.mxu1 }
 0xae5   :  { %v8652_v18 = vpop.f32.mrf.mxu0 }
 0xae6   :  { %v8653_v11 = vadd.f32 %v8652_v18, %v8549_v61  ;;  %v25752_v18 = vld [vmem:[#allocation17_spill] sm:$0xff]  ;;  %v25758_v61 = vld [vmem:[#allocation26_spill] sm:$0xff] }
 0xae7   :  { %v15912_v51 = vpop.f32.mrf.mxu0 }
 0xae8   :  { %v8742_v50 = vadd.f32 %v8741_v10, %v8653_v11  ;;  %v25754_v51 = vld [vmem:[#allocation29_spill] sm:$0xff]  ;;  %v25760_v11 = vld [vmem:[#allocation19_spill] sm:$0xff] }
 0xafe   :  { %v8947_v26 = vpop.f32.mrf.mxu1 }
 0xb00   :  { %v16017_v41 = vpop.f32.mrf.mxu1 }
 0xb01   :  { %v25759_v41 = vld [vmem:[#allocation12_spill] sm:$0xff] }
 0xb06   :  { %v8860_v28 = vpop.f32.mrf.mxu0 }
 0xb07   :  { %v8861_v34 = vadd.f32 %v8860_v28, %v8742_v50  ;;  %v25761_v50 = vld [vmem:[#allocation5_spill] sm:$0xff] }
 0xb08   :  { %v15982_v56 = vpop.f32.mrf.mxu0  ;;  %v25762_v28 = vld [vmem:[#allocation21_spill] sm:$0xff] }
 0xb09   :  { %v8948_v20 = vadd.f32 %v8947_v26, %v8861_v34  ;;  %v25757_v26 = vld [vmem:[#allocation3_spill] sm:$0xff]  ;;  %v25763_v34 = vld [vmem:[#allocation8_spill] sm:$0xff]  ;;  %v25764_v56 = vld [vmem:[#allocation13_spill] sm:$0xff] }
 0xb0b   :  { %v8951_v49 = vmax.f32 %v8948_v20, 0.0  ;;  %v25765_v20 = vld [vmem:[#allocation24_spill] sm:$0xff] }
 0xb0d   :  { %v22503_v23 = vand.u32 4294901760, %v8951_v49 }
 0xb0f   :  { %25748 = vst [vmem:[#allocation25_spill] sm:$0xff] %v22503_v23  ;;  %v22506_v19 = vsub.f32 %v8951_v49, %v22503_v23  ;;  %9456 = vmatmul.mubr.f32.vlgmr.msra.gmra.mxu1 %v22503_v23  ;;  %v25768_v23 = vld [vmem:[#allocation22_spill] sm:$0xff] }
 0xb10   :  { %9602 = vmatpush1.msra.mxu1 %v22090_v52  ;;  %9695 = vmatprep.mubr.f32.mxu1 %v25671_v24 }
 0xb11   :  { %25749 = vst [vmem:[#allocation27_spill] sm:$0xff] %v22506_v19  ;;  %9604 = vmatprep.subr.mxu1 %v22098_v39  ;;  %v22513_v10 = vand.u32 4294901760, %v22506_v19 }
 0xb12   :  { %9606 = vmatpush1.msra.mxu1 %v22107_v45 }
 0xb13   :  { %25750 = vst [vmem:[#allocation7_spill] sm:$0xff] %v22513_v10  ;;  %9608 = vmatprep.subr.mxu1 %v22123_v55  ;;  %v9222_v8 = vsub.f32 %v22506_v19, %v22513_v10 }
 0xb14   :  { %9610 = vmatpush1.msra.mxu1 %v22125_v31 }
 0xb15   :  { %9612 = vmatprep.subr.mxu1 %v22135_v13  ;;  %v22521_v49 = vand.u32 4294901760, %v9222_v8  ;;  %v25766_v8 = vld [vmem:[#allocation16_spill] sm:$0xff] }
 0xb16   :  { %9614 = vmatpush1.msra.mxu1 %v22137_v44 }
 0xb17   :  { %25751 = vst [vmem:[#allocation20_spill] sm:$0xff] %v22521_v49  ;;  %9616 = vmatprep.subr.mxu1 %v22189_v3  ;;  %9224 = vmatmul.mubr.f32.vlgmr.msra.gmra.mxu0 %v22521_v49  ;;  %v25767_v49 = vld [vmem:[#allocation30_spill] sm:$0xff] }
 0xb18   :  { %9467 = vmatpush1.msra.mxu0 %v22105_v54  ;;  %9618 = vmatpush1.msra.mxu1 %v22200_v5 }
 0xb19   :  { %9470 = vmatprep.subr.mxu0 %v22121_v37  ;;  %9620 = vmatprep.subr.mxu1 %v22211_v1 }
 0xb1a   :  { %9473 = vmatpush1.msra.mxu0 %v22133_v48  ;;  %9622 = vmatpush1.msra.mxu1 %v22223_v21 }
 0xb1b   :  { %9476 = vmatprep.subr.mxu0 %v22145_v15  ;;  %9624 = vmatprep.subr.mxu1 %v22230_v59 }
 0xb1c   :  { %9479 = vmatpush1.msra.mxu0 %v22148_v6  ;;  %9626 = vmatpush1.msra.mxu1 %v22232_v2 }
 0xb1d   :  { %9482 = vmatprep.subr.mxu0 %v22156_v29  ;;  %9628 = vmatprep.subr.mxu1 %v22239_v30 }
 0xb1e   :  { %9485 = vmatpush1.msra.mxu0 %v22159_v58  ;;  %9630 = vmatpush1.msra.mxu1 %v22241_v4 }
 0xb1f   :  { %9488 = vmatprep.subr.mxu0 %v22209_v60  ;;  %9632 = vmatprep.subr.mxu1 %v22293_v17 }
 0xb20   :  { %9491 = vmatpush1.msra.mxu0 %v22221_v62  ;;  %9634 = vmatpush1.msra.mxu1 %v22304_v57 }
 0xb21   :  { %9494 = vmatprep.subr.mxu0 %v22228_v14  ;;  %9636 = vmatprep.subr.mxu1 %v22315_v32 }
 0xb22   :  { %9497 = vmatpush1.msra.mxu0 %v22237_v35  ;;  %9638 = vmatpush1.msra.mxu1 %v22327_v53 }
 0xb23   :  { %9500 = vmatprep.subr.mxu0 %v22249_v43  ;;  %9640 = vmatprep.subr.mxu1 %v22334_v9 }
 0xb24   :  { %9503 = vmatpush1.msra.mxu0 %v22252_v16  ;;  %9642 = vmatpush1.msra.mxu1 %v22336_v42 }
 0xb25   :  { %9506 = vmatprep.subr.mxu0 %v22260_v63  ;;  %9644 = vmatprep.subr.mxu1 %v22343_v25 }
 0xb26   :  { %9509 = vmatpush1.msra.mxu0 %v22263_v36  ;;  %9646 = vmatpush1.msra.mxu1 %v25752_v18 }
 0xb27   :  { %9512 = vmatprep.subr.mxu0 %v25753_v47  ;;  %9648 = vmatprep.subr.mxu1 %v22397_v27 }
 0xb28   :  { %9515 = vmatpush1.msra.mxu0 %v25754_v51  ;;  %9650 = vmatpush1.msra.mxu1 %v22408_v38 }
 0xb29   :  { %9518 = vmatprep.subr.mxu0 %v25755_v40  ;;  %9652 = vmatprep.subr.mxu1 %v25756_v0 }
 0xb2a   :  { %9521 = vmatpush1.msra.mxu0 %v25757_v26  ;;  %9654 = vmatpush1.msra.mxu1 %v25758_v61 }
 0xb2b   :  { %9524 = vmatprep.subr.mxu0 %v25759_v41  ;;  %9656 = vmatprep.subr.mxu1 %v22438_v7 }
 0xb2c   :  { %9527 = vmatpush1.msra.mxu0 %v25760_v11  ;;  %9658 = vmatpush1.msra.mxu1 %v22440_v46 }
 0xb2d   :  { %9530 = vmatprep.subr.mxu0 %v25761_v50  ;;  %9660 = vmatprep.subr.mxu1 %v22447_v33 }
 0xb2e   :  { %9533 = vmatpush1.msra.mxu0 %v25762_v28  ;;  %9662 = vmatpush1.msra.mxu1 %v22449_v22 }
 0xb2f   :  { %9536 = vmatprep.subr.mxu0 %v25763_v34  ;;  %9699 = vmatmul.mubr.f32.vlgmr.msra.gmra.mxu1 %v22513_v10 }
 0xb30   :  { %9874 = vmatprep.subr.mxu1 %v22085_v12  ;;  %9539 = vmatpush1.msra.mxu0 %v25764_v56  ;;  %v25769_v12 = vld [vmem:[#allocation23_spill] sm:$0xff] }
 0xb31   :  { %9876 = vmatpush1.msra.mxu1 %v22090_v52  ;;  %9542 = vmatprep.subr.mxu0 %v25765_v20  ;;  %v25770_v52 = vld [vmem:[#allocation28_spill] sm:$0xff] }
 0xb32   :  { %9878 = vmatprep.subr.mxu1 %v22098_v39  ;;  %9545 = vmatpush1.msra.mxu0 %v25766_v8  ;;  %v9075_v39 = vld [vmem:[%s24660_s5 + $0x3d8] sm:$0xff] }
 0xb33   :  { %9880 = vmatpush1.msra.mxu1 %v22107_v45  ;;  %9548 = vmatprep.subr.mxu0 %v25767_v49  ;;  %v25771_v45 = vld [vmem:[#allocation9_spill] sm:$0xff]  ;;  %v22605_v10 = vand.u32 4294901760, %v9075_v39 }
 0xb34   :  { %9882 = vmatprep.subr.mxu1 %v22123_v55  ;;  %9551 = vmatpush1.msra.mxu0 %v25768_v23  ;;  %v25772_v55 = vand.u32 4294901760, %v25771_v45  ;;  %v9067_v45 = vld [vmem:[%s24660_s5 + $0x398] sm:$0xff] }
 0xb35   :  { %9884 = vmatpush1.msra.mxu1 %v22125_v31  ;;  %9554 = vmatprep.subr.mxu0 %v25769_v12  ;;  %v25773_v31 = vand.u32 4294901760, %v22105_v54  ;;  %v25775_v54 = vand.u32 4294901760, %v22133_v48  ;;  %v25777_v48 = vand.u32 4294901760, %v22148_v6  ;;  %v9051_v6 = vld [vmem:[%s24660_s5 + $0x318] sm:$0xff] }
 0xb36   :  { %9886 = vmatprep.subr.mxu1 %v22135_v13  ;;  %9557 = vmatpush1.msra.mxu0 %v25770_v52  ;;  %v9074_v13 = vld [vmem:[%s24660_s5 + $0x3d0] sm:$0xff] }
 0xb37   :  { %9590 = vmatprep.mubr.f32.mxu0 %v25671_v24  ;;  %9888 = vmatpush1.msra.mxu1 %v22137_v44  ;;  %v25774_v44 = vand.u32 4294901760, %v22121_v37  ;;  %v25776_v37 = vand.u32 4294901760, %v22145_v15  ;;  %v25778_v15 = vand.u32 4294901760, %v22156_v29  ;;  %v9050_v29 = vld [vmem:[%s24660_s5 + $0x310] sm:$0xff] }
 0xb38   :  { %9593 = vmatmul.mubr.f32.vlgmr.msra.gmra.mxu0 %v22506_v19  ;;  %9708 = vmatprep.subr.mxu0 %v25772_v55  ;;  %v9059_v55 = vld [vmem:[%s24660_s5 + $0x358] sm:$0xff] }
 0xb39   :  { %9890 = vmatprep.subr.mxu1 %v22189_v3  ;;  %9712 = vmatpush1.msra.mxu0 %v25773_v31  ;;  %v9066_v3 = vld [vmem:[%s24660_s5 + $0x390] sm:$0xff]  ;;  %v22636_v31 = vsub.f32 %v9075_v39, %v22605_v10 }
 0xb3a   :  { %9892 = vmatpush1.msra.mxu1 %v22200_v5  ;;  %9716 = vmatprep.subr.mxu0 %v25774_v44  ;;  %v22619_v5 = vand.u32 4294901760, %v9074_v13  ;;  %v22638_v44 = vand.u32 4294901760, %v9066_v3 }
 0xb3b   :  { %9894 = vmatprep.subr.mxu1 %v22211_v1  ;;  %9720 = vmatpush1.msra.mxu0 %v25775_v54  ;;  %v22627_v1 = vand.u32 4294901760, %v9067_v45  ;;  %v22646_v54 = vand.u32 4294901760, %v9059_v55 }
 0xb3c   :  { %9896 = vmatpush1.msra.mxu1 %v22223_v21  ;;  %9724 = vmatprep.subr.mxu0 %v25776_v37  ;;  %v9058_v21 = vld [vmem:[%s24660_s5 + $0x350] sm:$0xff]  ;;  %v22655_v39 = vsub.f32 %v9074_v13, %v22619_v5  ;;  %v25784_v13 = vand.u32 4294901760, %v22228_v14 }
 0xb3d   :  { %9898 = vmatprep.subr.mxu1 %v22230_v59  ;;  %9728 = vmatpush1.msra.mxu0 %v25777_v48  ;;  %v25779_v59 = vand.u32 4294901760, %v22159_v58  ;;  %v22657_v37 = vand.u32 4294901760, %v9058_v21  ;;  %v9043_v58 = vld [vmem:[%s24660_s5 + $0x2d8] sm:$0xff]  ;;  %v22666_v48 = vsub.f32 %v9067_v45, %v22627_v1 }
 0xb3e   :  { %9900 = vmatpush1.msra.mxu1 %v22232_v2  ;;  %9732 = vmatprep.subr.mxu0 %v25778_v15  ;;  %v25780_v2 = vand.u32 4294901760, %v22209_v60  ;;  %25781 = vst [vmem:[#allocation11_spill] sm:$0xff] %v22655_v39  ;;  %v9042_v60 = vld [vmem:[%s24660_s5 + $0x2d0] sm:$0xff]  ;;  %v25070_v15 = vand.u32 4294901760, %v22636_v31  ;;  %v9035_v45 = vld [vmem:[%s24660_s5 + $0x298] sm:$0xff]  ;;  %v22691_v14 = vand.u32 4294901760, %v9043_v58 }
 0xb3f   :  { %9902 = vmatprep.subr.mxu1 %v22239_v30  ;;  %9736 = vmatpush1.msra.mxu0 %v25779_v59  ;;  %v25782_v30 = vand.u32 4294901760, %v22221_v62  ;;  %25783 = vst [vmem:[#allocation6_spill] sm:$0xff] %v22666_v48  ;;  %v22680_v62 = vand.u32 4294901760, %v9050_v29  ;;  %v25786_v59 = vand.u32 4294901760, %v22237_v35  ;;  %v22703_v35 = vand.u32 4294901760, %v9042_v60 }
 0xb40   :  { %9904 = vmatpush1.msra.mxu1 %v22241_v4  ;;  %9740 = vmatprep.subr.mxu0 %v25780_v2  ;;  %v22668_v4 = vand.u32 4294901760, %v9051_v6  ;;  %v25788_v2 = vand.u32 4294901760, %v22249_v43 }
 0xb41   :  { %9906 = vmatprep.subr.mxu1 %v22293_v17  ;;  %9744 = vmatpush1.msra.mxu0 %v25782_v30  ;;  %v22678_v17 = vsub.f32 %v9066_v3, %v22638_v44  ;;  %v9034_v3 = vld [vmem:[%s24660_s5 + $0x290] sm:$0xff]  ;;  %v25071_v30 = vand.u32 4294901760, %v22655_v39 }
 0xb42   :  { %9908 = vmatpush1.msra.mxu1 %v22304_v57  ;;  %9748 = vmatprep.subr.mxu0 %v25784_v13  ;;  %v22689_v57 = vsub.f32 %v9059_v55, %v22646_v54  ;;  %v9027_v55 = vld [vmem:[%s24660_s5 + $0x258] sm:$0xff]  ;;  %v25790_v13 = vand.u32 4294901760, %v22252_v16  ;;  %v22713_v43 = vsub.f32 %v9051_v6, %v22668_v4  ;;  %v22730_v6 = vsub.f32 %v9050_v29, %v22680_v62 }
 0xb43   :  { %25785 = vst [vmem:[#allocation2_spill] sm:$0xff] %v22678_v17  ;;  %9910 = vmatprep.subr.mxu1 %v22315_v32  ;;  %9752 = vmatpush1.msra.mxu0 %v25786_v59  ;;  %v22701_v32 = vsub.f32 %v9058_v21, %v22657_v37  ;;  %v22715_v59 = vand.u32 4294901760, %v9035_v45  ;;  %v9026_v21 = vld [vmem:[%s24660_s5 + $0x250] sm:$0xff]  ;;  %v25796_v29 = vand.u32 4294901760, %v25753_v47  ;;  %v22752_v16 = vsub.f32 %v22655_v39, %v25071_v30 }
 0xb44   :  { %25787 = vst [vmem:[#allocation4_spill] sm:$0xff] %v22689_v57  ;;  %9912 = vmatpush1.msra.mxu1 %v22327_v53  ;;  %9756 = vmatprep.subr.mxu0 %v25788_v2  ;;  %25791 = vst [vmem:[#allocation17_spill] sm:$0xff] %v22713_v43  ;;  %v25792_v2 = vand.u32 4294901760, %v22260_v63  ;;  %v9019_v53 = vld [vmem:[%s24660_s5 + $0x218] sm:$0xff]  ;;  %v25799_v47 = vand.u32 4294901760, %v22666_v48  ;;  %v25801_v63 = vand.u32 4294901760, %v25755_v40 }
 0xb45   :  { %25789 = vst [vmem:[#allocation18_spill] sm:$0xff] %v22701_v32  ;;  %9914 = vmatprep.subr.mxu1 %v22334_v9  ;;  %9760 = vmatpush1.msra.mxu0 %v25790_v13  ;;  %v22726_v9 = vsub.f32 %v22636_v31, %v25070_v15  ;;  %25793 = vst [vmem:[#allocation14_spill] sm:$0xff] %v22730_v6  ;;  %v22732_v13 = vand.u32 4294901760, %v9034_v3  ;;  %v22744_v15 = vand.u32 4294901760, %v9027_v55 }
 0xb46   :  { %9916 = vmatpush1.msra.mxu1 %v22336_v42  ;;  %9764 = vmatprep.subr.mxu0 %v25792_v2  ;;  %v25794_v42 = vand.u32 4294901760, %v22263_v36  ;;  %v22742_v2 = vsub.f32 %v9043_v58, %v22691_v14  ;;  %v9018_v58 = vld [vmem:[%s24660_s5 + $0x210] sm:$0xff]  ;;  %v22775_v36 = vand.u32 4294901760, %v9019_v53 }
 0xb47   :  { %9918 = vmatprep.subr.mxu1 %v22343_v25  ;;  %v22756_v25 = vsub.f32 %v9042_v60, %v22703_v35  ;;  %v22773_v60 = vsub.f32 %v9035_v45, %v22715_v59  ;;  %v22788_v30 = vsub.f32 %v9034_v3, %v22732_v13  ;;  %v25804_v45 = vand.u32 4294901760, %v25757_v26  ;;  %v9011_v3 = vld [vmem:[%s24660_s5 + $0x1d8] sm:$0xff]  ;;  %9969 = vmatprep.mubr.f32.mxu1 %v25671_v24 }
 0xb48   :  { %9768 = vmatpush1.msra.mxu0 %v25794_v42  ;;  %25795 = vst [vmem:[#allocation29_spill] sm:$0xff] %v22742_v2  ;;  %9920 = vmatpush1.msra.mxu1 %v25752_v18  ;;  %v22758_v42 = vand.u32 4294901760, %v9026_v21  ;;  %v25798_v18 = vand.u32 4294901760, %v25754_v51  ;;  %v25802_v51 = vand.u32 4294901760, %v22678_v17  ;;  %v10095_v26 = vand.u32 4294901760, %v22752_v16 }
 0xb49   :  { %9772 = vmatprep.subr.mxu0 %v25796_v29  ;;  %25797 = vst [vmem:[#allocation15_spill] sm:$0xff] %v22756_v25  ;;  %9922 = vmatprep.subr.mxu1 %v22397_v27  ;;  %v22769_v29 = vsub.f32 %v22666_v48, %v25799_v47  ;;  %25800 = vst [vmem:[#allocation10_spill] sm:$0xff] %v22773_v60  ;;  %v10089_v27 = vand.u32 4294901760, %v22726_v9  ;;  %v25810_v47 = vand.u32 4294901760, %v25760_v11  ;;  %v25821_v19 = vand.u32 4294901760, %v22773_v60 }
 0xb4a   :  { %9776 = vmatpush1.msra.mxu0 %v25798_v18  ;;  %9924 = vmatpush1.msra.mxu1 %v22408_v38  ;;  %v22784_v18 = vsub.f32 %v22678_v17, %v25802_v51  ;;  %25803 = vst [vmem:[#allocation3_spill] sm:$0xff] %v22788_v30  ;;  %v25805_v38 = vand.u32 4294901760, %v22689_v57  ;;  %v22802_v51 = vand.u32 4294901760, %v9018_v58  ;;  %v22818_v9 = vsub.f32 %v9026_v21, %v22758_v42  ;;  %v9010_v21 = vld [vmem:[%s24660_s5 + $0x1d0] sm:$0xff] }
 0xb4b   :  { %9780 = vmatprep.subr.mxu0 %v25801_v63  ;;  %9926 = vmatprep.subr.mxu1 %v25756_v0  ;;  %v22800_v63 = vsub.f32 %v9027_v55, %v22744_v15  ;;  %v25807_v0 = vand.u32 4294901760, %v25759_v41  ;;  %v25811_v41 = vand.u32 4294901760, %v22713_v43  ;;  %v9002_v55 = vld [vmem:[%s24660_s5 + $0x190] sm:$0xff] }
 0xb4c   :  { %9784 = vmatpush1.msra.mxu0 %v25804_v45  ;;  %v22796_v40 = vsub.f32 %v22689_v57, %v25805_v38  ;;  %9928 = vmatpush1.msra.mxu1 %v25758_v61  ;;  %v25808_v45 = vand.u32 4294901760, %v22701_v32  ;;  %25809 = vst [vmem:[#allocation12_spill] sm:$0xff] %v22818_v9  ;;  %v10101_v61 = vand.u32 4294901760, %v22769_v29  ;;  %v10107_v11 = vand.u32 4294901760, %v22784_v18 }
 0xb4d   :  { %25806 = vst [vmem:[#allocation26_spill] sm:$0xff] %v22800_v63  ;;  %9788 = vmatprep.subr.mxu0 %v25807_v0  ;;  %9930 = vmatprep.subr.mxu1 %v22438_v7  ;;  %v22827_v16 = vsub.f32 %v22713_v43, %v25811_v41  ;;  %v25813_v7 = vand.u32 4294901760, %v25761_v50  ;;  %v25814_v29 = vand.u32 4294901760, %v22730_v6  ;;  %v9003_v0 = vld [vmem:[%s24660_s5 + $0x198] sm:$0xff]  ;;  %v25816_v18 = vand.u32 4294901760, %v22742_v2 }
 0xb4e   :  { %v22814_v38 = vsub.f32 %v22701_v32, %v25808_v45  ;;  %9792 = vmatpush1.msra.mxu0 %v25810_v47  ;;  %v22831_v45 = vsub.f32 %v9019_v53, %v22775_v36  ;;  %9932 = vmatpush1.msra.mxu1 %v22440_v46  ;;  %v22846_v53 = vand.u32 4294901760, %v9011_v3  ;;  %v25815_v46 = vand.u32 4294901760, %v25762_v28 }
 0xb4f   :  { %9796 = vmatprep.subr.mxu0 %v25813_v7  ;;  %v22843_v47 = vsub.f32 %v22730_v6, %v25814_v29  ;;  %9934 = vmatprep.subr.mxu1 %v22447_v33  ;;  %v10113_v50 = vand.u32 4294901760, %v22796_v40  ;;  %v22858_v7 = vsub.f32 %v22742_v2, %v25816_v18  ;;  %v22862_v41 = vsub.f32 %v9018_v58, %v22802_v51  ;;  %v8995_v58 = vld [vmem:[%s24660_s5 + $0x158] sm:$0xff]  ;;  %v8994_v2 = vld [vmem:[%s24660_s5 + $0x150] sm:$0xff] }
 0xb50   :  { %25812 = vst [vmem:[#allocation19_spill] sm:$0xff] %v22831_v45  ;;  %9800 = vmatpush1.msra.mxu0 %v25815_v46  ;;  %9936 = vmatpush1.msra.mxu1 %v22449_v22  ;;  %v10119_v33 = vand.u32 4294901760, %v22814_v38  ;;  %v25818_v28 = vand.u32 4294901760, %v22756_v25  ;;  %v22876_v18 = vand.u32 4294901760, %v9010_v21  ;;  %v25819_v29 = vand.u32 4294901760, %v25763_v34  ;;  %v25820_v22 = vld [vmem:[#allocation25_spill] sm:$0xff] }
 0xb51   :  { %25817 = vst [vmem:[#allocation5_spill] sm:$0xff] %v22862_v41  ;;  %9971 = vmatmul.mubr.f32.vlgmr.msra.gmra.mxu1 %v25820_v22  ;;  %v10125_v38 = vand.u32 4294901760, %v22827_v16  ;;  %10090 = vmatprep.subr.mxu1 %v10089_v27  ;;  %v25822_v34 = vand.u32 4294901760, %v25764_v56  ;;  %v25823_v16 = vand.u32 4294901760, %v22788_v30  ;;  %v22907_v46 = vand.u32 4294901760, %v9002_v55 }
 0xb52   :  { %v22873_v40 = vsub.f32 %v22756_v25, %v25818_v28  ;;  %9804 = vmatprep.subr.mxu0 %v25819_v29  ;;  %v22888_v28 = vsub.f32 %v22773_v60, %v25821_v19  ;;  %v22891_v25 = vand.u32 4294901760, %v9003_v0  ;;  %v10131_v29 = vand.u32 4294901760, %v22843_v47  ;;  %v8987_v60 = vld [vmem:[%s24660_s5 + $0x118] sm:$0xff]  ;;  %10096 = vmatpush1.msra.mxu1 %v10095_v26 }
 0xb53   :  { %9808 = vmatpush1.msra.mxu0 %v25822_v34  ;;  %v22902_v6 = vsub.f32 %v22788_v30, %v25823_v16  ;;  %v22905_v19 = vsub.f32 %v9011_v3, %v22846_v53  ;;  %v25825_v56 = vand.u32 4294901760, %v25765_v20  ;;  %v10137_v27 = vand.u32 4294901760, %v22858_v7  ;;  %v8986_v30 = vld [vmem:[%s24660_s5 + $0x110] sm:$0xff]  ;;  %10102 = vmatprep.subr.mxu1 %v10101_v61 }
 0xb54   :  { %v25826_v47 = vand.u32 4294901760, %v22800_v63  ;;  %v22921_v16 = vand.u32 4294901760, %v8995_v58  ;;  %v25828_v26 = vand.u32 4294901760, %v25766_v8  ;;  %v10143_v20 = vand.u32 4294901760, %v22873_v40  ;;  %10108 = vmatpush1.msra.mxu1 %v10107_v11  ;;  %9865 = vmatprep.mubr.f32.mxu0 %v25671_v24 }
 0xb55   :  { %25824 = vst [vmem:[#allocation21_spill] sm:$0xff] %v22905_v19  ;;  %9812 = vmatprep.subr.mxu0 %v25825_v56  ;;  %v25829_v7 = vand.u32 4294901760, %v22818_v9  ;;  %v22937_v3 = vand.u32 4294901760, %v8994_v2  ;;  %v25831_v8 = vand.u32 4294901760, %v25767_v49  ;;  %v10149_v61 = vand.u32 4294901760, %v22888_v28  ;;  %10114 = vmatprep.subr.mxu1 %v10113_v50  ;;  %v8970_v28 = vld [vmem:[%s24660_s5 + $0x90] sm:$0xff] }
 0xb56   :  { %v22918_v34 = vsub.f32 %v22800_v63, %v25826_v47  ;;  %25827 = vst [vmem:[#allocation8_spill] sm:$0xff] %v22921_v16  ;;  %9816 = vmatpush1.msra.mxu0 %v25828_v26  ;;  %v22935_v47 = vsub.f32 %v9010_v21, %v22876_v18  ;;  %v8979_v63 = vld [vmem:[%s24660_s5 + $0xd8] sm:$0xff]  ;;  %v25832_v40 = vand.u32 4294901760, %v22831_v45  ;;  %v22951_v21 = vsub.f32 %v9003_v0, %v22891_v25 }
 0xb57   :  { %v22932_v56 = vsub.f32 %v22818_v9, %v25829_v7  ;;  %9820 = vmatprep.subr.mxu0 %v25831_v8  ;;  %v22953_v7 = vand.u32 4294901760, %v8987_v60  ;;  %v8978_v9 = vld [vmem:[%s24660_s5 + $0xd0] sm:$0xff]  ;;  %v25834_v49 = vand.u32 4294901760, %v25768_v23  ;;  %v10155_v11 = vand.u32 4294901760, %v22902_v6  ;;  %v8971_v0 = vld [vmem:[%s24660_s5 + $0x98] sm:$0xff]  ;;  %10120 = vmatpush1.msra.mxu1 %v10119_v33 }
 0xb58   :  { %25830 = vst [vmem:[#allocation13_spill] sm:$0xff] %v22935_v47  ;;  %v22948_v26 = vsub.f32 %v22831_v45, %v25832_v40  ;;  %25833 = vst [vmem:[#allocation24_spill] sm:$0xff] %v22951_v21  ;;  %v22963_v8 = vsub.f32 %v9002_v55, %v22907_v46  ;;  %v22965_v40 = vand.u32 4294901760, %v8986_v30  ;;  %v25835_v45 = vand.u32 4294901760, %v25769_v12  ;;  %10126 = vmatprep.subr.mxu1 %v10125_v38 }
 0xb59   :  { %9824 = vmatpush1.msra.mxu0 %v25834_v49  ;;  %v10161_v23 = vand.u32 4294901760, %v22918_v34  ;;  %v25836_v50 = vand.u32 4294901760, %v22862_v41  ;;  %v22979_v55 = vsub.f32 %v8995_v58, %v22921_v16  ;;  %v22981_v49 = vand.u32 4294901760, %v8979_v63  ;;  %v8963_v58 = vld [vmem:[%s24660_s5 + $0x58] sm:$0xff]  ;;  %10132 = vmatpush1.msra.mxu1 %v10131_v29 }
 0xb5a   :  { %9828 = vmatprep.subr.mxu0 %v25835_v45  ;;  %v25837_v12 = vand.u32 4294901760, %v25770_v52  ;;  %v10167_v45 = vand.u32 4294901760, %v22932_v56  ;;  %v22991_v34 = vsub.f32 %v8994_v2, %v22937_v3  ;;  %v10173_v38 = vand.u32 4294901760, %v22948_v26  ;;  %v8962_v2 = vld [vmem:[%s24660_s5 + $0x50] sm:$0xff]  ;;  %10138 = vmatprep.subr.mxu1 %v10137_v27 }
 0xb5b   :  { %v22976_v6 = vsub.f32 %v22862_v41, %v25836_v50  ;;  %v22993_v50 = vand.u32 4294901760, %v8978_v9  ;;  %v23002_v56 = vsub.f32 %v8987_v60, %v22953_v7  ;;  %v25838_v33 = vand.u32 4294901760, %v22905_v19  ;;  %v8955_v41 = vld [vmem:[%s24660_s5 + $0x18] sm:$0xff]  ;;  %10144 = vmatpush1.msra.mxu1 %v10143_v20  ;;  %10309 = vmatprep.mubr.f32.mxu1 %v25671_v24 }
 0xb5c   :  { %9832 = vmatpush1.msra.mxu0 %v25837_v12  ;;  %v23004_v12 = vand.u32 4294901760, %v8971_v0  ;;  %v23016_v52 = vsub.f32 %v8986_v30, %v22965_v40  ;;  %v23018_v60 = vand.u32 4294901760, %v8970_v28  ;;  %v23029_v26 = vand.u32 4294901760, %v8963_v58  ;;  %v8954_v30 = vld [vmem:[%s24660_s5 + $0x10] sm:$0xff]  ;;  %10150 = vmatprep.subr.mxu1 %v10149_v61 }
 0xb5d   :  { %9867 = vmatmul.mubr.f32.vlgmr.msra.gmra.mxu0 %v25820_v22  ;;  %9978 = vmatprep.subr.mxu0 %v22605_v10  ;;  %v10184_v29 = vsub.f32 %v22905_v19, %v25838_v33  ;;  %v10179_v43 = vand.u32 4294901760, %v22976_v6  ;;  %v23027_v33 = vsub.f32 %v8979_v63, %v22981_v49  ;;  %v25840_v27 = vand.u32 4294901760, %v22935_v47 }
 0xb5e   :  { %25839 = vst [vmem:[#allocation16_spill] sm:$0xff] %v23018_v60  ;;  %9980 = vmatpush1.msra.mxu0 %v22619_v5  ;;  %v23040_v32 = vsub.f32 %v8978_v9, %v22993_v50  ;;  %v23042_v63 = vand.u32 4294901760, %v8962_v2  ;;  %v25841_v57 = vand.u32 4294901760, %v22951_v21  ;;  %v23050_v48 = vsub.f32 %v8971_v0, %v23004_v12  ;;  %10156 = vmatpush1.msra.mxu1 %v10155_v11 }
 0xb5f   :  { %9982 = vmatprep.subr.mxu0 %v22627_v1  ;;  %v10190_v19 = vsub.f32 %v22935_v47, %v25840_v27  ;;  %v23052_v27 = vand.u32 4294901760, %v8955_v41  ;;  %v25842_v9 = vand.u32 4294901760, %v22963_v8  ;;  %v23060_v47 = vsub.f32 %v8970_v28, %v23018_v60  ;;  %10162 = vmatprep.subr.mxu1 %v10161_v23 }
 0xb60   :  { %9984 = vmatpush1.msra.mxu0 %v22638_v44  ;;  %v10196_v20 = vsub.f32 %v22951_v21, %v25841_v57  ;;  %v23062_v57 = vand.u32 4294901760, %v8954_v30  ;;  %v10185_v0 = vand.u32 4294901760, %v10184_v29  ;;  %v25843_v17 = vand.u32 4294901760, %v22979_v55  ;;  %10168 = vmatpush1.msra.mxu1 %v10167_v45 }
 0xb61   :  { %9986 = vmatprep.subr.mxu0 %v22646_v54  ;;  %v10202_v61 = vsub.f32 %v22963_v8, %v25842_v9  ;;  %v23070_v39 = vsub.f32 %v8963_v58, %v23029_v26  ;;  %v10191_v28 = vand.u32 4294901760, %v10190_v19  ;;  %v25844_v9 = vand.u32 4294901760, %v22991_v34  ;;  %10174 = vmatprep.subr.mxu1 %v10173_v38 }
 0xb62   :  { %9988 = vmatpush1.msra.mxu0 %v22657_v37  ;;  %v10208_v11 = vsub.f32 %v22979_v55, %v25843_v17  ;;  %v23078_v29 = vsub.f32 %v8962_v2, %v23042_v63  ;;  %v10197_v17 = vand.u32 4294901760, %v10196_v20  ;;  %v25845_v58 = vand.u32 4294901760, %v23002_v56  ;;  %10180 = vmatpush1.msra.mxu1 %v10179_v43 }
 0xb63   :  { %9990 = vmatprep.subr.mxu0 %v22668_v4  ;;  %v10214_v23 = vsub.f32 %v22991_v34, %v25844_v9  ;;  %v23086_v19 = vsub.f32 %v8955_v41, %v23052_v27  ;;  %v10203_v9 = vand.u32 4294901760, %v10202_v61  ;;  %v25846_v2 = vand.u32 4294901760, %v23016_v52  ;;  %10186 = vmatprep.subr.mxu1 %v10185_v0 }
 0xb64   :  { %9992 = vmatpush1.msra.mxu0 %v22680_v62  ;;  %v10220_v45 = vsub.f32 %v23002_v56, %v25845_v58  ;;  %v23094_v20 = vsub.f32 %v8954_v30, %v23062_v57  ;;  %v10209_v58 = vand.u32 4294901760, %v10208_v11  ;;  %v25847_v41 = vand.u32 4294901760, %v23027_v33  ;;  %10192 = vmatpush1.msra.mxu1 %v10191_v28 }
 0xb65   :  { %9994 = vmatprep.subr.mxu0 %v22691_v14  ;;  %v10226_v38 = vsub.f32 %v23016_v52, %v25846_v2  ;;  %v10215_v61 = vand.u32 4294901760, %v10214_v23  ;;  %v25848_v2 = vand.u32 4294901760, %v23040_v32  ;;  %10198 = vmatprep.subr.mxu1 %v10197_v17  ;;  %v25849_v11 = vand.u32 4294901760, %v23050_v48 }
 0xb66   :  { %9996 = vmatpush1.msra.mxu0 %v22703_v35  ;;  %v10232_v43 = vsub.f32 %v23027_v33, %v25847_v41  ;;  %v10221_v0 = vand.u32 4294901760, %v10220_v45  ;;  %10204 = vmatpush1.msra.mxu1 %v10203_v9  ;;  %v25850_v23 = vand.u32 4294901760, %v23060_v47  ;;  %v25110_v30 = vand.u32 4294901760, %v23094_v20 }
 0xb67   :  { %9998 = vmatprep.subr.mxu0 %v22715_v59  ;;  %v10238_v6 = vsub.f32 %v23040_v32, %v25848_v2  ;;  %v10244_v41 = vsub.f32 %v23050_v48, %v25849_v11  ;;  %v10227_v28 = vand.u32 4294901760, %v10226_v38  ;;  %10210 = vmatprep.subr.mxu1 %v10209_v58  ;;  %v25851_v45 = vand.u32 4294901760, %v23070_v39 }
 0xb68   :  { %10000 = vmatpush1.msra.mxu0 %v22732_v13  ;;  %v10250_v2 = vsub.f32 %v23060_v47, %v25850_v23  ;;  %v10233_v17 = vand.u32 4294901760, %v10232_v43  ;;  %10216 = vmatpush1.msra.mxu1 %v10215_v61  ;;  %v25852_v38 = vand.u32 4294901760, %v23078_v29  ;;  %v25853_v58 = vand.u32 4294901760, %v23086_v19 }
 0xb69   :  { %10002 = vmatprep.subr.mxu0 %v22744_v15  ;;  %v10256_v11 = vsub.f32 %v23070_v39, %v25851_v45  ;;  %v10239_v9 = vand.u32 4294901760, %v10238_v6  ;;  %10222 = vmatprep.subr.mxu1 %v10221_v0  ;;  %v10245_v23 = vand.u32 4294901760, %v10244_v41  ;;  %v10274_v6 = vsub.f32 %v23094_v20, %v25110_v30  ;;  %v25869_v30 = vld [vmem:[#allocation5_spill] sm:$0xff] }
 0xb6a   :  { %10004 = vmatpush1.msra.mxu0 %v22758_v42  ;;  %v10262_v21 = vsub.f32 %v23078_v29, %v25852_v38  ;;  %v10268_v43 = vsub.f32 %v23086_v19, %v25853_v58  ;;  %10228 = vmatpush1.msra.mxu1 %v10227_v28  ;;  %v10251_v45 = vand.u32 4294901760, %v10250_v2  ;;  %v25855_v2 = vld [vmem:[#allocation11_spill] sm:$0xff]  ;;  %v25859_v38 = vld [vmem:[#allocation18_spill] sm:$0xff] }
 0xb6b   :  { %10006 = vmatprep.subr.mxu0 %v22775_v36  ;;  %10234 = vmatprep.subr.mxu1 %v10233_v17  ;;  %v10257_v61 = vand.u32 4294901760, %v10256_v11  ;;  %v10275_v28 = vand.u32 4294901760, %v10274_v6  ;;  %v25856_v17 = vld [vmem:[#allocation6_spill] sm:$0xff] }
 0xb6c   :  { %10008 = vmatpush1.msra.mxu0 %v22802_v51  ;;  %10240 = vmatpush1.msra.mxu1 %v10239_v9  ;;  %v10263_v0 = vand.u32 4294901760, %v10262_v21  ;;  %v10269_v41 = vand.u32 4294901760, %v10268_v43  ;;  %v25854_v21 = vld [vmem:[#allocation20_spill] sm:$0xff]  ;;  %v25857_v11 = vld [vmem:[#allocation2_spill] sm:$0xff]  ;;  %v25862_v43 = vld [vmem:[#allocation29_spill] sm:$0xff] }
 0xb6d   :  { %10010 = vmatprep.subr.mxu0 %v22846_v53  ;;  %10246 = vmatprep.subr.mxu1 %v10245_v23  ;;  %v25858_v9 = vld [vmem:[#allocation4_spill] sm:$0xff]  ;;  %v25860_v23 = vld [vmem:[#allocation17_spill] sm:$0xff]  ;;  %v25861_v58 = vld [vmem:[#allocation14_spill] sm:$0xff] }
 0xb6e   :  { %10012 = vmatpush1.msra.mxu0 %v22876_v18  ;;  %10252 = vmatpush1.msra.mxu1 %v10251_v45  ;;  %v25863_v45 = vld [vmem:[#allocation15_spill] sm:$0xff]  ;;  %v25864_v6 = vld [vmem:[#allocation10_spill] sm:$0xff] }
 0xb6f   :  { %10014 = vmatprep.subr.mxu0 %v22891_v25  ;;  %10258 = vmatprep.subr.mxu1 %v10257_v61  ;;  %v25865_v61 = vld [vmem:[#allocation3_spill] sm:$0xff] }
 0xb70   :  { %10016 = vmatpush1.msra.mxu0 %v22907_v46  ;;  %10264 = vmatpush1.msra.mxu1 %v10263_v0  ;;  %v25866_v0 = vld [vmem:[#allocation26_spill] sm:$0xff] }
 0xb71   :  { %10018 = vmatprep.subr.mxu0 %v22921_v16  ;;  %10270 = vmatprep.subr.mxu1 %v10269_v41  ;;  %v25867_v41 = vld [vmem:[#allocation12_spill] sm:$0xff] }
 0xb72   :  { %10020 = vmatpush1.msra.mxu0 %v22937_v3  ;;  %10276 = vmatpush1.msra.mxu1 %v10275_v28  ;;  %v25868_v28 = vld [vmem:[#allocation19_spill] sm:$0xff] }
 0xb73   :  { %10022 = vmatprep.subr.mxu0 %v22953_v7  ;;  %10311 = vmatmul.mubr.f32.vlgmr.msra.gmra.mxu1 %v25820_v22  ;;  %v25871_v22 = vld [vmem:[#allocation13_spill] sm:$0xff] }
 0xb74   :  { %10024 = vmatpush1.msra.mxu0 %v22965_v40  ;;  %10455 = vmatprep.subr.mxu1 %v22605_v10 }
 0xb75   :  { %10026 = vmatprep.subr.mxu0 %v22981_v49  ;;  %10457 = vmatpush1.msra.mxu1 %v22619_v5 }
 0xb76   :  { %10028 = vmatpush1.msra.mxu0 %v22993_v50  ;;  %10459 = vmatprep.subr.mxu1 %v22627_v1 }
 0xb77   :  { %10030 = vmatprep.subr.mxu0 %v23004_v12  ;;  %10461 = vmatpush1.msra.mxu1 %v22638_v44 }
 0xb78   :  { %10032 = vmatpush1.msra.mxu0 %v23018_v60  ;;  %10463 = vmatprep.subr.mxu1 %v22646_v54 }
 0xb79   :  { %10034 = vmatprep.subr.mxu0 %v23029_v26  ;;  %10465 = vmatpush1.msra.mxu1 %v22657_v37 }
 0xb7a   :  { %10036 = vmatpush1.msra.mxu0 %v23042_v63  ;;  %10467 = vmatprep.subr.mxu1 %v22668_v4 }
 0xb7b   :  { %10038 = vmatprep.subr.mxu0 %v23052_v27  ;;  %10073 = vmatprep.mubr.f32.mxu0 %v25671_v24 }
 0xb7c   :  { %10040 = vmatpush1.msra.mxu0 %v23062_v57  ;;  %10469 = vmatpush1.msra.mxu1 %v22680_v62 }
 0xb7d   :  { %10079 = vmatmul.mubr.f32.vlgmr.msra.gmra.mxu0 %v25854_v21  ;;  %10319 = vmatprep.subr.mxu0 %v22636_v31  ;;  %v25870_v21 = vld [vmem:[#allocation21_spill] sm:$0xff] }
 0xb7e   :  { %10471 = vmatprep.subr.mxu1 %v22691_v14  ;;  %10322 = vmatpush1.msra.mxu0 %v25855_v2 }
 0xb7f   :  { %10473 = vmatpush1.msra.mxu1 %v22703_v35  ;;  %10325 = vmatprep.subr.mxu0 %v25856_v17 }
 0xb80   :  { %10475 = vmatprep.subr.mxu1 %v22715_v59  ;;  %10328 = vmatpush1.msra.mxu0 %v25857_v11 }
 0xb81   :  { %10477 = vmatpush1.msra.mxu1 %v22732_v13  ;;  %10331 = vmatprep.subr.mxu0 %v25858_v9 }
 0xb82   :  { %10479 = vmatprep.subr.mxu1 %v22744_v15  ;;  %10334 = vmatpush1.msra.mxu0 %v25859_v38 }
 0xb83   :  { %10481 = vmatpush1.msra.mxu1 %v22758_v42  ;;  %10337 = vmatprep.subr.mxu0 %v25860_v23 }
 0xb84   :  { %10483 = vmatprep.subr.mxu1 %v22775_v36  ;;  %10340 = vmatpush1.msra.mxu0 %v25861_v58 }
 0xb85   :  { %10485 = vmatpush1.msra.mxu1 %v22802_v51  ;;  %10343 = vmatprep.subr.mxu0 %v25862_v43 }
 0xb86   :  { %10487 = vmatprep.subr.mxu1 %v22846_v53  ;;  %10346 = vmatpush1.msra.mxu0 %v25863_v45 }
 0xb87   :  { %10489 = vmatpush1.msra.mxu1 %v22876_v18  ;;  %10349 = vmatprep.subr.mxu0 %v25864_v6 }
 0xb88   :  { %10491 = vmatprep.subr.mxu1 %v22891_v25  ;;  %10352 = vmatpush1.msra.mxu0 %v25865_v61 }
 0xb89   :  { %10493 = vmatpush1.msra.mxu1 %v22907_v46  ;;  %10355 = vmatprep.subr.mxu0 %v25866_v0 }
 0xb8a   :  { %10495 = vmatprep.subr.mxu1 %v22921_v16  ;;  %10358 = vmatpush1.msra.mxu0 %v25867_v41  ;;  %v25872_v16 = vld [vmem:[#allocation24_spill] sm:$0xff] }
 0xb8b   :  { %10497 = vmatpush1.msra.mxu1 %v22937_v3  ;;  %10361 = vmatprep.subr.mxu0 %v25868_v28 }
 0xb8c   :  { %10499 = vmatprep.subr.mxu1 %v22953_v7  ;;  %10364 = vmatpush1.msra.mxu0 %v25869_v30 }
 0xb8d   :  { %10501 = vmatpush1.msra.mxu1 %v22965_v40  ;;  %10367 = vmatprep.subr.mxu0 %v25870_v21 }
 0xb8e   :  { %10503 = vmatprep.subr.mxu1 %v22981_v49  ;;  %10370 = vmatpush1.msra.mxu0 %v25871_v22 }
 0xb8f   :  { %10505 = vmatpush1.msra.mxu1 %v22993_v50  ;;  %10373 = vmatprep.subr.mxu0 %v25872_v16 }
 0xb90   :  { %10507 = vmatprep.subr.mxu1 %v23004_v12  ;;  %10376 = vmatpush1.msra.mxu0 %v22963_v8 }
 0xb91   :  { %10509 = vmatpush1.msra.mxu1 %v23018_v60  ;;  %10379 = vmatprep.subr.mxu0 %v22979_v55  ;;  %v25873_v60 = vld [vmem:[#allocation7_spill] sm:$0xff] }
 0xb92   :  { %10511 = vmatprep.subr.mxu1 %v23029_v26  ;;  %10382 = vmatpush1.msra.mxu0 %v22991_v34 }
 0xb93   :  { %10513 = vmatpush1.msra.mxu1 %v23042_v63  ;;  %10385 = vmatprep.subr.mxu0 %v23002_v56 }
 0xb94   :  { %10515 = vmatprep.subr.mxu1 %v23052_v27  ;;  %10388 = vmatpush1.msra.mxu0 %v23016_v52 }
 0xb95   :  { %10517 = vmatpush1.msra.mxu1 %v23062_v57  ;;  %10550 = vmatprep.mubr.f32.mxu1 %v25671_v24 }
 0xb96   :  { %10391 = vmatprep.subr.mxu0 %v23027_v33  ;;  %10554 = vmatmul.mubr.f32.vlgmr.msra.gmra.mxu1 %v25873_v60 }
 0xb97   :  { %10729 = vmatprep.subr.mxu1 %v22605_v10  ;;  %10394 = vmatpush1.msra.mxu0 %v23040_v32  ;;  %v9077_v10 = vld [vmem:[%s24660_s5 + $0x3e8] sm:$0xff] }
 0xb98   :  { %10731 = vmatpush1.msra.mxu1 %v22619_v5  ;;  %10397 = vmatprep.subr.mxu0 %v23050_v48  ;;  %v25874_v5 = vld [vmem:[#allocation27_spill] sm:$0xff] }
 0xb99   :  { %10733 = vmatprep.subr.mxu1 %v22627_v1  ;;  %10400 = vmatpush1.msra.mxu0 %v23060_v47  ;;  %v25875_v1 = vand.u32 4294901760, %v22636_v31  ;;  %v9069_v31 = vld [vmem:[%s24660_s5 + $0x3a8] sm:$0xff] }
 0xb9a   :  { %10735 = vmatpush1.msra.mxu1 %v22638_v44  ;;  %10403 = vmatprep.subr.mxu0 %v23070_v39  ;;  %v25876_v44 = vand.u32 4294901760, %v25855_v2 }
 0xb9b   :  { %10737 = vmatprep.subr.mxu1 %v22646_v54  ;;  %10406 = vmatpush1.msra.mxu0 %v23078_v29  ;;  %v9076_v54 = vld [vmem:[%s24660_s5 + $0x3e0] sm:$0xff] }
 0xb9c   :  { %10739 = vmatpush1.msra.mxu1 %v22657_v37  ;;  %10409 = vmatprep.subr.mxu0 %v23086_v19  ;;  %v25877_v37 = vand.u32 4294901760, %v25856_v17  ;;  %v23255_v2 = vand.u32 4294901760, %v9076_v54  ;;  %v9061_v17 = vld [vmem:[%s24660_s5 + $0x368] sm:$0xff] }
 0xb9d   :  { %10741 = vmatprep.subr.mxu1 %v22668_v4  ;;  %10412 = vmatpush1.msra.mxu0 %v23094_v20  ;;  %v23241_v4 = vand.u32 4294901760, %v9077_v10 }
 0xb9e   :  { %10445 = vmatprep.mubr.f32.mxu0 %v25671_v24  ;;  %10743 = vmatpush1.msra.mxu1 %v22680_v62  ;;  %v25878_v62 = vand.u32 4294901760, %v25857_v11  ;;  %v23263_v11 = vand.u32 4294901760, %v9069_v31 }
 0xb9f   :  { %10448 = vmatmul.mubr.f32.vlgmr.msra.gmra.mxu0 %v25874_v5  ;;  %10563 = vmatprep.subr.mxu0 %v25875_v1  ;;  %v23272_v1 = vsub.f32 %v9077_v10, %v23241_v4  ;;  %v23291_v10 = vsub.f32 %v9076_v54, %v23255_v2  ;;  %v25887_v54 = vand.u32 4294901760, %v25864_v6  ;;  %v25915_v5 = vand.u32 4294901760, %v22991_v34 }
 0xba0   :  { %10745 = vmatprep.subr.mxu1 %v22691_v14  ;;  %10567 = vmatpush1.msra.mxu0 %v25876_v44  ;;  %v9068_v14 = vld [vmem:[%s24660_s5 + $0x3a0] sm:$0xff]  ;;  %v25918_v34 = vand.u32 4294901760, %v23002_v56  ;;  %v25920_v56 = vand.u32 4294901760, %v23016_v52 }
 0xba1   :  { %10747 = vmatpush1.msra.mxu1 %v22703_v35  ;;  %10571 = vmatprep.subr.mxu0 %v25877_v37  ;;  %v25879_v35 = vand.u32 4294901760, %v25858_v9  ;;  %v25881_v9 = vand.u32 4294901760, %v25860_v23  ;;  %v23274_v44 = vand.u32 4294901760, %v9068_v14  ;;  %v23282_v37 = vand.u32 4294901760, %v9061_v17  ;;  %25884 = vst [vmem:[#allocation30_spill] sm:$0xff] %v23291_v10 }
 0xba2   :  { %10749 = vmatprep.subr.mxu1 %v22715_v59  ;;  %10575 = vmatpush1.msra.mxu0 %v25878_v62  ;;  %v25880_v59 = vand.u32 4294901760, %v25859_v38  ;;  %v25882_v38 = vand.u32 4294901760, %v25861_v58  ;;  %v25883_v23 = vand.u32 4294901760, %v25862_v43  ;;  %v25885_v58 = vand.u32 4294901760, %v25863_v45  ;;  %v9044_v43 = vld [vmem:[%s24660_s5 + $0x2e0] sm:$0xff] }
 0xba3   :  { %10751 = vmatpush1.msra.mxu1 %v22732_v13  ;;  %10579 = vmatprep.subr.mxu0 %v25879_v35  ;;  %v9060_v13 = vld [vmem:[%s24660_s5 + $0x360] sm:$0xff]  ;;  %v23302_v35 = vsub.f32 %v9069_v31, %v23263_v11  ;;  %v9037_v31 = vld [vmem:[%s24660_s5 + $0x2a8] sm:$0xff] }
 0xba4   :  { %10753 = vmatprep.subr.mxu1 %v22744_v15  ;;  %10583 = vmatpush1.msra.mxu0 %v25880_v59  ;;  %v9053_v15 = vld [vmem:[%s24660_s5 + $0x328] sm:$0xff]  ;;  %v23293_v62 = vand.u32 4294901760, %v9060_v13  ;;  %v25114_v59 = vand.u32 4294901760, %v23272_v1 }
 0xba5   :  { %10755 = vmatpush1.msra.mxu1 %v22758_v42  ;;  %10587 = vmatprep.subr.mxu0 %v25881_v9  ;;  %v9052_v42 = vld [vmem:[%s24660_s5 + $0x320] sm:$0xff]  ;;  %25886 = vst [vmem:[#allocation22_spill] sm:$0xff] %v23302_v35  ;;  %v25889_v9 = vand.u32 4294901760, %v25865_v61  ;;  %v23339_v61 = vand.u32 4294901760, %v9044_v43 }
 0xba6   :  { %10757 = vmatprep.subr.mxu1 %v22775_v36  ;;  %10591 = vmatpush1.msra.mxu0 %v25882_v38  ;;  %v9045_v36 = vld [vmem:[%s24660_s5 + $0x2e8] sm:$0xff]  ;;  %v23316_v45 = vand.u32 4294901760, %v9052_v42  ;;  %v25891_v38 = vand.u32 4294901760, %v25866_v0 }
 0xba7   :  { %10759 = vmatpush1.msra.mxu1 %v22802_v51  ;;  %10595 = vmatprep.subr.mxu0 %v25883_v23  ;;  %v23304_v51 = vand.u32 4294901760, %v9053_v15  ;;  %v23327_v6 = vand.u32 4294901760, %v9045_v36  ;;  %v25115_v23 = vand.u32 4294901760, %v23291_v10 }
 0xba8   :  { %10761 = vmatprep.subr.mxu1 %v22846_v53  ;;  %10599 = vmatpush1.msra.mxu0 %v25885_v58  ;;  %v23314_v53 = vsub.f32 %v9068_v14, %v23274_v44  ;;  %v9036_v14 = vld [vmem:[%s24660_s5 + $0x2a0] sm:$0xff]  ;;  %v25893_v58 = vld [vmem:[#allocation8_spill] sm:$0xff] }
 0xba9   :  { %10763 = vmatpush1.msra.mxu1 %v22876_v18  ;;  %10603 = vmatprep.subr.mxu0 %v25887_v54  ;;  %v23325_v18 = vsub.f32 %v9061_v17, %v23282_v37  ;;  %v9029_v17 = vld [vmem:[%s24660_s5 + $0x268] sm:$0xff]  ;;  %v25894_v54 = vand.u32 4294901760, %v25867_v41  ;;  %v23349_v0 = vsub.f32 %v9053_v15, %v23304_v51  ;;  %v23362_v41 = vsub.f32 %v23272_v1, %v25114_v59 }
 0xbaa   :  { %25888 = vst [vmem:[#allocation23_spill] sm:$0xff] %v23314_v53  ;;  %10765 = vmatprep.subr.mxu1 %v22891_v25  ;;  %10607 = vmatpush1.msra.mxu0 %v25889_v9  ;;  %v23337_v25 = vsub.f32 %v9060_v13, %v23293_v62  ;;  %v23351_v9 = vand.u32 4294901760, %v9037_v31  ;;  %v9028_v13 = vld [vmem:[%s24660_s5 + $0x260] sm:$0xff]  ;;  %v23366_v15 = vsub.f32 %v9052_v42, %v23316_v45  ;;  %v23380_v59 = vand.u32 4294901760, %v9029_v17 }
 0xbab   :  { %25890 = vst [vmem:[#allocation28_spill] sm:$0xff] %v23325_v18  ;;  %10767 = vmatpush1.msra.mxu1 %v22907_v46  ;;  %10611 = vmatprep.subr.mxu0 %v25891_v38  ;;  %25895 = vst [vmem:[#allocation11_spill] sm:$0xff] %v23349_v0  ;;  %v25896_v38 = vand.u32 4294901760, %v25868_v28  ;;  %v9021_v46 = vld [vmem:[%s24660_s5 + $0x228] sm:$0xff]  ;;  %v25900_v42 = vand.u32 4294901760, %v25870_v21  ;;  %v25903_v21 = vand.u32 4294901760, %v23302_v35 }
 0xbac   :  { %25892 = vst [vmem:[#allocation9_spill] sm:$0xff] %v23337_v25  ;;  %10769 = vmatprep.subr.mxu1 %v25893_v58  ;;  %10615 = vmatpush1.msra.mxu0 %v25894_v54  ;;  %25897 = vst [vmem:[#allocation6_spill] sm:$0xff] %v23366_v15  ;;  %v23368_v54 = vand.u32 4294901760, %v9036_v14  ;;  %v23388_v58 = vsub.f32 %v23291_v10, %v25115_v23  ;;  %v25905_v28 = vand.u32 4294901760, %v25872_v16  ;;  %v25909_v16 = vand.u32 4294901760, %v23325_v18 }
 0xbad   :  { %10771 = vmatpush1.msra.mxu1 %v22937_v3  ;;  %10619 = vmatprep.subr.mxu0 %v25896_v38  ;;  %v25898_v3 = vand.u32 4294901760, %v25869_v30  ;;  %v23378_v38 = vsub.f32 %v9045_v36, %v23327_v6  ;;  %v23392_v30 = vsub.f32 %v9044_v43, %v23339_v61  ;;  %v9020_v36 = vld [vmem:[%s24660_s5 + $0x220] sm:$0xff]  ;;  %v23409_v43 = vsub.f32 %v9037_v31, %v23351_v9 }
 0xbae   :  { %10773 = vmatprep.subr.mxu1 %v22953_v7  ;;  %v23411_v7 = vand.u32 4294901760, %v9021_v46  ;;  %v23424_v23 = vsub.f32 %v9036_v14, %v23368_v54  ;;  %v25908_v31 = vand.u32 4294901760, %v22963_v8  ;;  %v9013_v14 = vld [vmem:[%s24660_s5 + $0x1e8] sm:$0xff]  ;;  %v25912_v8 = vand.u32 4294901760, %v22979_v55  ;;  %10824 = vmatprep.mubr.f32.mxu1 %v25671_v24 }
 0xbaf   :  { %10623 = vmatpush1.msra.mxu0 %v25898_v3  ;;  %25899 = vst [vmem:[#allocation2_spill] sm:$0xff] %v23378_v38  ;;  %10775 = vmatpush1.msra.mxu1 %v22965_v40  ;;  %25901 = vst [vmem:[#allocation4_spill] sm:$0xff] %v23392_v30  ;;  %v23394_v3 = vand.u32 4294901760, %v9028_v13  ;;  %v25902_v40 = vand.u32 4294901760, %v25871_v22  ;;  %v10944_v22 = vand.u32 4294901760, %v23362_v41  ;;  %v25926_v60 = vand.u32 4294901760, %v23409_v43 }
 0xbb0   :  { %10627 = vmatprep.subr.mxu0 %v25900_v42  ;;  %10777 = vmatprep.subr.mxu1 %v22981_v49  ;;  %v23405_v42 = vsub.f32 %v23302_v35, %v25903_v21  ;;  %25904 = vst [vmem:[#allocation18_spill] sm:$0xff] %v23409_v43  ;;  %v25906_v49 = vand.u32 4294901760, %v23314_v53  ;;  %25907 = vst [vmem:[#allocation17_spill] sm:$0xff] %v23424_v23 }
 0xbb1   :  { %10631 = vmatpush1.msra.mxu0 %v25902_v40  ;;  %10779 = vmatpush1.msra.mxu1 %v22993_v50  ;;  %v23432_v50 = vsub.f32 %v23325_v18, %v25909_v16  ;;  %v25913_v16 = vand.u32 4294901760, %v23337_v25  ;;  %v23454_v21 = vsub.f32 %v9028_v13, %v23394_v3  ;;  %v9012_v13 = vld [vmem:[%s24660_s5 + $0x1e0] sm:$0xff] }
 0xbb2   :  { %10635 = vmatprep.subr.mxu0 %v25905_v28  ;;  %v23420_v40 = vsub.f32 %v23314_v53, %v25906_v49  ;;  %10781 = vmatprep.subr.mxu1 %v23004_v12  ;;  %v23436_v28 = vsub.f32 %v9029_v17, %v23380_v59  ;;  %v23438_v49 = vand.u32 4294901760, %v9020_v36  ;;  %v25911_v12 = vld [vmem:[#allocation16_spill] sm:$0xff]  ;;  %v10956_v55 = vand.u32 4294901760, %v23405_v42  ;;  %v9004_v17 = vld [vmem:[%s24660_s5 + $0x1a0] sm:$0xff] }
 0xbb3   :  { %10639 = vmatpush1.msra.mxu0 %v25908_v31  ;;  %10783 = vmatpush1.msra.mxu1 %v25911_v12  ;;  %v10950_v31 = vand.u32 4294901760, %v23388_v58  ;;  %v23450_v41 = vsub.f32 %v23337_v25, %v25913_v16  ;;  %25914 = vst [vmem:[#allocation29_spill] sm:$0xff] %v23454_v21  ;;  %v25916_v12 = vand.u32 4294901760, %v23349_v0  ;;  %v23467_v16 = vsub.f32 %v9021_v46, %v23411_v7 }
 0xbb4   :  { %25910 = vst [vmem:[#allocation14_spill] sm:$0xff] %v23436_v28  ;;  %10643 = vmatprep.subr.mxu0 %v25912_v8  ;;  %10785 = vmatprep.subr.mxu1 %v23029_v26  ;;  %v10962_v26 = vand.u32 4294901760, %v23420_v40  ;;  %v23482_v46 = vand.u32 4294901760, %v9013_v14  ;;  %v9005_v8 = vld [vmem:[%s24660_s5 + $0x1a8] sm:$0xff]  ;;  %v25921_v40 = vand.u32 4294901760, %v23378_v38 }
 0xbb5   :  { %10647 = vmatpush1.msra.mxu0 %v25915_v5  ;;  %v23463_v58 = vsub.f32 %v23349_v0, %v25916_v12  ;;  %25917 = vst [vmem:[#allocation15_spill] sm:$0xff] %v23467_v16  ;;  %10787 = vmatpush1.msra.mxu1 %v23042_v63  ;;  %v25919_v5 = vand.u32 4294901760, %v23366_v15  ;;  %v10968_v63 = vand.u32 4294901760, %v23432_v50  ;;  %v23498_v12 = vsub.f32 %v9020_v36, %v23438_v49  ;;  %v8997_v36 = vld [vmem:[%s24660_s5 + $0x168] sm:$0xff] }
 0xbb6   :  { %10651 = vmatprep.subr.mxu0 %v25918_v34  ;;  %10789 = vmatprep.subr.mxu1 %v23052_v27  ;;  %v23494_v34 = vsub.f32 %v23378_v38, %v25921_v40  ;;  %v10974_v52 = vand.u32 4294901760, %v23450_v41  ;;  %v25923_v27 = vand.u32 4294901760, %v23392_v30  ;;  %v23512_v40 = vand.u32 4294901760, %v9012_v13  ;;  %v8996_v38 = vld [vmem:[%s24660_s5 + $0x160] sm:$0xff] }
 0xbb7   :  { %v23479_v42 = vsub.f32 %v23366_v15, %v25919_v5  ;;  %10655 = vmatpush1.msra.mxu0 %v25920_v56  ;;  %25922 = vst [vmem:[#allocation10_spill] sm:$0xff] %v23498_v12  ;;  %10791 = vmatpush1.msra.mxu1 %v23062_v57  ;;  %v25924_v5 = vand.u32 4294901760, %v23027_v33  ;;  %v25925_v57 = vld [vmem:[#allocation25_spill] sm:$0xff]  ;;  %v10980_v41 = vand.u32 4294901760, %v23463_v58  ;;  %v25927_v33 = vand.u32 4294901760, %v23040_v32 }
 0xbb8   :  { %v23509_v50 = vsub.f32 %v23392_v30, %v25923_v27  ;;  %10826 = vmatmul.mubr.f32.vlgmr.msra.gmra.mxu1 %v25925_v57  ;;  %v23524_v27 = vsub.f32 %v23409_v43, %v25926_v60  ;;  %v23527_v30 = vand.u32 4294901760, %v9005_v8  ;;  %10945 = vmatprep.subr.mxu1 %v10944_v22  ;;  %v25928_v58 = vand.u32 4294901760, %v23424_v23  ;;  %v8989_v43 = vld [vmem:[%s24660_s5 + $0x128] sm:$0xff] }
 0xbb9   :  { %10659 = vmatprep.subr.mxu0 %v25924_v5  ;;  %v10986_v5 = vand.u32 4294901760, %v23479_v42  ;;  %v23541_v60 = vsub.f32 %v9013_v14, %v23482_v46  ;;  %v23543_v56 = vand.u32 4294901760, %v9004_v17  ;;  %10951 = vmatpush1.msra.mxu1 %v10950_v31  ;;  %v25930_v32 = vand.u32 4294901760, %v23050_v48 }
 0xbba   :  { %10663 = vmatpush1.msra.mxu0 %v25927_v33  ;;  %v23538_v15 = vsub.f32 %v23424_v23, %v25928_v58  ;;  %v10992_v22 = vand.u32 4294901760, %v23494_v34  ;;  %v25931_v42 = vand.u32 4294901760, %v23436_v28  ;;  %v23557_v58 = vand.u32 4294901760, %v8997_v36  ;;  %v8988_v23 = vld [vmem:[%s24660_s5 + $0x120] sm:$0xff]  ;;  %10957 = vmatprep.subr.mxu1 %v10956_v55 }
 0xbbb   :  { %25929 = vst [vmem:[#allocation3_spill] sm:$0xff] %v23541_v60  ;;  %10667 = vmatprep.subr.mxu0 %v25930_v32  ;;  %v25933_v31 = vand.u32 4294901760, %v23060_v47  ;;  %v10998_v48 = vand.u32 4294901760, %v23509_v50  ;;  %v25934_v34 = vand.u32 4294901760, %v23454_v21  ;;  %v23573_v14 = vand.u32 4294901760, %v8996_v38  ;;  %10963 = vmatpush1.msra.mxu1 %v10962_v26 }
 0xbbc   :  { %v23554_v33 = vsub.f32 %v23436_v28, %v25931_v42  ;;  %25932 = vst [vmem:[#allocation26_spill] sm:$0xff] %v23557_v58  ;;  %v23571_v42 = vsub.f32 %v9012_v13, %v23512_v40  ;;  %v8981_v28 = vld [vmem:[%s24660_s5 + $0xe8] sm:$0xff]  ;;  %v25936_v47 = vand.u32 4294901760, %v23070_v39  ;;  %v11004_v55 = vand.u32 4294901760, %v23524_v27  ;;  %10969 = vmatprep.subr.mxu1 %v10968_v63  ;;  %v8972_v27 = vld [vmem:[%s24660_s5 + $0xa0] sm:$0xff]  ;;  %10720 = vmatprep.mubr.f32.mxu0 %v25671_v24 }
 0xbbd   :  { %10671 = vmatpush1.msra.mxu0 %v25933_v31  ;;  %v23568_v32 = vsub.f32 %v23454_v21, %v25934_v34  ;;  %v25937_v50 = vand.u32 4294901760, %v23467_v16  ;;  %v23587_v13 = vsub.f32 %v9005_v8, %v23527_v30  ;;  %v23589_v34 = vand.u32 4294901760, %v8989_v43  ;;  %v8980_v21 = vld [vmem:[%s24660_s5 + $0xe0] sm:$0xff]  ;;  %v8973_v8 = vld [vmem:[%s24660_s5 + $0xa8] sm:$0xff]  ;;  %10975 = vmatpush1.msra.mxu1 %v10974_v52 }
 0xbbe   :  { %25935 = vst [vmem:[#allocation12_spill] sm:$0xff] %v23571_v42  ;;  %10675 = vmatprep.subr.mxu0 %v25936_v47  ;;  %v25939_v39 = vand.u32 4294901760, %v23078_v29  ;;  %v11010_v26 = vand.u32 4294901760, %v23538_v15  ;;  %v23599_v47 = vsub.f32 %v9004_v17, %v23543_v56  ;;  %v11016_v29 = vand.u32 4294901760, %v23554_v33  ;;  %10981 = vmatprep.subr.mxu1 %v10980_v41 }
 0xbbf   :  { %v23584_v31 = vsub.f32 %v23467_v16, %v25937_v50  ;;  %25938 = vst [vmem:[#allocation19_spill] sm:$0xff] %v23587_v13  ;;  %v23601_v50 = vand.u32 4294901760, %v8988_v23  ;;  %v25940_v16 = vand.u32 4294901760, %v23086_v19  ;;  %v25941_v63 = vand.u32 4294901760, %v23498_v12  ;;  %10987 = vmatpush1.msra.mxu1 %v10986_v5  ;;  %11164 = vmatprep.mubr.f32.mxu1 %v25671_v24 }
 0xbc0   :  { %10679 = vmatpush1.msra.mxu0 %v25939_v39  ;;  %v23615_v17 = vsub.f32 %v8997_v36, %v23557_v58  ;;  %v23617_v39 = vand.u32 4294901760, %v8981_v28  ;;  %v25942_v19 = vand.u32 4294901760, %v23094_v20  ;;  %v23627_v33 = vsub.f32 %v8996_v38, %v23573_v14  ;;  %v8965_v36 = vld [vmem:[%s24660_s5 + $0x68] sm:$0xff]  ;;  %v8964_v38 = vld [vmem:[%s24660_s5 + $0x60] sm:$0xff]  ;;  %10993 = vmatprep.subr.mxu1 %v10992_v22 }
 0xbc1   :  { %10683 = vmatprep.subr.mxu0 %v25940_v16  ;;  %v23612_v15 = vsub.f32 %v23498_v12, %v25941_v63  ;;  %v11022_v16 = vand.u32 4294901760, %v23568_v32  ;;  %v23629_v63 = vand.u32 4294901760, %v8980_v21  ;;  %v11028_v41 = vand.u32 4294901760, %v23584_v31  ;;  %v8957_v12 = vld [vmem:[%s24660_s5 + $0x28] sm:$0xff]  ;;  %10999 = vmatpush1.msra.mxu1 %v10998_v48 }
 0xbc2   :  { %10687 = vmatpush1.msra.mxu0 %v25942_v19  ;;  %v23638_v32 = vsub.f32 %v8989_v43, %v23589_v34  ;;  %v23640_v19 = vand.u32 4294901760, %v8973_v8  ;;  %v25943_v52 = vand.u32 4294901760, %v23541_v60  ;;  %v23652_v20 = vsub.f32 %v8988_v23, %v23601_v50  ;;  %v8956_v23 = vld [vmem:[%s24660_s5 + $0x20] sm:$0xff]  ;;  %11005 = vmatprep.subr.mxu1 %v11004_v55 }
 0xbc3   :  { %10722 = vmatmul.mubr.f32.vlgmr.msra.gmra.mxu0 %v25925_v57  ;;  %10833 = vmatprep.subr.mxu0 %v23241_v4  ;;  %v23654_v43 = vand.u32 4294901760, %v8972_v27  ;;  %v11034_v0 = vand.u32 4294901760, %v23612_v15  ;;  %v23665_v31 = vand.u32 4294901760, %v8965_v36  ;;  %v25946_v22 = vand.u32 4294901760, %v23571_v42 }
 0xbc4   :  { %v11039_v5 = vsub.f32 %v23541_v60, %v25943_v52  ;;  %25944 = vst [vmem:[#allocation5_spill] sm:$0xff] %v23652_v20  ;;  %10835 = vmatpush1.msra.mxu0 %v23255_v2  ;;  %v23663_v52 = vsub.f32 %v8981_v28, %v23617_v39  ;;  %v23676_v25 = vsub.f32 %v8980_v21, %v23629_v63  ;;  %v23678_v28 = vand.u32 4294901760, %v8964_v38 }
 0xbc5   :  { %25945 = vst [vmem:[#allocation21_spill] sm:$0xff] %v23654_v43  ;;  %10837 = vmatprep.subr.mxu0 %v23263_v11  ;;  %v11045_v60 = vsub.f32 %v23571_v42, %v25946_v22  ;;  %v25947_v18 = vand.u32 4294901760, %v23587_v13  ;;  %v23686_v35 = vsub.f32 %v8973_v8, %v23640_v19  ;;  %v23688_v22 = vand.u32 4294901760, %v8957_v12  ;;  %11011 = vmatpush1.msra.mxu1 %v11010_v26 }
 0xbc6   :  { %10839 = vmatpush1.msra.mxu0 %v23274_v44  ;;  %v25948_v21 = vand.u32 4294901760, %v23599_v47  ;;  %v23696_v42 = vsub.f32 %v8972_v27, %v23654_v43  ;;  %11017 = vmatprep.subr.mxu1 %v11016_v29  ;;  %v11040_v8 = vand.u32 4294901760, %v11039_v5  ;;  %v25950_v53 = vand.u32 4294901760, %v23615_v17 }
 0xbc7   :  { %v11051_v48 = vsub.f32 %v23587_v13, %v25947_v18  ;;  %10841 = vmatprep.subr.mxu0 %v23282_v37  ;;  %v23698_v18 = vand.u32 4294901760, %v8956_v23  ;;  %v23706_v10 = vsub.f32 %v8965_v36, %v23665_v31  ;;  %11023 = vmatpush1.msra.mxu1 %v11022_v16  ;;  %v11046_v27 = vand.u32 4294901760, %v11045_v60 }
 0xbc8   :  { %v11057_v55 = vsub.f32 %v23599_v47, %v25948_v21  ;;  %10843 = vmatpush1.msra.mxu0 %v23293_v62  ;;  %v11063_v26 = vsub.f32 %v23615_v17, %v25950_v53  ;;  %v25951_v21 = vand.u32 4294901760, %v23627_v33  ;;  %v23714_v5 = vsub.f32 %v8964_v38, %v23678_v28  ;;  %11029 = vmatprep.subr.mxu1 %v11028_v41 }
 0xbc9   :  { %25949 = vst [vmem:[#allocation13_spill] sm:$0xff] %v23698_v18  ;;  %10845 = vmatprep.subr.mxu0 %v23304_v51  ;;  %v11052_v53 = vand.u32 4294901760, %v11051_v48  ;;  %v25953_v36 = vand.u32 4294901760, %v23638_v32  ;;  %v23722_v60 = vsub.f32 %v8957_v12, %v23688_v22  ;;  %11035 = vmatpush1.msra.mxu1 %v11034_v0  ;;  %v25955_v38 = vand.u32 4294901760, %v23652_v20 }
 0xbca   :  { %v11069_v29 = vsub.f32 %v23627_v33, %v25951_v21  ;;  %25952 = vst [vmem:[#allocation24_spill] sm:$0xff] %v23714_v5  ;;  %10847 = vmatpush1.msra.mxu0 %v23316_v45  ;;  %v11058_v21 = vand.u32 4294901760, %v11057_v55  ;;  %v23730_v48 = vsub.f32 %v8956_v23, %v23698_v18  ;;  %11041 = vmatprep.subr.mxu1 %v11040_v8  ;;  %v25957_v12 = vand.u32 4294901760, %v23663_v52 }
 0xbcb   :  { %v11075_v16 = vsub.f32 %v23638_v32, %v25953_v36  ;;  %25954 = vst [vmem:[#allocation8_spill] sm:$0xff] %v23722_v60  ;;  %10849 = vmatprep.subr.mxu0 %v23327_v6  ;;  %v11081_v41 = vsub.f32 %v23652_v20, %v25955_v38  ;;  %v11064_v36 = vand.u32 4294901760, %v11063_v26  ;;  %11047 = vmatpush1.msra.mxu1 %v11046_v27  ;;  %v25958_v38 = vand.u32 4294901760, %v23676_v25 }
 0xbcc   :  { %25956 = vst [vmem:[#allocation16_spill] sm:$0xff] %v23730_v48  ;;  %10851 = vmatpush1.msra.mxu0 %v23339_v61  ;;  %v11087_v0 = vsub.f32 %v23663_v52, %v25957_v12  ;;  %v11070_v55 = vand.u32 4294901760, %v11069_v29  ;;  %11053 = vmatprep.subr.mxu1 %v11052_v53  ;;  %v25959_v26 = vand.u32 4294901760, %v23686_v35  ;;  %v25960_v29 = vand.u32 4294901760, %v23696_v42 }
 0xbcd   :  { %10853 = vmatprep.subr.mxu0 %v23351_v9  ;;  %v11093_v15 = vsub.f32 %v23676_v25, %v25958_v38  ;;  %v11076_v8 = vand.u32 4294901760, %v11075_v16  ;;  %11059 = vmatpush1.msra.mxu1 %v11058_v21  ;;  %v11082_v27 = vand.u32 4294901760, %v11081_v41  ;;  %v25152_v23 = vand.u32 4294901760, %v23730_v48 }
 0xbce   :  { %10855 = vmatpush1.msra.mxu0 %v23368_v54  ;;  %v11099_v12 = vsub.f32 %v23686_v35, %v25959_v26  ;;  %v11105_v38 = vsub.f32 %v23696_v42, %v25960_v29  ;;  %11065 = vmatprep.subr.mxu1 %v11064_v36  ;;  %v11088_v53 = vand.u32 4294901760, %v11087_v0  ;;  %v25961_v16 = vand.u32 4294901760, %v23706_v10 }
 0xbcf   :  { %10857 = vmatprep.subr.mxu0 %v23380_v59  ;;  %11071 = vmatpush1.msra.mxu1 %v11070_v55  ;;  %v11094_v21 = vand.u32 4294901760, %v11093_v15  ;;  %v25962_v41 = vand.u32 4294901760, %v23714_v5  ;;  %v25963_v36 = vand.u32 4294901760, %v23722_v60  ;;  %v11129_v15 = vsub.f32 %v23730_v48, %v25152_v23  ;;  %v25979_v23 = vld [vmem:[#allocation10_spill] sm:$0xff] }
 0xbd0   :  { %10859 = vmatpush1.msra.mxu0 %v23394_v3  ;;  %v11111_v26 = vsub.f32 %v23706_v10, %v25961_v16  ;;  %11077 = vmatprep.subr.mxu1 %v11076_v8  ;;  %v11100_v29 = vand.u32 4294901760, %v11099_v12  ;;  %v11106_v16 = vand.u32 4294901760, %v11105_v38  ;;  %v25965_v38 = vld [vmem:[#allocation30_spill] sm:$0xff] }
 0xbd1   :  { %10861 = vmatprep.subr.mxu0 %v23411_v7  ;;  %v11117_v13 = vsub.f32 %v23714_v5, %v25962_v41  ;;  %v11123_v0 = vsub.f32 %v23722_v60, %v25963_v36  ;;  %11083 = vmatpush1.msra.mxu1 %v11082_v27  ;;  %v11130_v27 = vand.u32 4294901760, %v11129_v15  ;;  %v25969_v41 = vld [vmem:[#allocation9_spill] sm:$0xff]  ;;  %v25971_v36 = vld [vmem:[#allocation6_spill] sm:$0xff] }
 0xbd2   :  { %10863 = vmatpush1.msra.mxu0 %v23438_v49  ;;  %11089 = vmatprep.subr.mxu1 %v11088_v53  ;;  %v11112_v55 = vand.u32 4294901760, %v11111_v26  ;;  %v25966_v53 = vld [vmem:[#allocation22_spill] sm:$0xff]  ;;  %v25967_v26 = vld [vmem:[#allocation23_spill] sm:$0xff] }
 0xbd3   :  { %10865 = vmatprep.subr.mxu0 %v23482_v46  ;;  %11095 = vmatpush1.msra.mxu1 %v11094_v21  ;;  %v11118_v8 = vand.u32 4294901760, %v11117_v13  ;;  %v11124_v12 = vand.u32 4294901760, %v11123_v0  ;;  %v25964_v13 = vld [vmem:[#allocation20_spill] sm:$0xff]  ;;  %v25972_v0 = vld [vmem:[#allocation2_spill] sm:$0xff] }
 0xbd4   :  { %10867 = vmatpush1.msra.mxu0 %v23512_v40  ;;  %11101 = vmatprep.subr.mxu1 %v11100_v29  ;;  %v25968_v21 = vld [vmem:[#allocation28_spill] sm:$0xff]  ;;  %v25970_v29 = vld [vmem:[#allocation11_spill] sm:$0xff]  ;;  %v25974_v15 = vld [vmem:[#allocation18_spill] sm:$0xff] }
 0xbd5   :  { %10869 = vmatprep.subr.mxu0 %v23527_v30  ;;  %11107 = vmatpush1.msra.mxu1 %v11106_v16  ;;  %v25973_v16 = vld [vmem:[#allocation4_spill] sm:$0xff] }
 0xbd6   :  { %10871 = vmatpush1.msra.mxu0 %v23543_v56  ;;  %11113 = vmatprep.subr.mxu1 %v11112_v55  ;;  %v25975_v55 = vld [vmem:[#allocation17_spill] sm:$0xff] }
 0xbd7   :  { %10873 = vmatprep.subr.mxu0 %v23557_v58  ;;  %11119 = vmatpush1.msra.mxu1 %v11118_v8  ;;  %v25976_v8 = vld [vmem:[#allocation14_spill] sm:$0xff] }
 0xbd8   :  { %10875 = vmatpush1.msra.mxu0 %v23573_v14  ;;  %11125 = vmatprep.subr.mxu1 %v11124_v12  ;;  %v25977_v12 = vld [vmem:[#allocation29_spill] sm:$0xff] }
 0xbd9   :  { %10877 = vmatprep.subr.mxu0 %v23589_v34  ;;  %11131 = vmatpush1.msra.mxu1 %v11130_v27  ;;  %v25978_v27 = vld [vmem:[#allocation15_spill] sm:$0xff] }
 0xbda   :  { %10879 = vmatpush1.msra.mxu0 %v23601_v50  ;;  %11166 = vmatmul.mubr.f32.vlgmr.msra.gmra.mxu1 %v25925_v57  ;;  %v25981_v57 = vld [vmem:[#allocation12_spill] sm:$0xff] }
 0xbdb   :  { %10881 = vmatprep.subr.mxu0 %v23617_v39  ;;  %11310 = vmatprep.subr.mxu1 %v23241_v4 }
 0xbdc   :  { %10883 = vmatpush1.msra.mxu0 %v23629_v63  ;;  %11312 = vmatpush1.msra.mxu1 %v23255_v2 }
 0xbdd   :  { %10885 = vmatprep.subr.mxu0 %v23640_v19  ;;  %11314 = vmatprep.subr.mxu1 %v23263_v11 }
 0xbde   :  { %10887 = vmatpush1.msra.mxu0 %v23654_v43  ;;  %11316 = vmatpush1.msra.mxu1 %v23274_v44 }
 0xbdf   :  { %10889 = vmatprep.subr.mxu0 %v23665_v31  ;;  %11318 = vmatprep.subr.mxu1 %v23282_v37 }
 0xbe0   :  { %10891 = vmatpush1.msra.mxu0 %v23678_v28  ;;  %11320 = vmatpush1.msra.mxu1 %v23293_v62 }
 0xbe1   :  { %10893 = vmatprep.subr.mxu0 %v23688_v22  ;;  %11322 = vmatprep.subr.mxu1 %v23304_v51 }
 0xbe2   :  { %10895 = vmatpush1.msra.mxu0 %v23698_v18  ;;  %10928 = vmatprep.mubr.f32.mxu0 %v25671_v24 }
 0xbe3   :  { %11324 = vmatpush1.msra.mxu1 %v23316_v45  ;;  %10934 = vmatmul.mubr.f32.vlgmr.msra.gmra.mxu0 %v25964_v13  ;;  %v25980_v13 = vld [vmem:[#allocation3_spill] sm:$0xff] }
 0xbe4   :  { %11174 = vmatprep.subr.mxu0 %v23272_v1  ;;  %11326 = vmatprep.subr.mxu1 %v23327_v6 }
 0xbe5   :  { %11177 = vmatpush1.msra.mxu0 %v25965_v38  ;;  %11328 = vmatpush1.msra.mxu1 %v23339_v61 }
 0xbe6   :  { %11180 = vmatprep.subr.mxu0 %v25966_v53  ;;  %11330 = vmatprep.subr.mxu1 %v23351_v9 }
 0xbe7   :  { %11183 = vmatpush1.msra.mxu0 %v25967_v26  ;;  %11332 = vmatpush1.msra.mxu1 %v23368_v54 }
 0xbe8   :  { %11186 = vmatprep.subr.mxu0 %v25968_v21  ;;  %11334 = vmatprep.subr.mxu1 %v23380_v59 }
 0xbe9   :  { %11189 = vmatpush1.msra.mxu0 %v25969_v41  ;;  %11336 = vmatpush1.msra.mxu1 %v23394_v3 }
 0xbea   :  { %11192 = vmatprep.subr.mxu0 %v25970_v29  ;;  %11338 = vmatprep.subr.mxu1 %v23411_v7 }
 0xbeb   :  { %11195 = vmatpush1.msra.mxu0 %v25971_v36  ;;  %11340 = vmatpush1.msra.mxu1 %v23438_v49 }
 0xbec   :  { %11198 = vmatprep.subr.mxu0 %v25972_v0  ;;  %11342 = vmatprep.subr.mxu1 %v23482_v46 }
 0xbed   :  { %11201 = vmatpush1.msra.mxu0 %v25973_v16  ;;  %11344 = vmatpush1.msra.mxu1 %v23512_v40 }
 0xbee   :  { %11204 = vmatprep.subr.mxu0 %v25974_v15  ;;  %11346 = vmatprep.subr.mxu1 %v23527_v30 }
 0xbef   :  { %11207 = vmatpush1.msra.mxu0 %v25975_v55  ;;  %11348 = vmatpush1.msra.mxu1 %v23543_v56 }
 0xbf0   :  { %11210 = vmatprep.subr.mxu0 %v25976_v8  ;;  %11350 = vmatprep.subr.mxu1 %v23557_v58  ;;  %v25982_v58 = vld [vmem:[#allocation19_spill] sm:$0xff] }
 0xbf1   :  { %11213 = vmatpush1.msra.mxu0 %v25977_v12  ;;  %11352 = vmatpush1.msra.mxu1 %v23573_v14 }
 0xbf2   :  { %11216 = vmatprep.subr.mxu0 %v25978_v27  ;;  %11354 = vmatprep.subr.mxu1 %v23589_v34 }
 0xbf3   :  { %11219 = vmatpush1.msra.mxu0 %v25979_v23  ;;  %11356 = vmatpush1.msra.mxu1 %v23601_v50 }
 0xbf4   :  { %11222 = vmatprep.subr.mxu0 %v25980_v13  ;;  %11358 = vmatprep.subr.mxu1 %v23617_v39 }
 0xbf5   :  { %11225 = vmatpush1.msra.mxu0 %v25981_v57  ;;  %11360 = vmatpush1.msra.mxu1 %v23629_v63 }
 0xbf6   :  { %11228 = vmatprep.subr.mxu0 %v25982_v58  ;;  %11362 = vmatprep.subr.mxu1 %v23640_v19 }
 0xbf7   :  { %11231 = vmatpush1.msra.mxu0 %v23599_v47  ;;  %11364 = vmatpush1.msra.mxu1 %v23654_v43  ;;  %v25983_v43 = vld [vmem:[#allocation7_spill] sm:$0xff] }
 0xbf8   :  { %11234 = vmatprep.subr.mxu0 %v23615_v17  ;;  %11366 = vmatprep.subr.mxu1 %v23665_v31 }
 0xbf9   :  { %11237 = vmatpush1.msra.mxu0 %v23627_v33  ;;  %11368 = vmatpush1.msra.mxu1 %v23678_v28 }
 0xbfa   :  { %11240 = vmatprep.subr.mxu0 %v23638_v32  ;;  %11370 = vmatprep.subr.mxu1 %v23688_v22 }
 0xbfb   :  { %11243 = vmatpush1.msra.mxu0 %v23652_v20  ;;  %11372 = vmatpush1.msra.mxu1 %v23698_v18  ;;  %v9079_v18 = vld [vmem:[%s24660_s5 + $0x3f8] sm:$0xff]  ;;  %v9082_v20 = vlaneseq }
 0xbfc   :  { %11405 = vmatprep.mubr.f32.mxu1 %v25671_v24  ;;  %11246 = vmatprep.subr.mxu0 %v23663_v52 }
 0xbfd   :  { %11409 = vmatmul.mubr.f32.vlgmr.msra.gmra.mxu1 %v25983_v43  ;;  %11584 = vmatprep.subr.mxu1 %v23241_v4  ;;  %v9078_v4 = vld [vmem:[%s24660_s5 + $0x3f0] sm:$0xff]  ;;  %v23873_v43 = vshrl.u32 %v9082_v20, 7  ;;  %v25989_v20 = vand.u32 4294901760, %v25965_v38  ;;  %v25992_v38 = vand.u32 4294901760, %v25967_v26 }
 0xbfe   :  { %11249 = vmatpush1.msra.mxu0 %v23676_v25  ;;  %11586 = vmatpush1.msra.mxu1 %v23255_v2  ;;  %v23864_v2 = vand.u32 4294901760, %v9079_v18 }
 0xbff   :  { %11252 = vmatprep.subr.mxu0 %v23686_v35  ;;  %11588 = vmatprep.subr.mxu1 %v23263_v11  ;;  %v23868_v11 = vand.u32 4294901760, %v9078_v4  ;;  %25986 = vst [vmem:[#allocation23_spill] sm:$0xff] %v23873_v43 }
 0xc00   :  { %11255 = vmatpush1.msra.mxu0 %v23696_v42  ;;  %11590 = vmatpush1.msra.mxu1 %v23274_v44  ;;  %25984 = vst [vmem:[#allocation30_spill] sm:$0xff] %v23864_v2  ;;  %v9071_v44 = vld [vmem:[%s24660_s5 + $0x3b8] sm:$0xff] }
 0xc01   :  { %11258 = vmatprep.subr.mxu0 %v23706_v10  ;;  %11592 = vmatprep.subr.mxu1 %v23282_v37  ;;  %25985 = vst [vmem:[#allocation22_spill] sm:$0xff] %v23868_v11  ;;  %v25987_v37 = vld [vmem:[#allocation27_spill] sm:$0xff] }
 0xc02   :  { %11261 = vmatpush1.msra.mxu0 %v23714_v5  ;;  %11594 = vmatpush1.msra.mxu1 %v23293_v62  ;;  %v25988_v62 = vand.u32 4294901760, %v23272_v1  ;;  %v9062_v1 = vld [vmem:[%s24660_s5 + $0x370] sm:$0xff] }
 0xc03   :  { %11264 = vmatprep.subr.mxu0 %v23722_v60  ;;  %11596 = vmatprep.subr.mxu1 %v23304_v51  ;;  %v9070_v51 = vld [vmem:[%s24660_s5 + $0x3b0] sm:$0xff]  ;;  %v23901_v60 = vsub.f32 %v9078_v4, %v23868_v11  ;;  %v23920_v4 = vld [vmem:[%s24661_s6] sm:$0xff]  ;;  %v23925_v26 = vand.u32 4294901760, %v9062_v1 }
 0xc04   :  { %11267 = vmatpush1.msra.mxu0 %v23730_v48  ;;  %11300 = vmatprep.mubr.f32.mxu0 %v25671_v24  ;;  %v9063_v48 = vld [vmem:[%s24660_s5 + $0x378] sm:$0xff]  ;;  %25993 = vst [vmem:[#allocation9_spill] sm:$0xff] %v23920_v4 }
 0xc05   :  { %11598 = vmatpush1.msra.mxu1 %v23316_v45  ;;  %11303 = vmatmul.mubr.f32.vlgmr.msra.gmra.mxu0 %v25987_v37  ;;  %v23890_v45 = vsub.f32 %v9079_v18, %v23864_v2  ;;  %v23892_v37 = vand.u32 4294901760, %v9071_v44  ;;  %25991 = vst [vmem:[#allocation28_spill] sm:$0xff] %v23901_v60  ;;  %v9084_v18 = vsub.s32 0, %v23873_v43 }
 0xc06   :  { %11418 = vmatprep.subr.mxu0 %v25988_v62  ;;  %11600 = vmatprep.subr.mxu1 %v23327_v6  ;;  %v25990_v62 = vand.u32 4294901760, %v25966_v53  ;;  %v9055_v6 = vld [vmem:[%s24660_s5 + $0x338] sm:$0xff]  ;;  %v9054_v53 = vld [vmem:[%s24660_s5 + $0x330] sm:$0xff] }
 0xc07   :  { %11422 = vmatpush1.msra.mxu0 %v25989_v20  ;;  %11602 = vmatpush1.msra.mxu1 %v23339_v61  ;;  %v23910_v20 = vand.u32 4294901760, %v9070_v51  ;;  %v23912_v61 = vand.u32 4294901760, %v9063_v48  ;;  %v25168_v11 = vand.u32 4294901760, %v23890_v45  ;;  %v23933_v2 = vsub.f32 %v9071_v44, %v23892_v37 }
 0xc08   :  { %11426 = vmatprep.subr.mxu0 %v25990_v62  ;;  %11604 = vmatprep.subr.mxu1 %v23351_v9  ;;  %v25994_v9 = vand.u32 4294901760, %v25968_v21  ;;  %v9088_v62 = vsub.s32 1, %v23873_v43  ;;  %v23935_v5 = vand.u32 4294901760, %v9055_v6  ;;  %v25997_v21 = vand.u32 4294901760, %v25970_v29 }
 0xc09   :  { %11430 = vmatpush1.msra.mxu0 %v25992_v38  ;;  %11606 = vmatpush1.msra.mxu1 %v23368_v54  ;;  %v25995_v38 = vand.u32 4294901760, %v25969_v41  ;;  %25996 = vst [vmem:[#allocation11_spill] sm:$0xff] %v23933_v2  ;;  %v9225_v54 = vpop.f32.mrf.mxu0  ;;  %v23941_v43 = vand.u32 4294901760, %v9054_v53  ;;  %v25998_v41 = vand.u32 4294901760, %v25971_v36  ;;  %v23948_v44 = vsub.f32 %v9070_v51, %v23910_v20 }
 0xc0a   :  { %11434 = vmatprep.subr.mxu0 %v25994_v9  ;;  %11608 = vmatprep.subr.mxu1 %v23380_v59  ;;  %v25167_v9 = vand.u32 4294901760, %v23901_v60  ;;  %v9085_v59 = vrot.slane %v23920_v4, %v9084_v18  ;;  %v26001_v29 = vand.u32 4294901760, %v25972_v0  ;;  %v9089_v36 = vrot.slane %v23920_v4, %v9088_v62 }
 0xc0b   :  { %11438 = vmatpush1.msra.mxu0 %v25995_v38  ;;  %11610 = vmatpush1.msra.mxu1 %v23394_v3  ;;  %25999 = vst [vmem:[#allocation6_spill] sm:$0xff] %v23948_v44  ;;  %v23951_v38 = vsub.f32 %v9063_v48, %v23912_v61  ;;  %v9047_v3 = vld [vmem:[%s24660_s5 + $0x2f8] sm:$0xff]  ;;  %v26003_v51 = vand.u32 4294901760, %v25973_v16  ;;  %v23969_v48 = vsub.f32 %v23890_v45, %v25168_v11  ;;  %v9457_v16 = vpop.f32.mrf.mxu1  ;;  %v9227_v18 = vpop.f32.mrf.mxu0  ;;  %v26005_v62 = vand.u32 4294901760, %v25974_v15  ;;  %v26009_v11 = vld [vmem:[#allocation26_spill] sm:$0xff] }
 0xc0c   :  { %11442 = vmatprep.subr.mxu0 %v25997_v21  ;;  %11612 = vmatprep.subr.mxu1 %v23411_v7  ;;  %v23960_v7 = vsub.f32 %v9062_v1, %v23925_v26  ;;  %v23973_v0 = vsub.f32 %v9055_v6, %v23935_v5  ;;  %v9046_v1 = vld [vmem:[%s24660_s5 + $0x2f0] sm:$0xff]  ;;  %v23987_v6 = vsub.f32 %v23901_v60, %v25167_v9  ;;  %v26010_v15 = vand.u32 4294901760, %v25977_v12 }
 0xc0d   :  { %11446 = vmatpush1.msra.mxu0 %v25998_v41  ;;  %26000 = vst [vmem:[#allocation2_spill] sm:$0xff] %v23951_v38  ;;  %11614 = vmatpush1.msra.mxu1 %v23438_v49  ;;  %v25169_v49 = vand.u32 4294901760, %v23933_v2  ;;  %v23990_v21 = vsub.f32 %v9054_v53, %v23941_v43  ;;  %v23992_v41 = vand.u32 4294901760, %v9047_v3  ;;  %v9594_v9 = vpop.f32.mrf.mxu0  ;;  %v26008_v53 = vand.u32 4294901760, %v25976_v8 }
 0xc0e   :  { %11450 = vmatprep.subr.mxu0 %v26001_v29  ;;  %26002 = vst [vmem:[#allocation4_spill] sm:$0xff] %v23960_v7  ;;  %11616 = vmatprep.subr.mxu1 %v23482_v46  ;;  %26004 = vst [vmem:[#allocation18_spill] sm:$0xff] %v23973_v0  ;;  %v9039_v46 = vld [vmem:[%s24660_s5 + $0x2b8] sm:$0xff]  ;;  %v9226_v29 = vadd.f32 %v9225_v54, %v9085_v59  ;;  %v9030_v54 = vld [vmem:[%s24660_s5 + $0x270] sm:$0xff] }
 0xc0f   :  { %11454 = vmatpush1.msra.mxu0 %v26003_v51  ;;  %11618 = vmatpush1.msra.mxu1 %v23512_v40  ;;  %26006 = vst [vmem:[#allocation17_spill] sm:$0xff] %v23990_v21  ;;  %v26007_v51 = vand.u32 4294901760, %v25975_v55  ;;  %v24008_v55 = vand.u32 4294901760, %v9039_v46  ;;  %v9031_v59 = vld [vmem:[%s24660_s5 + $0x278] sm:$0xff]  ;;  %v24020_v8 = vsub.f32 %v23933_v2, %v25169_v49  ;;  %v9459_v40 = vpop.f32.mrf.mxu1  ;;  %v9596_v4 = vpop.f32.mrf.mxu0 }
 0xc10   :  { %11458 = vmatprep.subr.mxu0 %v26005_v62  ;;  %11620 = vmatprep.subr.mxu1 %v23527_v30  ;;  %v9038_v62 = vld [vmem:[%s24660_s5 + $0x2b0] sm:$0xff]  ;;  %v24006_v30 = vand.u32 4294901760, %v9046_v1  ;;  %v9023_v49 = vld [vmem:[%s24660_s5 + $0x238] sm:$0xff] }
 0xc11   :  { %11462 = vmatpush1.msra.mxu0 %v26007_v51  ;;  %11622 = vmatpush1.msra.mxu1 %v23543_v56  ;;  %v9228_v51 = vadd.f32 %v9227_v18, %v9089_v36  ;;  %v24032_v18 = vsub.f32 %v9047_v3, %v23992_v41  ;;  %v9458_v56 = vadd.f32 %v9457_v16, %v9226_v29  ;;  %v26015_v3 = vand.u32 4294901760, %v23951_v38 }
 0xc12   :  { %11466 = vmatprep.subr.mxu0 %v26008_v53  ;;  %11624 = vmatprep.subr.mxu1 %v26009_v11  ;;  %v26011_v11 = vand.u32 4294901760, %v25978_v27  ;;  %v26014_v27 = vand.u32 4294901760, %v23948_v44  ;;  %v24052_v36 = vand.u32 4294901760, %v9031_v59  ;;  %v9700_v53 = vpop.f32.mrf.mxu1  ;;  %v24063_v29 = vsub.f32 %v9046_v1, %v24006_v30 }
 0xc13   :  { %11470 = vmatpush1.msra.mxu0 %v26010_v15  ;;  %11626 = vmatpush1.msra.mxu1 %v23573_v14  ;;  %26012 = vst [vmem:[#allocation14_spill] sm:$0xff] %v24032_v18  ;;  %v24034_v15 = vand.u32 4294901760, %v9038_v62  ;;  %v26013_v14 = vand.u32 4294901760, %v25979_v23  ;;  %v24050_v12 = vsub.f32 %v23951_v38, %v26015_v3  ;;  %v26017_v23 = vand.u32 4294901760, %v23960_v7 }
 0xc14   :  { %11474 = vmatprep.subr.mxu0 %v26011_v11  ;;  %11628 = vmatprep.subr.mxu1 %v23589_v34  ;;  %v24045_v11 = vsub.f32 %v23948_v44, %v26014_v27  ;;  %v26016_v34 = vand.u32 4294901760, %v25980_v13  ;;  %26018 = vst [vmem:[#allocation29_spill] sm:$0xff] %v24063_v29  ;;  %v24068_v27 = vand.u32 4294901760, %v9030_v54  ;;  %v9595_v3 = vadd.f32 %v9594_v9, %v9458_v56  ;;  %v9006_v9 = vld [vmem:[%s24660_s5 + $0x1b0] sm:$0xff] }
 0xc15   :  { %11478 = vmatpush1.msra.mxu0 %v26013_v14  ;;  %11630 = vmatpush1.msra.mxu1 %v23601_v50  ;;  %v24060_v16 = vsub.f32 %v23960_v7, %v26017_v23  ;;  %v24066_v14 = vsub.f32 %v9039_v46, %v24008_v55  ;;  %v9022_v50 = vld [vmem:[%s24660_s5 + $0x230] sm:$0xff]  ;;  %v9460_v13 = vadd.f32 %v9459_v40, %v9228_v51  ;;  %v26021_v23 = vand.u32 4294901760, %v23973_v0 }
 0xc16   :  { %11482 = vmatprep.subr.mxu0 %v26016_v34  ;;  %11632 = vmatprep.subr.mxu1 %v23617_v39  ;;  %v26020_v34 = vand.u32 4294901760, %v25981_v57  ;;  %v24081_v46 = vand.u32 4294901760, %v9023_v49  ;;  %v26022_v7 = vand.u32 4294901760, %v25982_v58  ;;  %v26023_v40 = vand.u32 4294901760, %v23990_v21 }
 0xc17   :  { %26019 = vst [vmem:[#allocation15_spill] sm:$0xff] %v24066_v14  ;;  %v24079_v1 = vsub.f32 %v23973_v0, %v26021_v23  ;;  %11634 = vmatpush1.msra.mxu1 %v23629_v63  ;;  %v25174_v57 = vand.u32 4294901760, %v24032_v18  ;;  %v24094_v51 = vsub.f32 %v9038_v62, %v24034_v15  ;;  %v9597_v56 = vadd.f32 %v9596_v4, %v9460_v13  ;;  %v9015_v23 = vld [vmem:[%s24660_s5 + $0x1f8] sm:$0xff] }
 0xc18   :  { %11486 = vmatpush1.msra.mxu0 %v26020_v34  ;;  %v24090_v39 = vsub.f32 %v23990_v21, %v26023_v40  ;;  %11636 = vmatprep.subr.mxu1 %v23640_v19  ;;  %v26025_v63 = vand.u32 4294901760, %v23599_v47  ;;  %v24103_v34 = vand.u32 4294901760, %v9022_v50  ;;  %v9702_v40 = vpop.f32.mrf.mxu1  ;;  %v26027_v62 = vld [vmem:[#allocation21_spill] sm:$0xff]  ;;  %v26028_v4 = vand.u32 4294901760, %v23615_v17  ;;  %v9014_v47 = vld [vmem:[%s24660_s5 + $0x1f0] sm:$0xff] }
 0xc19   :  { %11490 = vmatprep.subr.mxu0 %v26022_v7  ;;  %26024 = vst [vmem:[#allocation10_spill] sm:$0xff] %v24094_v51  ;;  %v24101_v7 = vsub.f32 %v9031_v59, %v24052_v36  ;;  %11638 = vmatpush1.msra.mxu1 %v26027_v62  ;;  %v25175_v19 = vand.u32 4294901760, %v24063_v29  ;;  %v25178_v13 = vand.u32 4294901760, %v24066_v14  ;;  %v24115_v59 = vsub.f32 %v9030_v54, %v24068_v27 }
 0xc1a   :  { %11494 = vmatpush1.msra.mxu0 %v26025_v63  ;;  %11640 = vmatprep.subr.mxu1 %v23665_v31  ;;  %v26030_v63 = vand.u32 4294901760, %v23627_v33  ;;  %v9701_v17 = vadd.f32 %v9700_v53, %v9595_v3  ;;  %v26032_v54 = vand.u32 4294901760, %v23638_v32  ;;  %v9972_v31 = vpop.f32.mrf.mxu1  ;;  %v24135_v53 = vsub.f32 %v24032_v18, %v25174_v57  ;;  %v26033_v32 = vld [vmem:[#allocation5_spill] sm:$0xff]  ;;  %v26069_v18 = vld [vmem:[#allocation22_spill] sm:$0xff] }
 0xc1b   :  { %26026 = vst [vmem:[#allocation3_spill] sm:$0xff] %v24101_v7  ;;  %11498 = vmatprep.subr.mxu0 %v26028_v4  ;;  %26029 = vst [vmem:[#allocation12_spill] sm:$0xff] %v24115_v59  ;;  %v24123_v4 = vsub.f32 %v9023_v49, %v24081_v46  ;;  %11642 = vmatpush1.msra.mxu1 %v23678_v28  ;;  %v24138_v3 = vand.u32 4294901760, %v9015_v23  ;;  %v9007_v28 = vld [vmem:[%s24660_s5 + $0x1b8] sm:$0xff]  ;;  %v9703_v62 = vadd.f32 %v9702_v40, %v9597_v56 }
 0xc1c   :  { %11502 = vmatpush1.msra.mxu0 %v26030_v63  ;;  %11644 = vmatprep.subr.mxu1 %v23688_v22  ;;  %v24148_v57 = vsub.f32 %v9022_v50, %v24103_v34  ;;  %v26036_v49 = vld [vmem:[#allocation13_spill] sm:$0xff]  ;;  %v24158_v22 = vsub.f32 %v24063_v29, %v25175_v19  ;;  %v24163_v56 = vsub.f32 %v24066_v14, %v25178_v13  ;;  %v24166_v40 = vand.u32 4294901760, %v9014_v47  ;;  %v8998_v13 = vld [vmem:[%s24660_s5 + $0x170] sm:$0xff] }
 0xc1d   :  { %26031 = vst [vmem:[#allocation19_spill] sm:$0xff] %v24123_v4  ;;  %11506 = vmatprep.subr.mxu0 %v26032_v54  ;;  %v9868_v63 = vpop.f32.mrf.mxu0  ;;  %v26034_v54 = vand.u32 4294901760, %v26033_v32  ;;  %11646 = vmatpush1.msra.mxu1 %v26036_v49  ;;  %v26037_v49 = vand.u32 4294901760, %v23663_v52  ;;  %v26038_v32 = vld [vmem:[#allocation25_spill] sm:$0xff]  ;;  %v24175_v29 = vand.u32 4294901760, %v9007_v28  ;;  %v26039_v50 = vand.u32 4294901760, %v23969_v48  ;;  %v9974_v52 = vpop.f32.mrf.mxu1 }
 0xc1e   :  { %v9869_v33 = vadd.f32 %v9868_v63, %v9701_v17  ;;  %26035 = vst [vmem:[#allocation26_spill] sm:$0xff] %v24148_v57  ;;  %11679 = vmatprep.mubr.f32.mxu1 %v25671_v24  ;;  %v8999_v63 = vld [vmem:[%s24660_s5 + $0x178] sm:$0xff]  ;;  %v26040_v14 = vand.u32 4294901760, %v23676_v25  ;;  %v26043_v25 = vand.u32 4294901760, %v23987_v6  ;;  %v8990_v6 = vld [vmem:[%s24660_s5 + $0x130] sm:$0xff]  ;;  %11575 = vmatprep.mubr.f32.mxu0 %v25671_v24 }
 0xc1f   :  { %11510 = vmatpush1.msra.mxu0 %v26034_v54  ;;  %v9870_v17 = vpop.f32.mrf.mxu0  ;;  %11681 = vmatmul.mubr.f32.vlgmr.msra.gmra.mxu1 %v26038_v32  ;;  %v8991_v48 = vld [vmem:[%s24660_s5 + $0x138] sm:$0xff]  ;;  %v24211_v58 = vand.u32 4294901760, %v8999_v63 }
 0xc20   :  { %11514 = vmatprep.subr.mxu0 %v26037_v49  ;;  %v9973_v54 = vadd.f32 %v9972_v31, %v9869_v33  ;;  %v9871_v19 = vadd.f32 %v9870_v17, %v9703_v62  ;;  %11800 = vmatprep.subr.mxu1 %v26039_v50  ;;  %v11847_v49 = vand.u32 4294901760, %v24135_v53  ;;  %v26041_v31 = vand.u32 4294901760, %v24094_v51 }
 0xc21   :  { %11518 = vmatpush1.msra.mxu0 %v26040_v14  ;;  %v24191_v33 = vsub.f32 %v9015_v23, %v24138_v3  ;;  %v24193_v17 = vand.u32 4294901760, %v9006_v9  ;;  %11806 = vmatpush1.msra.mxu1 %v26043_v25  ;;  %v26044_v14 = vand.u32 4294901760, %v23686_v35  ;;  %v26045_v23 = vand.u32 4294901760, %v24101_v7  ;;  %26046 = vst [vmem:[#allocation5_spill] sm:$0xff] %v24211_v58 }
 0xc22   :  { %v24188_v62 = vsub.f32 %v24094_v51, %v26041_v31  ;;  %12542 = vst [vmem:[%s24662_s7] sm:$0xff] %v9973_v54  ;;  %v9975_v53 = vadd.f32 %v9974_v52, %v9871_v19  ;;  %v26047_v35 = vand.u32 4294901760, %v24020_v8  ;;  %v26048_v25 = vand.u32 4294901760, %v23696_v42  ;;  %v8983_v8 = vld [vmem:[%s24660_s5 + $0xf8] sm:$0xff]  ;;  %12019 = vmatprep.mubr.f32.mxu1 %v25671_v24 }
 0xc23   :  { %26042 = vst [vmem:[#allocation21_spill] sm:$0xff] %v24191_v33  ;;  %11522 = vmatprep.subr.mxu0 %v26044_v14  ;;  %v24208_v50 = vsub.f32 %v24101_v7, %v26045_v23  ;;  %v11853_v19 = vand.u32 4294901760, %v24158_v22  ;;  %v26049_v54 = vand.u32 4294901760, %v24115_v59  ;;  %v24227_v14 = vsub.f32 %v9014_v47, %v24166_v40  ;;  %v8967_v7 = vld [vmem:[%s24660_s5 + $0x78] sm:$0xff] }
 0xc24   :  { %11812 = vmatprep.subr.mxu1 %v26047_v35  ;;  %11526 = vmatpush1.msra.mxu0 %v26048_v25  ;;  %v24229_v23 = vand.u32 4294901760, %v8998_v13  ;;  %v26051_v35 = vand.u32 4294901760, %v24045_v11  ;;  %v26052_v42 = vand.u32 4294901760, %v23706_v10  ;;  %12543 = vst [vmem:[%s24662_s7 + $0x8] sm:$0xff] %v9975_v53  ;;  %v11859_v22 = vand.u32 4294901760, %v24163_v56  ;;  %v8982_v10 = vld [vmem:[%s24660_s5 + $0xf0] sm:$0xff] }
 0xc25   :  { %v24224_v52 = vsub.f32 %v24115_v59, %v26049_v54  ;;  %26050 = vst [vmem:[#allocation13_spill] sm:$0xff] %v24227_v14  ;;  %v26053_v47 = vand.u32 4294901760, %v24123_v4  ;;  %v24248_v54 = vsub.f32 %v9007_v28, %v24175_v29  ;;  %v24250_v31 = vand.u32 4294901760, %v8991_v48  ;;  %v26056_v53 = vld [vmem:[#allocation24_spill] sm:$0xff]  ;;  %v8959_v51 = vld [vmem:[%s24660_s5 + $0x38] sm:$0xff] }
 0xc26   :  { %11818 = vmatpush1.msra.mxu1 %v26051_v35  ;;  %11530 = vmatprep.subr.mxu0 %v26052_v42  ;;  %v26055_v11 = vand.u32 4294901760, %v24050_v12  ;;  %v26057_v35 = vand.u32 4294901760, %v26056_v53  ;;  %v11865_v56 = vand.u32 4294901760, %v24188_v62  ;;  %v24264_v28 = vand.u32 4294901760, %v8990_v6  ;;  %v26059_v12 = vld [vmem:[#allocation8_spill] sm:$0xff] }
 0xc27   :  { %v24245_v25 = vsub.f32 %v24123_v4, %v26053_v47  ;;  %26054 = vst [vmem:[#allocation31_spill] sm:$0xff] %v24248_v54  ;;  %v24262_v47 = vsub.f32 %v9006_v9, %v24193_v17  ;;  %v8975_v4 = vld [vmem:[%s24660_s5 + $0xb8] sm:$0xff]  ;;  %v26058_v59 = vand.u32 4294901760, %v24060_v16  ;;  %v11871_v53 = vand.u32 4294901760, %v24208_v50  ;;  %v8974_v16 = vld [vmem:[%s24660_s5 + $0xb0] sm:$0xff] }
 0xc28   :  { %11824 = vmatprep.subr.mxu1 %v26055_v11  ;;  %11534 = vmatpush1.msra.mxu0 %v26057_v35  ;;  %v26060_v11 = vand.u32 4294901760, %v26059_v12  ;;  %v26061_v62 = vand.u32 4294901760, %v24148_v57  ;;  %v24280_v9 = vsub.f32 %v8999_v63, %v24211_v58  ;;  %v24282_v42 = vand.u32 4294901760, %v8983_v8  ;;  %v26063_v12 = vld [vmem:[#allocation16_spill] sm:$0xff] }
 0xc29   :  { %11830 = vmatpush1.msra.mxu1 %v26058_v59  ;;  %v26062_v59 = vand.u32 4294901760, %v24079_v1  ;;  %v11877_v50 = vand.u32 4294901760, %v24224_v52  ;;  %v24296_v63 = vand.u32 4294901760, %v8982_v10  ;;  %v26065_v1 = vand.u32 4294901760, %v24090_v39 }
 0xc2a   :  { %11538 = vmatprep.subr.mxu0 %v26060_v11  ;;  %v24277_v35 = vsub.f32 %v24148_v57, %v26061_v62  ;;  %v26064_v11 = vand.u32 4294901760, %v26063_v12  ;;  %v24294_v57 = vsub.f32 %v8998_v13, %v24229_v23  ;;  %v24307_v12 = vsub.f32 %v8991_v48, %v24250_v31  ;;  %v26066_v62 = vld [vmem:[#allocation30_spill] sm:$0xff] }
 0xc2b   :  { %11836 = vmatprep.subr.mxu1 %v26062_v59  ;;  %v11883_v59 = vand.u32 4294901760, %v24245_v25  ;;  %v24309_v13 = vand.u32 4294901760, %v8975_v4  ;;  %v26067_v39 = vand.u32 4294901760, %v24191_v33  ;;  %v24321_v52 = vsub.f32 %v8990_v6, %v24264_v28  ;;  %v8958_v6 = vld [vmem:[%s24660_s5 + $0x30] sm:$0xff] }
 0xc2c   :  { %11542 = vmatpush1.msra.mxu0 %v26064_v11  ;;  %11842 = vmatpush1.msra.mxu1 %v26065_v1  ;;  %v8966_v11 = vld [vmem:[%s24660_s5 + $0x70] sm:$0xff]  ;;  %v24323_v48 = vand.u32 4294901760, %v8974_v16  ;;  %v11889_v21 = vand.u32 4294901760, %v24277_v35  ;;  %v24334_v25 = vand.u32 4294901760, %v8967_v7  ;;  %v24345_v0 = vsub.f32 %v8982_v10, %v24296_v63 }
 0xc2d   :  { %11577 = vmatmul.mubr.f32.vlgmr.msra.gmra.mxu0 %v26038_v32  ;;  %11688 = vmatprep.subr.mxu0 %v26066_v62  ;;  %v11894_v1 = vsub.f32 %v24191_v33, %v26067_v39  ;;  %v24332_v39 = vsub.f32 %v8983_v8, %v24282_v42  ;;  %v24347_v8 = vand.u32 4294901760, %v8966_v11  ;;  %v26071_v38 = vand.u32 4294901760, %v24248_v54 }
 0xc2e   :  { %26068 = vst [vmem:[#allocation24_spill] sm:$0xff] %v24323_v48  ;;  %11848 = vmatprep.subr.mxu1 %v11847_v49  ;;  %11690 = vmatpush1.msra.mxu0 %v26069_v18  ;;  %v26070_v49 = vand.u32 4294901760, %v24227_v14  ;;  %v24355_v2 = vsub.f32 %v8975_v4, %v24309_v13  ;;  %v26072_v10 = vand.u32 4294901760, %v24262_v47  ;;  %v26073_v44 = vand.u32 4294901760, %v24280_v9 }
 0xc2f   :  { %11854 = vmatpush1.msra.mxu1 %v11853_v19  ;;  %11692 = vmatprep.subr.mxu0 %v23892_v37  ;;  %v11906_v19 = vsub.f32 %v24248_v54, %v26071_v38  ;;  %v24367_v38 = vand.u32 4294901760, %v8958_v6  ;;  %v11895_v4 = vand.u32 4294901760, %v11894_v1  ;;  %v24375_v60 = vsub.f32 %v8967_v7, %v24334_v25 }
 0xc30   :  { %v11900_v33 = vsub.f32 %v24227_v14, %v26070_v49  ;;  %11860 = vmatprep.subr.mxu1 %v11859_v22  ;;  %11694 = vmatpush1.msra.mxu0 %v23910_v20  ;;  %v24357_v49 = vand.u32 4294901760, %v8959_v51  ;;  %v11912_v22 = vsub.f32 %v24262_v47, %v26072_v10  ;;  %v24365_v14 = vsub.f32 %v8974_v16, %v24323_v48 }
 0xc31   :  { %11866 = vmatpush1.msra.mxu1 %v11865_v56  ;;  %11696 = vmatprep.subr.mxu0 %v23912_v61  ;;  %v11918_v56 = vsub.f32 %v24280_v9, %v26073_v44  ;;  %v26074_v10 = vand.u32 4294901760, %v24294_v57  ;;  %v24383_v1 = vsub.f32 %v8966_v11, %v24347_v8  ;;  %v11907_v44 = vand.u32 4294901760, %v11906_v19 }
 0xc32   :  { %11872 = vmatprep.subr.mxu1 %v11871_v53  ;;  %11698 = vmatpush1.msra.mxu0 %v23925_v26  ;;  %v11901_v16 = vand.u32 4294901760, %v11900_v33  ;;  %v26075_v7 = vand.u32 4294901760, %v24307_v12  ;;  %v24391_v33 = vsub.f32 %v8959_v51, %v24357_v49  ;;  %v26076_v11 = vand.u32 4294901760, %v24321_v52 }
 0xc33   :  { %11878 = vmatpush1.msra.mxu1 %v11877_v50  ;;  %11700 = vmatprep.subr.mxu0 %v23935_v5  ;;  %v11924_v53 = vsub.f32 %v24294_v57, %v26074_v10  ;;  %v11913_v10 = vand.u32 4294901760, %v11912_v22  ;;  %v24399_v19 = vsub.f32 %v8958_v6, %v24367_v38  ;;  %v26077_v51 = vand.u32 4294901760, %v24332_v39 }
 0xc34   :  { %11884 = vmatprep.subr.mxu1 %v11883_v59  ;;  %11702 = vmatpush1.msra.mxu0 %v23941_v43  ;;  %v11930_v50 = vsub.f32 %v24307_v12, %v26075_v7  ;;  %v11936_v59 = vsub.f32 %v24321_v52, %v26076_v11  ;;  %v11919_v7 = vand.u32 4294901760, %v11918_v56  ;;  %v26078_v11 = vand.u32 4294901760, %v24345_v0 }
 0xc35   :  { %11890 = vmatpush1.msra.mxu1 %v11889_v21  ;;  %11704 = vmatprep.subr.mxu0 %v23992_v41  ;;  %v11942_v21 = vsub.f32 %v24332_v39, %v26077_v51  ;;  %v11925_v22 = vand.u32 4294901760, %v11924_v53  ;;  %v26079_v56 = vand.u32 4294901760, %v24355_v2  ;;  %v26080_v53 = vand.u32 4294901760, %v24365_v14 }
 0xc36   :  { %11896 = vmatprep.subr.mxu1 %v11895_v4  ;;  %11706 = vmatpush1.msra.mxu0 %v24006_v30  ;;  %v11948_v35 = vsub.f32 %v24345_v0, %v26078_v11  ;;  %v11931_v4 = vand.u32 4294901760, %v11930_v50  ;;  %v25211_v6 = vand.u32 4294901760, %v24399_v19  ;;  %v26081_v50 = vand.u32 4294901760, %v24375_v60 }
 0xc37   :  { %11902 = vmatpush1.msra.mxu1 %v11901_v16  ;;  %11708 = vmatprep.subr.mxu0 %v24008_v55  ;;  %v11954_v51 = vsub.f32 %v24355_v2, %v26079_v56  ;;  %v11937_v16 = vand.u32 4294901760, %v11936_v59  ;;  %v11960_v11 = vsub.f32 %v24365_v14, %v26080_v53  ;;  %v26082_v59 = vand.u32 4294901760, %v24383_v1 }
 0xc38   :  { %11908 = vmatprep.subr.mxu1 %v11907_v44  ;;  %11710 = vmatpush1.msra.mxu0 %v24034_v15  ;;  %v11943_v44 = vand.u32 4294901760, %v11942_v21  ;;  %v11966_v56 = vsub.f32 %v24375_v60, %v26081_v50 }
 0xc39   :  { %11914 = vmatpush1.msra.mxu1 %v11913_v10  ;;  %11712 = vmatprep.subr.mxu0 %v24052_v36  ;;  %v11949_v10 = vand.u32 4294901760, %v11948_v35  ;;  %v11972_v54 = vsub.f32 %v24383_v1, %v26082_v59  ;;  %v11955_v53 = vand.u32 4294901760, %v11954_v51  ;;  %v11961_v50 = vand.u32 4294901760, %v11960_v11  ;;  %v26085_v11 = vld [vmem:[#allocation28_spill] sm:$0xff] }
 0xc3a   :  { %11920 = vmatprep.subr.mxu1 %v11919_v7  ;;  %11714 = vmatpush1.msra.mxu0 %v24068_v27  ;;  %v26083_v7 = vand.u32 4294901760, %v24391_v33  ;;  %v11984_v35 = vsub.f32 %v24399_v19, %v25211_v6  ;;  %v26089_v59 = vld [vmem:[#allocation4_spill] sm:$0xff]  ;;  %v26100_v6 = vld [vmem:[#allocation21_spill] sm:$0xff] }
 0xc3b   :  { %11926 = vmatpush1.msra.mxu1 %v11925_v22  ;;  %11716 = vmatprep.subr.mxu0 %v24081_v46  ;;  %v11967_v22 = vand.u32 4294901760, %v11966_v56  ;;  %v26087_v56 = vld [vmem:[#allocation6_spill] sm:$0xff] }
 0xc3c   :  { %11932 = vmatprep.subr.mxu1 %v11931_v4  ;;  %11718 = vmatpush1.msra.mxu0 %v24103_v34  ;;  %v11978_v21 = vsub.f32 %v24391_v33, %v26083_v7  ;;  %v11973_v4 = vand.u32 4294901760, %v11972_v54  ;;  %v26084_v54 = vld [vmem:[#allocation20_spill] sm:$0xff]  ;;  %v26091_v7 = vld [vmem:[#allocation17_spill] sm:$0xff] }
 0xc3d   :  { %11938 = vmatpush1.msra.mxu1 %v11937_v16  ;;  %11720 = vmatprep.subr.mxu0 %v24138_v3  ;;  %v11985_v16 = vand.u32 4294901760, %v11984_v35  ;;  %v26094_v35 = vld [vmem:[#allocation15_spill] sm:$0xff] }
 0xc3e   :  { %11944 = vmatprep.subr.mxu1 %v11943_v44  ;;  %11722 = vmatpush1.msra.mxu0 %v24166_v40  ;;  %v11979_v51 = vand.u32 4294901760, %v11978_v21  ;;  %v26086_v44 = vld [vmem:[#allocation11_spill] sm:$0xff]  ;;  %v26092_v21 = vld [vmem:[#allocation14_spill] sm:$0xff] }
 0xc3f   :  { %11950 = vmatpush1.msra.mxu1 %v11949_v10  ;;  %11724 = vmatprep.subr.mxu0 %v24175_v29  ;;  %v26088_v10 = vld [vmem:[#allocation2_spill] sm:$0xff] }
 0xc40   :  { %11956 = vmatprep.subr.mxu1 %v11955_v53  ;;  %11726 = vmatpush1.msra.mxu0 %v24193_v17  ;;  %v26090_v53 = vld [vmem:[#allocation18_spill] sm:$0xff] }
 0xc41   :  { %11962 = vmatpush1.msra.mxu1 %v11961_v50  ;;  %11728 = vmatprep.subr.mxu0 %v24211_v58  ;;  %v26093_v50 = vld [vmem:[#allocation29_spill] sm:$0xff] }
 0xc42   :  { %11968 = vmatprep.subr.mxu1 %v11967_v22  ;;  %11730 = vmatpush1.msra.mxu0 %v24229_v23  ;;  %v26095_v22 = vld [vmem:[#allocation10_spill] sm:$0xff] }
 0xc43   :  { %11974 = vmatpush1.msra.mxu1 %v11973_v4  ;;  %11732 = vmatprep.subr.mxu0 %v24250_v31  ;;  %v26096_v4 = vld [vmem:[#allocation3_spill] sm:$0xff] }
 0xc44   :  { %11980 = vmatprep.subr.mxu1 %v11979_v51  ;;  %11734 = vmatpush1.msra.mxu0 %v24264_v28  ;;  %v26097_v51 = vld [vmem:[#allocation12_spill] sm:$0xff] }
 0xc45   :  { %11986 = vmatpush1.msra.mxu1 %v11985_v16  ;;  %11736 = vmatprep.subr.mxu0 %v24282_v42  ;;  %v26098_v16 = vld [vmem:[#allocation19_spill] sm:$0xff] }
 0xc46   :  { %12021 = vmatmul.mubr.f32.vlgmr.msra.gmra.mxu1 %v26038_v32  ;;  %12165 = vmatprep.subr.mxu1 %v26066_v62  ;;  %v26101_v32 = vld [vmem:[#allocation13_spill] sm:$0xff] }
 0xc47   :  { %11738 = vmatpush1.msra.mxu0 %v24296_v63  ;;  %12167 = vmatpush1.msra.mxu1 %v26069_v18 }
 0xc48   :  { %11740 = vmatprep.subr.mxu0 %v24309_v13  ;;  %12169 = vmatprep.subr.mxu1 %v23892_v37 }
 0xc49   :  { %11742 = vmatpush1.msra.mxu0 %v24323_v48  ;;  %12171 = vmatpush1.msra.mxu1 %v23910_v20 }
 0xc4a   :  { %11744 = vmatprep.subr.mxu0 %v24334_v25  ;;  %12173 = vmatprep.subr.mxu1 %v23912_v61 }
 0xc4b   :  { %11746 = vmatpush1.msra.mxu0 %v24347_v8  ;;  %12175 = vmatpush1.msra.mxu1 %v23925_v26 }
 0xc4c   :  { %11748 = vmatprep.subr.mxu0 %v24357_v49  ;;  %12177 = vmatprep.subr.mxu1 %v23935_v5 }
 0xc4d   :  { %11750 = vmatpush1.msra.mxu0 %v24367_v38  ;;  %11783 = vmatprep.mubr.f32.mxu0 %v25671_v24 }
 0xc4e   :  { %12179 = vmatpush1.msra.mxu1 %v23941_v43  ;;  %11789 = vmatmul.mubr.f32.vlgmr.msra.gmra.mxu0 %v26084_v54  ;;  %v26099_v54 = vld [vmem:[#allocation26_spill] sm:$0xff] }
 0xc4f   :  { %12029 = vmatprep.subr.mxu0 %v23890_v45  ;;  %12181 = vmatprep.subr.mxu1 %v23992_v41 }
 0xc50   :  { %12032 = vmatpush1.msra.mxu0 %v26085_v11  ;;  %12183 = vmatpush1.msra.mxu1 %v24006_v30 }
 0xc51   :  { %12035 = vmatprep.subr.mxu0 %v26086_v44  ;;  %12185 = vmatprep.subr.mxu1 %v24008_v55 }
 0xc52   :  { %12038 = vmatpush1.msra.mxu0 %v26087_v56  ;;  %12187 = vmatpush1.msra.mxu1 %v24034_v15 }
 0xc53   :  { %12041 = vmatprep.subr.mxu0 %v26088_v10  ;;  %12189 = vmatprep.subr.mxu1 %v24052_v36 }
 0xc54   :  { %12044 = vmatpush1.msra.mxu0 %v26089_v59  ;;  %12191 = vmatpush1.msra.mxu1 %v24068_v27 }
 0xc55   :  { %12047 = vmatprep.subr.mxu0 %v26090_v53  ;;  %12193 = vmatprep.subr.mxu1 %v24081_v46 }
 0xc56   :  { %12050 = vmatpush1.msra.mxu0 %v26091_v7  ;;  %12195 = vmatpush1.msra.mxu1 %v24103_v34 }
 0xc57   :  { %12053 = vmatprep.subr.mxu0 %v26092_v21  ;;  %12197 = vmatprep.subr.mxu1 %v24138_v3 }
 0xc58   :  { %12056 = vmatpush1.msra.mxu0 %v26093_v50  ;;  %12199 = vmatpush1.msra.mxu1 %v24166_v40 }
 0xc59   :  { %12059 = vmatprep.subr.mxu0 %v26094_v35  ;;  %12201 = vmatprep.subr.mxu1 %v24175_v29 }
 0xc5a   :  { %12062 = vmatpush1.msra.mxu0 %v26095_v22  ;;  %12203 = vmatpush1.msra.mxu1 %v24193_v17 }
 0xc5b   :  { %12065 = vmatprep.subr.mxu0 %v26096_v4  ;;  %12205 = vmatprep.subr.mxu1 %v24211_v58  ;;  %v26102_v58 = vld [vmem:[#allocation31_spill] sm:$0xff] }
 0xc5c   :  { %12068 = vmatpush1.msra.mxu0 %v26097_v51  ;;  %12207 = vmatpush1.msra.mxu1 %v24229_v23 }
 0xc5d   :  { %12071 = vmatprep.subr.mxu0 %v26098_v16  ;;  %12209 = vmatprep.subr.mxu1 %v24250_v31 }
 0xc5e   :  { %12074 = vmatpush1.msra.mxu0 %v26099_v54  ;;  %12211 = vmatpush1.msra.mxu1 %v24264_v28 }
 0xc5f   :  { %12077 = vmatprep.subr.mxu0 %v26100_v6  ;;  %12213 = vmatprep.subr.mxu1 %v24282_v42 }
 0xc60   :  { %12080 = vmatpush1.msra.mxu0 %v26101_v32  ;;  %12215 = vmatpush1.msra.mxu1 %v24296_v63 }
 0xc61   :  { %12083 = vmatprep.subr.mxu0 %v26102_v58  ;;  %12217 = vmatprep.subr.mxu1 %v24309_v13 }
 0xc62   :  { %12086 = vmatpush1.msra.mxu0 %v24262_v47  ;;  %12219 = vmatpush1.msra.mxu1 %v24323_v48  ;;  %v26103_v48 = vld [vmem:[#allocation7_spill] sm:$0xff] }
 0xc63   :  { %12089 = vmatprep.subr.mxu0 %v24280_v9  ;;  %12221 = vmatprep.subr.mxu1 %v24334_v25 }
 0xc64   :  { %12092 = vmatpush1.msra.mxu0 %v24294_v57  ;;  %12223 = vmatpush1.msra.mxu1 %v24347_v8 }
 0xc65   :  { %12095 = vmatprep.subr.mxu0 %v24307_v12  ;;  %12225 = vmatprep.subr.mxu1 %v24357_v49 }
 0xc66   :  { %12098 = vmatpush1.msra.mxu0 %v24321_v52  ;;  %12227 = vmatpush1.msra.mxu1 %v24367_v38 }
 0xc67   :  { %12260 = vmatprep.mubr.f32.mxu1 %v25671_v24  ;;  %12101 = vmatprep.subr.mxu0 %v24332_v39 }
 0xc68   :  { %12264 = vmatmul.mubr.f32.vlgmr.msra.gmra.mxu1 %v26103_v48  ;;  %12439 = vmatprep.subr.mxu1 %v26066_v62  ;;  %v10080_v62 = vpop.f32.mrf.mxu0  ;;  %v26113_v48 = vld [vmem:[#allocation9_spill] sm:$0xff] }
 0xc69   :  { %12104 = vmatpush1.msra.mxu0 %v24345_v0  ;;  %12441 = vmatpush1.msra.mxu1 %v26069_v18 }
 0xc6a   :  { %12107 = vmatprep.subr.mxu0 %v24355_v2  ;;  %12443 = vmatprep.subr.mxu1 %v23892_v37  ;;  %v26104_v37 = vld [vmem:[#allocation27_spill] sm:$0xff] }
 0xc6b   :  { %12110 = vmatpush1.msra.mxu0 %v24365_v14  ;;  %12445 = vmatpush1.msra.mxu1 %v23910_v20  ;;  %v26105_v20 = vand.u32 4294901760, %v23890_v45  ;;  %v26110_v45 = vand.u32 4294901760, %v26088_v10  ;;  %v10082_v10 = vpop.f32.mrf.mxu0 }
 0xc6c   :  { %12113 = vmatprep.subr.mxu0 %v24375_v60  ;;  %12447 = vmatprep.subr.mxu1 %v23912_v61  ;;  %v26106_v61 = vand.u32 4294901760, %v26085_v11 }
 0xc6d   :  { %12116 = vmatpush1.msra.mxu0 %v24383_v1  ;;  %12449 = vmatpush1.msra.mxu1 %v23925_v26  ;;  %v26108_v26 = vld [vmem:[#allocation23_spill] sm:$0xff] }
 0xc6e   :  { %12119 = vmatprep.subr.mxu0 %v24391_v33  ;;  %12451 = vmatprep.subr.mxu1 %v23935_v5  ;;  %v26107_v5 = vand.u32 4294901760, %v26086_v44  ;;  %v9092_v18 = vsub.s32 2, %v26108_v26 }
 0xc6f   :  { %12122 = vmatpush1.msra.mxu0 %v24399_v19  ;;  %12155 = vmatprep.mubr.f32.mxu0 %v25671_v24 }
 0xc70   :  { %12453 = vmatpush1.msra.mxu1 %v23941_v43  ;;  %12158 = vmatmul.mubr.f32.vlgmr.msra.gmra.mxu0 %v26104_v37  ;;  %v26109_v43 = vand.u32 4294901760, %v26087_v56  ;;  %v9093_v11 = vrot.slane %v26113_v48, %v9092_v18  ;;  %v10312_v56 = vpop.f32.mrf.mxu1  ;;  %v26124_v37 = vand.u32 4294901760, %v26100_v6 }
 0xc71   :  { %12273 = vmatprep.subr.mxu0 %v26105_v20  ;;  %12455 = vmatprep.subr.mxu1 %v23992_v41  ;;  %v9096_v41 = vsub.s32 3, %v26108_v26 }
 0xc72   :  { %12277 = vmatpush1.msra.mxu0 %v26106_v61  ;;  %12457 = vmatpush1.msra.mxu1 %v24006_v30  ;;  %v26111_v30 = vand.u32 4294901760, %v26089_v59  ;;  %v10081_v59 = vadd.f32 %v10080_v62, %v9093_v11  ;;  %v26129_v61 = vand.u32 4294901760, %v24280_v9 }
 0xc73   :  { %12281 = vmatprep.subr.mxu0 %v26107_v5  ;;  %12459 = vmatprep.subr.mxu1 %v24008_v55  ;;  %v26112_v55 = vand.u32 4294901760, %v26090_v53  ;;  %v9097_v44 = vrot.slane %v26113_v48, %v9096_v41  ;;  %v10449_v53 = vpop.f32.mrf.mxu0 }
 0xc74   :  { %12285 = vmatpush1.msra.mxu0 %v26109_v43  ;;  %12461 = vmatpush1.msra.mxu1 %v24034_v15  ;;  %v26114_v15 = vand.u32 4294901760, %v26091_v7  ;;  %v26135_v43 = vand.u32 4294901760, %v24345_v0  ;;  %v26141_v0 = vand.u32 4294901760, %v24399_v19 }
 0xc75   :  { %12289 = vmatprep.subr.mxu0 %v26110_v45  ;;  %12463 = vmatprep.subr.mxu1 %v24052_v36  ;;  %v26115_v36 = vand.u32 4294901760, %v26092_v21  ;;  %v10083_v7 = vadd.f32 %v10082_v10, %v9097_v44  ;;  %v26120_v21 = vld [vmem:[#allocation5_spill] sm:$0xff]  ;;  %v26138_v45 = vand.u32 4294901760, %v24375_v60  ;;  %v9104_v60 = vsub.s32 5, %v26108_v26 }
 0xc76   :  { %12293 = vmatpush1.msra.mxu0 %v26111_v30  ;;  %12465 = vmatpush1.msra.mxu1 %v24068_v27  ;;  %v26116_v27 = vand.u32 4294901760, %v26093_v50  ;;  %v10314_v50 = vpop.f32.mrf.mxu1 }
 0xc77   :  { %12297 = vmatprep.subr.mxu0 %v26112_v55  ;;  %12467 = vmatprep.subr.mxu1 %v24081_v46  ;;  %v26117_v46 = vand.u32 4294901760, %v26094_v35  ;;  %v10313_v35 = vadd.f32 %v10312_v56, %v10081_v59  ;;  %v10315_v20 = vadd.f32 %v10314_v50, %v10083_v7  ;;  %v9105_v62 = vrot.slane %v26113_v48, %v9104_v60 }
 0xc78   :  { %12301 = vmatpush1.msra.mxu0 %v26114_v15  ;;  %12469 = vmatpush1.msra.mxu1 %v24103_v34  ;;  %v26118_v34 = vand.u32 4294901760, %v26095_v22  ;;  %v10555_v22 = vpop.f32.mrf.mxu1 }
 0xc79   :  { %12305 = vmatprep.subr.mxu0 %v26115_v36  ;;  %12471 = vmatprep.subr.mxu1 %v24138_v3  ;;  %v26119_v3 = vand.u32 4294901760, %v26096_v4  ;;  %v10451_v4 = vpop.f32.mrf.mxu0 }
 0xc7a   :  { %12309 = vmatpush1.msra.mxu0 %v26116_v27  ;;  %12473 = vmatpush1.msra.mxu1 %v24166_v40  ;;  %v26121_v40 = vand.u32 4294901760, %v26097_v51  ;;  %v10450_v51 = vadd.f32 %v10449_v53, %v10313_v35  ;;  %v10557_v6 = vpop.f32.mrf.mxu1 }
 0xc7b   :  { %12313 = vmatprep.subr.mxu0 %v26117_v46  ;;  %12475 = vmatprep.subr.mxu1 %v24175_v29  ;;  %v26122_v29 = vand.u32 4294901760, %v26098_v16  ;;  %v10452_v16 = vadd.f32 %v10451_v4, %v10315_v20 }
 0xc7c   :  { %12317 = vmatpush1.msra.mxu0 %v26118_v34  ;;  %12477 = vmatpush1.msra.mxu1 %v24193_v17  ;;  %v26123_v17 = vand.u32 4294901760, %v26099_v54  ;;  %v26128_v54 = vld [vmem:[#allocation24_spill] sm:$0xff] }
 0xc7d   :  { %12321 = vmatprep.subr.mxu0 %v26119_v3  ;;  %12479 = vmatprep.subr.mxu1 %v26120_v21  ;;  %v10558_v5 = vadd.f32 %v10557_v6, %v10452_v16 }
 0xc7e   :  { %12325 = vmatpush1.msra.mxu0 %v26121_v40  ;;  %12481 = vmatpush1.msra.mxu1 %v24229_v23  ;;  %v26125_v23 = vand.u32 4294901760, %v26101_v32  ;;  %v26130_v32 = vand.u32 4294901760, %v24294_v57 }
 0xc7f   :  { %12329 = vmatprep.subr.mxu0 %v26122_v29  ;;  %12483 = vmatprep.subr.mxu1 %v24250_v31  ;;  %v26126_v31 = vand.u32 4294901760, %v26102_v58  ;;  %v26131_v58 = vand.u32 4294901760, %v24307_v12 }
 0xc80   :  { %12333 = vmatpush1.msra.mxu0 %v26123_v17  ;;  %12485 = vmatpush1.msra.mxu1 %v24264_v28  ;;  %v26127_v28 = vand.u32 4294901760, %v24262_v47  ;;  %v9108_v17 = vsub.s32 6, %v26108_v26 }
 0xc81   :  { %12337 = vmatprep.subr.mxu0 %v26124_v37  ;;  %12487 = vmatprep.subr.mxu1 %v24282_v42  ;;  %v10556_v42 = vadd.f32 %v10555_v22, %v10450_v51  ;;  %v9112_v22 = vsub.s32 7, %v26108_v26  ;;  %v16020_v37 = vld [vmem:[%s24661_s6] sm:$0xff] }
 0xc82   :  { %12341 = vmatpush1.msra.mxu0 %v26125_v23  ;;  %12489 = vmatpush1.msra.mxu1 %v24296_v63  ;;  %v10827_v63 = vpop.f32.mrf.mxu1  ;;  %v9109_v51 = vrot.slane %v16020_v37, %v9108_v17 }
 0xc83   :  { %12345 = vmatprep.subr.mxu0 %v26126_v31  ;;  %12491 = vmatprep.subr.mxu1 %v24309_v13  ;;  %v10723_v47 = vpop.f32.mrf.mxu0  ;;  %v26132_v13 = vand.u32 4294901760, %v24321_v52  ;;  %v26136_v52 = vand.u32 4294901760, %v24355_v2  ;;  %v26140_v2 = vand.u32 4294901760, %v24391_v33  ;;  %v9113_v20 = vrot.slane %v16020_v37, %v9112_v22 }
 0xc84   :  { %12349 = vmatpush1.msra.mxu0 %v26127_v28  ;;  %12493 = vmatpush1.msra.mxu1 %v26128_v54  ;;  %v10724_v9 = vadd.f32 %v10723_v47, %v10556_v42 }
 0xc85   :  { %12353 = vmatprep.subr.mxu0 %v26129_v61  ;;  %12495 = vmatprep.subr.mxu1 %v24334_v25  ;;  %v10725_v57 = vpop.f32.mrf.mxu0  ;;  %v26133_v25 = vand.u32 4294901760, %v24332_v39  ;;  %v26137_v39 = vand.u32 4294901760, %v24365_v14  ;;  %v9100_v14 = vsub.s32 4, %v26108_v26 }
 0xc86   :  { %12357 = vmatpush1.msra.mxu0 %v26130_v32  ;;  %12497 = vmatpush1.msra.mxu1 %v24347_v8  ;;  %v26134_v8 = vld [vmem:[#allocation25_spill] sm:$0xff]  ;;  %v10828_v12 = vadd.f32 %v10827_v63, %v10724_v9  ;;  %v10726_v18 = vadd.f32 %v10725_v57, %v10558_v5 }
 0xc87   :  { %12361 = vmatprep.subr.mxu0 %v26131_v58  ;;  %12499 = vmatprep.subr.mxu1 %v24357_v49  ;;  %v10829_v49 = vpop.f32.mrf.mxu1  ;;  %v9101_v30 = vrot.slane %v26113_v48, %v9100_v14 }
 0xc88   :  { %12365 = vmatpush1.msra.mxu0 %v26132_v13  ;;  %12501 = vmatpush1.msra.mxu1 %v24367_v38  ;;  %12544 = vst [vmem:[%s24662_s7 + $0x10] sm:$0xff] %v10828_v12  ;;  %v10830_v38 = vadd.f32 %v10829_v49, %v10726_v18 }
 0xc89   :  { %12534 = vmatprep.mubr.f32.mxu1 %v25671_v24  ;;  %12369 = vmatprep.subr.mxu0 %v26133_v25 }
 0xc8a   :  { %12536 = vmatmul.mubr.f32.vlgmr.msra.gmra.mxu1 %v26134_v8  ;;  %12373 = vmatpush1.msra.mxu0 %v26135_v43  ;;  %12545 = vst [vmem:[%s24662_s7 + $0x18] sm:$0xff] %v10830_v38 }
 0xc8b   :  { %12430 = vmatprep.mubr.f32.mxu0 %v25671_v24  ;;  %12377 = vmatprep.subr.mxu0 %v26136_v52  ;;  %v26139_v24 = vand.u32 4294901760, %v24383_v1 }
 0xc8c   :  { %12381 = vmatpush1.msra.mxu0 %v26137_v39 }
 0xc8d   :  { %12385 = vmatprep.subr.mxu0 %v26138_v45 }
 0xc8e   :  { %12389 = vmatpush1.msra.mxu0 %v26139_v24 }
 0xc8f   :  { %12393 = vmatprep.subr.mxu0 %v26140_v2 }
 0xc90   :  { %12397 = vmatpush1.msra.mxu0 %v26141_v0 }
 0xc91   :  { %12432 = vmatmul.mubr.f32.vlgmr.msra.gmra.mxu0 %v26134_v8 }
 0xc9a   :  { %v11167_v55 = vpop.f32.mrf.mxu1 }
 0xc9c   :  { %v11169_v36 = vpop.f32.mrf.mxu1 }
 0xca3   :  { %v10935_v41 = vpop.f32.mrf.mxu0 }
 0xca4   :  { %v10936_v11 = vadd.f32 %v10935_v41, %v9101_v30 }
 0xca5   :  { %v10937_v1 = vpop.f32.mrf.mxu0 }
 0xca6   :  { %v10938_v33 = vadd.f32 %v10937_v1, %v9105_v62  ;;  %v11168_v44 = vadd.f32 %v11167_v55, %v10936_v11 }
 0xca8   :  { %v11170_v10 = vadd.f32 %v11169_v36, %v10938_v33 }
 0xcbd   :  { %v11410_v19 = vpop.f32.mrf.mxu1 }
 0xcbf   :  { %v11412_v59 = vpop.f32.mrf.mxu1 }
 0xcc5   :  { %v11304_v15 = vpop.f32.mrf.mxu0 }
 0xcc6   :  { %v11305_v56 = vadd.f32 %v11304_v15, %v11168_v44 }
 0xcc7   :  { %v11306_v27 = vpop.f32.mrf.mxu0 }
 0xcc8   :  { %v11307_v46 = vadd.f32 %v11306_v27, %v11170_v10  ;;  %v11411_v34 = vadd.f32 %v11410_v19, %v11305_v56 }
 0xcca   :  { %v11413_v21 = vadd.f32 %v11412_v59, %v11307_v46 }
 0xcdf   :  { %v11682_v53 = vpop.f32.mrf.mxu1 }
 0xce1   :  { %v11684_v29 = vpop.f32.mrf.mxu1 }
 0xced   :  { %v11578_v3 = vpop.f32.mrf.mxu0 }
 0xcee   :  { %v11579_v7 = vadd.f32 %v11578_v3, %v11411_v34 }
 0xcef   :  { %v11580_v40 = vpop.f32.mrf.mxu0 }
 0xcf0   :  { %v11683_v48 = vadd.f32 %v11682_v53, %v11579_v7  ;;  %v11581_v50 = vadd.f32 %v11580_v40, %v11413_v21 }
 0xcf2   :  { %12546 = vst [vmem:[%s24662_s7 + $0x20] sm:$0xff] %v11683_v48  ;;  %v11685_v35 = vadd.f32 %v11684_v29, %v11581_v50 }
 0xcf4   :  { %12547 = vst [vmem:[%s24662_s7 + $0x28] sm:$0xff] %v11685_v35 }
 0xd06   :  { %v12022_v23 = vpop.f32.mrf.mxu1 }
 0xd08   :  { %v12024_v54 = vpop.f32.mrf.mxu1 }
 0xd0e   :  { %v11790_v4 = vpop.f32.mrf.mxu0 }
 0xd0f   :  { %v11791_v16 = vadd.f32 %v11790_v4, %v9109_v51 }
 0xd10   :  { %v11792_v31 = vpop.f32.mrf.mxu0 }
 0xd11   :  { %v11793_v6 = vadd.f32 %v11792_v31, %v9113_v20  ;;  %v12023_v61 = vadd.f32 %v12022_v23, %v11791_v16 }
 0xd13   :  { %v12025_v63 = vadd.f32 %v12024_v54, %v11793_v6 }
 0xd28   :  { %v12265_v32 = vpop.f32.mrf.mxu1 }
 0xd2a   :  { %v12267_v26 = vpop.f32.mrf.mxu1 }
 0xd30   :  { %v12159_v28 = vpop.f32.mrf.mxu0 }
 0xd31   :  { %v12160_v58 = vadd.f32 %v12159_v28, %v12023_v61 }
 0xd32   :  { %v12161_v42 = vpop.f32.mrf.mxu0 }
 0xd33   :  { %v12162_v47 = vadd.f32 %v12161_v42, %v12025_v63  ;;  %v12266_v13 = vadd.f32 %v12265_v32, %v12160_v58 }
 0xd35   :  { %v12268_v25 = vadd.f32 %v12267_v26, %v12162_v47 }
 0xd4a   :  { %v12537_v9 = vpop.f32.mrf.mxu1 }
 0xd4c   :  { %v12539_v43 = vpop.f32.mrf.mxu1 }
 0xd51   :  { %v12433_v5 = vpop.f32.mrf.mxu0 }
 0xd52   :  { %v12434_v57 = vadd.f32 %v12433_v5, %v12266_v13 }
 0xd53   :  { %v12435_v8 = vpop.f32.mrf.mxu0 }
 0xd54   :  { %v12538_v12 = vadd.f32 %v12537_v9, %v12434_v57  ;;  %v12436_v18 = vadd.f32 %v12435_v8, %v12268_v25 }
 0xd56   :  { %12548 = vst [vmem:[%s24662_s7 + $0x30] sm:$0xff] %v12538_v12  ;;  %v12540_v49 = vadd.f32 %v12539_v43, %v12436_v18 }
 0xd58   :  { %12549 = vst [vmem:[%s24662_s7 + $0x38] sm:$0xff] %v12540_v49 }

</bundles_post_ra>
